<compile_context>
chip_gen: v5e
topology: v5e:2x2
jax: 0.10.0
libtpu: 0.0.40
codegen_flags: <defaults>
</compile_context>

<pallas_src>
import jax
import jax.numpy as jnp
from jax.experimental import pallas as pl
from jax.experimental.pallas import tpu as pltpu

# ---------------- hyper-parameters (consistent with the module defaults) ----------------
PLANES = 16          # conv channels
IN_DIM_CAPS = 8      # d
OUT_NUM_CAPS = 4     # O
OUT_DIM_CAPS = 16    # D
SPATIAL = 4          # S (spatial_size)
Z_DIM = 32
ROUTINGS = 3
BN_EPS = 1e-5
GROUPS = PLANES // IN_DIM_CAPS
IN_NUM_CAPS = SPATIAL * SPATIAL * GROUPS   # N = 32
FC_HIDDEN = 1024


def _full_spec(shape):
    # one block == full array (allowed even when not (8,128)-aligned)
    return pl.BlockSpec(shape, lambda i: (0,) * len(shape))


def _squash(s):
    mag_sq = jnp.sum(s * s, axis=-1, keepdims=True)
    return (mag_sq / (1.0 + mag_sq)) * s / (jnp.sqrt(mag_sq) + 1e-8)


# ------------------------------- single fused kernel ----------------------------------
def _vaecap_kernel(patches_ref, wconv_ref, scale_ref, shift_ref, wcaps_ref,
                   w1v_ref, b1v_ref, w2_ref, b2_ref, mu_ref, var_ref):
    f32 = jnp.float32
    HW = SPATIAL * SPATIAL
    B = patches_ref.shape[0] // HW
    d, O, N, D = wcaps_ref.shape          # (8, 4, 32, 16)

    # ---- conv 3x3 'SAME' (im2col matmul) + folded BatchNorm(eval) + ReLU ----
    y = jnp.dot(patches_ref[...], wconv_ref[...], preferred_element_type=f32)
    y = jnp.maximum(y * scale_ref[...] + shift_ref[...], 0.0)          # (B*HW, C)

    # ---- pose (B, N, d), torch ordering n = g*HW + h*W + w, channels g*d..(g+1)*d ----
    # built with slices / concat / stack only (no minor-dim reshapes)
    pose_rows = []
    for b in range(B):
        yb = y[b * HW:(b + 1) * HW, :]                                  # (HW, C)
        pose_rows.append(jnp.concatenate(
            [yb[:, g * IN_DIM_CAPS:(g + 1) * IN_DIM_CAPS] for g in range(GROUPS)],
            axis=0))                                                    # (N, d)
    pose = _squash(jnp.stack(pose_rows, axis=0))                        # (B, N, d)

    # ---- u_hat[b,o,n,k] = sum_dd W[o,n,k,dd] * pose[b,n,dd] ----
    # d = 8 is tiny -> pure-VPU broadcast FMA, unrolled over d (no 32-way batched MXU)
    w_all = wcaps_ref[...]                                              # (d, O, N, D)
    xh = pose[:, None, :, 0:1] * w_all[0][None, :, :, :]                # (B, O, N, D)
    for dd in range(1, d):
        xh = xh + pose[:, None, :, dd:dd + 1] * w_all[dd][None, :, :, :]

    # ---- dynamic routing (3 iters); iteration-0 softmax(0) over O is exactly 1/O ----
    s = jnp.sum(xh * (1.0 / O), axis=2, keepdims=True)                  # (B, O, 1, D)
    v = _squash(s)
    b_coef = jnp.sum(v * xh, axis=-1, keepdims=True)                    # (B, O, N, 1)
    for i in range(1, ROUTINGS):
        bmax = jnp.max(b_coef, axis=1, keepdims=True)                   # softmax over O
        e = jnp.exp(b_coef - bmax)
        c = e / jnp.sum(e, axis=1, keepdims=True)
        s = jnp.sum(c * xh, axis=2, keepdims=True)
        v = _squash(s)
        if i < ROUTINGS - 1:
            b_coef = b_coef + jnp.sum(v * xh, axis=-1, keepdims=True)

    # ---- heads: fc_mean layer-1 and fc_var share the lhs -> single fused matmul ----
    out2d = jnp.concatenate([v[b, :, 0, :] for b in range(B)], axis=0)  # (B*O, D)
    hp = jnp.dot(out2d, w1v_ref[...], preferred_element_type=f32) + b1v_ref[...]
    h = jnp.maximum(hp[:, :FC_HIDDEN], 0.0)                             # fc_mean hidden
    pre = hp[:, FC_HIDDEN:]                                             # fc_var pre-act
    mu_ref[...] = jnp.dot(h, w2_ref[...], preferred_element_type=f32) + b2_ref[...]
    sp = jnp.maximum(pre, 0.0) + jnp.log(1.0 + jnp.exp(-jnp.abs(pre)))  # stable softplus
    var_ref[...] = sp + 1e-8


# ------------------------------------ forward wrapper ---------------------------------
def vaecap_forward(x_nchw, p):
    B, C, H, W = x_nchw.shape
    O, Z = OUT_NUM_CAPS, Z_DIM

    # im2col: pure layout plumbing, fused by XLA into the jit around the single kernel
    xpad = jnp.pad(x_nchw, ((0, 0), (0, 0), (1, 1), (1, 1)))
    cols = [xpad[:, :, kh:kh + H, kw:kw + W] for kh in range(3) for kw in range(3)]
    patches = jnp.stack(cols, axis=-1).transpose(0, 2, 3, 4, 1).reshape(B * H * W, 9 * C)

    # parameter repacking (weights only; folded BN, capsule weight permute, [w1|wv] concat)
    wmat = p['conv_w'].transpose(2, 3, 1, 0).reshape(9 * C, C)          # ((kh,kw,cin), cout)
    scale = p['bn_gamma'] / jnp.sqrt(p['bn_var'] + BN_EPS)
    shift = p['bn_beta'] - p['bn_mean'] * scale
    wcaps = p['caps_w'].transpose(3, 0, 1, 2)                           # (d, O, N, D)
    w1v = jnp.concatenate([p['w1'], p['wv']], axis=1)                   # (D, 1024 + Z)
    b1v = jnp.concatenate([p['b1'], p['bv']], axis=0).reshape(1, -1)

    args = (patches, wmat, scale.reshape(1, C), shift.reshape(1, C), wcaps,
            w1v, b1v, p['w2'], p['b2'].reshape(1, -1))

    mu, var = pl.pallas_call(
        _vaecap_kernel,
        out_shape=(jax.ShapeDtypeStruct((B * O, Z), jnp.float32),
                   jax.ShapeDtypeStruct((B * O, Z), jnp.float32)),
        grid=(1,),
        in_specs=[_full_spec(a.shape) for a in args],
        out_specs=(_full_spec((B * O, Z)), _full_spec((B * O, Z))),
        compiler_params=pltpu.CompilerParams(dimension_semantics=("arbitrary",)),
    )(*args)

    z_mu = mu.reshape(B, O, Z)
    z_var = var.reshape(B, O, Z)
    z = z_mu  # TODO(synk): training-mode reparametrization uses torch.randn eps; eval-mode z = z_mu
    return z, z_mu, z_var


vaecap_forward_jit = jax.jit(vaecap_forward)


# ------------------------------------ pure-JAX reference -------------------------------
def _squash_ref(s, axis=-1):
    mag_sq = jnp.sum(s * s, axis=axis, keepdims=True)
    mag = jnp.sqrt(mag_sq)
    return mag_sq / (1.0 + mag_sq) * (s / (mag + 1e-8))


def vaecap_reference(x, p):
    y = jax.lax.conv_general_dilated(x, p['conv_w'], (1, 1), 'SAME',
                                     dimension_numbers=('NCHW', 'OIHW', 'NCHW'))
    scale = p['bn_gamma'] / jnp.sqrt(p['bn_var'] + BN_EPS)
    shift = p['bn_beta'] - p['bn_mean'] * scale
    y = jnp.maximum(y * scale[None, :, None, None] + shift[None, :, None, None], 0.0)
    B, C, H, W = y.shape
    pose = y.reshape(B, GROUPS, IN_DIM_CAPS, H, W).transpose(0, 1, 3, 4, 2).reshape(B, -1, IN_DIM_CAPS)
    pose = _squash_ref(pose)
    x_hat = jnp.einsum('ondk,bnk->bond', p['caps_w'], pose)
    b = jnp.zeros((B, OUT_NUM_CAPS, IN_NUM_CAPS), jnp.float32)
    v = None
    for i in range(ROUTINGS):
        c = jax.nn.softmax(b, axis=1)
        s = jnp.sum(c[..., None] * x_hat, axis=2, keepdims=True)
        v = _squash_ref(s)
        if i < ROUTINGS - 1:
            b = b + jnp.sum(v * x_hat, axis=-1)
    out = v[:, :, 0, :]
    h = jnp.maximum(out @ p['w1'] + p['b1'], 0.0)
    z_mu = h @ p['w2'] + p['b2']
    z_var = jax.nn.softplus(out @ p['wv'] + p['bv']) + 1e-8
    return z_mu, z_mu, z_var


# ------------------------------------------ params -------------------------------------
def init_params(key):
    ks = jax.random.split(key, 12)
    p = {}
    p['conv_w'] = 0.05 * jax.random.normal(ks[0], (PLANES, PLANES, 3, 3), jnp.float32)
    p['bn_gamma'] = 1.0 + 0.1 * jax.random.normal(ks[1], (PLANES,), jnp.float32)
    p['bn_beta'] = 0.1 * jax.random.normal(ks[2], (PLANES,), jnp.float32)
    p['bn_mean'] = 0.1 * jax.random.normal(ks[3], (PLANES,), jnp.float32)
    p['bn_var'] = 0.5 + jax.random.uniform(ks[4], (PLANES,), jnp.float32)
    p['caps_w'] = 0.01 * jax.random.normal(
        ks[5], (OUT_NUM_CAPS, IN_NUM_CAPS, OUT_DIM_CAPS, IN_DIM_CAPS), jnp.float32)
    p['w1'] = jax.random.normal(ks[6], (OUT_DIM_CAPS, FC_HIDDEN), jnp.float32) / jnp.sqrt(float(OUT_DIM_CAPS))
    p['b1'] = 0.01 * jax.random.normal(ks[7], (FC_HIDDEN,), jnp.float32)
    p['w2'] = jax.random.normal(ks[8], (FC_HIDDEN, Z_DIM), jnp.float32) / jnp.sqrt(float(FC_HIDDEN))
    p['b2'] = 0.01 * jax.random.normal(ks[9], (Z_DIM,), jnp.float32)
    p['wv'] = jax.random.normal(ks[10], (OUT_DIM_CAPS, Z_DIM), jnp.float32) / jnp.sqrt(float(OUT_DIM_CAPS))
    p['bv'] = 0.01 * jax.random.normal(ks[11], (Z_DIM,), jnp.float32)
    return p


if __name__ == "__main__":
    key = jax.random.PRNGKey(0)
    kx, kp = jax.random.split(key)
    x = jax.random.normal(kx, (2, PLANES, SPATIAL, SPATIAL), jnp.float32)
    params = init_params(kp)

    z, z_mu, z_var = vaecap_forward_jit(x, params)
    jax.block_until_ready((z, z_mu, z_var))

    assert z.shape == (2, OUT_NUM_CAPS, Z_DIM)
    assert z_mu.shape == (2, OUT_NUM_CAPS, Z_DIM)
    assert z_var.shape == (2, OUT_NUM_CAPS, Z_DIM)

    # numerical check vs plain-JAX reference of the torch forward (eval mode)
    rz, rmu, rvar = vaecap_reference(x, params)
    assert jnp.allclose(z_mu, rmu, rtol=2e-2, atol=2e-3), "z_mu mismatch"
    assert jnp.allclose(z_var, rvar, rtol=2e-2, atol=2e-3), "z_var mismatch"
    assert jnp.allclose(z, rz, rtol=2e-2, atol=2e-3), "z mismatch"

    print("KERNEL_OK")
</pallas_src>

<mosaic_0001>
module attributes {stable_mosaic.version = 11 : i64} {
  func.func @_vaecap_kernel(%arg0: i32, %arg1: memref<32x144xf32, #tpu.memory_space<vmem>>, %arg2: memref<144x16xf32, #tpu.memory_space<vmem>>, %arg3: memref<1x16xf32, #tpu.memory_space<vmem>>, %arg4: memref<1x16xf32, #tpu.memory_space<vmem>>, %arg5: memref<8x4x32x16xf32, #tpu.memory_space<vmem>>, %arg6: memref<16x1056xf32, #tpu.memory_space<vmem>>, %arg7: memref<1x1056xf32, #tpu.memory_space<vmem>>, %arg8: memref<1024x32xf32, #tpu.memory_space<vmem>>, %arg9: memref<1x32xf32, #tpu.memory_space<vmem>>, %arg10: memref<8x32xf32, #tpu.memory_space<vmem>>, %arg11: memref<8x32xf32, #tpu.memory_space<vmem>>) attributes {dimension_semantics = [#tpu.dimension_semantics<arbitrary>], iteration_bounds = array<i64: 1>, scalar_prefetch = 0 : i64, scratch_operands = 0 : i64, tpu.core_type = #tpu.core_type<tc>, window_params = [{pipeline_mode = #tpu.pipeline_mode<synchronous>, transform_indices = @transform_0, window_bounds = array<i64: 32, 144>}, {pipeline_mode = #tpu.pipeline_mode<synchronous>, transform_indices = @transform_1, window_bounds = array<i64: 144, 16>}, {pipeline_mode = #tpu.pipeline_mode<synchronous>, transform_indices = @transform_2, window_bounds = array<i64: 1, 16>}, {pipeline_mode = #tpu.pipeline_mode<synchronous>, transform_indices = @transform_3, window_bounds = array<i64: 1, 16>}, {pipeline_mode = #tpu.pipeline_mode<synchronous>, transform_indices = @transform_4, window_bounds = array<i64: 8, 4, 32, 16>}, {pipeline_mode = #tpu.pipeline_mode<synchronous>, transform_indices = @transform_5, window_bounds = array<i64: 16, 1056>}, {pipeline_mode = #tpu.pipeline_mode<synchronous>, transform_indices = @transform_6, window_bounds = array<i64: 1, 1056>}, {pipeline_mode = #tpu.pipeline_mode<synchronous>, transform_indices = @transform_7, window_bounds = array<i64: 1024, 32>}, {pipeline_mode = #tpu.pipeline_mode<synchronous>, transform_indices = @transform_8, window_bounds = array<i64: 1, 32>}, {pipeline_mode = #tpu.pipeline_mode<synchronous>, transform_indices = @transform_9, window_bounds = array<i64: 8, 32>}, {pipeline_mode = #tpu.pipeline_mode<synchronous>, transform_indices = @transform_10, window_bounds = array<i64: 8, 32>}]} {
    %c0 = arith.constant 0 : index
    %c0_0 = arith.constant 0 : index
    %0 = vector.load %arg1[%c0, %c0_0] : memref<32x144xf32, #tpu.memory_space<vmem>>, vector<32x144xf32>
    %c0_1 = arith.constant 0 : index
    %c0_2 = arith.constant 0 : index
    %1 = vector.load %arg2[%c0_1, %c0_2] : memref<144x16xf32, #tpu.memory_space<vmem>>, vector<144x16xf32>
    %cst = arith.constant dense<0.000000e+00> : vector<32x16xf32>
    %2 = tpu.matmul %0, %1, %cst {dimension_numbers = #tpu.dot_dimension_numbers<[1], [0], [0], [1], [0, 0, 1, 1], [], []>} : vector<32x144xf32>, vector<144x16xf32>, vector<32x16xf32> -> vector<32x16xf32>
    %c0_3 = arith.constant 0 : index
    %c0_4 = arith.constant 0 : index
    %3 = vector.load %arg3[%c0_3, %c0_4] : memref<1x16xf32, #tpu.memory_space<vmem>>, vector<1x16xf32>
    %4 = vector.broadcast %3 : vector<1x16xf32> to vector<32x16xf32>
    %5 = arith.mulf %2, %4 : vector<32x16xf32>
    %c0_5 = arith.constant 0 : index
    %c0_6 = arith.constant 0 : index
    %6 = vector.load %arg4[%c0_5, %c0_6] : memref<1x16xf32, #tpu.memory_space<vmem>>, vector<1x16xf32>
    %7 = vector.broadcast %6 : vector<1x16xf32> to vector<32x16xf32>
    %8 = arith.addf %5, %7 : vector<32x16xf32>
    %cst_7 = arith.constant 0.000000e+00 : f32
    %9 = vector.broadcast %cst_7 : f32 to vector<32x16xf32>
    %10 = arith.maximumf %8, %9 : vector<32x16xf32>
    %11 = vector.extract_strided_slice %10 {offsets = [0, 0], sizes = [16, 16], strides = [1, 1]} : vector<32x16xf32> to vector<16x16xf32>
    %12 = vector.extract_strided_slice %11 {offsets = [0, 0], sizes = [16, 8], strides = [1, 1]} : vector<16x16xf32> to vector<16x8xf32>
    %13 = vector.extract_strided_slice %11 {offsets = [0, 8], sizes = [16, 8], strides = [1, 1]} : vector<16x16xf32> to vector<16x8xf32>
    %14 = tpu.concatenate %12, %13 in 0 : vector<16x8xf32>, vector<16x8xf32> -> vector<32x8xf32>
    %15 = vector.extract_strided_slice %10 {offsets = [16, 0], sizes = [16, 16], strides = [1, 1]} : vector<32x16xf32> to vector<16x16xf32>
    %16 = vector.extract_strided_slice %15 {offsets = [0, 0], sizes = [16, 8], strides = [1, 1]} : vector<16x16xf32> to vector<16x8xf32>
    %17 = vector.extract_strided_slice %15 {offsets = [0, 8], sizes = [16, 8], strides = [1, 1]} : vector<16x16xf32> to vector<16x8xf32>
    %18 = tpu.concatenate %16, %17 in 0 : vector<16x8xf32>, vector<16x8xf32> -> vector<32x8xf32>
    %19 = vector.shape_cast %14 : vector<32x8xf32> to vector<1x32x8xf32>
    %20 = vector.shape_cast %18 : vector<32x8xf32> to vector<1x32x8xf32>
    %21 = tpu.concatenate %19, %20 in 0 : vector<1x32x8xf32>, vector<1x32x8xf32> -> vector<2x32x8xf32>
    %22 = arith.mulf %21, %21 : vector<2x32x8xf32>
    %cst_8 = arith.constant dense<0.000000e+00> : vector<2x32xf32>
    %23 = vector.multi_reduction <add>, %22, %cst_8 [2] : vector<2x32x8xf32> to vector<2x32xf32>
    %24 = vector.shape_cast %23 : vector<2x32xf32> to vector<2x32x1xf32>
    %cst_9 = arith.constant 1.000000e+00 : f32
    %25 = vector.broadcast %cst_9 : f32 to vector<2x32x1xf32>
    %26 = arith.addf %25, %24 : vector<2x32x1xf32>
    %27 = arith.divf %24, %26 : vector<2x32x1xf32>
    %28 = vector.broadcast %27 : vector<2x32x1xf32> to vector<2x32x8xf32>
    %29 = arith.mulf %28, %21 : vector<2x32x8xf32>
    %30 = math.sqrt %24 : vector<2x32x1xf32>
    %cst_10 = arith.constant 9.99999993E-9 : f32
    %31 = vector.broadcast %cst_10 : f32 to vector<2x32x1xf32>
    %32 = arith.addf %30, %31 : vector<2x32x1xf32>
    %33 = vector.broadcast %32 : vector<2x32x1xf32> to vector<2x32x8xf32>
    %34 = arith.divf %29, %33 : vector<2x32x8xf32>
    %c0_11 = arith.constant 0 : index
    %c0_12 = arith.constant 0 : index
    %c0_13 = arith.constant 0 : index
    %c0_14 = arith.constant 0 : index
    %35 = vector.load %arg5[%c0_11, %c0_12, %c0_13, %c0_14] : memref<8x4x32x16xf32, #tpu.memory_space<vmem>>, vector<8x4x32x16xf32>
    %36 = vector.extract_strided_slice %34 {offsets = [0, 0, 0], sizes = [2, 32, 1], strides = [1, 1, 1]} : vector<2x32x8xf32> to vector<2x32x1xf32>
    %37 = vector.shape_cast %36 : vector<2x32x1xf32> to vector<2x1x32x1xf32>
    %38 = vector.extract_strided_slice %35 {offsets = [0, 0, 0, 0], sizes = [1, 4, 32, 16], strides = [1, 1, 1, 1]} : vector<8x4x32x16xf32> to vector<1x4x32x16xf32>
    %39 = vector.shape_cast %38 : vector<1x4x32x16xf32> to vector<4x32x16xf32>
    %40 = vector.shape_cast %39 : vector<4x32x16xf32> to vector<1x4x32x16xf32>
    %41 = vector.broadcast %37 : vector<2x1x32x1xf32> to vector<2x4x32x16xf32>
    %42 = vector.broadcast %40 : vector<1x4x32x16xf32> to vector<2x4x32x16xf32>
    %43 = arith.mulf %41, %42 : vector<2x4x32x16xf32>
    %44 = vector.extract_strided_slice %34 {offsets = [0, 0, 1], sizes = [2, 32, 1], strides = [1, 1, 1]} : vector<2x32x8xf32> to vector<2x32x1xf32>
    %45 = vector.shape_cast %44 : vector<2x32x1xf32> to vector<2x1x32x1xf32>
    %46 = vector.extract_strided_slice %35 {offsets = [1, 0, 0, 0], sizes = [1, 4, 32, 16], strides = [1, 1, 1, 1]} : vector<8x4x32x16xf32> to vector<1x4x32x16xf32>
    %47 = vector.shape_cast %46 : vector<1x4x32x16xf32> to vector<4x32x16xf32>
    %48 = vector.shape_cast %47 : vector<4x32x16xf32> to vector<1x4x32x16xf32>
    %49 = vector.broadcast %45 : vector<2x1x32x1xf32> to vector<2x4x32x16xf32>
    %50 = vector.broadcast %48 : vector<1x4x32x16xf32> to vector<2x4x32x16xf32>
    %51 = arith.mulf %49, %50 : vector<2x4x32x16xf32>
    %52 = arith.addf %43, %51 : vector<2x4x32x16xf32>
    %53 = vector.extract_strided_slice %34 {offsets = [0, 0, 2], sizes = [2, 32, 1], strides = [1, 1, 1]} : vector<2x32x8xf32> to vector<2x32x1xf32>
    %54 = vector.shape_cast %53 : vector<2x32x1xf32> to vector<2x1x32x1xf32>
    %55 = vector.extract_strided_slice %35 {offsets = [2, 0, 0, 0], sizes = [1, 4, 32, 16], strides = [1, 1, 1, 1]} : vector<8x4x32x16xf32> to vector<1x4x32x16xf32>
    %56 = vector.shape_cast %55 : vector<1x4x32x16xf32> to vector<4x32x16xf32>
    %57 = vector.shape_cast %56 : vector<4x32x16xf32> to vector<1x4x32x16xf32>
    %58 = vector.broadcast %54 : vector<2x1x32x1xf32> to vector<2x4x32x16xf32>
    %59 = vector.broadcast %57 : vector<1x4x32x16xf32> to vector<2x4x32x16xf32>
    %60 = arith.mulf %58, %59 : vector<2x4x32x16xf32>
    %61 = arith.addf %52, %60 : vector<2x4x32x16xf32>
    %62 = vector.extract_strided_slice %34 {offsets = [0, 0, 3], sizes = [2, 32, 1], strides = [1, 1, 1]} : vector<2x32x8xf32> to vector<2x32x1xf32>
    %63 = vector.shape_cast %62 : vector<2x32x1xf32> to vector<2x1x32x1xf32>
    %64 = vector.extract_strided_slice %35 {offsets = [3, 0, 0, 0], sizes = [1, 4, 32, 16], strides = [1, 1, 1, 1]} : vector<8x4x32x16xf32> to vector<1x4x32x16xf32>
    %65 = vector.shape_cast %64 : vector<1x4x32x16xf32> to vector<4x32x16xf32>
    %66 = vector.shape_cast %65 : vector<4x32x16xf32> to vector<1x4x32x16xf32>
    %67 = vector.broadcast %63 : vector<2x1x32x1xf32> to vector<2x4x32x16xf32>
    %68 = vector.broadcast %66 : vector<1x4x32x16xf32> to vector<2x4x32x16xf32>
    %69 = arith.mulf %67, %68 : vector<2x4x32x16xf32>
    %70 = arith.addf %61, %69 : vector<2x4x32x16xf32>
    %71 = vector.extract_strided_slice %34 {offsets = [0, 0, 4], sizes = [2, 32, 1], strides = [1, 1, 1]} : vector<2x32x8xf32> to vector<2x32x1xf32>
    %72 = vector.shape_cast %71 : vector<2x32x1xf32> to vector<2x1x32x1xf32>
    %73 = vector.extract_strided_slice %35 {offsets = [4, 0, 0, 0], sizes = [1, 4, 32, 16], strides = [1, 1, 1, 1]} : vector<8x4x32x16xf32> to vector<1x4x32x16xf32>
    %74 = vector.shape_cast %73 : vector<1x4x32x16xf32> to vector<4x32x16xf32>
    %75 = vector.shape_cast %74 : vector<4x32x16xf32> to vector<1x4x32x16xf32>
    %76 = vector.broadcast %72 : vector<2x1x32x1xf32> to vector<2x4x32x16xf32>
    %77 = vector.broadcast %75 : vector<1x4x32x16xf32> to vector<2x4x32x16xf32>
    %78 = arith.mulf %76, %77 : vector<2x4x32x16xf32>
    %79 = arith.addf %70, %78 : vector<2x4x32x16xf32>
    %80 = vector.extract_strided_slice %34 {offsets = [0, 0, 5], sizes = [2, 32, 1], strides = [1, 1, 1]} : vector<2x32x8xf32> to vector<2x32x1xf32>
    %81 = vector.shape_cast %80 : vector<2x32x1xf32> to vector<2x1x32x1xf32>
    %82 = vector.extract_strided_slice %35 {offsets = [5, 0, 0, 0], sizes = [1, 4, 32, 16], strides = [1, 1, 1, 1]} : vector<8x4x32x16xf32> to vector<1x4x32x16xf32>
    %83 = vector.shape_cast %82 : vector<1x4x32x16xf32> to vector<4x32x16xf32>
    %84 = vector.shape_cast %83 : vector<4x32x16xf32> to vector<1x4x32x16xf32>
    %85 = vector.broadcast %81 : vector<2x1x32x1xf32> to vector<2x4x32x16xf32>
    %86 = vector.broadcast %84 : vector<1x4x32x16xf32> to vector<2x4x32x16xf32>
    %87 = arith.mulf %85, %86 : vector<2x4x32x16xf32>
    %88 = arith.addf %79, %87 : vector<2x4x32x16xf32>
    %89 = vector.extract_strided_slice %34 {offsets = [0, 0, 6], sizes = [2, 32, 1], strides = [1, 1, 1]} : vector<2x32x8xf32> to vector<2x32x1xf32>
    %90 = vector.shape_cast %89 : vector<2x32x1xf32> to vector<2x1x32x1xf32>
    %91 = vector.extract_strided_slice %35 {offsets = [6, 0, 0, 0], sizes = [1, 4, 32, 16], strides = [1, 1, 1, 1]} : vector<8x4x32x16xf32> to vector<1x4x32x16xf32>
    %92 = vector.shape_cast %91 : vector<1x4x32x16xf32> to vector<4x32x16xf32>
    %93 = vector.shape_cast %92 : vector<4x32x16xf32> to vector<1x4x32x16xf32>
    %94 = vector.broadcast %90 : vector<2x1x32x1xf32> to vector<2x4x32x16xf32>
    %95 = vector.broadcast %93 : vector<1x4x32x16xf32> to vector<2x4x32x16xf32>
    %96 = arith.mulf %94, %95 : vector<2x4x32x16xf32>
    %97 = arith.addf %88, %96 : vector<2x4x32x16xf32>
    %98 = vector.extract_strided_slice %34 {offsets = [0, 0, 7], sizes = [2, 32, 1], strides = [1, 1, 1]} : vector<2x32x8xf32> to vector<2x32x1xf32>
    %99 = vector.shape_cast %98 : vector<2x32x1xf32> to vector<2x1x32x1xf32>
    %100 = vector.extract_strided_slice %35 {offsets = [7, 0, 0, 0], sizes = [1, 4, 32, 16], strides = [1, 1, 1, 1]} : vector<8x4x32x16xf32> to vector<1x4x32x16xf32>
    %101 = vector.shape_cast %100 : vector<1x4x32x16xf32> to vector<4x32x16xf32>
    %102 = vector.shape_cast %101 : vector<4x32x16xf32> to vector<1x4x32x16xf32>
    %103 = vector.broadcast %99 : vector<2x1x32x1xf32> to vector<2x4x32x16xf32>
    %104 = vector.broadcast %102 : vector<1x4x32x16xf32> to vector<2x4x32x16xf32>
    %105 = arith.mulf %103, %104 : vector<2x4x32x16xf32>
    %106 = arith.addf %97, %105 : vector<2x4x32x16xf32>
    %cst_15 = arith.constant 2.500000e-01 : f32
    %107 = vector.broadcast %cst_15 : f32 to vector<2x4x32x16xf32>
    %108 = arith.mulf %106, %107 : vector<2x4x32x16xf32>
    %cst_16 = arith.constant dense<0.000000e+00> : vector<2x4x16xf32>
    %109 = vector.multi_reduction <add>, %108, %cst_16 [2] : vector<2x4x32x16xf32> to vector<2x4x16xf32>
    %110 = vector.shape_cast %109 : vector<2x4x16xf32> to vector<2x4x1x16xf32>
    %111 = arith.mulf %110, %110 : vector<2x4x1x16xf32>
    %cst_17 = arith.constant dense<0.000000e+00> : vector<2x4x1xf32>
    %112 = vector.multi_reduction <add>, %111, %cst_17 [3] : vector<2x4x1x16xf32> to vector<2x4x1xf32>
    %113 = vector.shape_cast %112 : vector<2x4x1xf32> to vector<2x4x1x1xf32>
    %cst_18 = arith.constant 1.000000e+00 : f32
    %114 = vector.broadcast %cst_18 : f32 to vector<2x4x1x1xf32>
    %115 = arith.addf %114, %113 : vector<2x4x1x1xf32>
    %116 = arith.divf %113, %115 : vector<2x4x1x1xf32>
    %117 = vector.broadcast %116 : vector<2x4x1x1xf32> to vector<2x4x1x16xf32>
    %118 = arith.mulf %117, %110 : vector<2x4x1x16xf32>
    %119 = math.sqrt %113 : vector<2x4x1x1xf32>
    %cst_19 = arith.constant 9.99999993E-9 : f32
    %120 = vector.broadcast %cst_19 : f32 to vector<2x4x1x1xf32>
    %121 = arith.addf %119, %120 : vector<2x4x1x1xf32>
    %122 = vector.broadcast %121 : vector<2x4x1x1xf32> to vector<2x4x1x16xf32>
    %123 = arith.divf %118, %122 : vector<2x4x1x16xf32>
    %124 = vector.broadcast %123 : vector<2x4x1x16xf32> to vector<2x4x32x16xf32>
    %125 = arith.mulf %124, %106 : vector<2x4x32x16xf32>
    %cst_20 = arith.constant dense<0.000000e+00> : vector<2x4x32xf32>
    %126 = vector.multi_reduction <add>, %125, %cst_20 [3] : vector<2x4x32x16xf32> to vector<2x4x32xf32>
    %127 = vector.shape_cast %126 : vector<2x4x32xf32> to vector<2x4x32x1xf32>
    %cst_21 = arith.constant dense<0xFF800000> : vector<2x32x1xf32>
    %128 = vector.multi_reduction <maximumf>, %127, %cst_21 [1] : vector<2x4x32x1xf32> to vector<2x32x1xf32>
    %129 = vector.shape_cast %128 : vector<2x32x1xf32> to vector<2x1x32x1xf32>
    %130 = vector.broadcast %129 : vector<2x1x32x1xf32> to vector<2x4x32x1xf32>
    %131 = arith.subf %127, %130 : vector<2x4x32x1xf32>
    %132 = math.exp %131 : vector<2x4x32x1xf32>
    %cst_22 = arith.constant dense<0.000000e+00> : vector<2x32x1xf32>
    %133 = vector.multi_reduction <add>, %132, %cst_22 [1] : vector<2x4x32x1xf32> to vector<2x32x1xf32>
    %134 = vector.shape_cast %133 : vector<2x32x1xf32> to vector<2x1x32x1xf32>
    %135 = vector.broadcast %134 : vector<2x1x32x1xf32> to vector<2x4x32x1xf32>
    %136 = arith.divf %132, %135 : vector<2x4x32x1xf32>
    %137 = vector.broadcast %136 : vector<2x4x32x1xf32> to vector<2x4x32x16xf32>
    %138 = arith.mulf %137, %106 : vector<2x4x32x16xf32>
    %cst_23 = arith.constant dense<0.000000e+00> : vector<2x4x16xf32>
    %139 = vector.multi_reduction <add>, %138, %cst_23 [2] : vector<2x4x32x16xf32> to vector<2x4x16xf32>
    %140 = vector.shape_cast %139 : vector<2x4x16xf32> to vector<2x4x1x16xf32>
    %141 = arith.mulf %140, %140 : vector<2x4x1x16xf32>
    %cst_24 = arith.constant dense<0.000000e+00> : vector<2x4x1xf32>
    %142 = vector.multi_reduction <add>, %141, %cst_24 [3] : vector<2x4x1x16xf32> to vector<2x4x1xf32>
    %143 = vector.shape_cast %142 : vector<2x4x1xf32> to vector<2x4x1x1xf32>
    %cst_25 = arith.constant 1.000000e+00 : f32
    %144 = vector.broadcast %cst_25 : f32 to vector<2x4x1x1xf32>
    %145 = arith.addf %144, %143 : vector<2x4x1x1xf32>
    %146 = arith.divf %143, %145 : vector<2x4x1x1xf32>
    %147 = vector.broadcast %146 : vector<2x4x1x1xf32> to vector<2x4x1x16xf32>
    %148 = arith.mulf %147, %140 : vector<2x4x1x16xf32>
    %149 = math.sqrt %143 : vector<2x4x1x1xf32>
    %cst_26 = arith.constant 9.99999993E-9 : f32
    %150 = vector.broadcast %cst_26 : f32 to vector<2x4x1x1xf32>
    %151 = arith.addf %149, %150 : vector<2x4x1x1xf32>
    %152 = vector.broadcast %151 : vector<2x4x1x1xf32> to vector<2x4x1x16xf32>
    %153 = arith.divf %148, %152 : vector<2x4x1x16xf32>
    %154 = vector.broadcast %153 : vector<2x4x1x16xf32> to vector<2x4x32x16xf32>
    %155 = arith.mulf %154, %106 : vector<2x4x32x16xf32>
    %cst_27 = arith.constant dense<0.000000e+00> : vector<2x4x32xf32>
    %156 = vector.multi_reduction <add>, %155, %cst_27 [3] : vector<2x4x32x16xf32> to vector<2x4x32xf32>
    %157 = vector.shape_cast %156 : vector<2x4x32xf32> to vector<2x4x32x1xf32>
    %158 = arith.addf %127, %157 : vector<2x4x32x1xf32>
    %cst_28 = arith.constant dense<0xFF800000> : vector<2x32x1xf32>
    %159 = vector.multi_reduction <maximumf>, %158, %cst_28 [1] : vector<2x4x32x1xf32> to vector<2x32x1xf32>
    %160 = vector.shape_cast %159 : vector<2x32x1xf32> to vector<2x1x32x1xf32>
    %161 = vector.broadcast %160 : vector<2x1x32x1xf32> to vector<2x4x32x1xf32>
    %162 = arith.subf %158, %161 : vector<2x4x32x1xf32>
    %163 = math.exp %162 : vector<2x4x32x1xf32>
    %cst_29 = arith.constant dense<0.000000e+00> : vector<2x32x1xf32>
    %164 = vector.multi_reduction <add>, %163, %cst_29 [1] : vector<2x4x32x1xf32> to vector<2x32x1xf32>
    %165 = vector.shape_cast %164 : vector<2x32x1xf32> to vector<2x1x32x1xf32>
    %166 = vector.broadcast %165 : vector<2x1x32x1xf32> to vector<2x4x32x1xf32>
    %167 = arith.divf %163, %166 : vector<2x4x32x1xf32>
    %168 = vector.broadcast %167 : vector<2x4x32x1xf32> to vector<2x4x32x16xf32>
    %169 = arith.mulf %168, %106 : vector<2x4x32x16xf32>
    %cst_30 = arith.constant dense<0.000000e+00> : vector<2x4x16xf32>
    %170 = vector.multi_reduction <add>, %169, %cst_30 [2] : vector<2x4x32x16xf32> to vector<2x4x16xf32>
    %171 = vector.shape_cast %170 : vector<2x4x16xf32> to vector<2x4x1x16xf32>
    %172 = arith.mulf %171, %171 : vector<2x4x1x16xf32>
    %cst_31 = arith.constant dense<0.000000e+00> : vector<2x4x1xf32>
    %173 = vector.multi_reduction <add>, %172, %cst_31 [3] : vector<2x4x1x16xf32> to vector<2x4x1xf32>
    %174 = vector.shape_cast %173 : vector<2x4x1xf32> to vector<2x4x1x1xf32>
    %cst_32 = arith.constant 1.000000e+00 : f32
    %175 = vector.broadcast %cst_32 : f32 to vector<2x4x1x1xf32>
    %176 = arith.addf %175, %174 : vector<2x4x1x1xf32>
    %177 = arith.divf %174, %176 : vector<2x4x1x1xf32>
    %178 = vector.broadcast %177 : vector<2x4x1x1xf32> to vector<2x4x1x16xf32>
    %179 = arith.mulf %178, %171 : vector<2x4x1x16xf32>
    %180 = math.sqrt %174 : vector<2x4x1x1xf32>
    %cst_33 = arith.constant 9.99999993E-9 : f32
    %181 = vector.broadcast %cst_33 : f32 to vector<2x4x1x1xf32>
    %182 = arith.addf %180, %181 : vector<2x4x1x1xf32>
    %183 = vector.broadcast %182 : vector<2x4x1x1xf32> to vector<2x4x1x16xf32>
    %184 = arith.divf %179, %183 : vector<2x4x1x16xf32>
    %185 = vector.extract_strided_slice %184 {offsets = [0, 0, 0, 0], sizes = [1, 4, 1, 16], strides = [1, 1, 1, 1]} : vector<2x4x1x16xf32> to vector<1x4x1x16xf32>
    %186 = vector.shape_cast %185 : vector<1x4x1x16xf32> to vector<4x16xf32>
    %187 = vector.extract_strided_slice %184 {offsets = [1, 0, 0, 0], sizes = [1, 4, 1, 16], strides = [1, 1, 1, 1]} : vector<2x4x1x16xf32> to vector<1x4x1x16xf32>
    %188 = vector.shape_cast %187 : vector<1x4x1x16xf32> to vector<4x16xf32>
    %189 = tpu.concatenate %186, %188 in 0 : vector<4x16xf32>, vector<4x16xf32> -> vector<8x16xf32>
    %c0_34 = arith.constant 0 : index
    %c0_35 = arith.constant 0 : index
    %190 = vector.load %arg6[%c0_34, %c0_35] : memref<16x1056xf32, #tpu.memory_space<vmem>>, vector<16x1056xf32>
    %cst_36 = arith.constant dense<0.000000e+00> : vector<8x1056xf32>
    %191 = tpu.matmul %189, %190, %cst_36 {dimension_numbers = #tpu.dot_dimension_numbers<[1], [0], [0], [1], [0, 0, 1, 1], [], []>} : vector<8x16xf32>, vector<16x1056xf32>, vector<8x1056xf32> -> vector<8x1056xf32>
    %c0_37 = arith.constant 0 : index
    %c0_38 = arith.constant 0 : index
    %192 = vector.load %arg7[%c0_37, %c0_38] : memref<1x1056xf32, #tpu.memory_space<vmem>>, vector<1x1056xf32>
    %193 = vector.broadcast %192 : vector<1x1056xf32> to vector<8x1056xf32>
    %194 = arith.addf %191, %193 : vector<8x1056xf32>
    %195 = vector.extract_strided_slice %194 {offsets = [0, 0], sizes = [8, 1024], strides = [1, 1]} : vector<8x1056xf32> to vector<8x1024xf32>
    %cst_39 = arith.constant 0.000000e+00 : f32
    %196 = vector.broadcast %cst_39 : f32 to vector<8x1024xf32>
    %197 = arith.maximumf %195, %196 : vector<8x1024xf32>
    %198 = vector.extract_strided_slice %194 {offsets = [0, 1024], sizes = [8, 32], strides = [1, 1]} : vector<8x1056xf32> to vector<8x32xf32>
    %c0_40 = arith.constant 0 : index
    %c0_41 = arith.constant 0 : index
    %199 = vector.load %arg8[%c0_40, %c0_41] : memref<1024x32xf32, #tpu.memory_space<vmem>>, vector<1024x32xf32>
    %cst_42 = arith.constant dense<0.000000e+00> : vector<8x32xf32>
    %200 = tpu.matmul %197, %199, %cst_42 {dimension_numbers = #tpu.dot_dimension_numbers<[1], [0], [0], [1], [0, 0, 1, 1], [], []>} : vector<8x1024xf32>, vector<1024x32xf32>, vector<8x32xf32> -> vector<8x32xf32>
    %c0_43 = arith.constant 0 : index
    %c0_44 = arith.constant 0 : index
    %201 = vector.load %arg9[%c0_43, %c0_44] : memref<1x32xf32, #tpu.memory_space<vmem>>, vector<1x32xf32>
    %202 = vector.broadcast %201 : vector<1x32xf32> to vector<8x32xf32>
    %203 = arith.addf %200, %202 : vector<8x32xf32>
    %c0_45 = arith.constant 0 : index
    %c0_46 = arith.constant 0 : index
    %204 = vector.load %arg10[%c0_45, %c0_46] : memref<8x32xf32, #tpu.memory_space<vmem>>, vector<8x32xf32>
    tpu.vector_store %arg10[%c0_45, %c0_46], %203 {strides = array<i32>} : memref<8x32xf32, #tpu.memory_space<vmem>>, vector<8x32xf32>,
    %cst_47 = arith.constant 0.000000e+00 : f32
    %205 = vector.broadcast %cst_47 : f32 to vector<8x32xf32>
    %206 = arith.maximumf %198, %205 : vector<8x32xf32>
    %207 = math.absf %198 : vector<8x32xf32>
    %cst_48 = arith.constant 0.000000e+00 : f32
    %208 = vector.broadcast %cst_48 : f32 to vector<8x32xf32>
    %209 = arith.subf %208, %207 : vector<8x32xf32>
    %210 = math.exp %209 : vector<8x32xf32>
    %cst_49 = arith.constant 1.000000e+00 : f32
    %211 = vector.broadcast %cst_49 : f32 to vector<8x32xf32>
    %212 = arith.addf %211, %210 : vector<8x32xf32>
    %213 = math.log %212 : vector<8x32xf32>
    %214 = arith.addf %206, %213 : vector<8x32xf32>
    %cst_50 = arith.constant 9.99999993E-9 : f32
    %215 = vector.broadcast %cst_50 : f32 to vector<8x32xf32>
    %216 = arith.addf %214, %215 : vector<8x32xf32>
    %c0_51 = arith.constant 0 : index
    %c0_52 = arith.constant 0 : index
    %217 = vector.load %arg11[%c0_51, %c0_52] : memref<8x32xf32, #tpu.memory_space<vmem>>, vector<8x32xf32>
    tpu.vector_store %arg11[%c0_51, %c0_52], %216 {strides = array<i32>} : memref<8x32xf32, #tpu.memory_space<vmem>>, vector<8x32xf32>,
    return
  }
  func.func @transform_0(%arg0: i32) -> (i32, i32) {
    %c0_i32 = arith.constant 0 : i32
    %c0_i32_0 = arith.constant 0 : i32
    %c0_i32_1 = arith.constant 0 : i32
    return %c0_i32, %c0_i32_0 : i32, i32
  }
  func.func @transform_1(%arg0: i32) -> (i32, i32) {
    %c0_i32 = arith.constant 0 : i32
    %c0_i32_0 = arith.constant 0 : i32
    %c0_i32_1 = arith.constant 0 : i32
    return %c0_i32, %c0_i32_0 : i32, i32
  }
  func.func @transform_2(%arg0: i32) -> (i32, i32) {
    %c0_i32 = arith.constant 0 : i32
    %c0_i32_0 = arith.constant 0 : i32
    %c0_i32_1 = arith.constant 0 : i32
    return %c0_i32, %c0_i32_0 : i32, i32
  }
  func.func @transform_3(%arg0: i32) -> (i32, i32) {
    %c0_i32 = arith.constant 0 : i32
    %c0_i32_0 = arith.constant 0 : i32
    %c0_i32_1 = arith.constant 0 : i32
    return %c0_i32, %c0_i32_0 : i32, i32
  }
  func.func @transform_4(%arg0: i32) -> (i32, i32, i32, i32) {
    %c0_i32 = arith.constant 0 : i32
    %c0_i32_0 = arith.constant 0 : i32
    %c0_i32_1 = arith.constant 0 : i32
    %c0_i32_2 = arith.constant 0 : i32
    %c0_i32_3 = arith.constant 0 : i32
    return %c0_i32, %c0_i32_0, %c0_i32_1, %c0_i32_2 : i32, i32, i32, i32
  }
  func.func @transform_5(%arg0: i32) -> (i32, i32) {
    %c0_i32 = arith.constant 0 : i32
    %c0_i32_0 = arith.constant 0 : i32
    %c0_i32_1 = arith.constant 0 : i32
    return %c0_i32, %c0_i32_0 : i32, i32
  }
  func.func @transform_6(%arg0: i32) -> (i32, i32) {
    %c0_i32 = arith.constant 0 : i32
    %c0_i32_0 = arith.constant 0 : i32
    %c0_i32_1 = arith.constant 0 : i32
    return %c0_i32, %c0_i32_0 : i32, i32
  }
  func.func @transform_7(%arg0: i32) -> (i32, i32) {
    %c0_i32 = arith.constant 0 : i32
    %c0_i32_0 = arith.constant 0 : i32
    %c0_i32_1 = arith.constant 0 : i32
    return %c0_i32, %c0_i32_0 : i32, i32
  }
  func.func @transform_8(%arg0: i32) -> (i32, i32) {
    %c0_i32 = arith.constant 0 : i32
    %c0_i32_0 = arith.constant 0 : i32
    %c0_i32_1 = arith.constant 0 : i32
    return %c0_i32, %c0_i32_0 : i32, i32
  }
  func.func @transform_9(%arg0: i32) -> (i32, i32) {
    %c0_i32 = arith.constant 0 : i32
    %c0_i32_0 = arith.constant 0 : i32
    %c0_i32_1 = arith.constant 0 : i32
    return %c0_i32, %c0_i32_0 : i32, i32
  }
  func.func @transform_10(%arg0: i32) -> (i32, i32) {
    %c0_i32 = arith.constant 0 : i32
    %c0_i32_0 = arith.constant 0 : i32
    %c0_i32_1 = arith.constant 0 : i32
    return %c0_i32, %c0_i32_0 : i32, i32
  }
}

</mosaic_0001>

<bundles_post_ra>
// kernel: vaecap_forward.1
= control target key start
LH: loop header
LB: loop body
LE: loop exit
PB: predicated region body
PF: predicated region fallthrough
CT: control target
= control target key end

     0   :  { %vm61_vm0 = vcmask 130048   ;;  %s10059_s0 = inlined_call_operand.vmem [shape: f32[32,144], index: 0, kind: input, shape index: {}]   ;;  %s10060_s1 = inlined_call_operand.vmem [shape: f32[144,16], index: 1, kind: input, shape index: {}]   ;;  %s10061_s2 = inlined_call_operand.vmem [shape: f32[1,16], index: 2, kind: input, shape index: {}]   ;;  %s10062_s3 = inlined_call_operand.vmem [shape: f32[1,16], index: 3, kind: input, shape index: {}]   ;;  %s10063_s4 = inlined_call_operand.vmem [shape: f32[8,4,32,16], index: 4, kind: input, shape index: {}]   ;;  %s10064_s5 = inlined_call_operand.vmem [shape: f32[16,1056], index: 5, kind: input, shape index: {}]   ;;  %s10065_s6 = inlined_call_operand.vmem [shape: f32[1,1056], index: 6, kind: input, shape index: {}]   ;;  %s10066_s7 = inlined_call_operand.vmem [shape: f32[1024,32], index: 7, kind: input, shape index: {}]   ;;  %s10067_s8 = inlined_call_operand.vmem [shape: f32[1,32], index: 8, kind: input, shape index: {}]   ;;  %s10068_s9 = inlined_call_operand.vmem [shape: f32[8,32], index: 9, kind: output, shape index: {0}]   ;;  %s10069_s10 = inlined_call_operand.hbm [shape: f32[8,32], index: 10, kind: output, shape index: {1}]  }
   0x1   :  { %v58_v0 = vld [vmem:[%s10060_s1 + $0x78] sm:$0xff]  ;;  %v57_v1 = vld [vmem:[%s10060_s1 + $0x70] sm:$0xff]  ;;  %v56_v2 = vld [vmem:[%s10060_s1 + $0x68] sm:$0xff] }
   0x2   :  { %74 = vmatpush.msra.mxu0 %v58_v0  ;;  %v55_v3 = vld [vmem:[%s10060_s1 + $0x60] sm:$0xff]  ;;  %v60_v4 = vld [vmem:[%s10060_s1 + $0x88] sm:$0xff]  ;;  %v54_v6 = vld [vmem:[%s10060_s1 + $0x58] sm:$0xff] }
   0x3   :  { %v59_v5 = vld [vmem:[%s10060_s1 + $0x80] sm:$0xff]  ;;  %117 = vmatpush.msra.mxu1 %v60_v4  ;;  %v36_v7 = vld [vmem:[%s10059_s0 + $0x8] sm:$0xff]  ;;  %v53_v8 = vld [vmem:[%s10060_s1 + $0x50] sm:$0xff] }
   0x4   :  { %75 = vmatpush.msra.mxu0 %v57_v1 }
   0x5   :  { %118 = vmatpush.msra.mxu1 %v59_v5 }
   0x6   :  { %76 = vmatpush.msra.mxu0 %v56_v2  ;;  %4461 = vmatmul.msk.f32.vlgmr.msra.gmra.mxu1 %vm61_vm0, %v36_v7 }
   0x8   :  { %77 = vmatpush.msra.mxu0 %v55_v3 }
   0xa   :  { %78 = vmatpush.msra.mxu0 %v54_v6 }
   0xb   :  { %16 = vsyncpa [#allocation3], 0  ;;  %v52_v9 = vld [vmem:[%s10060_s1 + $0x48] sm:$0xff]  ;;  %v51_v10 = vld [vmem:[%s10060_s1 + $0x40] sm:$0xff]  ;;  %vm176_vm1 = vcmask 64512   ;;  %v10080_v1 = vmov 4  }
   0xc   :  { %79 = vmatpush.msra.mxu0 %v53_v8  ;;  %v50_v11 = vld [vmem:[%s10060_s1 + $0x38] sm:$0xff]  ;;  %v49_v13 = vld [vmem:[%s10060_s1 + $0x30] sm:$0xff]  ;;  %v48_v14 = vld [vmem:[%s10060_s1 + $0x28] sm:$0xff]  ;;  %4488 = vset.pattern.permute.xlu1 %v10080_v1  ;;  %v10076_v2 = vmov 2   ;;  %s4450_s29 = sshll.u32 %s10069_s10, 4  ;;  %s4941_s30 = smov [#allocation2]   ;;  %s4451_s29 = int_to_ptr.hbm [resolvable:$true] %s4450_s29 }
   0xd   :  { %v38_v12 = vld [vmem:[%s10059_s0 + $0x18] sm:$0xff]  ;;  %v47_v15 = vld [vmem:[%s10060_s1 + $0x20] sm:$0xff]  ;;  %v40_v17 = vld [vmem:[%s10059_s0 + $0x28] sm:$0xff]  ;;  %4486 = vset.pattern.permute.xlu0 %v10076_v2  ;;  %s4448_s11 = sshll.u32 %s4941_s30, 4  ;;  %s4449_s11 = int_to_ptr.vmem [resolvable:$true] %s4448_s11 }
   0xe   :  { %80 = vmatpush.msra.mxu0 %v52_v9  ;;  %4462 = vmatmul.msk.f32.gmra.mxu1 %vm61_vm0, %v38_v12  ;;  %v46_v16 = vld [vmem:[%s10060_s1 + $0x18] sm:$0xff]  ;;  %v45_v18 = vld [vmem:[%s10060_s1 + $0x10] sm:$0xff]  ;;  %v44_v19 = vld [vmem:[%s10060_s1 + $0x8] sm:$0xff] }
   0xf   :  { %v43_v20 = vld [vmem:[%s10060_s1] sm:$0xff]  ;;  %v42_v22 = vld [vmem:[%s10059_s0 + $0x38] sm:$0xff]  ;;  %v37_v23 = vld [vmem:[%s10059_s0 + $0x10] sm:$0xff] }
  0x10   :  { %81 = vmatpush.msra.mxu0 %v51_v10  ;;  %v35_v21 = vld [vmem:[%s10059_s0] sm:$0xff]  ;;  %v41_v25 = vld [vmem:[%s10059_s0 + $0x30] sm:$0xff] }
  0x11   :  { %v39_v24 = vld [vmem:[%s10059_s0 + $0x20] sm:$0xff]  ;;  %s4932_s0 = smov 120  }
  0x12   :  { %82 = vmatpush.msra.mxu0 %v50_v11  ;;  %v4546_v27 = vld [vmem:[%s10061_s2] ss:$0 sm:$0xff] }
  0x13   :  { %v4547_v30 = vld [vmem:[%s10062_s3] ss:$0 sm:$0xff] }
  0x14   :  { %83 = vmatpush.msra.mxu0 %v49_v13 }
  0x16   :  { %84 = vmatpush.msra.mxu0 %v48_v14  ;;  %4463 = vmatmul.msk.f32.gmra.mxu1 %vm61_vm0, %v40_v17 }
  0x18   :  { %85 = vmatpush.msra.mxu0 %v47_v15  ;;  %v10072_v15 = vmov 0  }
  0x19   :  { %4484 = vset.pattern.permute.xlu2 %v10072_v15 }
  0x1a   :  { %86 = vmatpush.msra.mxu0 %v46_v16 }
  0x1c   :  { %87 = vmatpush.msra.mxu0 %v45_v18 }
  0x1e   :  { %88 = vmatpush.msra.mxu0 %v44_v19  ;;  %4464 = vmatmul.msk.f32.gmra.mxu1 %vm61_vm0, %v42_v22 }
  0x20   :  { %89 = vmatpush.msra.mxu0 %v43_v20 }
  0x21   :  { %90 = vmatmul.f32.vlgmr.msra.gmra.mxu0 %v35_v21 }
  0x29   :  { %93 = vmatmul.f32.gmra.mxu0 %v37_v23 }
  0x31   :  { %96 = vmatmul.f32.gmra.mxu0 %v39_v24 }
  0x39   :  { %99 = vmatmul.f32.gmra.mxu0 %v41_v25 }
  0x83   :  { %v120_v26 = vpop.f32.mrf.mxu1 }
  0x8b   :  { %v123_v31 = vpop.f32.mrf.mxu1 }
  0x93   :  { %v126_v40 = vpop.f32.mrf.mxu1 }
  0x9b   :  { %v129_v49 = vpop.f32.mrf.mxu1 }
  0x9e   :  { %v91_v28 = vpop.f32.mrf.mxu0 }
  0x9f   :  { %v121_v29 = vadd.f32 %v120_v26, %v91_v28 }
  0xa1   :  { %v136_v32 = vmul.f32 %v4546_v27, %v121_v29 }
  0xa3   :  { %v144_v33 = vadd.f32 %v4547_v30, %v136_v32 }
  0xa5   :  { %v5085_v34 = vmax.f32 %v144_v33, 0.0 }
  0xa6   :  { %v94_v35 = vpop.f32.mrf.mxu0 }
  0xa7   :  { %v124_v36 = vadd.f32 %v123_v31, %v94_v35  ;;  %154 = vrot.lane.b32.xlu0 %v5085_v34, %s4932_s0  ;;  %v168_v37 = vmul.f32 %v5085_v34, %v5085_v34 }
  0xa9   :  { %v137_v38 = vmul.f32 %v4546_v27, %v124_v36  ;;  %v177_v39 = vsel %vm176_vm1, %v168_v37, 0.0 }
  0xaa   :  { %178 = vadd.xlane.f32.xlu2 %v177_v39 }
  0xab   :  { %v145_v41 = vadd.f32 %v4547_v30, %v137_v38 }
  0xad   :  { %v5091_v42 = vmax.f32 %v145_v41, 0.0 }
  0xae   :  { %v97_v43 = vpop.f32.mrf.mxu0 }
  0xaf   :  { %v127_v44 = vadd.f32 %v126_v40, %v97_v43  ;;  %156 = vrot.lane.b32.xlu1 %v5091_v42, %s4932_s0  ;;  %v169_v45 = vmul.f32 %v5091_v42, %v5091_v42 }
  0xb1   :  { %v138_v46 = vmul.f32 %v4546_v27, %v127_v44  ;;  %v180_v47 = vsel %vm176_vm1, %v169_v45, 0.0 }
  0xb2   :  { %181 = vadd.xlane.f32.xlu2 %v180_v47 }
  0xb3   :  { %v146_v48 = vadd.f32 %v4547_v30, %v138_v46 }
  0xb5   :  { %v5097_v50 = vmax.f32 %v146_v48, 0.0 }
  0xb6   :  { %v100_v51 = vpop.f32.mrf.mxu0 }
  0xb7   :  { %v130_v52 = vadd.f32 %v129_v49, %v100_v51  ;;  %162 = vrot.lane.b32.xlu0 %v5097_v50, %s4932_s0  ;;  %v172_v56 = vmul.f32 %v5097_v50, %v5097_v50 }
  0xb9   :  { %v139_v53 = vmul.f32 %v4546_v27, %v130_v52  ;;  %v189_v57 = vsel %vm176_vm1, %v172_v56, 0.0 }
  0xbb   :  { %v147_v54 = vadd.f32 %v4547_v30, %v139_v53 }
  0xbd   :  { %v5100_v55 = vmax.f32 %v147_v54, 0.0 }
  0xbf   :  { %164 = vrot.lane.b32.xlu1 %v5100_v55, %s4932_s0  ;;  %v173_v58 = vmul.f32 %v5100_v55, %v5100_v55 }
  0xc1   :  { %v192_v59 = vsel %vm176_vm1, %v173_v58, 0.0 }
  0xe1   :  { %190 = vadd.xlane.f32.xlu0 %v189_v57 }
  0xe9   :  { %193 = vadd.xlane.f32.xlu1 %v192_v59 }
 0x119   :  { %v5109_v60 = vpop.permute.xlu0 %154 }
 0x11a   :  { %v170_v61 = vmul.f32 %v5109_v60, %v5109_v60 }
 0x11c   :  { %v183_v62 = vsel %vm176_vm1, %v170_v61, 0.0 }
 0x11d   :  { %v5114_v63 = vpop.xlane.xlu2 %178  ;;  %184 = vadd.xlane.f32.xlu2 %v183_v62 }
 0x11e   :  { %v5117_v0 = vadd.f32 1.0, %v5114_v63  ;;  %4550 = vrsqrt.f32 %v5114_v63  ;;  %vm344_vm2 = vcmp.eq.f32.partialorder %v5114_v63, inf  ;;  %v347_v24 = vand.u32 2147483648, %v5114_v63 }
 0x11f   :  { %vm346_vm3 = vcmp.eq.f32.partialorder %v5114_v63, 0.0 }
 0x120   :  { %4552 = vrcp.f32 %v5117_v0  ;;  %v220_v37 = vand.u32 2147483648, %v5117_v0  ;;  %vm214_vm5 = vweird.f32 %v5117_v0  ;;  %v218_v39 = vand.u32 2147483647, %v5117_v0 }
 0x121   :  { %v5123_v3 = vpop.permute.xlu1 %156 }
 0x122   :  { %v171_v4 = vmul.f32 %v5123_v3, %v5123_v3  ;;  %v221_v45 = vor.u32 1.1754944e-38, %v220_v37  ;;  %vm219_vm9 = vcmp.eq.f32.partialorder %v218_v39, 8.507059e+37 }
 0x124   :  { %v4551_v5 = vpop.eup %4550  ;;  %v186_v6 = vsel %vm176_vm1, %v171_v4, 0.0 }
 0x125   :  { %v338_v7 = vmul.f32 %v4551_v5, %v5114_v63  ;;  %187 = vadd.xlane.f32.xlu2 %v186_v6  ;;  %v5129_v8 = vpop.xlane.xlu2 %181 }
 0x126   :  { %v4553_v9 = vpop.eup %4552  ;;  %4554 = vrsqrt.f32 %v5129_v8  ;;  %v5142_v23 = vadd.f32 1.0, %v5129_v8  ;;  %vm356_vm6 = vcmp.eq.f32.partialorder %v5129_v8, inf  ;;  %v359_v40 = vand.u32 2147483648, %v5129_v8 }
 0x127   :  { %v339_v10 = vmul.f32 %v4551_v5, %v338_v7  ;;  %v210_v11 = vmul.f32 %v4553_v9, %v5117_v0  ;;  %vm215_vm4 = vweird.f32 %v4553_v9  ;;  %vm358_vm8 = vcmp.eq.f32.partialorder %v5129_v8, 0.0 }
 0x128   :  { %4556 = vrcp.f32 %v5142_v23  ;;  %vm216_vm7 = vmor %vm214_vm5, %vm215_vm4  ;;  %vm229_vm14 = vweird.f32 %v5142_v23 }
 0x129   :  { %v340_v12 = vmul.f32 0.5, %v339_v10  ;;  %v5133_v13 = vpop.permute.xlu0 %162  ;;  %v211_v19 = vsub.f32 1.0, %v210_v11  ;;  %v235_v11 = vand.u32 2147483648, %v5142_v23 }
 0x12a   :  { %v174_v14 = vmul.f32 %v5133_v13, %v5133_v13 }
 0x12b   :  { %v341_v16 = vsub.f32 1.5, %v340_v12  ;;  %v212_v26 = vmul.f32 %v4553_v9, %v211_v19 }
 0x12c   :  { %v4555_v17 = vpop.eup %4554  ;;  %v195_v18 = vsel %vm176_vm1, %v174_v14, 0.0 }
 0x12d   :  { %v342_v20 = vmul.f32 %v4551_v5, %v341_v16  ;;  %v350_v21 = vmul.f32 %v4555_v17, %v5129_v8  ;;  %196 = vadd.xlane.f32.xlu2 %v195_v18  ;;  %v213_v36 = vadd.f32 %v4553_v9, %v212_v26  ;;  %v233_v16 = vand.u32 2147483647, %v5142_v23 }
 0x12e   :  { %v4557_v43 = vpop.eup %4556 }
 0x12f   :  { %v343_v22 = vmul.f32 %v342_v20, %v5114_v63  ;;  %v351_v25 = vmul.f32 %v4555_v17, %v350_v21  ;;  %v217_v44 = vsel %vm216_vm7, %v4553_v9, %v213_v36  ;;  %v225_v51 = vmul.f32 %v4557_v43, %v5142_v23 }
 0x130   :  { %v222_v49 = vsel %vm219_vm9, %v221_v45, %v217_v44  ;;  %vm230_vm15 = vweird.f32 %v4557_v43  ;;  %v10074_v44 = vmov 7  }
 0x131   :  { %v345_v27 = vsel %vm344_vm2, %v5114_v63, %v343_v22  ;;  %v5148_v28 = vpop.permute.xlu1 %164  ;;  %v352_v30 = vmul.f32 0.5, %v351_v25  ;;  %v223_v56 = vmul.f32 %v222_v49, %v5114_v63  ;;  %v226_v58 = vsub.f32 1.0, %v225_v51 }
 0x132   :  { %v348_v29 = vsel %vm346_vm3, %v347_v24, %v345_v27  ;;  %v175_v31 = vmul.f32 %v5148_v28, %v5148_v28  ;;  %vm234_vm2 = vcmp.eq.f32.partialorder %v233_v16, 8.507059e+37  ;;  %v10070_v22 = vmov 3  }
 0x133   :  { %v433_v32 = vadd.f32 1e-08, %v348_v29  ;;  %v353_v33 = vsub.f32 1.5, %v352_v30  ;;  %v329_v5 = vmul.f32 %v223_v56, %v5085_v34  ;;  %v227_v6 = vmul.f32 %v4557_v43, %v226_v58 }
 0x134   :  { %v198_v35 = vsel %vm176_vm1, %v175_v31, 0.0  ;;  %vm231_vm1 = vmor %vm229_vm14, %vm230_vm15  ;;  %v236_v34 = vor.u32 1.1754944e-38, %v235_v11  ;;  %v10084_v24 = vmov 5   ;;  %v10082_v31 = vmov 1  }
 0x135   :  { %4558 = vrcp.f32 %v433_v32  ;;  %199 = vadd.xlane.f32.xlu2 %v198_v35  ;;  %v354_v38 = vmul.f32 %v4555_v17, %v353_v33  ;;  %v452_v57 = vand.u32 2147483648, %v433_v32  ;;  %v450_v61 = vand.u32 2147483647, %v433_v32 }
 0x136   :  { %vm446_vm11 = vweird.f32 %v433_v32  ;;  %v228_v14 = vadd.f32 %v4557_v43, %v227_v6  ;;  %v10078_v35 = vmov 6  }
 0x137   :  { %v355_v41 = vmul.f32 %v354_v38, %v5129_v8  ;;  %v453_v0 = vor.u32 1.1754944e-38, %v452_v57  ;;  %vm451_vm13 = vcmp.eq.f32.partialorder %v450_v61, 8.507059e+37 }
 0x138   :  { %v232_v18 = vsel %vm231_vm1, %v4557_v43, %v228_v14 }
 0x139   :  { %v357_v46 = vsel %vm356_vm6, %v5129_v8, %v355_v41  ;;  %v237_v20 = vsel %vm234_vm2, %v236_v34, %v232_v18 }
 0x13a   :  { %v360_v48 = vsel %vm358_vm8, %v359_v40, %v357_v46  ;;  %v238_v25 = vmul.f32 %v237_v20, %v5129_v8 }
 0x13b   :  { %v4559_v47 = vpop.eup %4558  ;;  %v434_v52 = vadd.f32 1e-08, %v360_v48 }
 0x13c   :  { %v442_v53 = vmul.f32 %v4559_v47, %v433_v32  ;;  %vm447_vm10 = vweird.f32 %v4559_v47  ;;  %v330_v33 = vmul.f32 %v238_v25, %v5091_v42 }
 0x13d   :  { %4560 = vrcp.f32 %v434_v52  ;;  %vm448_vm12 = vmor %vm446_vm11, %vm447_vm10  ;;  %v467_v21 = vand.u32 2147483648, %v434_v52  ;;  %vm461_vm4 = vweird.f32 %v434_v52  ;;  %v465_v23 = vand.u32 2147483647, %v434_v52 }
 0x13e   :  { %v443_v54 = vsub.f32 1.0, %v442_v53 }
 0x13f   :  { %v468_v27 = vor.u32 1.1754944e-38, %v467_v21  ;;  %vm466_vm6 = vcmp.eq.f32.partialorder %v465_v23, 8.507059e+37 }
 0x140   :  { %v444_v59 = vmul.f32 %v4559_v47, %v443_v54 }
 0x142   :  { %v445_v62 = vadd.f32 %v4559_v47, %v444_v59 }
 0x143   :  { %v4561_v4 = vpop.eup %4560 }
 0x144   :  { %v449_v7 = vsel %vm448_vm12, %v4559_v47, %v445_v62  ;;  %v457_v10 = vmul.f32 %v4561_v4, %v434_v52  ;;  %vm462_vm3 = vweird.f32 %v4561_v4 }
 0x145   :  { %v454_v9 = vsel %vm451_vm13, %v453_v0, %v449_v7  ;;  %vm463_vm5 = vmor %vm461_vm4, %vm462_vm3 }
 0x146   :  { %v455_v63 = vmul.f32 %v454_v9, %v329_v5  ;;  %v458_v12 = vsub.f32 1.0, %v457_v10 }
 0x148   :  { %858 = vperm.xlu0 %4486, %v455_v63   ;;  %1050 = vperm.xlu1 %4488, %v455_v63   ;;  %v459_v17 = vmul.f32 %v4561_v4, %v458_v12 }
 0x14a   :  { %v460_v19 = vadd.f32 %v4561_v4, %v459_v17 }
 0x14c   :  { %v464_v26 = vsel %vm463_vm5, %v4561_v4, %v460_v19 }
 0x14d   :  { %691 = vperm.xlu2 %4484, %v455_v63   ;;  %v469_v32 = vsel %vm466_vm6, %v468_v27, %v464_v26 }
 0x14e   :  { %v5180_v8 = vmul.f32 %v469_v32, %v330_v33 }
 0x150   :  { %4487 = vset.pattern.permute.xlu0 %v10070_v22  ;;  %4489 = vset.pattern.permute.xlu1 %v10084_v24 }
 0x151   :  { %954 = vperm.xlu0 %4487, %v455_v63   ;;  %1146 = vperm.xlu1 %4489, %v455_v63  }
 0x154   :  { %v5171_v29 = vpop.xlane.xlu0 %190 }
 0x155   :  { %v5174_v30 = vadd.f32 1.0, %v5171_v29  ;;  %4562 = vrsqrt.f32 %v5171_v29  ;;  %4485 = vset.pattern.permute.xlu2 %v10082_v31  ;;  %vm392_vm7 = vcmp.eq.f32.partialorder %v5171_v29, inf  ;;  %v395_v52 = vand.u32 2147483648, %v5171_v29 }
 0x156   :  { %762 = vperm.xlu2 %4485, %v455_v63   ;;  %vm394_vm8 = vcmp.eq.f32.partialorder %v5171_v29, 0.0 }
 0x157   :  { %4564 = vrcp.f32 %v5174_v30  ;;  %v280_v4 = vand.u32 2147483648, %v5174_v30  ;;  %vm274_vm10 = vweird.f32 %v5174_v30  ;;  %v278_v6 = vand.u32 2147483647, %v5174_v30 }
 0x159   :  { %4492 = vset.pattern.permute.xlu0 %v10072_v15  ;;  %4490 = vset.pattern.permute.xlu1 %v10078_v35  ;;  %v281_v14 = vor.u32 1.1754944e-38, %v280_v4  ;;  %vm279_vm14 = vcmp.eq.f32.partialorder %v278_v6, 8.507059e+37 }
 0x15a   :  { %696 = vperm.xlu0 %4492, %v5180_v8   ;;  %1242 = vperm.xlu1 %4490, %v455_v63  }
 0x15b   :  { %v4563_v36 = vpop.eup %4562 }
 0x15c   :  { %v386_v37 = vmul.f32 %v4563_v36, %v5171_v29  ;;  %v5186_v38 = vpop.xlane.xlu1 %193 }
 0x15d   :  { %4566 = vrsqrt.f32 %v5186_v38  ;;  %v4565_v42 = vpop.eup %4564  ;;  %v5196_v49 = vadd.f32 1.0, %v5186_v38  ;;  %vm404_vm12 = vcmp.eq.f32.partialorder %v5186_v38, inf  ;;  %v407_v10 = vand.u32 2147483648, %v5186_v38 }
 0x15e   :  { %v387_v39 = vmul.f32 %v4563_v36, %v386_v37  ;;  %4496 = vset.pattern.permute.xlu2 %v10080_v1  ;;  %v270_v41 = vmul.f32 %v4565_v42, %v5174_v30  ;;  %vm275_vm9 = vweird.f32 %v4565_v42  ;;  %vm406_vm13 = vcmp.eq.f32.partialorder %v5186_v38, 0.0 }
 0x15f   :  { %1054 = vperm.xlu2 %4496, %v5180_v8   ;;  %4568 = vrcp.f32 %v5196_v49  ;;  %vm5214_vm11 = vmor %vm274_vm10, %vm275_vm9  ;;  %vm289_vm5 = vweird.f32 %v5196_v49 }
 0x160   :  { %v388_v40 = vmul.f32 0.5, %v387_v39  ;;  %v271_v48 = vsub.f32 1.0, %v270_v41 }
 0x162   :  { %v389_v43 = vsub.f32 1.5, %v388_v40  ;;  %4491 = vset.pattern.permute.xlu1 %v10074_v44  ;;  %4504 = vset.pattern.permute.xlu0 %v10080_v1  ;;  %v272_v56 = vmul.f32 %v4565_v42, %v271_v48 }
 0x163   :  { %v4567_v45 = vpop.eup %4566  ;;  %1338 = vperm.xlu1 %4491, %v455_v63  }
 0x164   :  { %v390_v46 = vmul.f32 %v4563_v36, %v389_v43  ;;  %v398_v47 = vmul.f32 %v4567_v45, %v5186_v38  ;;  %v273_v62 = vadd.f32 %v4565_v42, %v272_v56 }
 0x165   :  { %v5209_v5 = vpop.eup %4568 }
 0x166   :  { %v391_v51 = vmul.f32 %v390_v46, %v5171_v29  ;;  %v399_v53 = vmul.f32 %v4567_v45, %v398_v47  ;;  %v277_v63 = vsel %vm5214_vm11, %v4565_v42, %v273_v62  ;;  %v285_v16 = vmul.f32 %v5209_v5, %v5196_v49 }
 0x167   :  { %4497 = vset.pattern.permute.xlu2 %v10084_v24  ;;  %v282_v19 = vsel %vm279_vm14, %v281_v14, %v277_v63  ;;  %vm290_vm4 = vweird.f32 %v5209_v5 }
 0x168   :  { %v393_v54 = vsel %vm392_vm7, %v5171_v29, %v391_v51  ;;  %1150 = vperm.xlu2 %4497, %v5180_v8   ;;  %v400_v58 = vmul.f32 0.5, %v399_v53  ;;  %v286_v23 = vsub.f32 1.0, %v285_v16  ;;  %v283_v25 = vmul.f32 %v282_v19, %v5171_v29  ;;  %vm291_vm6 = vmor %vm289_vm5, %vm290_vm4 }
 0x169   :  { %v396_v57 = vsel %vm394_vm8, %v395_v52, %v393_v54 }
 0x16a   :  { %v437_v59 = vadd.f32 1e-08, %v396_v57  ;;  %v401_v61 = vsub.f32 1.5, %v400_v58  ;;  %v287_v33 = vmul.f32 %v5209_v5, %v286_v23  ;;  %v333_v37 = vmul.f32 %v283_v25, %v5097_v50 }
 0x16b   :  { %4493 = vset.pattern.permute.xlu1 %v10082_v31  ;;  %v293_v50 = vand.u32 2147483647, %v5196_v49 }
 0x16c   :  { %4570 = vrcp.f32 %v437_v59  ;;  %766 = vperm.xlu1 %4493, %v5180_v8   ;;  %v402_v0 = vmul.f32 %v4567_v45, %v401_v61  ;;  %v512_v21 = vand.u32 2147483648, %v437_v59  ;;  %v510_v27 = vand.u32 2147483647, %v437_v59 }
 0x16d   :  { %vm506_vm1 = vweird.f32 %v437_v59  ;;  %v288_v41 = vadd.f32 %v5209_v5, %v287_v33  ;;  %v295_v45 = vand.u32 2147483648, %v5196_v49  ;;  %vm294_vm7 = vcmp.eq.f32.partialorder %v293_v50, 8.507059e+37 }
 0x16e   :  { %v403_v7 = vmul.f32 %v402_v0, %v5186_v38  ;;  %v513_v32 = vor.u32 1.1754944e-38, %v512_v21  ;;  %vm511_vm3 = vcmp.eq.f32.partialorder %v510_v27, 8.507059e+37 }
 0x16f   :  { %v292_v47 = vsel %vm291_vm6, %v5209_v5, %v288_v41  ;;  %v296_v48 = vor.u32 1.1754944e-38, %v295_v45 }
 0x170   :  { %4498 = vset.pattern.permute.xlu2 %v10078_v35  ;;  %v405_v11 = vsel %vm404_vm12, %v5186_v38, %v403_v7 }
 0x171   :  { %1246 = vperm.xlu2 %4498, %v5180_v8   ;;  %v408_v17 = vsel %vm406_vm13, %v407_v10, %v405_v11 }
 0x172   :  { %v4571_v12 = vpop.eup %4570  ;;  %v438_v18 = vadd.f32 1e-08, %v408_v17 }
 0x173   :  { %v502_v34 = vmul.f32 %v4571_v12, %v437_v59  ;;  %vm507_vm15 = vweird.f32 %v4571_v12 }
 0x174   :  { %4494 = vset.pattern.permute.xlu1 %v10076_v2  ;;  %4572 = vrcp.f32 %v438_v18  ;;  %vm508_vm2 = vmor %vm506_vm1, %vm507_vm15  ;;  %v527_v52 = vand.u32 2147483648, %v438_v18  ;;  %vm521_vm9 = vweird.f32 %v438_v18  ;;  %v525_v53 = vand.u32 2147483647, %v438_v18 }
 0x175   :  { %v503_v20 = vsub.f32 1.0, %v502_v34  ;;  %862 = vperm.xlu1 %4494, %v5180_v8  }
 0x176   :  { %v528_v56 = vor.u32 1.1754944e-38, %v527_v52  ;;  %vm526_vm11 = vcmp.eq.f32.partialorder %v525_v53, 8.507059e+37 }
 0x177   :  { %v504_v26 = vmul.f32 %v4571_v12, %v503_v20 }
 0x179   :  { %v505_v30 = vadd.f32 %v4571_v12, %v504_v26  ;;  %4499 = vset.pattern.permute.xlu2 %v10074_v44 }
 0x17a   :  { %1342 = vperm.xlu2 %4499, %v5180_v8   ;;  %v4573_v36 = vpop.eup %4572 }
 0x17b   :  { %v509_v42 = vsel %vm508_vm2, %v4571_v12, %v505_v30  ;;  %v517_v29 = vmul.f32 %v4573_v36, %v438_v18  ;;  %vm522_vm8 = vweird.f32 %v4573_v36 }
 0x17c   :  { %v514_v39 = vsel %vm511_vm3, %v513_v32, %v509_v42  ;;  %vm523_vm10 = vmor %vm521_vm9, %vm522_vm8 }
 0x17d   :  { %v515_v40 = vmul.f32 %v514_v39, %v333_v37  ;;  %4495 = vset.pattern.permute.xlu1 %v10070_v22  ;;  %v518_v43 = vsub.f32 1.0, %v517_v29 }
 0x17e   :  { %958 = vperm.xlu1 %4495, %v5180_v8   ;;  %v297_v8 = vsel %vm294_vm7, %v296_v48, %v292_v47 }
 0x17f   :  { %1066 = vperm.xlu0 %4504, %v515_v40   ;;  %v519_v46 = vmul.f32 %v4573_v36, %v518_v43  ;;  %v298_v49 = vmul.f32 %v297_v8, %v5186_v38 }
 0x181   :  { %v520_v51 = vadd.f32 %v4573_v36, %v519_v46  ;;  %v334_v58 = vmul.f32 %v298_v49, %v5100_v55 }
 0x182   :  { %4501 = vset.pattern.permute.xlu2 %v10082_v31 }
 0x183   :  { %778 = vperm.xlu2 %4501, %v515_v40   ;;  %v524_v54 = vsel %vm523_vm10, %v4573_v36, %v520_v51 }
 0x184   :  { %v529_v57 = vsel %vm526_vm11, %v528_v56, %v524_v54 }
 0x185   :  { %v5249_v59 = vmul.f32 %v529_v57, %v334_v58 }
 0x186   :  { %4500 = vset.pattern.permute.xlu1 %v10072_v15 }
 0x187   :  { %4505 = vset.pattern.permute.xlu0 %v10084_v24  ;;  %711 = vperm.xlu1 %4500, %v515_v40  }
 0x188   :  { %1162 = vperm.xlu0 %4505, %v515_v40  }
 0x18b   :  { %4502 = vset.pattern.permute.xlu2 %v10076_v2 }
 0x18c   :  { %874 = vperm.xlu2 %4502, %v515_v40  }
 0x18f   :  { %4509 = vset.pattern.permute.xlu1 %v10082_v31 }
 0x190   :  { %v5252_v61 = vpop.xlane.xlu2 %184  ;;  %4506 = vset.pattern.permute.xlu0 %v10078_v35  ;;  %782 = vperm.xlu1 %4509, %v5249_v59  }
 0x191   :  { %v5257_v38 = vadd.f32 1.0, %v5252_v61  ;;  %4574 = vrsqrt.f32 %v5252_v61  ;;  %1258 = vperm.xlu0 %4506, %v515_v40   ;;  %vm368_vm12 = vcmp.eq.f32.partialorder %v5252_v61, inf  ;;  %v371_v18 = vand.u32 2147483648, %v5252_v61 }
 0x192   :  { %vm370_vm13 = vcmp.eq.f32.partialorder %v5252_v61, 0.0 }
 0x193   :  { %4576 = vrcp.f32 %v5257_v38  ;;  %v250_v26 = vand.u32 2147483648, %v5257_v38  ;;  %vm244_vm15 = vweird.f32 %v5257_v38  ;;  %v248_v32 = vand.u32 2147483647, %v5257_v38 }
 0x194   :  { %4503 = vset.pattern.permute.xlu2 %v10070_v22 }
 0x195   :  { %970 = vperm.xlu2 %4503, %v515_v40   ;;  %v251_v43 = vor.u32 1.1754944e-38, %v250_v26  ;;  %vm249_vm3 = vcmp.eq.f32.partialorder %v248_v32, 8.507059e+37 }
 0x197   :  { %v4575_v55 = vpop.eup %4574 }
 0x198   :  { %v362_v62 = vmul.f32 %v4575_v55, %v5252_v61  ;;  %v5263_v0 = vpop.xlane.xlu2 %187  ;;  %4510 = vset.pattern.permute.xlu1 %v10076_v2 }
 0x199   :  { %v4577_v4 = vpop.eup %4576  ;;  %4578 = vrsqrt.f32 %v5263_v0  ;;  %4507 = vset.pattern.permute.xlu0 %v10074_v44  ;;  %878 = vperm.xlu1 %4510, %v5249_v59   ;;  %v5294_v33 = vadd.f32 1.0, %v5263_v0  ;;  %vm380_vm2 = vcmp.eq.f32.partialorder %v5263_v0, inf  ;;  %v383_v47 = vand.u32 2147483648, %v5263_v0 }
 0x19a   :  { %v240_v5 = vmul.f32 %v4577_v4, %v5257_v38  ;;  %v363_v6 = vmul.f32 %v4575_v55, %v362_v62  ;;  %1354 = vperm.xlu0 %4507, %v515_v40   ;;  %vm245_vm14 = vweird.f32 %v4577_v4  ;;  %vm382_vm4 = vcmp.eq.f32.partialorder %v5263_v0, 0.0 }
 0x19b   :  { %vm5296_vm1 = vmor %vm244_vm15, %vm245_vm14 }
 0x19c   :  { %v364_v7 = vmul.f32 0.5, %v363_v6  ;;  %v241_v9 = vsub.f32 1.0, %v240_v5 }
 0x19d   :  { %4508 = vset.pattern.permute.xlu2 %v10072_v15 }
 0x19e   :  { %v365_v10 = vsub.f32 1.5, %v364_v7  ;;  %716 = vperm.xlu2 %4508, %v5249_v59   ;;  %v242_v16 = vmul.f32 %v4577_v4, %v241_v9 }
 0x19f   :  { %v4579_v63 = vpop.eup %4578 }
 0x1a0   :  { %v366_v11 = vmul.f32 %v4575_v55, %v365_v10  ;;  %v374_v12 = vmul.f32 %v4579_v63, %v5263_v0  ;;  %v5273_v14 = vpop.xlane.xlu2 %196  ;;  %v243_v21 = vadd.f32 %v4577_v4, %v242_v16 }
 0x1a1   :  { %v5276_v17 = vadd.f32 1.0, %v5273_v14  ;;  %4580 = vrsqrt.f32 %v5273_v14  ;;  %4511 = vset.pattern.permute.xlu1 %v10070_v22  ;;  %vm416_vm5 = vcmp.eq.f32.partialorder %v5273_v14, inf  ;;  %vm418_vm8 = vcmp.eq.f32.partialorder %v5273_v14, 0.0 }
 0x1a2   :  { %v367_v34 = vmul.f32 %v366_v11, %v5252_v61  ;;  %974 = vperm.xlu1 %4511, %v5249_v59   ;;  %4529 = vset.pattern.permute.xlu0 %v10072_v15  ;;  %v375_v19 = vmul.f32 %v4579_v63, %v374_v12  ;;  %v247_v40 = vsel %vm5296_vm1, %v4577_v4, %v243_v21 }
 0x1a3   :  { %4582 = vrcp.f32 %v5276_v17  ;;  %v252_v48 = vsel %vm249_vm3, %v251_v43, %v247_v40  ;;  %vm304_vm6 = vweird.f32 %v5276_v17  ;;  %v310_v55 = vand.u32 2147483648, %v5276_v17 }
 0x1a4   :  { %v369_v20 = vsel %vm368_vm12, %v5252_v61, %v367_v34  ;;  %v376_v25 = vmul.f32 0.5, %v375_v19  ;;  %v253_v57 = vmul.f32 %v252_v48, %v5252_v61  ;;  %v308_v7 = vand.u32 2147483647, %v5276_v17 }
 0x1a5   :  { %v372_v23 = vsel %vm370_vm13, %v371_v18, %v369_v20  ;;  %v419_v61 = vand.u32 2147483648, %v5273_v14 }
 0x1a6   :  { %v5289_v27 = vadd.f32 1e-08, %v372_v23  ;;  %v377_v36 = vsub.f32 1.5, %v376_v25  ;;  %v331_v20 = vmul.f32 %v253_v57, %v5109_v60  ;;  %v311_v23 = vor.u32 1.1754944e-38, %v310_v55 }
 0x1a7   :  { %v4581_v30 = vpop.eup %4580  ;;  %vm309_vm12 = vcmp.eq.f32.partialorder %v308_v7, 8.507059e+37 }
 0x1a8   :  { %4584 = vrcp.f32 %v5289_v27  ;;  %v410_v42 = vmul.f32 %v4581_v30, %v5273_v14  ;;  %v5302_v39 = vpop.xlane.xlu2 %199  ;;  %v378_v41 = vmul.f32 %v4579_v63, %v377_v36  ;;  %v482_v12 = vand.u32 2147483648, %v5289_v27 }
 0x1a9   :  { %v5304_v29 = vpop.eup %4582  ;;  %4586 = vrsqrt.f32 %v5302_v39  ;;  %v480_v19 = vand.u32 2147483647, %v5289_v27  ;;  %vm476_vm11 = vweird.f32 %v5289_v27  ;;  %vm428_vm15 = vcmp.eq.f32.partialorder %v5302_v39, inf }
 0x1aa   :  { %v300_v45 = vmul.f32 %v5304_v29, %v5276_v17  ;;  %v411_v50 = vmul.f32 %v4581_v30, %v410_v42  ;;  %4512 = vset.pattern.permute.xlu1 %v10080_v1  ;;  %4588 = vrcp.f32 %v5294_v33  ;;  %v379_v46 = vmul.f32 %v378_v41, %v5263_v0 }
 0x1ab   :  { %1070 = vperm.xlu1 %4512, %v5249_v59   ;;  %vm305_vm7 = vweird.f32 %v5304_v29  ;;  %v483_v36 = vor.u32 1.1754944e-38, %v482_v12  ;;  %vm481_vm14 = vcmp.eq.f32.partialorder %v480_v19, 8.507059e+37  ;;  %vm430_vm1 = vcmp.eq.f32.partialorder %v5302_v39, 0.0 }
 0x1ac   :  { %v301_v51 = vsub.f32 1.0, %v300_v45  ;;  %v412_v8 = vmul.f32 0.5, %v411_v50  ;;  %v381_v52 = vsel %vm380_vm2, %v5263_v0, %v379_v46  ;;  %vm5341_vm9 = vmor %vm304_vm6, %vm305_vm7  ;;  %vm259_vm6 = vweird.f32 %v5294_v33 }
 0x1ad   :  { %v384_v58 = vsel %vm382_vm4, %v383_v47, %v381_v52  ;;  %v5369_v47 = vadd.f32 1.0, %v5302_v39 }
 0x1ae   :  { %v4585_v53 = vpop.eup %4584  ;;  %v302_v49 = vmul.f32 %v5304_v29, %v301_v51  ;;  %v413_v54 = vsub.f32 1.5, %v412_v8  ;;  %v5334_v10 = vadd.f32 1e-08, %v384_v58  ;;  %v5380_v8 = vld [vmem:[%s10063_s4] sm:$0xff] }
 0x1af   :  { %v4587_v56 = vpop.eup %4586  ;;  %v472_v38 = vmul.f32 %v4585_v53, %v5289_v27  ;;  %vm477_vm10 = vweird.f32 %v4585_v53  ;;  %v5407_v58 = vld [vmem:[%s10063_s4 + $0x80] sm:$0xff] }
 0x1b0   :  { %v414_v62 = vmul.f32 %v4581_v30, %v413_v54  ;;  %v422_v4 = vmul.f32 %v4587_v56, %v5302_v39  ;;  %v5327_v5 = vpop.permute.xlu2 %691  ;;  %v5329_v6 = vpop.eup %4588  ;;  %v303_v63 = vadd.f32 %v5304_v29, %v302_v49  ;;  %vm478_vm13 = vmor %vm476_vm11, %vm477_vm10  ;;  %4590 = vrcp.f32 %v5334_v10 }
 0x1b1   :  { %v473_v9 = vsub.f32 1.0, %v472_v38  ;;  %v255_v21 = vmul.f32 %v5329_v6, %v5294_v33  ;;  %v431_v54 = vand.u32 2147483648, %v5302_v39  ;;  %v5412_v38 = vld [vmem:[%s10063_s4 + $0xa0] sm:$0xff]  ;;  %vm260_vm7 = vweird.f32 %v5329_v6 }
 0x1b2   :  { %v415_v11 = vmul.f32 %v414_v62, %v5273_v14  ;;  %v423_v34 = vmul.f32 %v4587_v56, %v422_v4  ;;  %v307_v60 = vsel %vm5341_vm9, %v5304_v29, %v303_v63  ;;  %v5418_v62 = vld [vmem:[%s10063_s4 + $0x140] sm:$0xff]  ;;  %vm491_vm11 = vweird.f32 %v5334_v10 }
 0x1b3   :  { %4513 = vset.pattern.permute.xlu1 %v10084_v24  ;;  %v474_v18 = vmul.f32 %v4585_v53, %v473_v9  ;;  %v312_v43 = vsel %vm309_vm12, %v311_v23, %v307_v60  ;;  %v256_v45 = vsub.f32 1.0, %v255_v21  ;;  %v729_v9 = vmul.f32 %v5327_v5, %v5380_v8 }
 0x1b4   :  { %v417_v17 = vsel %vm416_vm5, %v5273_v14, %v415_v11  ;;  %1166 = vperm.xlu1 %4513, %v5249_v59   ;;  %v424_v26 = vmul.f32 0.5, %v423_v34  ;;  %v313_v48 = vmul.f32 %v312_v43, %v5273_v14  ;;  %v5392_v14 = vld [vmem:[%s10063_s4 + $0x100] sm:$0xff] }
 0x1b5   :  { %v420_v25 = vsel %vm418_vm8, %v419_v61, %v417_v17  ;;  %v475_v30 = vadd.f32 %v4585_v53, %v474_v18  ;;  %v5427_v61 = vld [vmem:[%s10063_s4 + $0xc0] sm:$0xff]  ;;  %vm261_vm8 = vmor %vm259_vm6, %vm260_vm7 }
 0x1b6   :  { %v5360_v32 = vadd.f32 1e-08, %v420_v25  ;;  %v425_v37 = vsub.f32 1.5, %v424_v26  ;;  %v5374_v51 = vpop.eup %4590  ;;  %v335_v55 = vmul.f32 %v313_v48, %v5133_v13  ;;  %v5434_v13 = vld [vmem:[%s10063_s4 + $0x160] sm:$0xff] }
 0x1b7   :  { %v479_v42 = vsel %vm478_vm13, %v4585_v53, %v475_v30  ;;  %v5385_v53 = vmul.f32 %v5329_v6, %v256_v45  ;;  %v5440_v16 = vmul.f32 %v5374_v51, %v5334_v10  ;;  %v5445_v34 = vld [vmem:[%s10063_s4 + $0xe0] sm:$0xff]  ;;  %vm492_vm10 = vweird.f32 %v5374_v51 }
 0x1b8   :  { %4592 = vrcp.f32 %v5360_v32  ;;  %v763_v40 = vpop.permute.xlu2 %762  ;;  %v484_v41 = vsel %vm481_vm14, %v483_v36, %v479_v42  ;;  %v426_v50 = vmul.f32 %v4587_v56, %v425_v37  ;;  %v5400_v56 = vld [vmem:[%s10063_s4 + $0x120] sm:$0xff]  ;;  %vm536_vm2 = vweird.f32 %v5360_v32  ;;  %vm493_vm12 = vmor %vm491_vm11, %vm492_vm10 }
 0x1b9   :  { %v5364_v27 = vmul.f32 %v484_v41, %v331_v20  ;;  %4594 = vrcp.f32 %v5369_v47  ;;  %v540_v7 = vand.u32 2147483647, %v5360_v32  ;;  %v542_v12 = vand.u32 2147483648, %v5360_v32  ;;  %v5450_v18 = vld [vmem:[%s10063_s4 + $0x20] sm:$0xff] }
 0x1ba   :  { %v859_v29 = vpop.permute.xlu0 %858  ;;  %v5366_v46 = vpop.permute.xlu1 %1050  ;;  %v427_v49 = vmul.f32 %v426_v50, %v5302_v39  ;;  %v793_v21 = vmul.f32 %v763_v40, %v5407_v58  ;;  %v797_v23 = vmul.f32 %v763_v40, %v5412_v38  ;;  %v5461_v17 = vld [vmem:[%s10063_s4 + $0x40] sm:$0xff]  ;;  %v801_v37 = vmul.f32 %v763_v40, %v5427_v61 }
 0x1bb   :  { %701 = vperm.xlu2 %4508, %v5364_v27   ;;  %v889_v63 = vmul.f32 %v859_v29, %v5392_v14  ;;  %v893_v20 = vmul.f32 %v859_v29, %v5400_v56  ;;  %v897_v25 = vmul.f32 %v859_v29, %v5418_v62  ;;  %v5467_v26 = vld [vmem:[%s10063_s4 + $0x180] sm:$0xff]  ;;  %v901_v41 = vmul.f32 %v859_v29, %v5434_v13 }
 0x1bc   :  { %4514 = vset.pattern.permute.xlu1 %v10078_v35  ;;  %v429_v19 = vsel %vm428_vm15, %v5302_v39, %v427_v49  ;;  %v5478_v42 = vld [vmem:[%s10063_s4 + $0x60] sm:$0xff]  ;;  %vm5492_vm4 = vcmp.eq.f32.partialorder %v540_v7, 8.507059e+37  ;;  %v805_v48 = vmul.f32 %v763_v40, %v5445_v34  ;;  %v733_v29 = vmul.f32 %v5327_v5, %v5450_v18 }
 0x1bd   :  { %1262 = vperm.xlu1 %4514, %v5249_v59   ;;  %v5484_v43 = vld [vmem:[%s10063_s4 + $0x1a0] sm:$0xff]  ;;  %v543_v22 = vor.u32 1.1754944e-38, %v542_v12  ;;  %v737_v40 = vmul.f32 %v5327_v5, %v5461_v17  ;;  %vm319_vm14 = vweird.f32 %v5369_v47 }
 0x1be   :  { %v5382_v52 = vpop.eup %4592  ;;  %v5489_v45 = vld [vmem:[%s10063_s4 + $0x1c0] sm:$0xff] }
 0x1bf   :  { %v532_v57 = vmul.f32 %v5382_v52, %v5360_v32  ;;  %vm537_vm3 = vweird.f32 %v5382_v52  ;;  %v5499_v49 = vpop.eup %4594  ;;  %v833_v35 = vadd.f32 %v801_v37, %v737_v40  ;;  %v497_v40 = vand.u32 2147483648, %v5334_v10 }
 0x1c0   :  { %v5420_v4 = vpop.permute.xlu2 %1054  ;;  %vm538_vm5 = vmor %vm536_vm2, %vm537_vm3  ;;  %vm320_vm15 = vweird.f32 %v5499_v49 }
 0x1c1   :  { %10234 = vst [vmem:[#allocation5_spill] sm:$0xff] %v5420_v4  ;;  %v533_v11 = vsub.f32 1.0, %v532_v57  ;;  %v432_v57 = vsel %vm430_vm1, %v431_v54, %v429_v19  ;;  %v741_v54 = vmul.f32 %v5327_v5, %v5478_v42  ;;  %v825_v19 = vadd.f32 %v793_v21, %v729_v9  ;;  %vm5638_vm1 = vmor %vm319_vm14, %vm320_vm15 }
 0x1c3   :  { %v955_v30 = vpop.permute.xlu0 %954  ;;  %4519 = vset.pattern.permute.xlu2 %v10080_v1  ;;  %v5470_v60 = vpop.permute.xlu1 %1146  ;;  %v534_v36 = vmul.f32 %v5382_v52, %v533_v11  ;;  %v5506_v11 = vld [vmem:[%s10063_s4 + $0x1e0] sm:$0xff]  ;;  %v5523_v1 = vadd.f32 1e-08, %v432_v57  ;;  %v837_v24 = vadd.f32 %v805_v48, %v741_v54  ;;  %v921_v9 = vadd.f32 %v889_v63, %v825_v19 }
 0x1c4   :  { %1058 = vperm.xlu2 %4519, %v5364_v27   ;;  %v985_v15 = vmul.f32 %v955_v30, %v5467_v26  ;;  %v993_v12 = vmul.f32 %v955_v30, %v5489_v45  ;;  %v10243_v63 = vmov 1   ;;  %v10245_v48 = vmov 4  }
 0x1c5   :  { %4515 = vset.pattern.permute.xlu1 %v10074_v44  ;;  %v535_v7 = vadd.f32 %v5382_v52, %v534_v36  ;;  %v829_v44 = vadd.f32 %v797_v23, %v733_v29  ;;  %v989_v36 = vmul.f32 %v955_v30, %v5484_v43  ;;  %v929_v23 = vadd.f32 %v897_v25, %v833_v35 }
 0x1c6   :  { %1358 = vperm.xlu1 %4515, %v5249_v59   ;;  %v997_v59 = vmul.f32 %v955_v30, %v5506_v11  ;;  %v488_v30 = vsub.f32 1.0, %v5440_v16  ;;  %v5536_v37 = vadd.f32 %v985_v15, %v921_v9  ;;  %4596 = vrcp.f32 %v5523_v1 }
 0x1c7   :  { %v539_v2 = vsel %vm538_vm5, %v5382_v52, %v535_v7  ;;  %v925_v21 = vadd.f32 %v893_v20, %v829_v44  ;;  %v933_v52 = vadd.f32 %v901_v41, %v837_v24  ;;  %v10240_v35 = vmov 5  }
 0x1c8   :  { %v5526_v31 = vpop.permute.xlu2 %1150  ;;  %v544_v32 = vsel %vm5492_vm4, %v543_v22, %v539_v2  ;;  %v5540_v2 = vadd.f32 %v993_v12, %v929_v23  ;;  %v265_v22 = vand.u32 2147483648, %v5294_v33  ;;  %v258_v24 = vadd.f32 %v5329_v6, %v5385_v53 }
 0x1c9   :  { %10237 = vst [vmem:[#allocation6_spill] sm:$0xff] %v5526_v31  ;;  %v5530_v5 = vmul.f32 %v544_v32, %v335_v55  ;;  %v5538_v29 = vadd.f32 %v989_v36, %v925_v21  ;;  %v5547_v55 = vadd.f32 %v997_v59, %v933_v52  ;;  %v263_v15 = vand.u32 2147483647, %v5294_v33 }
 0x1ca   :  { %10239 = vst [vmem:[#allocation8_spill] sm:$0xff] %v5540_v2  ;;  %v489_v16 = vmul.f32 %v5374_v51, %v488_v30  ;;  %v266_v20 = vor.u32 1.1754944e-38, %v265_v22  ;;  %v315_v25 = vmul.f32 %v5499_v49, %v5369_v47  ;;  %v262_v41 = vsel %vm261_vm8, %v5329_v6, %v258_v24  ;;  %v5603_v22 = vld [vmem:[%s10063_s4 + $0x48] sm:$0xff] }
 0x1cb   :  { %721 = vperm.xlu0 %4529, %v5530_v5   ;;  %10238 = vst [vmem:[#allocation7_spill] sm:$0xff] %v5538_v29  ;;  %vm264_vm9 = vcmp.eq.f32.partialorder %v263_v15, 8.507059e+37  ;;  %v10246_v54 = vmov 6   ;;  %v495_v6 = vand.u32 2147483647, %v5334_v10  ;;  %v10248_v59 = vmov 2  }
 0x1cc   :  { %4520 = vset.pattern.permute.xlu2 %v10240_v35  ;;  %v5545_v44 = vpop.permute.xlu1 %1242  ;;  %10242 = vst [vmem:[#allocation10_spill] sm:$0xff] %v5547_v55  ;;  %v5565_v50 = vpop.eup %4596  ;;  %v490_v33 = vadd.f32 %v5374_v51, %v489_v16  ;;  %v267_v57 = vsel %vm264_vm9, %v266_v20, %v262_v41  ;;  %v316_v7 = vsub.f32 1.0, %v315_v25  ;;  %v498_v23 = vor.u32 1.1754944e-38, %v497_v40  ;;  %v5608_v24 = vld [vmem:[%s10063_s4 + $0x68] sm:$0xff] }
 0x1cd   :  { %10241 = vst [vmem:[#allocation9_spill] sm:$0xff] %v5545_v44  ;;  %1154 = vperm.xlu2 %4520, %v5364_v27   ;;  %v547_v36 = vmul.f32 %v5565_v50, %v5523_v1  ;;  %v268_v12 = vmul.f32 %v267_v57, %v5263_v0  ;;  %vm496_vm13 = vcmp.eq.f32.partialorder %v495_v6, 8.507059e+37  ;;  %v5592_v0 = vld [vmem:[%s10063_s4 + $0x8] sm:$0xff]  ;;  %v697_v15 = vpop.permute.xlu0 %696  ;;  %v325_v25 = vand.u32 2147483648, %v5369_v47 }
 0x1ce   :  { %4516 = vset.pattern.permute.xlu1 %v10243_v63  ;;  %v494_v32 = vsel %vm493_vm12, %v5374_v51, %v490_v33  ;;  %v317_v9 = vmul.f32 %v5499_v49, %v316_v7  ;;  %v5597_v51 = vld [vmem:[%s10063_s4 + $0x28] sm:$0xff]  ;;  %v10253_v31 = vmov 3   ;;  %vm552_vm3 = vweird.f32 %v5565_v50 }
 0x1cf   :  { %770 = vperm.xlu1 %4516, %v5364_v27   ;;  %v548_v10 = vsub.f32 1.0, %v547_v36  ;;  %v499_v52 = vsel %vm496_vm13, %v498_v23, %v494_v32  ;;  %v332_v30 = vmul.f32 %v268_v12, %v5123_v3  ;;  %v5613_v16 = vld [vmem:[%s10063_s4 + $0x88] sm:$0xff]  ;;  %v323_v3 = vand.u32 2147483647, %v5369_v47 }
 0x1d0   :  { %v5562_v53 = vpop.permute.xlu2 %1246  ;;  %v318_v20 = vadd.f32 %v5499_v49, %v317_v9  ;;  %v5622_v41 = vld [vmem:[%s10063_s4 + $0xa8] sm:$0xff]  ;;  %v730_v36 = vmul.f32 %v697_v15, %v5592_v0  ;;  %v734_v12 = vmul.f32 %v697_v15, %v5597_v51  ;;  %v738_v32 = vmul.f32 %v697_v15, %v5603_v22 }
 0x1d1   :  { %10244 = vst [vmem:[#allocation11_spill] sm:$0xff] %v5562_v53  ;;  %v5627_v33 = vld [vmem:[%s10063_s4 + $0xc8] sm:$0xff]  ;;  %v5643_v40 = vmul.f32 %v499_v52, %v332_v30  ;;  %v549_v6 = vmul.f32 %v5565_v50, %v548_v10  ;;  %v742_v9 = vmul.f32 %v697_v15, %v5608_v24  ;;  %v10252_v23 = vmov 0  }
 0x1d2   :  { %v5632_v57 = vld [vmem:[%s10063_s4 + $0xe8] sm:$0xff]  ;;  %v322_v10 = vsel %vm5638_vm1, %v5499_v49, %v318_v20  ;;  %vm324_vm2 = vcmp.eq.f32.partialorder %v323_v3, 8.507059e+37  ;;  %v326_v53 = vor.u32 1.1754944e-38, %v325_v25  ;;  %v555_v4 = vand.u32 2147483647, %v5523_v1 }
 0x1d3   :  { %4533 = vset.pattern.permute.xlu0 %v10245_v48  ;;  %v557_v49 = vand.u32 2147483648, %v5523_v1  ;;  %v5670_v3 = vld [vmem:[%s10063_s4 + $0x108] sm:$0xff]  ;;  %vm551_vm4 = vweird.f32 %v5523_v1 }
 0x1d4   :  { %1074 = vperm.xlu0 %4533, %v5530_v5   ;;  %v327_v20 = vsel %vm324_vm2, %v326_v53, %v322_v10  ;;  %v5687_v53 = vld [vmem:[%s10063_s4 + $0x168] sm:$0xff]  ;;  %vm5689_vm5 = vmor %vm551_vm4, %vm552_vm3  ;;  %vm556_vm6 = vcmp.eq.f32.partialorder %v555_v4, 8.507059e+37 }
 0x1d5   :  { %4521 = vset.pattern.permute.xlu2 %v10246_v54  ;;  %v5573_v19 = vpop.permute.xlu1 %1338  ;;  %v328_v7 = vmul.f32 %v327_v20, %v5302_v39  ;;  %v5713_v25 = vld [vmem:[%s10063_s4 + $0x188] sm:$0xff] }
 0x1d6   :  { %10247 = vst [vmem:[#allocation12_spill] sm:$0xff] %v5573_v19  ;;  %1250 = vperm.xlu2 %4521, %v5364_v27  }
 0x1d7   :  { %4517 = vset.pattern.permute.xlu1 %v10248_v59  ;;  %v336_v4 = vmul.f32 %v328_v7, %v5148_v28  ;;  %v5724_v28 = vld [vmem:[%s10063_s4 + $0x1c8] sm:$0xff] }
 0x1d8   :  { %v5584_v21 = vpop.permute.xlu2 %1342  ;;  %866 = vperm.xlu1 %4517, %v5364_v27  }
 0x1d9   :  { %10249 = vst [vmem:[#allocation13_spill] sm:$0xff] %v5584_v21 }
 0x1dc   :  { %4534 = vset.pattern.permute.xlu0 %v10240_v35 }
 0x1dd   :  { %1170 = vperm.xlu0 %4534, %v5530_v5  }
 0x1de   :  { %4522 = vset.pattern.permute.xlu2 %v10252_v23  ;;  %v767_v47 = vpop.permute.xlu1 %766 }
 0x1df   :  { %v794_v21 = vmul.f32 %v767_v47, %v5613_v16  ;;  %v798_v19 = vmul.f32 %v767_v47, %v5622_v41  ;;  %v802_v52 = vmul.f32 %v767_v47, %v5627_v33  ;;  %v806_v30 = vmul.f32 %v767_v47, %v5632_v57  ;;  %706 = vperm.xlu2 %4522, %v5643_v40  }
 0x1e0   :  { %v5659_v15 = vpop.permute.xlu2 %778  ;;  %4518 = vset.pattern.permute.xlu1 %v10253_v31  ;;  %v550_v47 = vadd.f32 %v5565_v50, %v549_v6 }
 0x1e1   :  { %v826_v44 = vadd.f32 %v794_v21, %v730_v36  ;;  %v830_v55 = vadd.f32 %v798_v19, %v734_v12  ;;  %v834_v2 = vadd.f32 %v802_v52, %v738_v32  ;;  %v838_v29 = vadd.f32 %v806_v30, %v742_v9  ;;  %962 = vperm.xlu1 %4518, %v5364_v27   ;;  %v5675_v19 = vld [vmem:[%s10063_s4 + $0x128] sm:$0xff] }
 0x1e2   :  { %v5682_v21 = vld [vmem:[%s10063_s4 + $0x148] sm:$0xff]  ;;  %v554_v1 = vsel %vm5689_vm5, %v5565_v50, %v550_v47  ;;  %v558_v36 = vor.u32 1.1754944e-38, %v557_v49 }
 0x1e4   :  { %v559_v50 = vsel %vm556_vm6, %v558_v36, %v554_v1 }
 0x1e5   :  { %4535 = vset.pattern.permute.xlu0 %v10246_v54  ;;  %v5707_v49 = vmul.f32 %v559_v50, %v336_v4  ;;  %v809_v50 = vmul.f32 %v5659_v15, %v5407_v58  ;;  %v813_v4 = vmul.f32 %v5659_v15, %v5412_v38 }
 0x1e6   :  { %1266 = vperm.xlu0 %4535, %v5530_v5  }
 0x1e7   :  { %4524 = vset.pattern.permute.xlu2 %v10248_v59  ;;  %v863_v6 = vpop.permute.xlu1 %862 }
 0x1e8   :  { %v890_v12 = vmul.f32 %v863_v6, %v5670_v3  ;;  %v894_v32 = vmul.f32 %v863_v6, %v5675_v19  ;;  %v898_v9 = vmul.f32 %v863_v6, %v5682_v21  ;;  %v902_v52 = vmul.f32 %v863_v6, %v5687_v53  ;;  %v875_v30 = vpop.permute.xlu2 %874  ;;  %870 = vperm.xlu2 %4524, %v5643_v40  }
 0x1e9   :  { %4523 = vset.pattern.permute.xlu1 %v10243_v63 }
 0x1ea   :  { %v922_v39 = vadd.f32 %v890_v12, %v826_v44  ;;  %v926_v10 = vadd.f32 %v894_v32, %v830_v55  ;;  %v930_v47 = vadd.f32 %v898_v9, %v834_v2  ;;  %v934_v20 = vadd.f32 %v902_v52, %v838_v29  ;;  %774 = vperm.xlu1 %4523, %v5643_v40   ;;  %v5719_v2 = vld [vmem:[%s10063_s4 + $0x1a8] sm:$0xff] }
 0x1eb   :  { %v5729_v29 = vld [vmem:[%s10063_s4 + $0x1e8] sm:$0xff] }
 0x1ee   :  { %4536 = vset.pattern.permute.xlu0 %v10252_v23 }
 0x1ef   :  { %726 = vperm.xlu0 %4536, %v5707_v49  }
 0x1f0   :  { %4525 = vset.pattern.permute.xlu2 %v10253_v31  ;;  %v959_v44 = vpop.permute.xlu1 %958  ;;  %v971_v23 = vpop.permute.xlu2 %970 }
 0x1f1   :  { %v1067_v55 = vpop.permute.xlu0 %1066  ;;  %966 = vperm.xlu2 %4525, %v5643_v40   ;;  %v986_v1 = vmul.f32 %v959_v44, %v5713_v25  ;;  %v990_v7 = vmul.f32 %v959_v44, %v5719_v2  ;;  %v994_v6 = vmul.f32 %v959_v44, %v5724_v28  ;;  %v998_v36 = vmul.f32 %v959_v44, %v5729_v29 }
 0x1f2   :  { %4541 = vset.pattern.permute.xlu1 %v10253_v31  ;;  %v817_v44 = vmul.f32 %v5659_v15, %v5427_v61 }
 0x1f3   :  { %982 = vperm.xlu1 %4541, %v5707_v49   ;;  %v5739_v12 = vadd.f32 %v986_v1, %v922_v39  ;;  %v5741_v32 = vadd.f32 %v990_v7, %v926_v10  ;;  %v5743_v9 = vadd.f32 %v994_v6, %v930_v47  ;;  %v5745_v52 = vadd.f32 %v998_v36, %v934_v20 }
 0x1f4   :  { %v821_v39 = vmul.f32 %v5659_v15, %v5445_v34  ;;  %v905_v10 = vmul.f32 %v875_v30, %v5392_v14  ;;  %v909_v47 = vmul.f32 %v875_v30, %v5400_v56  ;;  %v913_v20 = vmul.f32 %v875_v30, %v5418_v62 }
 0x1f5   :  { %10256 = vst [vmem:[#allocation14_spill] sm:$0xff] %v5739_v12  ;;  %v917_v1 = vmul.f32 %v875_v30, %v5434_v13  ;;  %v1001_v14 = vmul.f32 %v971_v23, %v5467_v26  ;;  %v1005_v56 = vmul.f32 %v971_v23, %v5484_v43  ;;  %v1009_v62 = vmul.f32 %v971_v23, %v5489_v45  ;;  %v5790_v26 = vld [vmem:[%s10063_s4 + $0x260] sm:$0xff] }
 0x1f6   :  { %10257 = vst [vmem:[#allocation15_spill] sm:$0xff] %v5741_v32  ;;  %v1013_v13 = vmul.f32 %v971_v23, %v5506_v11  ;;  %v1109_v36 = vmul.f32 %v1067_v55, %v5790_v26 }
 0x1f7   :  { %10258 = vst [vmem:[#allocation16_spill] sm:$0xff] %v5743_v9  ;;  %4539 = vset.pattern.permute.xlu0 %v10248_v59 }
 0x1f8   :  { %10259 = vst [vmem:[#allocation17_spill] sm:$0xff] %v5745_v52  ;;  %886 = vperm.xlu0 %4539, %v5707_v49  }
 0x1f9   :  { %4526 = vset.pattern.permute.xlu2 %v10245_v48  ;;  %v712_v58 = vpop.permute.xlu1 %711 }
 0x1fa   :  { %v745_v38 = vmul.f32 %v712_v58, %v5380_v8  ;;  %v749_v61 = vmul.f32 %v712_v58, %v5450_v18  ;;  %v753_v7 = vmul.f32 %v712_v58, %v5461_v17  ;;  %v757_v34 = vmul.f32 %v712_v58, %v5478_v42  ;;  %v1163_v15 = vpop.permute.xlu0 %1162  ;;  %1062 = vperm.xlu2 %4526, %v5643_v40   ;;  %v5774_v8 = vld [vmem:[%s10063_s4 + $0x200] sm:$0xff]  ;;  %v717_v42 = vpop.permute.xlu2 %716 }
 0x1fb   :  { %4542 = vset.pattern.permute.xlu1 %v10245_v48  ;;  %v5780_v18 = vld [vmem:[%s10063_s4 + $0x220] sm:$0xff]  ;;  %v1097_v30 = vmul.f32 %v1067_v55, %v5774_v8  ;;  %v746_v12 = vmul.f32 %v717_v42, %v5592_v0 }
 0x1fc   :  { %v5785_v17 = vld [vmem:[%s10063_s4 + $0x240] sm:$0xff]  ;;  %v841_v43 = vadd.f32 %v809_v50, %v745_v38  ;;  %v845_v45 = vadd.f32 %v813_v4, %v749_v61  ;;  %v849_v11 = vadd.f32 %v817_v44, %v753_v7  ;;  %v853_v48 = vadd.f32 %v821_v39, %v757_v34  ;;  %1078 = vperm.xlu1 %4542, %v5707_v49  }
 0x1fd   :  { %v1101_v23 = vmul.f32 %v1067_v55, %v5780_v18  ;;  %v1105_v6 = vmul.f32 %v1067_v55, %v5785_v17  ;;  %v750_v50 = vmul.f32 %v717_v42, %v5597_v51  ;;  %v754_v4 = vmul.f32 %v717_v42, %v5603_v22  ;;  %v5804_v39 = vld [vmem:[%s10063_s4 + $0x280] sm:$0xff] }
 0x1fe   :  { %v937_v58 = vadd.f32 %v905_v10, %v841_v43  ;;  %v941_v52 = vadd.f32 %v909_v47, %v845_v45  ;;  %v945_v9 = vadd.f32 %v913_v20, %v849_v11  ;;  %v949_v32 = vadd.f32 %v917_v1, %v853_v48  ;;  %v5809_v55 = vld [vmem:[%s10063_s4 + $0x2a0] sm:$0xff] }
 0x1ff   :  { %v758_v44 = vmul.f32 %v717_v42, %v5608_v24  ;;  %v5814_v0 = vld [vmem:[%s10063_s4 + $0x2c0] sm:$0xff]  ;;  %v10260_v20 = vmov 7   ;;  %v1193_v1 = vmul.f32 %v1163_v15, %v5804_v39  ;;  %v1197_v38 = vmul.f32 %v1163_v15, %v5809_v55 }
 0x200   :  { %v5819_v51 = vld [vmem:[%s10063_s4 + $0x2e0] sm:$0xff]  ;;  %v1033_v22 = vadd.f32 %v1001_v14, %v937_v58  ;;  %v1037_v24 = vadd.f32 %v1005_v56, %v941_v52  ;;  %v1041_v10 = vadd.f32 %v1009_v62, %v945_v9  ;;  %v1045_v47 = vadd.f32 %v1013_v13, %v949_v32  ;;  %4540 = vset.pattern.permute.xlu0 %v10260_v20 }
 0x201   :  { %v1201_v61 = vmul.f32 %v1163_v15, %v5814_v0  ;;  %v1205_v7 = vmul.f32 %v1163_v15, %v5819_v51  ;;  %1362 = vperm.xlu0 %4540, %v5530_v5  }
 0x202   :  { %v1129_v34 = vadd.f32 %v1097_v30, %v1033_v22  ;;  %v1133_v42 = vadd.f32 %v1101_v23, %v1037_v24  ;;  %v1137_v43 = vadd.f32 %v1105_v6, %v1041_v10  ;;  %v1141_v45 = vadd.f32 %v1109_v36, %v1045_v47  ;;  %4527 = vset.pattern.permute.xlu2 %v10240_v35  ;;  %v783_v9 = vpop.permute.xlu1 %782 }
 0x203   :  { %v810_v32 = vmul.f32 %v783_v9, %v5613_v16  ;;  %v814_v52 = vmul.f32 %v783_v9, %v5622_v41  ;;  %v818_v14 = vmul.f32 %v783_v9, %v5627_v33  ;;  %v822_v56 = vmul.f32 %v783_v9, %v5632_v57  ;;  %v5832_v62 = vpop.permute.xlu0 %1258  ;;  %1158 = vperm.xlu2 %4527, %v5643_v40   ;;  %v5841_v41 = vld [vmem:[%s10063_s4 + $0x320] sm:$0xff] }
 0x204   :  { %v5835_v15 = vadd.f32 %v1193_v1, %v1129_v34  ;;  %v1229_v13 = vadd.f32 %v1197_v38, %v1133_v42  ;;  %v1233_v11 = vadd.f32 %v1201_v61, %v1137_v43  ;;  %v1237_v48 = vadd.f32 %v1205_v7, %v1141_v45  ;;  %4543 = vset.pattern.permute.xlu1 %v10240_v35  ;;  %v5846_v33 = vld [vmem:[%s10063_s4 + $0x340] sm:$0xff] }
 0x205   :  { %v842_v30 = vadd.f32 %v810_v32, %v746_v12  ;;  %v846_v23 = vadd.f32 %v814_v52, %v750_v50  ;;  %v850_v16 = vadd.f32 %v818_v14, %v754_v4  ;;  %v854_v6 = vadd.f32 %v822_v56, %v758_v44  ;;  %v5851_v57 = vld [vmem:[%s10063_s4 + $0x360] sm:$0xff]  ;;  %1174 = vperm.xlu1 %4543, %v5707_v49  }
 0x206   :  { %v1293_v35 = vmul.f32 %v5832_v62, %v5841_v41  ;;  %v1297_v12 = vmul.f32 %v5832_v62, %v5846_v33  ;;  %v1301_v36 = vmul.f32 %v5832_v62, %v5851_v57  ;;  %v5872_v1 = vld [vmem:[%s10063_s4 + $0x3e0] sm:$0xff] }
 0x208   :  { %v5860_v58 = vadd.f32 %v1293_v35, %v1229_v13  ;;  %v5862_v50 = vadd.f32 %v1297_v12, %v1233_v11  ;;  %v1333_v4 = vadd.f32 %v1301_v36, %v1237_v48  ;;  %v5924_v12 = vld [vmem:[%s10063_s4 + $0x288] sm:$0xff] }
 0x209   :  { %v5930_v36 = vld [vmem:[%s10063_s4 + $0x2a8] sm:$0xff] }
 0x20b   :  { %4528 = vset.pattern.permute.xlu2 %v10246_v54  ;;  %v879_v44 = vpop.permute.xlu1 %878 }
 0x20c   :  { %v906_v22 = vmul.f32 %v879_v44, %v5670_v3  ;;  %v910_v24 = vmul.f32 %v879_v44, %v5675_v19  ;;  %v914_v10 = vmul.f32 %v879_v44, %v5682_v21  ;;  %v918_v47 = vmul.f32 %v879_v44, %v5687_v53  ;;  %v5874_v38 = vpop.permute.xlu0 %1354  ;;  %1254 = vperm.xlu2 %4528, %v5643_v40   ;;  %v5940_v44 = vld [vmem:[%s10063_s4 + $0x2e8] sm:$0xff] }
 0x20d   :  { %v1397_v61 = vmul.f32 %v5874_v38, %v5872_v1  ;;  %4544 = vset.pattern.permute.xlu1 %v10246_v54 }
 0x20e   :  { %v938_v3 = vadd.f32 %v906_v22, %v842_v30  ;;  %v942_v19 = vadd.f32 %v910_v24, %v846_v23  ;;  %v946_v7 = vadd.f32 %v914_v10, %v850_v16  ;;  %v950_v21 = vadd.f32 %v918_v47, %v854_v6  ;;  %1270 = vperm.xlu1 %4544, %v5707_v49  }
 0x20f   :  { %v5881_v53 = vadd.f32 %v1397_v61, %v1333_v4  ;;  %v5935_v4 = vld [vmem:[%s10063_s4 + $0x2c8] sm:$0xff] }
 0x211   :  { %10261 = vst [vmem:[#allocation18_spill] sm:$0xff] %v5881_v53 }
 0x214   :  { %4530 = vset.pattern.permute.xlu2 %v10243_v63  ;;  %v975_v34 = vpop.permute.xlu1 %974 }
 0x215   :  { %v1002_v42 = vmul.f32 %v975_v34, %v5713_v25  ;;  %v1006_v43 = vmul.f32 %v975_v34, %v5719_v2  ;;  %v1010_v45 = vmul.f32 %v975_v34, %v5724_v28  ;;  %v1014_v9 = vmul.f32 %v975_v34, %v5729_v29  ;;  %786 = vperm.xlu2 %4530, %v5530_v5   ;;  %v5889_v54 = vpop.permute.xlu2 %701  ;;  %v5896_v25 = vld [vmem:[%s10063_s4 + $0x208] sm:$0xff] }
 0x216   :  { %4545 = vset.pattern.permute.xlu1 %v10260_v20  ;;  %v5902_v2 = vld [vmem:[%s10063_s4 + $0x228] sm:$0xff] }
 0x217   :  { %v1034_v32 = vadd.f32 %v1002_v42, %v938_v3  ;;  %v1038_v52 = vadd.f32 %v1006_v43, %v942_v19  ;;  %v1042_v14 = vadd.f32 %v1010_v45, %v946_v7  ;;  %v1046_v56 = vadd.f32 %v1014_v9, %v950_v21  ;;  %1350 = vperm.xlu1 %4545, %v5643_v40   ;;  %v5907_v28 = vld [vmem:[%s10063_s4 + $0x248] sm:$0xff] }
 0x218   :  { %v5912_v40 = vld [vmem:[%s10063_s4 + $0x268] sm:$0xff] }
 0x219   :  { %v5952_v34 = vld [vmem:[%s10063_s4 + $0x308] sm:$0xff] }
 0x21a   :  { %v5958_v42 = vld [vmem:[%s10063_s4 + $0x328] sm:$0xff] }
 0x21b   :  { %v5968_v43 = vld [vmem:[%s10063_s4 + $0x368] sm:$0xff] }
 0x21d   :  { %4531 = vset.pattern.permute.xlu2 %v10248_v59  ;;  %v1071_v29 = vpop.permute.xlu1 %1070 }
 0x21e   :  { %v1098_v13 = vmul.f32 %v1071_v29, %v5896_v25  ;;  %v1102_v59 = vmul.f32 %v1071_v29, %v5902_v2  ;;  %v1106_v11 = vmul.f32 %v1071_v29, %v5907_v28  ;;  %v1110_v48 = vmul.f32 %v1071_v29, %v5912_v40  ;;  %882 = vperm.xlu2 %4531, %v5530_v5   ;;  %v5919_v30 = vpop.permute.xlu2 %1058 }
 0x220   :  { %v1130_v23 = vadd.f32 %v1098_v13, %v1034_v32  ;;  %v1134_v16 = vadd.f32 %v1102_v59, %v1038_v52  ;;  %v1138_v6 = vadd.f32 %v1106_v11, %v1042_v14  ;;  %v1142_v35 = vadd.f32 %v1110_v48, %v1046_v56  ;;  %v5980_v11 = vld [vmem:[%s10063_s4 + $0x388] sm:$0xff] }
 0x221   :  { %v5986_v48 = vld [vmem:[%s10063_s4 + $0x3a8] sm:$0xff] }
 0x226   :  { %4532 = vset.pattern.permute.xlu2 %v10253_v31  ;;  %v1167_v22 = vpop.permute.xlu1 %1166 }
 0x227   :  { %v1194_v24 = vmul.f32 %v1167_v22, %v5924_v12  ;;  %v1198_v31 = vmul.f32 %v1167_v22, %v5930_v36  ;;  %v1202_v10 = vmul.f32 %v1167_v22, %v5935_v4  ;;  %v1206_v47 = vmul.f32 %v1167_v22, %v5940_v44  ;;  %978 = vperm.xlu2 %4532, %v5530_v5   ;;  %v5947_v61 = vpop.permute.xlu2 %1154  ;;  %v5963_v5 = vld [vmem:[%s10063_s4 + $0x348] sm:$0xff] }
 0x229   :  { %v1226_v3 = vadd.f32 %v1194_v24, %v1130_v23  ;;  %v1230_v19 = vadd.f32 %v1198_v31, %v1134_v16  ;;  %v1234_v7 = vadd.f32 %v1202_v10, %v1138_v6  ;;  %v1238_v21 = vadd.f32 %v1206_v47, %v1142_v35  ;;  %v5991_v23 = vld [vmem:[%s10063_s4 + $0x3c8] sm:$0xff] }
 0x22a   :  { %v5996_v16 = vld [vmem:[%s10063_s4 + $0x3e8] sm:$0xff] }
 0x22f   :  { %4537 = vset.pattern.permute.xlu2 %v10243_v63  ;;  %v1263_v45 = vpop.permute.xlu1 %1262 }
 0x230   :  { %v1290_v9 = vmul.f32 %v1263_v45, %v5952_v34  ;;  %v1294_v63 = vmul.f32 %v1263_v45, %v5958_v42  ;;  %v1298_v32 = vmul.f32 %v1263_v45, %v5963_v5  ;;  %v1302_v52 = vmul.f32 %v1263_v45, %v5968_v43  ;;  %790 = vperm.xlu2 %4537, %v5707_v49   ;;  %v5975_v14 = vpop.permute.xlu2 %1250 }
 0x231   :  { %v1085_v45 = vmul.f32 %v5366_v46, %v5780_v18  ;;  %v6042_v18 = vld [vmem:[%s10063_s4 + $0x300] sm:$0xff] }
 0x232   :  { %v1322_v56 = vadd.f32 %v1290_v9, %v1226_v3  ;;  %v1326_v29 = vadd.f32 %v1294_v63, %v1230_v19  ;;  %v1330_v13 = vadd.f32 %v1298_v32, %v1234_v7  ;;  %v1334_v59 = vadd.f32 %v1302_v52, %v1238_v21  ;;  %v6016_v7 = vld [vmem:[%s10063_s4 + $0x70] sm:$0xff] }
 0x233   :  { %10266 = vst [vmem:[#allocation23_spill] sm:$0xff] %v6016_v7  ;;  %v6021_v21 = vld [vmem:[%s10063_s4 + $0xf0] sm:$0xff]  ;;  %v1089_v9 = vmul.f32 %v5366_v46, %v5785_v17  ;;  %v1093_v63 = vmul.f32 %v5366_v46, %v5790_v26  ;;  %v1177_v32 = vmul.f32 %v5470_v60, %v5804_v39  ;;  %v1181_v52 = vmul.f32 %v5470_v60, %v5809_v55  ;;  %v10268_v39 = vld [vmem:[#allocation5_spill] sm:$0xff] }
 0x234   :  { %10267 = vst [vmem:[#allocation24_spill] sm:$0xff] %v6021_v21  ;;  %v743_v26 = vmul.f32 %v5889_v54, %v6016_v7  ;;  %v1082_v55 = vmul.f32 %v10268_v39, %v5896_v25  ;;  %v1090_v25 = vmul.f32 %v10268_v39, %v5907_v28  ;;  %v10275_v28 = vld [vmem:[#allocation16_spill] sm:$0xff] }
 0x238   :  { %4538 = vset.pattern.permute.xlu2 %v10260_v20  ;;  %v1359_v6 = vpop.permute.xlu1 %1358 }
 0x239   :  { %v1386_v35 = vmul.f32 %v1359_v6, %v5980_v11  ;;  %v1390_v20 = vmul.f32 %v1359_v6, %v5986_v48  ;;  %v1394_v22 = vmul.f32 %v1359_v6, %v5991_v23  ;;  %v1398_v24 = vmul.f32 %v1359_v6, %v5996_v16  ;;  %1346 = vperm.xlu2 %4538, %v5364_v27   ;;  %v6003_v31 = vpop.permute.xlu2 %706 }
 0x23a   :  { %v1081_v27 = vmul.f32 %v5366_v46, %v5774_v8  ;;  %v1189_v8 = vmul.f32 %v5470_v60, %v5819_v51  ;;  %v10269_v51 = vld [vmem:[#allocation7_spill] sm:$0xff] }
 0x23b   :  { %v6005_v10 = vadd.f32 %v1386_v35, %v1322_v56  ;;  %v6007_v47 = vadd.f32 %v1390_v20, %v1326_v29  ;;  %v6009_v3 = vadd.f32 %v1394_v22, %v1330_v13  ;;  %v6011_v19 = vadd.f32 %v1398_v24, %v1334_v59  ;;  %v10270_v13 = vld [vmem:[#allocation8_spill] sm:$0xff]  ;;  %v10272_v35 = vld [vmem:[#allocation9_spill] sm:$0xff]  ;;  %v10273_v22 = vld [vmem:[#allocation14_spill] sm:$0xff] }
 0x23c   :  { %v1185_v56 = vmul.f32 %v5470_v60, %v5814_v0  ;;  %v1113_v17 = vadd.f32 %v1081_v27, %v5536_v37  ;;  %v1117_v29 = vadd.f32 %v1085_v45, %v10269_v51  ;;  %v1121_v59 = vadd.f32 %v1089_v9, %v10270_v13 }
 0x23d   :  { %10262 = vst [vmem:[#allocation19_spill] sm:$0xff] %v6005_v10  ;;  %v1086_v37 = vmul.f32 %v10268_v39, %v5902_v2  ;;  %v1273_v20 = vmul.f32 %v10272_v35, %v6042_v18  ;;  %v1114_v24 = vadd.f32 %v1082_v55, %v10273_v22  ;;  %v1277_v45 = vmul.f32 %v10272_v35, %v5841_v41  ;;  %v10274_v2 = vld [vmem:[#allocation15_spill] sm:$0xff] }
 0x23e   :  { %10263 = vst [vmem:[#allocation20_spill] sm:$0xff] %v6007_v47  ;;  %v1281_v9 = vmul.f32 %v10272_v35, %v5846_v33  ;;  %v1209_v13 = vadd.f32 %v1177_v32, %v1113_v17  ;;  %v1213_v41 = vadd.f32 %v1181_v52, %v1117_v29  ;;  %v1217_v22 = vadd.f32 %v1185_v56, %v1121_v59  ;;  %v6087_v32 = vld [vmem:[%s10063_s4 + $0x380] sm:$0xff]  ;;  %v6111_v59 = vld [vmem:[%s10063_s4 + $0x10] sm:$0xff] }
 0x23f   :  { %10264 = vst [vmem:[#allocation21_spill] sm:$0xff] %v6009_v3  ;;  %v1118_v51 = vadd.f32 %v1086_v37, %v10274_v2  ;;  %v6106_v29 = vld [vmem:[%s10063_s4 + $0x3c0] sm:$0xff] }
 0x240   :  { %10265 = vst [vmem:[#allocation22_spill] sm:$0xff] %v6011_v19 }
 0x241   :  { %1366 = vperm.xlu2 %4538, %v5707_v49   ;;  %v6045_v46 = vpop.permute.xlu1 %770  ;;  %v10271_v49 = vld [vmem:[#allocation10_spill] sm:$0xff] }
 0x242   :  { %v807_v60 = vmul.f32 %v6045_v46, %v6021_v21  ;;  %v6054_v0 = vpop.permute.xlu2 %870  ;;  %v1125_v6 = vadd.f32 %v1093_v63, %v10271_v49  ;;  %v1285_v63 = vmul.f32 %v10272_v35, %v5851_v57  ;;  %v1094_v49 = vmul.f32 %v10268_v39, %v5912_v40  ;;  %v6092_v40 = vld [vmem:[%s10063_s4 + $0x3a0] sm:$0xff]  ;;  %v10278_v35 = vld [vmem:[#allocation11_spill] sm:$0xff] }
 0x243   :  { %v1122_v21 = vadd.f32 %v1090_v25, %v10275_v28  ;;  %v1305_v57 = vadd.f32 %v1273_v20, %v1209_v13  ;;  %v1274_v20 = vmul.f32 %v10278_v35, %v5952_v34  ;;  %v6122_v25 = vld [vmem:[%s10063_s4 + $0x90] sm:$0xff]  ;;  %v10282_v34 = vld [vmem:[#allocation12_spill] sm:$0xff]  ;;  %v1282_v2 = vmul.f32 %v10278_v35, %v5963_v5 }
 0x244   :  { %v6066_v27 = vadd.f32 %v807_v60, %v743_v26  ;;  %v10276_v26 = vld [vmem:[#allocation6_spill] sm:$0xff]  ;;  %v6080_v60 = vpop.permute.xlu0 %721  ;;  %v1221_v7 = vadd.f32 %v1189_v8, %v1125_v6  ;;  %v6097_v8 = vadd.f32 %v1277_v45, %v1213_v41  ;;  %10279 = vst [vmem:[#allocation5_spill] sm:$0xff] %v6122_v25  ;;  %v1369_v45 = vmul.f32 %v10282_v34, %v6087_v32 }
 0x245   :  { %v1178_v55 = vmul.f32 %v10276_v26, %v5924_v12  ;;  %v1182_v33 = vmul.f32 %v10276_v26, %v5930_v36  ;;  %v10277_v12 = vld [vmem:[#allocation17_spill] sm:$0xff]  ;;  %v1186_v52 = vmul.f32 %v10276_v26, %v5935_v4  ;;  %v6099_v36 = vadd.f32 %v1281_v9, %v1217_v22  ;;  %v6143_v9 = vld [vmem:[%s10063_s4 + $0x30] sm:$0xff] }
 0x246   :  { %v1126_v17 = vadd.f32 %v1094_v49, %v10277_v12  ;;  %v6101_v39 = vadd.f32 %v1285_v63, %v1221_v7  ;;  %v1190_v4 = vmul.f32 %v10276_v26, %v5940_v44  ;;  %v1278_v7 = vmul.f32 %v10278_v35, %v5958_v42  ;;  %v6132_v44 = vld [vmem:[%s10063_s4 + $0xd0] sm:$0xff]  ;;  %10283 = vst [vmem:[#allocation10_spill] sm:$0xff] %v6143_v9 }
 0x247   :  { %v1210_v56 = vadd.f32 %v1178_v55, %v1114_v24  ;;  %v1214_v6 = vadd.f32 %v1182_v33, %v1118_v51  ;;  %v1218_v37 = vadd.f32 %v1186_v52, %v1122_v21  ;;  %v6127_v24 = vld [vmem:[%s10063_s4 + $0xb0] sm:$0xff]  ;;  %10281 = vst [vmem:[#allocation8_spill] sm:$0xff] %v6132_v44  ;;  %v6138_v42 = vmul.f32 %v10282_v34, %v6092_v40 }
 0x248   :  { %10280 = vst [vmem:[#allocation7_spill] sm:$0xff] %v6127_v24  ;;  %v6148_v63 = vld [vmem:[%s10063_s4 + $0x50] sm:$0xff]  ;;  %v1286_v51 = vmul.f32 %v10278_v35, %v5968_v43  ;;  %v6163_v28 = vmul.f32 %v10282_v34, %v6106_v29  ;;  %v6167_v26 = vmul.f32 %v10282_v34, %v5872_v1  ;;  %v1222_v55 = vadd.f32 %v1190_v4, %v1126_v17 }
 0x249   :  { %10284 = vst [vmem:[#allocation9_spill] sm:$0xff] %v6148_v63  ;;  %v6157_v13 = vld [vmem:[%s10063_s4 + $0x110] sm:$0xff]  ;;  %v1306_v5 = vadd.f32 %v1274_v20, %v1210_v56  ;;  %v1310_v33 = vadd.f32 %v1278_v7, %v1214_v6  ;;  %v795_v1 = vmul.f32 %v6045_v46, %v6122_v25  ;;  %v799_v12 = vmul.f32 %v6045_v46, %v6127_v24 }
 0x24a   :  { %v867_v21 = vpop.permute.xlu1 %866  ;;  %10285 = vst [vmem:[#allocation14_spill] sm:$0xff] %v6157_v13  ;;  %v6172_v43 = vld [vmem:[%s10063_s4 + $0x130] sm:$0xff]  ;;  %v803_v17 = vmul.f32 %v6045_v46, %v6132_v44  ;;  %v731_v52 = vmul.f32 %v5889_v54, %v6111_v59  ;;  %v735_v56 = vmul.f32 %v5889_v54, %v6143_v9  ;;  %v739_v4 = vmul.f32 %v5889_v54, %v6148_v63  ;;  %v10290_v44 = vld [vmem:[#allocation13_spill] sm:$0xff] }
 0x24b   :  { %v6159_v49 = vpop.permute.xlu2 %966  ;;  %10286 = vst [vmem:[#allocation15_spill] sm:$0xff] %v6172_v43  ;;  %v6177_v41 = vld [vmem:[%s10063_s4 + $0x150] sm:$0xff]  ;;  %v1314_v35 = vadd.f32 %v1282_v2, %v1218_v37  ;;  %v891_v6 = vmul.f32 %v867_v21, %v6157_v13  ;;  %v895_v20 = vmul.f32 %v867_v21, %v6172_v43  ;;  %v6200_v24 = vadd.f32 %v1369_v45, %v1305_v57 }
 0x24c   :  { %10287 = vst [vmem:[#allocation16_spill] sm:$0xff] %v6177_v41  ;;  %v6182_v22 = vld [vmem:[%s10063_s4 + $0x170] sm:$0xff]  ;;  %v899_v7 = vmul.f32 %v867_v21, %v6177_v41  ;;  %v1370_v25 = vmul.f32 %v10290_v44, %v5980_v11  ;;  %v1374_v54 = vmul.f32 %v10290_v44, %v5986_v48  ;;  %v1378_v37 = vmul.f32 %v10290_v44, %v5991_v23  ;;  %v6213_v2 = vpop.permute.xlu0 %1074 }
 0x24d   :  { %10288 = vst [vmem:[#allocation6_spill] sm:$0xff] %v6182_v22  ;;  %v903_v34 = vmul.f32 %v867_v21, %v6182_v22  ;;  %v6205_v46 = vld [vmem:[%s10063_s4 + $0x210] sm:$0xff]  ;;  %v6222_v21 = vmul.f32 %v10290_v44, %v5996_v16  ;;  %v827_v45 = vadd.f32 %v795_v1, %v731_v52  ;;  %v831_v22 = vadd.f32 %v799_v12, %v735_v56 }
 0x24e   :  { %10289 = vst [vmem:[#allocation17_spill] sm:$0xff] %v6200_v24  ;;  %v6218_v57 = vld [vmem:[%s10063_s4 + $0x190] sm:$0xff]  ;;  %v835_v11 = vadd.f32 %v803_v17, %v739_v4  ;;  %v6254_v12 = vadd.f32 %v1286_v51, %v1222_v55  ;;  %v6256_v17 = vadd.f32 %v1370_v25, %v1306_v5  ;;  %v6258_v52 = vadd.f32 %v1374_v54, %v1310_v33 }
 0x24f   :  { %10291 = vst [vmem:[#allocation11_spill] sm:$0xff] %v6213_v2  ;;  %v6227_v48 = vld [vmem:[%s10063_s4 + $0x1b0] sm:$0xff]  ;;  %v6260_v56 = vadd.f32 %v1378_v37, %v1314_v35  ;;  %v923_v43 = vadd.f32 %v891_v6, %v827_v45  ;;  %v927_v13 = vadd.f32 %v895_v20, %v831_v22  ;;  %v935_v63 = vadd.f32 %v903_v34, %v6066_v27 }
 0x250   :  { %10292 = vst [vmem:[#allocation12_spill] sm:$0xff] %v6218_v57  ;;  %v6232_v23 = vld [vmem:[%s10063_s4 + $0x1d0] sm:$0xff]  ;;  %v931_v2 = vadd.f32 %v899_v7, %v835_v11  ;;  %v1083_v6 = vmul.f32 %v5919_v30, %v6205_v46 }
 0x251   :  { %10293 = vst [vmem:[#allocation13_spill] sm:$0xff] %v6227_v48  ;;  %v6237_v41 = vld [vmem:[%s10063_s4 + $0x1f0] sm:$0xff] }
 0x252   :  { %10294 = vst [vmem:[#allocation25_spill] sm:$0xff] %v6232_v23  ;;  %v6242_v16 = vld [vmem:[%s10063_s4 + $0x230] sm:$0xff] }
 0x253   :  { %10295 = vst [vmem:[#allocation26_spill] sm:$0xff] %v6237_v41  ;;  %v6247_v44 = vld [vmem:[%s10063_s4 + $0x250] sm:$0xff]  ;;  %v963_v9 = vpop.permute.xlu1 %962  ;;  %v1087_v20 = vmul.f32 %v5919_v30, %v6242_v16 }
 0x254   :  { %10296 = vst [vmem:[#allocation27_spill] sm:$0xff] %v6242_v16  ;;  %v6252_v1 = vld [vmem:[%s10063_s4 + $0x270] sm:$0xff]  ;;  %v987_v5 = vmul.f32 %v963_v9, %v6218_v57  ;;  %v991_v27 = vmul.f32 %v963_v9, %v6227_v48  ;;  %v995_v22 = vmul.f32 %v963_v9, %v6232_v23  ;;  %v999_v33 = vmul.f32 %v963_v9, %v6237_v41  ;;  %v6287_v35 = vpop.permute.xlu2 %1062  ;;  %v6328_v16 = vld [vmem:[%s10063_s4 + $0x18] sm:$0xff] }
 0x255   :  { %10297 = vst [vmem:[#allocation28_spill] sm:$0xff] %v6247_v44  ;;  %v6265_v4 = vld [vmem:[%s10063_s4 + $0x290] sm:$0xff]  ;;  %v1091_v7 = vmul.f32 %v5919_v30, %v6247_v44  ;;  %v1095_v34 = vmul.f32 %v5919_v30, %v6252_v1 }
 0x256   :  { %10298 = vst [vmem:[#allocation29_spill] sm:$0xff] %v6252_v1  ;;  %v6271_v25 = vld [vmem:[%s10063_s4 + $0x2b0] sm:$0xff]  ;;  %v1019_v30 = vadd.f32 %v987_v5, %v923_v43  ;;  %v1023_v11 = vadd.f32 %v991_v27, %v927_v13  ;;  %v1027_v41 = vadd.f32 %v995_v22, %v931_v2  ;;  %v1031_v23 = vadd.f32 %v999_v33, %v935_v63  ;;  %v6333_v63 = vld [vmem:[%s10063_s4 + $0x38] sm:$0xff] }
 0x257   :  { %10299 = vst [vmem:[#allocation30_spill] sm:$0xff] %v6256_v17  ;;  %v6276_v51 = vld [vmem:[%s10063_s4 + $0x2d0] sm:$0xff]  ;;  %v1179_v48 = vmul.f32 %v5947_v61, %v6265_v4  ;;  %v1183_v57 = vmul.f32 %v5947_v61, %v6271_v25  ;;  %v6338_v13 = vld [vmem:[%s10063_s4 + $0x58] sm:$0xff] }
 0x258   :  { %10300 = vst [vmem:[#allocation31_spill] sm:$0xff] %v6258_v52  ;;  %v6281_v55 = vld [vmem:[%s10063_s4 + $0x2f0] sm:$0xff]  ;;  %v1187_v1 = vmul.f32 %v5947_v61, %v6276_v51  ;;  %v6343_v43 = vld [vmem:[%s10063_s4 + $0x78] sm:$0xff]  ;;  %v1119_v2 = vadd.f32 %v1087_v20, %v1023_v11  ;;  %v1123_v5 = vadd.f32 %v1091_v7, %v1027_v41  ;;  %v1127_v27 = vadd.f32 %v1095_v34, %v1031_v23  ;;  %v6363_v23 = vpop.permute.xlu0 %1170 }
 0x259   :  { %10301 = vst [vmem:[#allocation32_spill] sm:$0xff] %v6260_v56  ;;  %v6300_v54 = vld [vmem:[%s10063_s4 + $0x310] sm:$0xff]  ;;  %v1191_v44 = vmul.f32 %v5947_v61, %v6281_v55  ;;  %v1115_v61 = vadd.f32 %v1083_v6, %v1019_v30  ;;  %v6361_v41 = vld [vmem:[%s10063_s4 + $0x98] sm:$0xff] }
 0x25a   :  { %10302 = vst [vmem:[#allocation33_spill] sm:$0xff] %v6271_v25  ;;  %v6305_v9 = vld [vmem:[%s10063_s4 + $0x330] sm:$0xff]  ;;  %v1275_v22 = vmul.f32 %v5975_v14, %v6300_v54  ;;  %v6356_v25 = vld [vmem:[%s10063_s4 + $0x118] sm:$0xff]  ;;  %v1215_v34 = vadd.f32 %v1183_v57, %v1119_v2  ;;  %v1219_v30 = vadd.f32 %v1187_v1, %v1123_v5 }
 0x25b   :  { %10303 = vst [vmem:[#allocation34_spill] sm:$0xff] %v6276_v51  ;;  %v6310_v37 = vld [vmem:[%s10063_s4 + $0x350] sm:$0xff]  ;;  %v1279_v33 = vmul.f32 %v5975_v14, %v6305_v9  ;;  %v6368_v6 = vld [vmem:[%s10063_s4 + $0xb8] sm:$0xff]  ;;  %v1211_v7 = vadd.f32 %v1179_v48, %v1115_v61  ;;  %v1223_v11 = vadd.f32 %v1191_v44, %v1127_v27 }
 0x25c   :  { %10304 = vst [vmem:[#allocation35_spill] sm:$0xff] %v6281_v55  ;;  %v6315_v45 = vld [vmem:[%s10063_s4 + $0x370] sm:$0xff]  ;;  %v1283_v55 = vmul.f32 %v5975_v14, %v6310_v37  ;;  %v6378_v20 = vld [vmem:[%s10063_s4 + $0xf8] sm:$0xff]  ;;  %v775_v44 = vpop.permute.xlu1 %774 }
 0x25d   :  { %10305 = vst [vmem:[#allocation36_spill] sm:$0xff] %v6300_v54  ;;  %v1287_v51 = vmul.f32 %v5975_v14, %v6315_v45  ;;  %v6373_v14 = vld [vmem:[%s10063_s4 + $0xd8] sm:$0xff]  ;;  %v744_v54 = vmul.f32 %v6003_v31, %v6343_v43  ;;  %v6403_v1 = vadd.f32 %v1275_v22, %v1211_v7  ;;  %v6405_v61 = vadd.f32 %v1279_v33, %v1215_v34 }
 0x25e   :  { %10306 = vst [vmem:[#allocation37_spill] sm:$0xff] %v6305_v9  ;;  %v740_v9 = vmul.f32 %v6003_v31, %v6338_v13  ;;  %v6396_v57 = vld [vmem:[%s10063_s4 + $0x158] sm:$0xff]  ;;  %v800_v22 = vmul.f32 %v775_v44, %v6368_v6  ;;  %v804_v33 = vmul.f32 %v775_v44, %v6373_v14  ;;  %v892_v7 = vmul.f32 %v6054_v0, %v6356_v25 }
 0x25f   :  { %10307 = vst [vmem:[#allocation38_spill] sm:$0xff] %v6310_v37  ;;  %v736_v37 = vmul.f32 %v6003_v31, %v6333_v63  ;;  %v6401_v48 = vld [vmem:[%s10063_s4 + $0x178] sm:$0xff]  ;;  %v6409_v2 = vadd.f32 %v1287_v51, %v1223_v11  ;;  %v6425_v51 = vpop.permute.xlu2 %1158 }
 0x260   :  { %10308 = vst [vmem:[#allocation39_spill] sm:$0xff] %v6315_v45  ;;  %v732_v45 = vmul.f32 %v6003_v31, %v6328_v16  ;;  %v6407_v31 = vadd.f32 %v1283_v55, %v1219_v30  ;;  %v6414_v5 = vld [vmem:[%s10063_s4 + $0x1d8] sm:$0xff]  ;;  %v808_v55 = vmul.f32 %v775_v44, %v6378_v20  ;;  %v900_v30 = vmul.f32 %v6054_v0, %v6396_v57 }
 0x261   :  { %10309 = vst [vmem:[#allocation40_spill] sm:$0xff] %v6343_v43  ;;  %v6419_v27 = vld [vmem:[%s10063_s4 + $0x1f8] sm:$0xff]  ;;  %v796_v43 = vmul.f32 %v775_v44, %v6361_v41  ;;  %v904_v11 = vmul.f32 %v6054_v0, %v6401_v48  ;;  %v1289_v44 = vmul.f32 %v5832_v62, %v6042_v18 }
 0x262   :  { %10310 = vst [vmem:[#allocation41_spill] sm:$0xff] %v6361_v41 }
 0x263   :  { %10311 = vst [vmem:[#allocation42_spill] sm:$0xff] %v6363_v23  ;;  %v6391_v23 = vld [vmem:[%s10063_s4 + $0x138] sm:$0xff] }
 0x264   :  { %10312 = vst [vmem:[#allocation43_spill] sm:$0xff] %v6368_v6  ;;  %v896_v34 = vmul.f32 %v6054_v0, %v6391_v23  ;;  %v1000_v6 = vmul.f32 %v6159_v49, %v6419_v27  ;;  %v6448_v0 = vld [vmem:[%s10063_s4 + $0x278] sm:$0xff] }
 0x265   :  { %10313 = vst [vmem:[#allocation44_spill] sm:$0xff] %v6373_v14  ;;  %v996_v14 = vmul.f32 %v6159_v49, %v6414_v5 }
 0x266   :  { %10314 = vst [vmem:[#allocation45_spill] sm:$0xff] %v6378_v20  ;;  %v6439_v20 = vadd.f32 %v6222_v21, %v6254_v12  ;;  %v1385_v21 = vmul.f32 %v5874_v38, %v6087_v32  ;;  %v1389_v12 = vmul.f32 %v5874_v38, %v6092_v40  ;;  %v1096_v32 = vmul.f32 %v6287_v35, %v6448_v0 }
 0x267   :  { %10315 = vst [vmem:[#allocation46_spill] sm:$0xff] %v6403_v1  ;;  %v840_v1 = vadd.f32 %v808_v55, %v744_v54  ;;  %v1433_v55 = vmul.f32 0.25, %v6200_v24  ;;  %v10345_v24 = vld [vmem:[#allocation36_spill] sm:$0xff] }
 0x268   :  { %10316 = vst [vmem:[#allocation47_spill] sm:$0xff] %v6405_v61  ;;  %v836_v61 = vadd.f32 %v804_v33, %v740_v9 }
 0x269   :  { %10317 = vst [vmem:[#allocation48_spill] sm:$0xff] %v6407_v31  ;;  %v832_v31 = vadd.f32 %v800_v22, %v736_v37  ;;  %v936_v18 = vadd.f32 %v904_v11, %v840_v1  ;;  %v6460_v37 = vadd.f32 %v6138_v42, %v6097_v8  ;;  %v6473_v1 = vadd.f32 %v6167_v26, %v6101_v39  ;;  %v6488_v26 = vpop.permute.xlu1 %982 }
 0x26a   :  { %10318 = vst [vmem:[#allocation49_spill] sm:$0xff] %v6409_v2  ;;  %v828_v2 = vadd.f32 %v796_v43, %v732_v45  ;;  %v932_v62 = vadd.f32 %v900_v30, %v836_v61  ;;  %v6464_v45 = vadd.f32 %v6163_v28, %v6099_v36  ;;  %v6469_v43 = vld [vmem:[%s10063_s4 + $0x2f8] sm:$0xff]  ;;  %v1321_v42 = vadd.f32 %v1289_v44, %v5835_v15  ;;  %v6482_v28 = vpop.permute.xlu0 %1266 }
 0x26b   :  { %10319 = vst [vmem:[#allocation50_spill] sm:$0xff] %v6439_v20  ;;  %v6452_v54 = vadd.f32 %v896_v34, %v832_v31  ;;  %v1032_v8 = vadd.f32 %v1000_v6, %v936_v18  ;;  %v1393_v36 = vmul.f32 %v5874_v38, %v6106_v29  ;;  %v1438_v61 = vmul.f32 0.25, %v6258_v52  ;;  %v6497_v29 = vpop.permute.xlu2 %1254 }
 0x26c   :  { %v6450_v9 = vadd.f32 %v892_v7, %v828_v2  ;;  %10320 = vst [vmem:[#allocation51_spill] sm:$0xff] %v6460_v37  ;;  %v6477_v40 = vadd.f32 %v996_v14, %v932_v62  ;;  %v1434_v31 = vmul.f32 0.25, %v6256_v17  ;;  %v1192_v39 = vmul.f32 %v6425_v51, %v6469_v43 }
 0x26d   :  { %10321 = vst [vmem:[#allocation52_spill] sm:$0xff] %v6464_v45  ;;  %v1128_v2 = vadd.f32 %v1096_v32, %v1032_v8  ;;  %v1442_v14 = vmul.f32 0.25, %v6260_v56  ;;  %v1446_v6 = vmul.f32 0.25, %v6439_v20  ;;  %v6492_v15 = vadd.f32 %v1385_v21, %v1321_v42 }
 0x26e   :  { %10322 = vst [vmem:[#allocation53_spill] sm:$0xff] %v6473_v1  ;;  %v6495_v38 = vadd.f32 %v1389_v12, %v5860_v58  ;;  %v1437_v33 = vmul.f32 0.25, %v6460_v37  ;;  %v6504_v7 = vadd.f32 %v1393_v36, %v5862_v50  ;;  %v1441_v34 = vmul.f32 0.25, %v6464_v45  ;;  %v10344_v45 = vld [vmem:[#allocation35_spill] sm:$0xff]  ;;  %v10346_v37 = vld [vmem:[#allocation37_spill] sm:$0xff] }
 0x26f   :  { %10323 = vst [vmem:[#allocation54_spill] sm:$0xff] %v6492_v15  ;;  %v6499_v22 = vadd.f32 %v1192_v39, %v1128_v2  ;;  %v1445_v30 = vmul.f32 0.25, %v6473_v1  ;;  %v1479_v11 = vsel %vm61_vm0, %v1438_v61, 0.0  ;;  %v1466_v58 = vsel %vm61_vm0, %v1434_v31, 0.0  ;;  %v6523_v61 = vld [vmem:[%s10063_s4 + $0x198] sm:$0xff] }
 0x270   :  { %10324 = vst [vmem:[#allocation55_spill] sm:$0xff] %v6495_v38  ;;  %v1492_v44 = vsel %vm61_vm0, %v1442_v14, 0.0  ;;  %v1505_v62 = vsel %vm61_vm0, %v1446_v6, 0.0  ;;  %v1449_v18 = vmul.f32 0.25, %v6492_v15  ;;  %v1450_v21 = vmul.f32 0.25, %v6005_v10  ;;  %v6528_v31 = vld [vmem:[%s10063_s4 + $0x1b8] sm:$0xff] }
 0x271   :  { %10325 = vst [vmem:[#allocation56_spill] sm:$0xff] %v6504_v7  ;;  %v1453_v12 = vmul.f32 0.25, %v6495_v38  ;;  %v1454_v50 = vmul.f32 0.25, %v6007_v47  ;;  %v1478_v32 = vsel %vm61_vm0, %v1437_v33, 0.0  ;;  %v1465_v8 = vsel %vm61_vm0, %v1433_v55, 0.0  ;;  %v6544_v47 = vpop.permute.xlu1 %1078 }
 0x272   :  { %v1458_v42 = vmul.f32 0.25, %v6009_v3  ;;  %v1462_v36 = vmul.f32 0.25, %v6011_v19  ;;  %v1491_v2 = vsel %vm61_vm0, %v1441_v34, 0.0  ;;  %v1457_v39 = vmul.f32 0.25, %v6504_v7  ;;  %v6542_v10 = vpop.permute.xlu0 %726 }
 0x273   :  { %v1461_v14 = vmul.f32 0.25, %v5881_v53  ;;  %v1504_v6 = vsel %vm61_vm0, %v1445_v30, 0.0  ;;  %v6534_v33 = vadd.f32 %v1479_v11, %v1478_v32  ;;  %v6536_v55 = vadd.f32 %v1466_v58, %v1465_v8  ;;  %v6579_v8 = vld [vmem:[%s10063_s4 + $0x258] sm:$0xff] }
 0x274   :  { %v6538_v19 = vadd.f32 %v1492_v44, %v1491_v2  ;;  %v6540_v3 = vadd.f32 %v1505_v62, %v1504_v6  ;;  %v1517_v34 = vsel %vm61_vm0, %v1449_v18, 0.0  ;;  %v1518_v7 = vsel %vm61_vm0, %v1450_v21, 0.0  ;;  %v6554_v44 = vpop.permute.xlu2 %786  ;;  %v10330_v21 = vld [vmem:[#allocation10_spill] sm:$0xff]  ;;  %v10332_v6 = vld [vmem:[#allocation23_spill] sm:$0xff] }
 0x275   :  { %10326 = vst [vmem:[#allocation57_spill] sm:$0xff] %v6534_v33  ;;  %v1530_v53 = vsel %vm61_vm0, %v1453_v12, 0.0  ;;  %v1531_v30 = vsel %vm61_vm0, %v1454_v50, 0.0  ;;  %v988_v11 = vmul.f32 %v6159_v49, %v6523_v61  ;;  %v992_v58 = vmul.f32 %v6159_v49, %v6528_v31  ;;  %v6569_v50 = vld [vmem:[%s10063_s4 + $0x218] sm:$0xff] }
 0x276   :  { %10327 = vst [vmem:[#allocation58_spill] sm:$0xff] %v6536_v55  ;;  %v1544_v62 = vsel %vm61_vm0, %v1458_v42, 0.0  ;;  %v1557_v32 = vsel %vm61_vm0, %v1462_v36, 0.0  ;;  %v6560_v18 = vmul.f32 %v6080_v60, %v6111_v59  ;;  %v6564_v12 = vmul.f32 %v6080_v60, %v10330_v21  ;;  %v6574_v49 = vld [vmem:[%s10063_s4 + $0x238] sm:$0xff]  ;;  %v10331_v36 = vld [vmem:[#allocation9_spill] sm:$0xff] }
 0x277   :  { %10328 = vst [vmem:[#allocation59_spill] sm:$0xff] %v6538_v19  ;;  %v1543_v59 = vsel %vm61_vm0, %v1457_v39, 0.0  ;;  %v1556_v42 = vsel %vm61_vm0, %v1461_v14, 0.0  ;;  %v6585_v2 = vmul.f32 %v6080_v60, %v10331_v36  ;;  %v6589_v21 = vmul.f32 %v6080_v60, %v10332_v6  ;;  %v10337_v14 = vld [vmem:[#allocation11_spill] sm:$0xff] }
 0x278   :  { %10329 = vst [vmem:[#allocation60_spill] sm:$0xff] %v6540_v3  ;;  %v1020_v38 = vadd.f32 %v988_v11, %v6450_v9  ;;  %v1024_v15 = vadd.f32 %v992_v58, %v6452_v54  ;;  %v6593_v20 = vadd.f32 %v1518_v7, %v1517_v34  ;;  %v6595_v1 = vadd.f32 %v1531_v30, %v1530_v53  ;;  %v10338_v7 = vld [vmem:[#allocation27_spill] sm:$0xff]  ;;  %v10339_v34 = vld [vmem:[#allocation28_spill] sm:$0xff]  ;;  %v10340_v11 = vld [vmem:[#allocation29_spill] sm:$0xff] }
 0x279   :  { %v6597_v56 = vadd.f32 %v1544_v62, %v1543_v59  ;;  %v6599_v39 = vadd.f32 %v1557_v32, %v1556_v42  ;;  %v6603_v36 = vmul.f32 %v10337_v14, %v6205_v46  ;;  %v1084_v60 = vmul.f32 %v6287_v35, %v6569_v50  ;;  %v10341_v58 = vld [vmem:[#allocation42_spill] sm:$0xff]  ;;  %v6635_v32 = vld [vmem:[%s10063_s4 + $0x2b8] sm:$0xff]  ;;  %v10342_v42 = vld [vmem:[#allocation33_spill] sm:$0xff] }
 0x27a   :  { %10333 = vst [vmem:[#allocation10_spill] sm:$0xff] %v6593_v20  ;;  %v1088_v9 = vmul.f32 %v6287_v35, %v6574_v49  ;;  %v1092_v54 = vmul.f32 %v6287_v35, %v6579_v8  ;;  %v6613_v53 = vmul.f32 %v10337_v14, %v10338_v7  ;;  %v6617_v30 = vmul.f32 %v10337_v14, %v10339_v34  ;;  %v6630_v35 = vld [vmem:[%s10063_s4 + $0x298] sm:$0xff]  ;;  %v10343_v34 = vld [vmem:[#allocation34_spill] sm:$0xff]  ;;  %v10352_v20 = vld [vmem:[#allocation40_spill] sm:$0xff] }
 0x27b   :  { %10334 = vst [vmem:[#allocation9_spill] sm:$0xff] %v6595_v1  ;;  %v6621_v46 = vmul.f32 %v10337_v14, %v10340_v11  ;;  %v6625_v62 = vmul.f32 %v10341_v58, %v6265_v4  ;;  %v6640_v59 = vld [vmem:[%s10063_s4 + $0x2d8] sm:$0xff]  ;;  %v6644_v6 = vmul.f32 %v10341_v58, %v10342_v42  ;;  %v1116_v4 = vadd.f32 %v1084_v60, %v1020_v38 }
 0x27c   :  { %10335 = vst [vmem:[#allocation23_spill] sm:$0xff] %v6597_v56  ;;  %v1120_v14 = vadd.f32 %v1088_v9, %v1024_v15  ;;  %v1124_v7 = vadd.f32 %v1092_v54, %v6477_v40  ;;  %v6649_v11 = vmul.f32 %v10341_v58, %v10343_v34  ;;  %v6653_v52 = vmul.f32 %v10341_v58, %v10344_v45  ;;  %v6666_v40 = vld [vmem:[%s10063_s4 + $0x318] sm:$0xff]  ;;  %v10347_v15 = vld [vmem:[#allocation38_spill] sm:$0xff]  ;;  %v6693_v58 = vpop.permute.xlu1 %1174  ;;  %v887_v56 = vpop.permute.xlu0 %886 }
 0x27d   :  { %10336 = vst [vmem:[#allocation61_spill] sm:$0xff] %v6599_v39  ;;  %v6657_v17 = vmul.f32 %v6482_v28, %v10345_v24  ;;  %v6661_v42 = vmul.f32 %v6482_v28, %v10346_v37  ;;  %v6670_v38 = vmul.f32 %v6482_v28, %v10347_v15  ;;  %v1180_v45 = vmul.f32 %v6425_v51, %v6630_v35  ;;  %v6681_v37 = vld [vmem:[%s10063_s4 + $0x338] sm:$0xff]  ;;  %v883_v19 = vpop.permute.xlu2 %882 }
 0x27e   :  { %v1184_v24 = vmul.f32 %v6425_v51, %v6635_v32  ;;  %v1188_v60 = vmul.f32 %v6425_v51, %v6640_v59  ;;  %v6686_v9 = vld [vmem:[%s10063_s4 + $0x358] sm:$0xff]  ;;  %v6701_v15 = vmul.f32 %v6542_v10, %v6328_v16  ;;  %v6705_v3 = vmul.f32 %v6542_v10, %v6333_v63 }
 0x27f   :  { %v6691_v54 = vld [vmem:[%s10063_s4 + $0x378] sm:$0xff]  ;;  %v6709_v39 = vmul.f32 %v6542_v10, %v6338_v13  ;;  %v1212_v55 = vadd.f32 %v1180_v45, %v1116_v4  ;;  %v1276_v16 = vmul.f32 %v6497_v29, %v6666_v40  ;;  %v1280_v63 = vmul.f32 %v6497_v29, %v6681_v37  ;;  %v10357_v45 = vld [vmem:[#allocation24_spill] sm:$0xff] }
 0x280   :  { %v10348_v34 = vld [vmem:[#allocation39_spill] sm:$0xff]  ;;  %10349 = vst [vmem:[#allocation11_spill] sm:$0xff] %v6701_v15  ;;  %v1216_v33 = vadd.f32 %v1184_v24, %v1120_v14  ;;  %v1220_v1 = vadd.f32 %v1188_v60, %v1124_v7  ;;  %v1288_v13 = vmul.f32 %v6497_v29, %v6691_v54  ;;  %v823_v24 = vmul.f32 %v6554_v44, %v10357_v45  ;;  %v10362_v45 = vld [vmem:[#allocation16_spill] sm:$0xff] }
 0x281   :  { %v6697_v51 = vmul.f32 %v6482_v28, %v10348_v34  ;;  %10350 = vst [vmem:[#allocation27_spill] sm:$0xff] %v6705_v3  ;;  %v6713_v28 = vmul.f32 %v6542_v10, %v10352_v20  ;;  %v1284_v34 = vmul.f32 %v6497_v29, %v6686_v9  ;;  %v10355_v14 = vld [vmem:[#allocation7_spill] sm:$0xff]  ;;  %v10356_v10 = vld [vmem:[#allocation8_spill] sm:$0xff]  ;;  %v6733_v60 = vmul.f32 %v6488_v26, %v6523_v61  ;;  %v10363_v61 = vld [vmem:[#allocation6_spill] sm:$0xff] }
 0x282   :  { %10351 = vst [vmem:[#allocation28_spill] sm:$0xff] %v6709_v39  ;;  %v10354_v39 = vld [vmem:[#allocation5_spill] sm:$0xff]  ;;  %v815_v7 = vmul.f32 %v6554_v44, %v10355_v14  ;;  %v819_v20 = vmul.f32 %v6554_v44, %v10356_v10  ;;  %v6741_v29 = vmul.f32 %v6488_v26, %v6414_v5  ;;  %v10360_v14 = vld [vmem:[#allocation14_spill] sm:$0xff]  ;;  %v10361_v3 = vld [vmem:[#allocation15_spill] sm:$0xff]  ;;  %v915_v15 = vmul.f32 %v883_v19, %v10362_v45 }
 0x283   :  { %10353 = vst [vmem:[#allocation29_spill] sm:$0xff] %v6713_v28  ;;  %v811_v4 = vmul.f32 %v6554_v44, %v10354_v39  ;;  %v6737_v28 = vmul.f32 %v6488_v26, %v6528_v31  ;;  %v6745_v39 = vmul.f32 %v6488_v26, %v6419_v27  ;;  %v907_v10 = vmul.f32 %v883_v19, %v10360_v14 }
 0x284   :  { %10358 = vst [vmem:[#allocation42_spill] sm:$0xff] %v6733_v60  ;;  %v911_v44 = vmul.f32 %v883_v19, %v10361_v3  ;;  %v919_v60 = vmul.f32 %v883_v19, %v10363_v61  ;;  %v6751_v41 = vadd.f32 %v1276_v16, %v1212_v55  ;;  %v6753_v31 = vadd.f32 %v1280_v63, %v1216_v33  ;;  %v1271_v33 = vpop.permute.xlu1 %1270  ;;  %v6779_v55 = vld [vmem:[%s10063_s4 + $0x390] sm:$0xff]  ;;  %v10364_v16 = vld [vmem:[#allocation12_spill] sm:$0xff]  ;;  %v10365_v63 = vld [vmem:[#allocation13_spill] sm:$0xff] }
 0x285   :  { %10359 = vst [vmem:[#allocation33_spill] sm:$0xff] %v6737_v28  ;;  %v6755_v28 = vadd.f32 %v1284_v34, %v1220_v1  ;;  %v6758_v5 = vadd.f32 %v1288_v13, %v6499_v22  ;;  %v843_v27 = vadd.f32 %v811_v4, %v6560_v18  ;;  %v847_v26 = vadd.f32 %v815_v7, %v6564_v12  ;;  %v10366_v13 = vld [vmem:[#allocation25_spill] sm:$0xff]  ;;  %v10367_v7 = vld [vmem:[#allocation26_spill] sm:$0xff] }
 0x286   :  { %v851_v14 = vadd.f32 %v819_v20, %v6585_v2  ;;  %v855_v3 = vadd.f32 %v823_v24, %v6589_v21  ;;  %v6765_v45 = vmul.f32 %v887_v56, %v6356_v25  ;;  %v6768_v19 = vmul.f32 %v887_v56, %v6391_v23  ;;  %v979_v21 = vpop.permute.xlu2 %978  ;;  %v6784_v23 = vld [vmem:[%s10063_s4 + $0x3b0] sm:$0xff] }
 0x287   :  { %v6771_v1 = vmul.f32 %v887_v56, %v6396_v57  ;;  %v6774_v22 = vmul.f32 %v887_v56, %v6401_v48  ;;  %v939_v18 = vadd.f32 %v907_v10, %v843_v27  ;;  %v943_v12 = vadd.f32 %v911_v44, %v847_v26  ;;  %v6789_v56 = vld [vmem:[%s10063_s4 + $0x3d0] sm:$0xff]  ;;  %v1363_v48 = vpop.permute.xlu0 %1362 }
 0x288   :  { %v947_v2 = vadd.f32 %v915_v15, %v851_v14  ;;  %v951_v25 = vadd.f32 %v919_v60, %v855_v3  ;;  %v6794_v57 = vld [vmem:[%s10063_s4 + $0x3f0] sm:$0xff]  ;;  %v1003_v15 = vmul.f32 %v979_v21, %v10364_v16  ;;  %v1007_v34 = vmul.f32 %v979_v21, %v10365_v63 }
 0x289   :  { %v1011_v4 = vmul.f32 %v979_v21, %v10366_v13  ;;  %v1015_v20 = vmul.f32 %v979_v21, %v10367_v7  ;;  %v6802_v24 = vmul.f32 %v6544_v47, %v6569_v50  ;;  %v6806_v60 = vmul.f32 %v6544_v47, %v6574_v49 }
 0x28a   :  { %v6810_v10 = vmul.f32 %v6544_v47, %v6579_v8  ;;  %v6814_v44 = vmul.f32 %v6544_v47, %v6448_v0  ;;  %v1035_v61 = vadd.f32 %v1003_v15, %v939_v18  ;;  %v1039_v27 = vadd.f32 %v1007_v34, %v943_v12 }
 0x28b   :  { %v1043_v26 = vadd.f32 %v1011_v4, %v947_v2  ;;  %v1047_v14 = vadd.f32 %v1015_v20, %v951_v25  ;;  %v1387_v3 = vmul.f32 %v1363_v48, %v6779_v55  ;;  %v1391_v50 = vmul.f32 %v1363_v48, %v6784_v23 }
 0x28c   :  { %v1395_v21 = vmul.f32 %v1363_v48, %v6789_v56  ;;  %v1399_v49 = vmul.f32 %v1363_v48, %v6794_v57  ;;  %v1131_v16 = vadd.f32 %v6603_v36, %v1035_v61  ;;  %v1135_v8 = vadd.f32 %v6613_v53, %v1039_v27  ;;  %v6843_v53 = vld [vmem:[%s10063_s4 + $0x398] sm:$0xff]  ;;  %v1351_v2 = vpop.permute.xlu1 %1350  ;;  %v10376_v61 = vld [vmem:[#allocation41_spill] sm:$0xff] }
 0x28d   :  { %v1139_v63 = vadd.f32 %v6617_v30, %v1043_v26  ;;  %v1143_v47 = vadd.f32 %v6621_v46, %v1047_v14  ;;  %v6826_v0 = vmul.f32 %v6693_v58, %v6630_v35  ;;  %v6830_v18 = vmul.f32 %v6693_v58, %v6635_v32  ;;  %v10377_v26 = vld [vmem:[#allocation43_spill] sm:$0xff] }
 0x28e   :  { %v6834_v12 = vmul.f32 %v6693_v58, %v6640_v59  ;;  %v6838_v36 = vmul.f32 %v6693_v58, %v6469_v43  ;;  %v1227_v30 = vadd.f32 %v6625_v62, %v1131_v16  ;;  %v1231_v46 = vadd.f32 %v6644_v6, %v1135_v8  ;;  %v6852_v59 = vld [vmem:[%s10063_s4 + $0x3b8] sm:$0xff] }
 0x28f   :  { %v1235_v35 = vadd.f32 %v6649_v11, %v1139_v63  ;;  %v1239_v32 = vadd.f32 %v6653_v52, %v1143_v47  ;;  %v6857_v43 = vld [vmem:[%s10063_s4 + $0x3d8] sm:$0xff]  ;;  %v6865_v6 = vmul.f32 %v1271_v33, %v6666_v40  ;;  %v6868_v52 = vmul.f32 %v1271_v33, %v6681_v37  ;;  %v791_v40 = vpop.permute.xlu2 %790 }
 0x290   :  { %v6862_v62 = vld [vmem:[%s10063_s4 + $0x3f8] sm:$0xff]  ;;  %v6871_v11 = vmul.f32 %v1271_v33, %v6686_v9  ;;  %v6874_v58 = vmul.f32 %v1271_v33, %v6691_v54  ;;  %v1323_v25 = vadd.f32 %v6657_v17, %v1227_v30  ;;  %v1327_v48 = vadd.f32 %v6661_v42, %v1231_v46  ;;  %v10382_v30 = vld [vmem:[#allocation28_spill] sm:$0xff] }
 0x291   :  { %v1331_v15 = vadd.f32 %v6670_v38, %v1235_v35  ;;  %v1335_v34 = vadd.f32 %v6697_v51, %v1239_v32  ;;  %v1372_v13 = vmul.f32 %v1351_v2, %v6843_v53  ;;  %v1376_v37 = vmul.f32 %v1351_v2, %v6852_v59  ;;  %v10380_v8 = vld [vmem:[#allocation11_spill] sm:$0xff]  ;;  %v10383_v35 = vld [vmem:[#allocation29_spill] sm:$0xff] }
 0x292   :  { %v1380_v9 = vmul.f32 %v1351_v2, %v6857_v43  ;;  %v1384_v4 = vmul.f32 %v1351_v2, %v6862_v62  ;;  %v6884_v54 = vadd.f32 %v1387_v3, %v1323_v25  ;;  %v6886_v33 = vadd.f32 %v1391_v50, %v1327_v48  ;;  %v10378_v3 = vld [vmem:[#allocation44_spill] sm:$0xff] }
 0x293   :  { %v6888_v17 = vadd.f32 %v1395_v21, %v1331_v15  ;;  %v6890_v42 = vadd.f32 %v1399_v49, %v1335_v34  ;;  %v6893_v38 = vadd.f32 %v1372_v13, %v6751_v41  ;;  %v6896_v51 = vadd.f32 %v1376_v37, %v6753_v31  ;;  %v10379_v21 = vld [vmem:[#allocation45_spill] sm:$0xff] }
 0x294   :  { %10368 = vst [vmem:[#allocation34_spill] sm:$0xff] %v6884_v54  ;;  %v6899_v7 = vadd.f32 %v1380_v9, %v6755_v28  ;;  %v6902_v20 = vadd.f32 %v1384_v4, %v6758_v5  ;;  %v812_v27 = vmul.f32 %v791_v40, %v10376_v61  ;;  %v816_v14 = vmul.f32 %v791_v40, %v10377_v26  ;;  %v10381_v5 = vld [vmem:[#allocation27_spill] sm:$0xff]  ;;  %v10384_v4 = vld [vmem:[#allocation10_spill] sm:$0xff] }
 0x295   :  { %10369 = vst [vmem:[#allocation35_spill] sm:$0xff] %v6886_v33  ;;  %v820_v50 = vmul.f32 %v791_v40, %v10378_v3  ;;  %v824_v49 = vmul.f32 %v791_v40, %v10379_v21  ;;  %v1440_v41 = vmul.f32 0.25, %v6896_v51  ;;  %v1436_v16 = vmul.f32 0.25, %v6893_v38  ;;  %v10385_v3 = vld [vmem:[#allocation42_spill] sm:$0xff]  ;;  %v10386_v21 = vld [vmem:[#allocation33_spill] sm:$0xff] }
 0x296   :  { %10370 = vst [vmem:[#allocation36_spill] sm:$0xff] %v6888_v17  ;;  %v1451_v31 = vmul.f32 0.25, %v6884_v54  ;;  %v1444_v28 = vmul.f32 0.25, %v6899_v7  ;;  %v844_v63 = vadd.f32 %v812_v27, %v10380_v8  ;;  %v848_v47 = vadd.f32 %v816_v14, %v10381_v5  ;;  %v10387_v5 = vld [vmem:[#allocation46_spill] sm:$0xff] }
 0x297   :  { %10371 = vst [vmem:[#allocation37_spill] sm:$0xff] %v6890_v42  ;;  %v852_v46 = vadd.f32 %v820_v50, %v10382_v30  ;;  %v856_v32 = vadd.f32 %v824_v49, %v10383_v35  ;;  %v1483_v2 = vsel %vm61_vm0, %v1440_v41, 0.0  ;;  %v1470_v25 = vsel %vm61_vm0, %v1436_v16, 0.0  ;;  %v1347_v9 = vpop.permute.xlu2 %1346 }
 0x298   :  { %10372 = vst [vmem:[#allocation38_spill] sm:$0xff] %v6893_v38  ;;  %v1520_v48 = vsel %vm61_vm0, %v1451_v31, 0.0  ;;  %v1496_v15 = vsel %vm61_vm0, %v1444_v28, 0.0  ;;  %v940_v34 = vadd.f32 %v6765_v45, %v844_v63  ;;  %v944_v40 = vadd.f32 %v6768_v19, %v848_v47 }
 0x299   :  { %10373 = vst [vmem:[#allocation39_spill] sm:$0xff] %v6896_v51  ;;  %v948_v13 = vadd.f32 %v6771_v1, %v852_v46  ;;  %v952_v37 = vadd.f32 %v6774_v22, %v856_v32  ;;  %v6925_v61 = vadd.f32 %v1520_v48, %v10384_v4  ;;  %v1455_v27 = vmul.f32 0.25, %v6886_v33 }
 0x29a   :  { %10374 = vst [vmem:[#allocation40_spill] sm:$0xff] %v6899_v7  ;;  %v1459_v26 = vmul.f32 0.25, %v6888_v17  ;;  %v1463_v14 = vmul.f32 0.25, %v6890_v42  ;;  %v1036_v50 = vadd.f32 %v10385_v3, %v940_v34  ;;  %v1040_v45 = vadd.f32 %v10386_v21, %v944_v40  ;;  %v10395_v21 = vld [vmem:[#allocation59_spill] sm:$0xff] }
 0x29b   :  { %10375 = vst [vmem:[#allocation5_spill] sm:$0xff] %v6902_v20  ;;  %v1044_v19 = vadd.f32 %v6741_v29, %v948_v13  ;;  %v1048_v1 = vadd.f32 %v6745_v39, %v952_v37  ;;  %v1371_v22 = vmul.f32 %v1347_v9, %v6779_v55  ;;  %v1375_v49 = vmul.f32 %v1347_v9, %v6784_v23  ;;  %v10388_v39 = vld [vmem:[#allocation47_spill] sm:$0xff]  ;;  %v10389_v55 = vld [vmem:[#allocation48_spill] sm:$0xff]  ;;  %v10392_v37 = vld [vmem:[#allocation9_spill] sm:$0xff] }
 0x29c   :  { %v1379_v41 = vmul.f32 %v1347_v9, %v6789_v56  ;;  %v1383_v16 = vmul.f32 %v1347_v9, %v6794_v57  ;;  %v1132_v31 = vadd.f32 %v6802_v24, %v1036_v50  ;;  %v1136_v28 = vadd.f32 %v6806_v60, %v1040_v45  ;;  %v10390_v56 = vld [vmem:[#allocation49_spill] sm:$0xff] }
 0x29d   :  { %v1140_v8 = vadd.f32 %v6810_v10, %v1044_v19  ;;  %v1144_v63 = vadd.f32 %v6814_v44, %v1048_v1  ;;  %v6943_v29 = vadd.f32 %v1371_v22, %v10387_v5  ;;  %v6946_v47 = vadd.f32 %v1375_v49, %v10388_v39 }
 0x29e   :  { %v6949_v23 = vadd.f32 %v1379_v41, %v10389_v55  ;;  %v6952_v30 = vadd.f32 %v1383_v16, %v10390_v56  ;;  %v1228_v57 = vadd.f32 %v6826_v0, %v1132_v31  ;;  %v1232_v24 = vadd.f32 %v6830_v18, %v1136_v28 }
 0x29f   :  { %v1236_v60 = vadd.f32 %v6834_v12, %v1140_v8  ;;  %v1240_v10 = vadd.f32 %v6838_v36, %v1144_v63  ;;  %v1439_v44 = vmul.f32 0.25, %v6946_v47  ;;  %v1435_v46 = vmul.f32 0.25, %v6943_v29  ;;  %v1367_v40 = vpop.permute.xlu2 %1366 }
 0x2a0   :  { %10391 = vst [vmem:[#allocation7_spill] sm:$0xff] %v6952_v30  ;;  %v1443_v35 = vmul.f32 0.25, %v6949_v23  ;;  %v1533_v32 = vsel %vm61_vm0, %v1455_v27, 0.0  ;;  %v1324_v48 = vadd.f32 %v6865_v6, %v1228_v57  ;;  %v1328_v34 = vadd.f32 %v6868_v52, %v1232_v24 }
 0x2a1   :  { %v1332_v0 = vadd.f32 %v6871_v11, %v1236_v60  ;;  %v1336_v18 = vadd.f32 %v6874_v58, %v1240_v10  ;;  %v1481_v12 = vsel %vm61_vm0, %v1439_v44, 0.0  ;;  %v1468_v36 = vsel %vm61_vm0, %v1435_v46, 0.0  ;;  %v10393_v11 = vld [vmem:[#allocation57_spill] sm:$0xff]  ;;  %v10394_v58 = vld [vmem:[#allocation58_spill] sm:$0xff] }
 0x2a2   :  { %v1494_v13 = vsel %vm61_vm0, %v1443_v35, 0.0  ;;  %v1534_v9 = vadd.f32 %v1533_v32, %v10392_v37  ;;  %v1388_v4 = vmul.f32 %v1367_v40, %v6843_v53  ;;  %v1392_v27 = vmul.f32 %v1367_v40, %v6852_v59 }
 0x2a3   :  { %v1396_v6 = vmul.f32 %v1367_v40, %v6857_v43  ;;  %v1400_v52 = vmul.f32 %v1367_v40, %v6862_v62  ;;  %v1482_v3 = vadd.f32 %v1481_v12, %v10393_v11  ;;  %v1469_v50 = vadd.f32 %v1468_v36, %v10394_v58  ;;  %v10400_v62 = vld [vmem:[#allocation23_spill] sm:$0xff] }
 0x2a4   :  { %v1495_v45 = vadd.f32 %v1494_v13, %v10395_v21  ;;  %v1546_v19 = vsel %vm61_vm0, %v1459_v26, 0.0  ;;  %v6978_v1 = vadd.f32 %v1388_v4, %v1324_v48  ;;  %v6980_v22 = vadd.f32 %v1392_v27, %v1328_v34 }
 0x2a5   :  { %v6982_v49 = vadd.f32 %v1396_v6, %v1332_v0  ;;  %v6984_v53 = vadd.f32 %v1400_v52, %v1336_v18  ;;  %v1484_v59 = vadd.f32 %v1483_v2, %v1482_v3  ;;  %v1471_v43 = vadd.f32 %v1470_v25, %v1469_v50 }
 0x2a6   :  { %10396 = vst [vmem:[#allocation8_spill] sm:$0xff] %v6978_v1  ;;  %v1497_v41 = vadd.f32 %v1496_v15, %v1495_v45  ;;  %v1547_v16 = vadd.f32 %v1546_v19, %v10400_v62  ;;  %v1452_v31 = vmul.f32 0.25, %v6978_v1  ;;  %v1456_v28 = vmul.f32 0.25, %v6980_v22  ;;  %v10401_v15 = vld [vmem:[#allocation61_spill] sm:$0xff] }
 0x2a7   :  { %10397 = vst [vmem:[#allocation24_spill] sm:$0xff] %v6980_v22  ;;  %v1460_v8 = vmul.f32 0.25, %v6982_v49  ;;  %v1464_v26 = vmul.f32 0.25, %v6984_v53  ;;  %v1485_v63 = vrot.slane %v1484_v59, 4  ;;  %v1472_v5 = vrot.slane %v1471_v43, 4 }
 0x2a8   :  { %10398 = vst [vmem:[#allocation14_spill] sm:$0xff] %v6982_v49  ;;  %v1498_v39 = vrot.slane %v1497_v41, 4  ;;  %v1559_v55 = vsel %vm61_vm0, %v1463_v14, 0.0  ;;  %v1522_v56 = vsel %vm61_vm0, %v1452_v31, 0.0  ;;  %v1535_v2 = vsel %vm61_vm0, %v1456_v28, 0.0 }
 0x2a9   :  { %10399 = vst [vmem:[#allocation15_spill] sm:$0xff] %v6984_v53  ;;  %v1548_v25 = vsel %vm61_vm0, %v1460_v8, 0.0  ;;  %v1560_v57 = vadd.f32 %v1559_v55, %v10401_v15  ;;  %v1486_v24 = vadd.f32 %v1485_v63, %v1484_v59  ;;  %v1473_v60 = vadd.f32 %v1472_v5, %v1471_v43  ;;  %v10402_v43 = vld [vmem:[#allocation60_spill] sm:$0xff] }
 0x2aa   :  { %v1523_v10 = vadd.f32 %v1522_v56, %v6925_v61  ;;  %v1499_v44 = vadd.f32 %v1498_v39, %v1497_v41  ;;  %v1536_v46 = vadd.f32 %v1535_v2, %v1534_v9  ;;  %v1549_v35 = vadd.f32 %v1548_v25, %v1547_v16 }
 0x2ab   :  { %v1561_v32 = vsel %vm61_vm0, %v1464_v26, 0.0  ;;  %v1447_v48 = vmul.f32 0.25, %v6952_v30  ;;  %v1487_v14 = vrot.slane %v1486_v24, 2  ;;  %v1474_v34 = vrot.slane %v1473_v60, 2 }
 0x2ac   :  { %v1524_v0 = vrot.slane %v1523_v10, 4  ;;  %v1500_v18 = vrot.slane %v1499_v44, 2  ;;  %v1537_v40 = vrot.slane %v1536_v46, 4  ;;  %v1550_v12 = vrot.slane %v1549_v35, 4 }
 0x2ad   :  { %v1562_v36 = vadd.f32 %v1561_v32, %v1560_v57  ;;  %v1448_v13 = vmul.f32 0.25, %v6902_v20  ;;  %v1488_v37 = vadd.f32 %v1487_v14, %v1486_v24  ;;  %v1475_v4 = vadd.f32 %v1474_v34, %v1473_v60 }
 0x2ae   :  { %v1525_v27 = vadd.f32 %v1524_v0, %v1523_v10  ;;  %v1501_v61 = vadd.f32 %v1500_v18, %v1499_v44  ;;  %v1538_v6 = vadd.f32 %v1537_v40, %v1536_v46  ;;  %v1551_v9 = vadd.f32 %v1550_v12, %v1549_v35 }
 0x2af   :  { %v1563_v52 = vrot.slane %v1562_v36, 4  ;;  %v1507_v11 = vsel %vm61_vm0, %v1447_v48, 0.0  ;;  %v1489_v3 = vrot.slane %v1488_v37, 1  ;;  %v1476_v58 = vrot.slane %v1475_v4, 1 }
 0x2b0   :  { %v1526_v50 = vrot.slane %v1525_v27, 2  ;;  %v1502_v21 = vrot.slane %v1501_v61, 1  ;;  %v1539_v45 = vrot.slane %v1538_v6, 2  ;;  %v1552_v19 = vrot.slane %v1551_v9, 2 }
 0x2b1   :  { %v1564_v59 = vadd.f32 %v1563_v52, %v1562_v36  ;;  %v1508_v41 = vadd.f32 %v1507_v11, %v10402_v43  ;;  %v7002_v62 = vadd.f32 %v1489_v3, %v1488_v37  ;;  %v7004_v16 = vadd.f32 %v1476_v58, %v1475_v4 }
 0x2b2   :  { %v1527_v31 = vadd.f32 %v1526_v50, %v1525_v27  ;;  %v1540_v28 = vadd.f32 %v1539_v45, %v1538_v6  ;;  %v1553_v8 = vadd.f32 %v1552_v19, %v1551_v9  ;;  %v1509_v55 = vsel %vm61_vm0, %v1448_v13, 0.0 }
 0x2b3   :  { %v1565_v26 = vrot.slane %v1564_v59, 2  ;;  %v1570_v63 = vmul.f32 %v7002_v62, %v7002_v62  ;;  %v1569_v5 = vmul.f32 %v7004_v16, %v7004_v16  ;;  %v7011_v56 = vadd.f32 %v1502_v21, %v1501_v61 }
 0x2b4   :  { %v1528_v39 = vrot.slane %v1527_v31, 1  ;;  %v1541_v2 = vrot.slane %v1540_v28, 1  ;;  %v1554_v25 = vrot.slane %v1553_v8, 1  ;;  %v1510_v15 = vadd.f32 %v1509_v55, %v1508_v41 }
 0x2b5   :  { %v1580_v57 = vsel %vm61_vm0, %v1570_v63, 0.0  ;;  %v1577_v24 = vsel %vm61_vm0, %v1569_v5, 0.0  ;;  %v1566_v10 = vadd.f32 %v1565_v26, %v1564_v59  ;;  %v1571_v32 = vmul.f32 %v7011_v56, %v7011_v56 }
 0x2b6   :  { %v7015_v60 = vadd.f32 %v1528_v39, %v1527_v31  ;;  %1581 = vadd.xlane.f32.xlu1 %v1580_v57  ;;  %1578 = vadd.xlane.f32.xlu0 %v1577_v24  ;;  %v7017_v44 = vadd.f32 %v1541_v2, %v1540_v28  ;;  %v1511_v46 = vrot.slane %v1510_v15, 4  ;;  %v7026_v0 = vadd.f32 %v1554_v25, %v1553_v8 }
 0x2b7   :  { %v1567_v18 = vrot.slane %v1566_v10, 1  ;;  %v1583_v36 = vsel %vm61_vm0, %v1571_v32, 0.0 }
 0x2b8   :  { %v1573_v35 = vmul.f32 %v7015_v60, %v7015_v60  ;;  %v1512_v48 = vadd.f32 %v1511_v46, %v1510_v15  ;;  %v1574_v34 = vmul.f32 %v7017_v44, %v7017_v44  ;;  %v1575_v37 = vmul.f32 %v7026_v0, %v7026_v0 }
 0x2b9   :  { %v7032_v4 = vadd.f32 %v1567_v18, %v1566_v10 }
 0x2ba   :  { %v1589_v14 = vsel %vm61_vm0, %v1573_v35, 0.0  ;;  %v1513_v40 = vrot.slane %v1512_v48, 2  ;;  %v1592_v13 = vsel %vm61_vm0, %v1574_v34, 0.0  ;;  %v1595_v6 = vsel %vm61_vm0, %v1575_v37, 0.0 }
 0x2bb   :  { %1590 = vadd.xlane.f32.xlu2 %v1589_v14  ;;  %10403 = vst [vmem:[#allocation16_spill] sm:$0xff] %v7032_v4  ;;  %v1576_v9 = vmul.f32 %v7032_v4, %v7032_v4 }
 0x2bc   :  { %v1514_v12 = vadd.f32 %v1513_v40, %v1512_v48 }
 0x2bd   :  { %v1598_v11 = vsel %vm61_vm0, %v1576_v9, 0.0 }
 0x2be   :  { %1584 = vadd.xlane.f32.xlu1 %v1583_v36  ;;  %1593 = vadd.xlane.f32.xlu0 %v1592_v13  ;;  %v1515_v27 = vrot.slane %v1514_v12, 1 }
 0x2c0   :  { %v7034_v61 = vadd.f32 %v1515_v27, %v1514_v12 }
 0x2c2   :  { %v1572_v52 = vmul.f32 %v7034_v61, %v7034_v61 }
 0x2c3   :  { %1596 = vadd.xlane.f32.xlu2 %v1595_v6 }
 0x2c4   :  { %v1586_v3 = vsel %vm61_vm0, %v1572_v52, 0.0 }
 0x2c6   :  { %1599 = vadd.xlane.f32.xlu1 %v1598_v11  ;;  %1587 = vadd.xlane.f32.xlu0 %v1586_v3 }
 0x329   :  { %v7043_v58 = vpop.xlane.xlu1 %1581  ;;  %v7045_v50 = vpop.xlane.xlu0 %1578 }
 0x32a   :  { %4598 = vrsqrt.f32 %v7043_v58  ;;  %v7053_v59 = vadd.f32 1.0, %v7043_v58  ;;  %v7067_v2 = vadd.f32 1.0, %v7045_v50  ;;  %vm1756_vm7 = vcmp.eq.f32.partialorder %v7043_v58, inf }
 0x32b   :  { %4600 = vrsqrt.f32 %v7045_v50  ;;  %vm1758_vm8 = vcmp.eq.f32.partialorder %v7043_v58, 0.0  ;;  %v1759_v12 = vand.u32 2147483648, %v7043_v58  ;;  %vm1744_vm9 = vcmp.eq.f32.partialorder %v7045_v50, inf }
 0x32c   :  { %v1635_v13 = vand.u32 2147483648, %v7053_v59  ;;  %vm1629_vm10 = vweird.f32 %v7053_v59  ;;  %vm1746_vm11 = vcmp.eq.f32.partialorder %v7045_v50, 0.0  ;;  %vm1614_vm3 = vweird.f32 %v7067_v2 }
 0x32e   :  { %v7049_v21 = vpop.xlane.xlu2 %1590 }
 0x32f   :  { %4602 = vrsqrt.f32 %v7049_v21  ;;  %v7090_v6 = vadd.f32 1.0, %v7049_v21  ;;  %vm1792_vm12 = vcmp.eq.f32.partialorder %v7049_v21, inf  ;;  %vm1794_vm1 = vcmp.eq.f32.partialorder %v7049_v21, 0.0 }
 0x330   :  { %v4599_v45 = vpop.eup %4598 }
 0x331   :  { %v4601_v19 = vpop.eup %4600  ;;  %v1750_v43 = vmul.f32 %v4599_v45, %v7043_v58  ;;  %v7056_v41 = vpop.xlane.xlu1 %1584 }
 0x332   :  { %v1738_v31 = vmul.f32 %v4601_v19, %v7045_v50  ;;  %4604 = vrsqrt.f32 %v7056_v41  ;;  %v7060_v8 = vpop.xlane.xlu0 %1593  ;;  %v7098_v3 = vadd.f32 1.0, %v7056_v41  ;;  %vm1768_vm13 = vcmp.eq.f32.partialorder %v7056_v41, inf }
 0x333   :  { %v1751_v28 = vmul.f32 %v4599_v45, %v1750_v43  ;;  %4606 = vrcp.f32 %v7053_v59  ;;  %vm1770_vm2 = vcmp.eq.f32.partialorder %v7056_v41, 0.0  ;;  %vm1804_vm5 = vcmp.eq.f32.partialorder %v7060_v8, inf }
 0x334   :  { %v1739_v63 = vmul.f32 %v4601_v19, %v1738_v31  ;;  %4608 = vrsqrt.f32 %v7060_v8  ;;  %v1633_v31 = vand.u32 2147483647, %v7053_v59 }
 0x335   :  { %v4603_v26 = vpop.eup %4602  ;;  %v1752_v5 = vmul.f32 0.5, %v1751_v28 }
 0x336   :  { %v1786_v39 = vmul.f32 %v4603_v26, %v7049_v21  ;;  %v7064_v55 = vpop.xlane.xlu2 %1596  ;;  %v1740_v25 = vmul.f32 0.5, %v1739_v63  ;;  %vm7135_vm14 = vcmp.eq.f32.partialorder %v1633_v31, 8.507059e+37 }
 0x337   :  { %v1753_v15 = vsub.f32 1.5, %v1752_v5  ;;  %4610 = vrsqrt.f32 %v7064_v55  ;;  %v7106_v5 = vadd.f32 1.0, %v7060_v8 }
 0x338   :  { %v1787_v57 = vmul.f32 %v4603_v26, %v1786_v39  ;;  %v4605_v24 = vpop.eup %4604  ;;  %4612 = vrcp.f32 %v7067_v2  ;;  %v1741_v32 = vsub.f32 1.5, %v1740_v25 }
 0x339   :  { %v1754_v10 = vmul.f32 %v4599_v45, %v1753_v15  ;;  %v1762_v46 = vmul.f32 %v4605_v24, %v7056_v41  ;;  %v7072_v35 = vpop.xlane.xlu1 %1599  ;;  %v7076_v48 = vpop.eup %4606 }
 0x33a   :  { %v1788_v34 = vmul.f32 0.5, %v1787_v57  ;;  %4614 = vrsqrt.f32 %v7072_v35  ;;  %v7080_v40 = vpop.eup %4608  ;;  %v7094_v11 = vpop.xlane.xlu0 %1587  ;;  %v1625_v43 = vmul.f32 %v7076_v48, %v7053_v59  ;;  %v1742_v28 = vmul.f32 %v4601_v19, %v1741_v32 }
 0x33b   :  { %v1755_v14 = vmul.f32 %v1754_v10, %v7043_v58  ;;  %v1763_v18 = vmul.f32 %v4605_v24, %v1762_v46  ;;  %v1798_v52 = vmul.f32 %v7080_v40, %v7060_v8  ;;  %4616 = vrsqrt.f32 %v7094_v11 }
 0x33c   :  { %v1789_v63 = vsub.f32 1.5, %v1788_v34  ;;  %4618 = vrcp.f32 %v7090_v6  ;;  %v7121_v32 = vor.u32 1.1754944e-38, %v1635_v13  ;;  %vm1630_vm15 = vweird.f32 %v7076_v48 }
 0x33d   :  { %v7086_v37 = vpop.eup %4610  ;;  %v1757_v27 = vsel %vm1756_vm7, %v7043_v58, %v1755_v14  ;;  %v1764_v9 = vmul.f32 0.5, %v1763_v18  ;;  %v1799_v39 = vmul.f32 %v7080_v40, %v1798_v52  ;;  %v1618_v14 = vand.u32 2147483647, %v7067_v2  ;;  %vm7177_vm4 = vmor %vm1629_vm10, %vm1630_vm15 }
 0x33e   :  { %v1810_v45 = vmul.f32 %v7086_v37, %v7064_v55  ;;  %v7109_v25 = vpop.eup %4612  ;;  %v1760_v15 = vsel %vm1758_vm8, %v1759_v12, %v1757_v27  ;;  %4620 = vrcp.f32 %v7098_v3  ;;  %v1626_v18 = vsub.f32 1.0, %v1625_v43 }
 0x33f   :  { %v1765_v10 = vsub.f32 1.5, %v1764_v9  ;;  %v1800_v34 = vmul.f32 0.5, %v1799_v39  ;;  %v1743_v27 = vmul.f32 %v1742_v28, %v7045_v50  ;;  %v1790_v9 = vmul.f32 %v4603_v26, %v1789_v63 }
 0x340   :  { %v7116_v46 = vpop.eup %4614  ;;  %v1811_v19 = vmul.f32 %v7086_v37, %v1810_v45  ;;  %4622 = vrcp.f32 %v7106_v5  ;;  %v7130_v52 = vadd.f32 1e-08, %v1760_v15  ;;  %v1627_v57 = vmul.f32 %v7076_v48, %v1626_v18 }
 0x341   :  { %v1766_v13 = vmul.f32 %v4605_v24, %v1765_v10  ;;  %v1822_v45 = vmul.f32 %v7116_v46, %v7072_v35  ;;  %v1610_v43 = vmul.f32 %v7109_v25, %v7067_v2  ;;  %v7143_v28 = vadd.f32 1.0, %v7064_v55  ;;  %v4617_v24 = vpop.eup %4616 }
 0x342   :  { %v1812_v63 = vmul.f32 0.5, %v1811_v19  ;;  %4624 = vrcp.f32 %v7130_v52  ;;  %v1801_v15 = vsub.f32 1.5, %v1800_v34  ;;  %v7147_v10 = vadd.f32 1.0, %v7072_v35  ;;  %v7151_v18 = vpop.eup %4618 }
 0x343   :  { %v1628_v31 = vadd.f32 %v7076_v48, %v1627_v57  ;;  %v1745_v12 = vsel %vm1744_vm9, %v7045_v50, %v1743_v27  ;;  %v1791_v26 = vmul.f32 %v1790_v9, %v7049_v21  ;;  %v7158_v19 = vadd.f32 1.0, %v7094_v11 }
 0x344   :  { %v1774_v34 = vmul.f32 %v4617_v24, %v7094_v11  ;;  %v7161_v36 = vpop.eup %4620  ;;  %v1767_v57 = vmul.f32 %v1766_v13, %v7056_v41  ;;  %v1823_v20 = vmul.f32 %v7116_v46, %v1822_v45  ;;  %v1611_v27 = vsub.f32 1.0, %v1610_v43 }
 0x345   :  { %4626 = vrcp.f32 %v7143_v28  ;;  %v1813_v49 = vsub.f32 1.5, %v1812_v63  ;;  %v10408_v45 = vand.u32 2147483648, %v7045_v50  ;;  %v1802_v53 = vmul.f32 %v7080_v40, %v1801_v15 }
 0x346   :  { %v7169_v9 = vpop.eup %4622  ;;  %v1775_v1 = vmul.f32 %v4617_v24, %v1774_v34  ;;  %4628 = vrcp.f32 %v7147_v10  ;;  %v1632_v63 = vsel %vm7177_vm4, %v7076_v48, %v1628_v31  ;;  %v1793_v59 = vsel %vm1792_vm12, %v7049_v21, %v1791_v26 }
 0x347   :  { %v1748_v43 = vsel %vm1746_vm11, %v10408_v45, %v1745_v12  ;;  %4630 = vrcp.f32 %v7158_v19  ;;  %vm1615_vm6 = vweird.f32 %v7109_v25  ;;  %v1769_v40 = vsel %vm1768_vm13, %v7056_v41, %v1767_v57 }
 0x348   :  { %v4625_v34 = vpop.eup %4624  ;;  %v1776_v42 = vmul.f32 0.5, %v1775_v1  ;;  %v1824_v12 = vmul.f32 0.5, %v1823_v20  ;;  %vm1780_vm7 = vcmp.eq.f32.partialorder %v7094_v11, inf  ;;  %v1612_v15 = vmul.f32 %v7109_v25, %v1611_v27  ;;  %vm7244_vm12 = vmor %vm1614_vm3, %vm1615_vm6 }
 0x349   :  { %v1857_v48 = vmul.f32 %v4625_v34, %v7130_v52  ;;  %vm7202_vm8 = vcmp.eq.f32.partialorder %v1618_v14, 8.507059e+37  ;;  %v1814_v31 = vmul.f32 %v7086_v37, %v1813_v49  ;;  %v1637_v13 = vsel %vm7135_vm14, %v7121_v32, %v1632_v63 }
 0x34a   :  { %v1777_v1 = vsub.f32 1.5, %v1776_v42  ;;  %v7210_v45 = vadd.f32 1e-08, %v1748_v43  ;;  %v1803_v20 = vmul.f32 %v1802_v53, %v7060_v8  ;;  %v1613_v4 = vadd.f32 %v7109_v25, %v1612_v15 }
 0x34b   :  { %v1858_v57 = vsub.f32 1.0, %v1857_v48  ;;  %v1640_v14 = vmul.f32 %v7161_v36, %v7098_v3  ;;  %v7216_v27 = vpop.eup %4626  ;;  %v1865_v49 = vand.u32 2147483647, %v7130_v52  ;;  %v1867_v42 = vand.u32 2147483648, %v7130_v52 }
 0x34c   :  { %v1778_v17 = vmul.f32 %v4617_v24, %v1777_v1  ;;  %4632 = vrcp.f32 %v7210_v45  ;;  %v7221_v37 = vpop.eup %4628  ;;  %vm1806_vm9 = vcmp.eq.f32.partialorder %v7060_v8, 0.0  ;;  %vm1782_vm10 = vcmp.eq.f32.partialorder %v7094_v11, 0.0 }
 0x34d   :  { %v1638_v53 = vmul.f32 %v1637_v13, %v7043_v58  ;;  %v1859_v32 = vmul.f32 %v4625_v34, %v1858_v57  ;;  %vm1862_vm11 = vweird.f32 %v4625_v34  ;;  %v1641_v39 = vsub.f32 1.0, %v1640_v14  ;;  %v7226_v43 = vpop.eup %4630 }
 0x34e   :  { %v10411_v24 = vand.u32 2147483648, %v7049_v21  ;;  %v10412_v48 = vand.u32 2147483648, %v7056_v41  ;;  %v1779_v1 = vmul.f32 %v1778_v17, %v7094_v11  ;;  %v1783_v58 = vand.u32 2147483648, %v7094_v11 }
 0x34f   :  { %vm1816_vm13 = vcmp.eq.f32.partialorder %v7064_v55, inf  ;;  %vm1861_vm14 = vweird.f32 %v7130_v52  ;;  %v1642_v17 = vmul.f32 %v7161_v36, %v1641_v39  ;;  %v1815_v57 = vmul.f32 %v1814_v31, %v7064_v55 }
 0x350   :  { %v7232_v63 = vsel %vm1794_vm1, %v10411_v24, %v1793_v59  ;;  %v1772_v15 = vsel %vm1770_vm2, %v10412_v48, %v1769_v40  ;;  %v1860_v59 = vadd.f32 %v4625_v34, %v1859_v32  ;;  %v1617_v40 = vsel %vm7244_vm12, %v7109_v25, %v1613_v4  ;;  %vm1863_vm15 = vmor %vm1861_vm14, %vm1862_vm11 }
 0x351   :  { %v1825_v14 = vsub.f32 1.5, %v1824_v12  ;;  %v1868_v24 = vor.u32 1.1754944e-38, %v1867_v42  ;;  %v10415_v48 = vand.u32 2147483648, %v7067_v2  ;;  %v1805_v32 = vsel %vm1804_vm5, %v7060_v8, %v1803_v20 }
 0x352   :  { %v1730_v52 = vmul.f32 %v1638_v53, %v7002_v62  ;;  %v1864_v33 = vsel %vm1863_vm15, %v4625_v34, %v1860_v59  ;;  %vm1866_vm1 = vcmp.eq.f32.partialorder %v1865_v49, 8.507059e+37  ;;  %v4633_v4 = vpop.eup %4632  ;;  %v1781_v25 = vsel %vm1780_vm7, %v7094_v11, %v1779_v1 }
 0x353   :  { %v1621_v22 = vor.u32 1.1754944e-38, %v10415_v48  ;;  %v1869_v12 = vsel %vm1866_vm1, %v1868_v24, %v1864_v33  ;;  %v7267_v42 = vadd.f32 1e-08, %v1772_v15  ;;  %v1842_v39 = vmul.f32 %v4633_v4, %v7210_v45  ;;  %v10416_v33 = vld [vmem:[#allocation51_spill] sm:$0xff] }
 0x354   :  { %v7269_v2 = vmul.f32 %v1869_v12, %v1730_v52  ;;  %v1643_v20 = vadd.f32 %v7161_v36, %v1642_v17  ;;  %vm1645_vm2 = vweird.f32 %v7161_v36  ;;  %v1826_v62 = vmul.f32 %v7116_v46, %v1825_v14 }
 0x355   :  { %v1622_v31 = vsel %vm7202_vm8, %v1621_v22, %v1617_v40  ;;  %v1852_v34 = vand.u32 2147483648, %v7210_v45  ;;  %v1650_v49 = vand.u32 2147483648, %v7098_v3  ;;  %4634 = vrcp.f32 %v7267_v42 }
 0x356   :  { %v1965_v22 = vmul.f32 %v7269_v2, %v10416_v33  ;;  %v1843_v26 = vsub.f32 1.0, %v1842_v39  ;;  %vm1644_vm3 = vweird.f32 %v7098_v3  ;;  %v1648_v53 = vand.u32 2147483647, %v7098_v3 }
 0x357   :  { %v10417_v15 = vand.u32 2147483648, %v7060_v8  ;;  %v1784_v46 = vsel %vm1782_vm10, %v1783_v58, %v1781_v25  ;;  %v1623_v13 = vmul.f32 %v1622_v31, %v7045_v50  ;;  %v1850_v59 = vand.u32 2147483647, %v7210_v45  ;;  %vm7292_vm4 = vmor %vm1644_vm3, %vm1645_vm2 }
 0x358   :  { %v2005_v17 = vsel %vm61_vm0, %v1965_v22, 0.0  ;;  %v1844_v3 = vmul.f32 %v4633_v4, %v1843_v26  ;;  %vm1847_vm5 = vweird.f32 %v4633_v4  ;;  %v1647_v14 = vsel %vm7292_vm4, %v7161_v36, %v1643_v20 }
 0x359   :  { %v7286_v1 = vsel %vm1806_vm9, %v10417_v15, %v1805_v32  ;;  %v7303_v58 = vsel %vm1816_vm13, %v7064_v55, %v1815_v57  ;;  %v7306_v50 = vmul.f32 %v1826_v62, %v7072_v35  ;;  %2006 = vadd.xlane.f32.xlu1 %v2005_v17  ;;  %v1651_v24 = vor.u32 1.1754944e-38, %v1650_v49 }
 0x35a   :  { %v1655_v48 = vmul.f32 %v7226_v43, %v7158_v19  ;;  %v1845_v32 = vadd.f32 %v4633_v4, %v1844_v3  ;;  %vm1846_vm6 = vweird.f32 %v7210_v45  ;;  %v1853_v52 = vor.u32 1.1754944e-38, %v1852_v34 }
 0x35b   :  { %vm1649_vm7 = vcmp.eq.f32.partialorder %v1648_v53, 8.507059e+37  ;;  %v4635_v25 = vpop.eup %4634  ;;  %vm1848_vm8 = vmor %vm1846_vm6, %vm1847_vm5  ;;  %v7311_v31 = vadd.f32 1e-08, %v1784_v46  ;;  %v1670_v57 = vmul.f32 %v7151_v18, %v7090_v6  ;;  %v1729_v39 = vmul.f32 %v1623_v13, %v7004_v16  ;;  %v10420_v46 = vld [vmem:[#allocation30_spill] sm:$0xff] }
 0x35c   :  { %v1652_v36 = vsel %vm1649_vm7, %v1651_v24, %v1647_v14  ;;  %v1656_v12 = vsub.f32 1.0, %v1655_v48  ;;  %v1849_v20 = vsel %vm1848_vm8, %v4633_v4, %v1845_v32  ;;  %vm1851_vm9 = vcmp.eq.f32.partialorder %v1850_v59, 8.507059e+37  ;;  %v10421_v59 = vld [vmem:[#allocation17_spill] sm:$0xff] }
 0x35d   :  { %v1872_v62 = vmul.f32 %v4635_v25, %v7267_v42  ;;  %v1854_v49 = vsel %vm1851_vm9, %v1853_v52, %v1849_v20  ;;  %v1880_v45 = vand.u32 2147483647, %v7267_v42  ;;  %4636 = vrcp.f32 %v7311_v31 }
 0x35e   :  { %v1657_v34 = vmul.f32 %v7226_v43, %v1656_v12  ;;  %v7320_v22 = vmul.f32 %v1854_v49, %v1729_v39  ;;  %v1653_v26 = vmul.f32 %v1652_v36, %v7056_v41  ;;  %v1882_v15 = vand.u32 2147483648, %v7267_v42  ;;  %v10422_v41 = vld [vmem:[#allocation31_spill] sm:$0xff] }
 0x35f   :  { %v1873_v53 = vsub.f32 1.0, %v1872_v62  ;;  %vm1877_vm10 = vweird.f32 %v4635_v25  ;;  %vm1660_vm11 = vweird.f32 %v7226_v43  ;;  %v1671_v4 = vsub.f32 1.0, %v1670_v57 }
 0x360   :  { %v1658_v16 = vadd.f32 %v7226_v43, %v1657_v34  ;;  %v1962_v13 = vmul.f32 %v7320_v22, %v10420_v46  ;;  %v1961_v40 = vmul.f32 %v7320_v22, %v10421_v59  ;;  %v1963_v17 = vmul.f32 %v7320_v22, %v6943_v29 }
 0x361   :  { %v1874_v3 = vmul.f32 %v4635_v25, %v1873_v53  ;;  %v1966_v14 = vmul.f32 %v7269_v2, %v10422_v41  ;;  %vm1659_vm12 = vweird.f32 %v7158_v19  ;;  %v1663_v24 = vand.u32 2147483647, %v7158_v19 }
 0x362   :  { %v1665_v48 = vand.u32 2147483648, %v7158_v19  ;;  %v1996_v32 = vsel %vm61_vm0, %v1962_v13, 0.0  ;;  %v1993_v52 = vsel %vm61_vm0, %v1961_v40, 0.0  ;;  %vm1876_vm13 = vweird.f32 %v7267_v42  ;;  %vm7340_vm14 = vmor %vm1659_vm12, %vm1660_vm11 }
 0x363   :  { %v1875_v36 = vadd.f32 %v4635_v25, %v1874_v3  ;;  %v4637_v57 = vpop.eup %4636  ;;  %1997 = vadd.xlane.f32.xlu0 %v1996_v32  ;;  %1994 = vadd.xlane.f32.xlu2 %v1993_v52  ;;  %v1999_v39 = vsel %vm61_vm0, %v1963_v17, 0.0  ;;  %v1731_v20 = vmul.f32 %v1653_v26, %v7011_v56  ;;  %vm1878_vm15 = vmor %vm1876_vm13, %vm1877_vm10  ;;  %vm1881_vm1 = vcmp.eq.f32.partialorder %v1880_v45, 8.507059e+37  ;;  %v10426_v17 = vld [vmem:[#allocation32_spill] sm:$0xff] }
 0x364   :  { %v1883_v19 = vor.u32 1.1754944e-38, %v1882_v15  ;;  %vm1818_vm2 = vcmp.eq.f32.partialorder %v7064_v55, 0.0  ;;  %2000 = vadd.xlane.f32.xlu1 %v1999_v39  ;;  %v1662_v42 = vsel %vm7340_vm14, %v7226_v43, %v1658_v16  ;;  %v1887_v49 = vmul.f32 %v4637_v57, %v7311_v31 }
 0x365   :  { %v1879_v62 = vsel %vm1878_vm15, %v4635_v25, %v1875_v36  ;;  %v1672_v34 = vmul.f32 %v7151_v18, %v1671_v4  ;;  %v2008_v13 = vsel %vm61_vm0, %v1966_v14, 0.0  ;;  %vm1664_vm3 = vcmp.eq.f32.partialorder %v1663_v24, 8.507059e+37  ;;  %v10425_v4 = vld [vmem:[#allocation52_spill] sm:$0xff] }
 0x366   :  { %v1884_v53 = vsel %vm1881_vm1, %v1883_v19, %v1879_v62  ;;  %v1666_v56 = vor.u32 1.1754944e-38, %v1665_v48  ;;  %vm1828_vm4 = vcmp.eq.f32.partialorder %v7072_v35, inf  ;;  %v1888_v26 = vsub.f32 1.0, %v1887_v49 }
 0x367   :  { %v7355_v45 = vmul.f32 %v1884_v53, %v1731_v20  ;;  %v1897_v25 = vand.u32 2147483648, %v7311_v31  ;;  %v7359_v15 = vadd.f32 1e-08, %v7232_v63  ;;  %vm1892_vm5 = vweird.f32 %v4637_v57 }
 0x368   :  { %v1667_v43 = vsel %vm1664_vm3, %v1666_v56, %v1662_v42  ;;  %vm1675_vm6 = vweird.f32 %v7151_v18  ;;  %v1685_v16 = vmul.f32 %v7169_v9, %v7106_v5  ;;  %v1889_v14 = vmul.f32 %v4637_v57, %v1888_v26 }
 0x369   :  { %v1969_v40 = vmul.f32 %v7355_v45, %v10425_v4  ;;  %v1970_v3 = vmul.f32 %v7355_v45, %v10426_v17  ;;  %v1673_v24 = vadd.f32 %v7151_v18, %v1672_v34  ;;  %v1895_v48 = vand.u32 2147483647, %v7311_v31 }
 0x36a   :  { %vm1674_vm7 = vweird.f32 %v7090_v6  ;;  %v1680_v63 = vand.u32 2147483648, %v7090_v6  ;;  %4638 = vrcp.f32 %v7359_v15  ;;  %v1890_v52 = vadd.f32 %v4637_v57, %v1889_v14 }
 0x36b   :  { %v2017_v32 = vsel %vm61_vm0, %v1969_v40, 0.0  ;;  %vm1891_vm8 = vweird.f32 %v7311_v31  ;;  %vm7375_vm9 = vmor %vm1674_vm7, %vm1675_vm6  ;;  %v1678_v12 = vand.u32 2147483647, %v7090_v6  ;;  %2009 = vadd.xlane.f32.xlu2 %v2008_v13  ;;  %v2020_v39 = vsel %vm61_vm0, %v1970_v3, 0.0 }
 0x36c   :  { %2018 = vadd.xlane.f32.xlu0 %v2017_v32  ;;  %v1967_v20 = vmul.f32 %v7269_v2, %v6946_v47  ;;  %v1668_v19 = vmul.f32 %v1667_v43, %v7094_v11  ;;  %vm1893_vm10 = vmor %vm1891_vm8, %vm1892_vm5  ;;  %v1686_v62 = vsub.f32 1.0, %v1685_v16  ;;  %2021 = vadd.xlane.f32.xlu1 %v2020_v39  ;;  %v1964_v31 = vmul.f32 %v7320_v22, %v6893_v38 }
 0x36d   :  { %v1894_v42 = vsel %vm1893_vm10, %v4637_v57, %v1890_v52  ;;  %v1898_v49 = vor.u32 1.1754944e-38, %v1897_v25  ;;  %v1677_v6 = vsel %vm7375_vm9, %v7151_v18, %v1673_v24  ;;  %v10429_v34 = vand.u32 2147483648, %v7064_v55 }
 0x36e   :  { %v1831_v11 = vand.u32 2147483648, %v7072_v35  ;;  %vm1896_vm11 = vcmp.eq.f32.partialorder %v1895_v48, 8.507059e+37  ;;  %v1681_v13 = vor.u32 1.1754944e-38, %v1680_v63  ;;  %vm1679_vm12 = vcmp.eq.f32.partialorder %v1678_v12, 8.507059e+37 }
 0x36f   :  { %v1820_v53 = vsel %vm1818_vm2, %v10429_v34, %v7303_v58  ;;  %v1899_v56 = vsel %vm1896_vm11, %v1898_v49, %v1894_v42  ;;  %v1687_v22 = vmul.f32 %v7169_v9, %v1686_v62  ;;  %v7398_v57 = vadd.f32 1e-08, %v7286_v1  ;;  %v10435_v34 = vld [vmem:[#allocation50_spill] sm:$0xff] }
 0x370   :  { %v4639_v26 = vpop.eup %4638  ;;  %v7404_v18 = vsel %vm1828_vm4, %v7072_v35, %v7306_v50  ;;  %v1968_v58 = vmul.f32 %v7269_v2, %v6896_v51  ;;  %v1732_v25 = vmul.f32 %v1668_v19, %v7034_v61  ;;  %v1682_v43 = vsel %vm1679_vm12, %v1681_v13, %v1677_v6 }
 0x371   :  { %v2002_v16 = vsel %vm61_vm0, %v1964_v31, 0.0  ;;  %v2011_v40 = vsel %vm61_vm0, %v1967_v20, 0.0  ;;  %v1902_v1 = vmul.f32 %v4639_v26, %v7359_v15  ;;  %v1700_v3 = vmul.f32 %v7216_v27, %v7143_v28  ;;  %v10430_v20 = vld [vmem:[#allocation53_spill] sm:$0xff] }
 0x372   :  { %v1971_v14 = vmul.f32 %v7355_v45, %v6949_v23  ;;  %v7416_v50 = vmul.f32 %v1899_v56, %v1732_v25  ;;  %v1910_v24 = vand.u32 2147483647, %v7359_v15  ;;  %4640 = vrcp.f32 %v7398_v57 }
 0x373   :  { %v1683_v61 = vmul.f32 %v1682_v43, %v7049_v21  ;;  %v1903_v2 = vsub.f32 1.0, %v1902_v1  ;;  %v1688_v48 = vadd.f32 %v7169_v9, %v1687_v22  ;;  %vm1690_vm13 = vweird.f32 %v7169_v9  ;;  %2012 = vadd.xlane.f32.xlu2 %v2011_v40 }
 0x374   :  { %2003 = vadd.xlane.f32.xlu0 %v2002_v16  ;;  %v2014_v63 = vsel %vm61_vm0, %v1968_v58, 0.0  ;;  %v1912_v32 = vand.u32 2147483648, %v7359_v15  ;;  %vm1689_vm14 = vweird.f32 %v7106_v5  ;;  %v1695_v52 = vand.u32 2147483648, %v7106_v5 }
 0x375   :  { %vm1830_vm15 = vcmp.eq.f32.partialorder %v7072_v35, 0.0  ;;  %2015 = vadd.xlane.f32.xlu1 %v2014_v63  ;;  %v1904_v36 = vmul.f32 %v4639_v26, %v1903_v2  ;;  %vm1907_vm1 = vweird.f32 %v4639_v26  ;;  %v1693_v21 = vand.u32 2147483647, %v7106_v5  ;;  %vm7439_vm4 = vmor %vm1689_vm14, %vm1690_vm13 }
 0x376   :  { %v1701_v12 = vsub.f32 1.0, %v1700_v3  ;;  %v2023_v39 = vsel %vm61_vm0, %v1971_v14, 0.0  ;;  %v1973_v19 = vmul.f32 %v7416_v50, %v10430_v20  ;;  %vm1906_vm2 = vweird.f32 %v7359_v15 }
 0x377   :  { %vm7433_vm3 = vcmp.eq.f32.partialorder %v1910_v24, 8.507059e+37  ;;  %v1733_v5 = vmul.f32 %v1683_v61, %v7015_v60  ;;  %v1905_v42 = vadd.f32 %v4639_v26, %v1904_v36  ;;  %v1692_v49 = vsel %vm7439_vm4, %v7169_v9, %v1688_v48  ;;  %vm1908_vm5 = vmor %vm1906_vm2, %vm1907_vm1 }
 0x378   :  { %v1702_v6 = vmul.f32 %v7216_v27, %v1701_v12  ;;  %v4641_v15 = vpop.eup %4640  ;;  %v1974_v13 = vmul.f32 %v7416_v50, %v10435_v34  ;;  %v1913_v56 = vor.u32 1.1754944e-38, %v1912_v32  ;;  %v1696_v22 = vor.u32 1.1754944e-38, %v1695_v52  ;;  %v10438_v52 = vld [vmem:[#allocation54_spill] sm:$0xff] }
 0x379   :  { %v7450_v58 = vadd.f32 1e-08, %v1820_v53  ;;  %v1909_v25 = vsel %vm1908_vm5, %v4639_v26, %v1905_v42  ;;  %vm1694_vm6 = vcmp.eq.f32.partialorder %v1693_v21, 8.507059e+37  ;;  %v1917_v60 = vmul.f32 %v4641_v15, %v7398_v57 }
 0x37a   :  { %vm1704_vm7 = vweird.f32 %v7143_v28  ;;  %v2029_v43 = vsel %vm61_vm0, %v1973_v19, 0.0  ;;  %v1914_v9 = vsel %vm7433_vm3, %v1913_v56, %v1909_v25  ;;  %v1697_v16 = vsel %vm1694_vm6, %v1696_v22, %v1692_v49 }
 0x37b   :  { %4642 = vrcp.f32 %v7450_v58  ;;  %v7458_v40 = vmul.f32 %v1914_v9, %v1733_v5  ;;  %v1918_v1 = vsub.f32 1.0, %v1917_v60  ;;  %v1703_v53 = vadd.f32 %v7216_v27, %v1702_v6  ;;  %2024 = vadd.xlane.f32.xlu2 %v2023_v39 }
 0x37c   :  { %vm1705_vm8 = vweird.f32 %v7216_v27  ;;  %2030 = vadd.xlane.f32.xlu0 %v2029_v43  ;;  %v2032_v26 = vsel %vm61_vm0, %v1974_v13, 0.0  ;;  %v1925_v3 = vand.u32 2147483647, %v7398_v57  ;;  %v1927_v14 = vand.u32 2147483648, %v7398_v57  ;;  %v10439_v43 = vld [vmem:[#allocation55_spill] sm:$0xff] }
 0x37d   :  { %v1710_v24 = vand.u32 2147483648, %v7143_v28  ;;  %2033 = vadd.xlane.f32.xlu1 %v2032_v26  ;;  %v1698_v61 = vmul.f32 %v1697_v16, %v7060_v8  ;;  %v1919_v2 = vmul.f32 %v4641_v15, %v1918_v1  ;;  %vm1922_vm9 = vweird.f32 %v4641_v15  ;;  %vm7480_vm11 = vmor %vm1704_vm7, %vm1705_vm8  ;;  %v10440_v16 = vld [vmem:[#allocation20_spill] sm:$0xff] }
 0x37e   :  { %v1708_v48 = vand.u32 2147483647, %v7143_v28  ;;  %v1832_v63 = vsel %vm1830_vm15, %v1831_v11, %v7404_v18  ;;  %v1975_v32 = vmul.f32 %v7416_v50, %v6952_v30  ;;  %vm1921_vm10 = vweird.f32 %v7398_v57 }
 0x37f   :  { %v1977_v36 = vmul.f32 %v7458_v40, %v10438_v52  ;;  %v1920_v21 = vadd.f32 %v4641_v15, %v1919_v2  ;;  %v1707_v11 = vsel %vm7480_vm11, %v7216_v27, %v1703_v53  ;;  %v1715_v18 = vmul.f32 %v7221_v37, %v7147_v10  ;;  %vm1923_vm12 = vmor %vm1921_vm10, %vm1922_vm9 }
 0x380   :  { %vm1926_vm13 = vcmp.eq.f32.partialorder %v1925_v3, 8.507059e+37  ;;  %v1928_v12 = vor.u32 1.1754944e-38, %v1927_v14  ;;  %v1972_v28 = vmul.f32 %v7355_v45, %v6899_v7  ;;  %v1711_v39 = vor.u32 1.1754944e-38, %v1710_v24  ;;  %v10441_v3 = vld [vmem:[#allocation19_spill] sm:$0xff] }
 0x381   :  { %v4643_v57 = vpop.eup %4642  ;;  %v1734_v19 = vmul.f32 %v1698_v61, %v7017_v44  ;;  %v1924_v62 = vsel %vm1923_vm12, %v4641_v15, %v1920_v21  ;;  %vm1709_vm14 = vcmp.eq.f32.partialorder %v1708_v48, 8.507059e+37  ;;  %v2035_v5 = vsel %vm61_vm0, %v1975_v32, 0.0 }
 0x382   :  { %v1932_v31 = vmul.f32 %v4643_v57, %v7450_v58  ;;  %v1929_v27 = vsel %vm1926_vm13, %v1928_v12, %v1924_v62  ;;  %v1712_v42 = vsel %vm1709_vm14, %v1711_v39, %v1707_v11  ;;  %v7496_v49 = vadd.f32 1e-08, %v1832_v63  ;;  %v10442_v12 = vld [vmem:[#allocation35_spill] sm:$0xff]  ;;  %v10443_v62 = vld [vmem:[#allocation56_spill] sm:$0xff] }
 0x383   :  { %v2041_v6 = vsel %vm61_vm0, %v1977_v36, 0.0  ;;  %v7499_v13 = vmul.f32 %v1929_v27, %v1734_v19  ;;  %v1716_v22 = vsub.f32 1.0, %v1715_v18  ;;  %2036 = vadd.xlane.f32.xlu2 %v2035_v5  ;;  %v2026_v44 = vsel %vm61_vm0, %v1972_v28, 0.0 }
 0x384   :  { %v1933_v56 = vsub.f32 1.0, %v1932_v31  ;;  %2042 = vadd.xlane.f32.xlu0 %v2041_v6  ;;  %v1942_v45 = vand.u32 2147483648, %v7450_v58  ;;  %4644 = vrcp.f32 %v7496_v49  ;;  %vm1937_vm15 = vweird.f32 %v4643_v57 }
 0x385   :  { %2027 = vadd.xlane.f32.xlu1 %v2026_v44  ;;  %v1940_v25 = vand.u32 2147483647, %v7450_v58  ;;  %v1713_v60 = vmul.f32 %v1712_v42, %v7064_v55  ;;  %vm1936_vm1 = vweird.f32 %v7450_v58  ;;  %v1981_v9 = vmul.f32 %v7499_v13, %v10439_v43 }
 0x386   :  { %v1934_v15 = vmul.f32 %v4643_v57, %v1933_v56  ;;  %v1982_v1 = vmul.f32 %v7499_v13, %v10440_v16  ;;  %v1717_v26 = vmul.f32 %v7221_v37, %v1716_v22  ;;  %v1978_v14 = vmul.f32 %v7458_v40, %v10441_v3  ;;  %vm1938_vm2 = vmor %vm1936_vm1, %vm1937_vm15 }
 0x387   :  { %v1943_v24 = vor.u32 1.1754944e-38, %v1942_v45  ;;  %vm1941_vm3 = vcmp.eq.f32.partialorder %v1940_v25, 8.507059e+37  ;;  %v1735_v55 = vmul.f32 %v1713_v60, %v7026_v0  ;;  %vm1720_vm4 = vweird.f32 %v7221_v37  ;;  %v10444_v25 = vld [vmem:[#allocation21_spill] sm:$0xff] }
 0x388   :  { %v1935_v53 = vadd.f32 %v4643_v57, %v1934_v15  ;;  %v2053_v48 = vsel %vm61_vm0, %v1981_v9, 0.0  ;;  %v2056_v63 = vsel %vm61_vm0, %v1982_v1, 0.0  ;;  %v1718_v32 = vadd.f32 %v7221_v37, %v1717_v26  ;;  %v10445_v9 = vld [vmem:[#allocation24_spill] sm:$0xff] }
 0x389   :  { %v2044_v36 = vsel %vm61_vm0, %v1978_v14, 0.0  ;;  %v1725_v11 = vand.u32 2147483648, %v7147_v10  ;;  %vm1719_vm5 = vweird.f32 %v7147_v10  ;;  %v1723_v0 = vand.u32 2147483647, %v7147_v10 }
 0x38a   :  { %v1939_v61 = vsel %vm1938_vm2, %v4643_v57, %v1935_v53  ;;  %v4645_v2 = vpop.eup %4644  ;;  %vm1721_vm6 = vmor %vm1719_vm5, %vm1720_vm4  ;;  %v1979_v57 = vmul.f32 %v7458_v40, %v6884_v54  ;;  %v1983_v28 = vmul.f32 %v7499_v13, %v10442_v12  ;;  %v1957_v10 = vand.u32 2147483648, %v7496_v49  ;;  %v10446_v53 = vld [vmem:[#allocation36_spill] sm:$0xff] }
 0x38b   :  { %v1944_v58 = vsel %vm1941_vm3, %v1943_v24, %v1939_v61  ;;  %v1947_v8 = vmul.f32 %v4645_v2, %v7496_v49  ;;  %2054 = vadd.xlane.f32.xlu2 %v2053_v48  ;;  %v1722_v39 = vsel %vm1721_vm6, %v7221_v37, %v1718_v32  ;;  %v1726_v5 = vor.u32 1.1754944e-38, %v1725_v11  ;;  %v10450_v32 = vld [vmem:[#allocation37_spill] sm:$0xff] }
 0x38c   :  { %2057 = vadd.xlane.f32.xlu0 %v2056_v63  ;;  %v1945_v21 = vmul.f32 %v1944_v58, %v1735_v55  ;;  %vm1724_vm7 = vcmp.eq.f32.partialorder %v1723_v0, 8.507059e+37  ;;  %vm1952_vm8 = vweird.f32 %v4645_v2  ;;  %v2047_v6 = vsel %vm61_vm0, %v1979_v57, 0.0 }
 0x38d   :  { %2045 = vadd.xlane.f32.xlu1 %v2044_v36  ;;  %v1948_v18 = vsub.f32 1.0, %v1947_v8  ;;  %v1727_v42 = vsel %vm1724_vm7, %v1726_v5, %v1722_v39  ;;  %v2059_v56 = vsel %vm61_vm0, %v1983_v28, 0.0  ;;  %vm1951_vm9 = vweird.f32 %v7496_v49  ;;  %v10452_v28 = vld [vmem:[#allocation14_spill] sm:$0xff] }
 0x38e   :  { %v1985_v31 = vmul.f32 %v1945_v21, %v10443_v62  ;;  %v1955_v22 = vand.u32 2147483647, %v7496_v49  ;;  %vm1953_vm10 = vmor %vm1951_vm9, %vm1952_vm8  ;;  %v1728_v44 = vmul.f32 %v1727_v42, %v7072_v35  ;;  %v1958_v15 = vor.u32 1.1754944e-38, %v1957_v10  ;;  %v10447_v49 = vld [vmem:[#allocation16_spill] sm:$0xff] }
 0x38f   :  { %v1949_v19 = vmul.f32 %v4645_v2, %v1948_v18  ;;  %v1986_v60 = vmul.f32 %v1945_v21, %v10444_v25  ;;  %v1984_v1 = vmul.f32 %v7499_v13, %v10445_v9  ;;  %v1987_v26 = vmul.f32 %v1945_v21, %v10446_v53  ;;  %v10449_v13 = vld [vmem:[#allocation22_spill] sm:$0xff] }
 0x390   :  { %v2065_v37 = vsel %vm61_vm0, %v1985_v31, 0.0  ;;  %vm1956_vm11 = vcmp.eq.f32.partialorder %v1955_v22, 8.507059e+37  ;;  %v1736_v24 = vmul.f32 %v1728_v44, %v10447_v49  ;;  %v10451_v18 = vld [vmem:[#allocation18_spill] sm:$0xff]  ;;  %v1988_v39 = vmul.f32 %v1945_v21, %v10452_v28  ;;  %v10453_v31 = vld [vmem:[#allocation5_spill] sm:$0xff] }
 0x391   :  { %v1950_v27 = vadd.f32 %v4645_v2, %v1949_v19  ;;  %v2068_v61 = vsel %vm61_vm0, %v1986_v60, 0.0  ;;  %v2062_v55 = vsel %vm61_vm0, %v1984_v1, 0.0  ;;  %v2071_v35 = vsel %vm61_vm0, %v1987_v26, 0.0 }
 0x392   :  { %v1976_v5 = vmul.f32 %v7416_v50, %v10453_v31 }
 0x393   :  { %2048 = vadd.xlane.f32.xlu2 %v2047_v6  ;;  %v1954_v45 = vsel %vm1953_vm10, %v4645_v2, %v1950_v27  ;;  %v10448_v2 = vld [vmem:[#allocation8_spill] sm:$0xff]  ;;  %v10454_v27 = vld [vmem:[#allocation15_spill] sm:$0xff] }
 0x394   :  { %2060 = vadd.xlane.f32.xlu0 %v2059_v56  ;;  %v1959_v14 = vsel %vm1956_vm11, %v1958_v15, %v1954_v45  ;;  %v1980_v48 = vmul.f32 %v7458_v40, %v10448_v2  ;;  %v2074_v40 = vsel %vm61_vm0, %v1988_v39, 0.0  ;;  %v2038_v10 = vsel %vm61_vm0, %v1976_v5, 0.0 }
 0x395   :  { %2066 = vadd.xlane.f32.xlu1 %v2065_v37  ;;  %v1960_v58 = vmul.f32 %v1959_v14, %v1736_v24 }
 0x396   :  { %v2050_v36 = vsel %vm61_vm0, %v1980_v48, 0.0 }
 0x397   :  { %v1990_v63 = vmul.f32 %v1960_v58, %v10449_v13  ;;  %v1991_v8 = vmul.f32 %v1960_v58, %v10450_v32  ;;  %v1989_v57 = vmul.f32 %v1960_v58, %v10451_v18  ;;  %v1992_v42 = vmul.f32 %v1960_v58, %v10454_v27 }
 0x399   :  { %v2080_v11 = vsel %vm61_vm0, %v1990_v63, 0.0  ;;  %v2083_v0 = vsel %vm61_vm0, %v1991_v8, 0.0  ;;  %v2077_v19 = vsel %vm61_vm0, %v1989_v57, 0.0  ;;  %v2086_v6 = vsel %vm61_vm0, %v1992_v42, 0.0 }
 0x39b   :  { %2069 = vadd.xlane.f32.xlu2 %v2068_v61 }
 0x39c   :  { %2063 = vadd.xlane.f32.xlu0 %v2062_v55 }
 0x39d   :  { %2072 = vadd.xlane.f32.xlu1 %v2071_v35 }
 0x3a3   :  { %2051 = vadd.xlane.f32.xlu2 %v2050_v36 }
 0x3a4   :  { %2081 = vadd.xlane.f32.xlu0 %v2080_v11 }
 0x3a5   :  { %2084 = vadd.xlane.f32.xlu1 %v2083_v0 }
 0x3ab   :  { %2078 = vadd.xlane.f32.xlu2 %v2077_v19 }
 0x3ac   :  { %2075 = vadd.xlane.f32.xlu0 %v2074_v40 }
 0x3b3   :  { %2039 = vadd.xlane.f32.xlu2 %v2038_v10 }
 0x3b4   :  { %2087 = vadd.xlane.f32.xlu0 %v2086_v6 }
 0x3cc   :  { %v7561_v56 = vpop.xlane.xlu1 %2006 }
 0x3cd   :  { %10455 = vst [vmem:[#allocation6_spill] sm:$0xff] %v7561_v56 }
 0x3d6   :  { %v7563_v21 = vpop.xlane.xlu2 %1994  ;;  %v7565_v22 = vpop.xlane.xlu0 %1997 }
 0x3d7   :  { %10456 = vst [vmem:[#allocation12_spill] sm:$0xff] %v7563_v21  ;;  %v7571_v45 = vpop.xlane.xlu1 %2000  ;;  %v2089_v1 = vmax.f32 %v7563_v21, %v7561_v56 }
 0x3d8   :  { %10457 = vst [vmem:[#allocation13_spill] sm:$0xff] %v7565_v22 }
 0x3d9   :  { %10460 = vst [vmem:[#allocation41_spill] sm:$0xff] %v7571_v45 }
 0x3de   :  { %v7567_v37 = vpop.xlane.xlu2 %2009 }
 0x3df   :  { %10458 = vst [vmem:[#allocation25_spill] sm:$0xff] %v7567_v37  ;;  %v7569_v44 = vpop.xlane.xlu0 %2018  ;;  %v7577_v60 = vpop.xlane.xlu1 %2021  ;;  %v2092_v40 = vmax.f32 %v7565_v22, %v7567_v37 }
 0x3e0   :  { %10459 = vst [vmem:[#allocation26_spill] sm:$0xff] %v7569_v44  ;;  %v2090_v26 = vmax.f32 %v2089_v1, %v7569_v44 }
 0x3e1   :  { %10463 = vst [vmem:[#allocation45_spill] sm:$0xff] %v7577_v60 }
 0x3e6   :  { %v7573_v50 = vpop.xlane.xlu2 %2012 }
 0x3e7   :  { %10461 = vst [vmem:[#allocation43_spill] sm:$0xff] %v7573_v50  ;;  %v7575_v15 = vpop.xlane.xlu0 %2003  ;;  %v2095_v58 = vmax.f32 %v7571_v45, %v7573_v50 }
 0x3e8   :  { %10462 = vst [vmem:[#allocation44_spill] sm:$0xff] %v7575_v15  ;;  %v7591_v35 = vpop.xlane.xlu1 %2015 }
 0x3e9   :  { %10466 = vst [vmem:[#allocation28_spill] sm:$0xff] %v7591_v35 }
 0x3ee   :  { %v7582_v14 = vpop.xlane.xlu2 %2024 }
 0x3ef   :  { %10464 = vst [vmem:[#allocation11_spill] sm:$0xff] %v7582_v14  ;;  %v7584_v49 = vpop.xlane.xlu0 %2030  ;;  %v2096_v63 = vmax.f32 %v2095_v58, %v7582_v14 }
 0x3f0   :  { %10465 = vst [vmem:[#allocation27_spill] sm:$0xff] %v7584_v49  ;;  %v2091_v24 = vmax.f32 %v2090_v26, %v7584_v49  ;;  %v2093_v26 = vmax.f32 %v2092_v40, %v7577_v60  ;;  %v7608_v58 = vpop.xlane.xlu1 %2033 }
 0x3f1   :  { %10468 = vst [vmem:[#allocation10_spill] sm:$0xff] %v7608_v58 }
 0x3f2   :  { %v2113_v61 = vsub.f32 %v7563_v21, %v2091_v24  ;;  %v2117_v55 = vsub.f32 %v7561_v56, %v2091_v24  ;;  %v2121_v11 = vsub.f32 %v7569_v44, %v2091_v24  ;;  %v2125_v5 = vsub.f32 %v7584_v49, %v2091_v24 }
 0x3f3   :  { %v2094_v24 = vmax.f32 %v2093_v26, %v7608_v58 }
 0x3f4   :  { %v2145_v48 = vmul.f32 1.442695, %v2113_v61  ;;  %v2153_v8 = vmul.f32 1.442695, %v2117_v55  ;;  %v2161_v42 = vmul.f32 1.442695, %v2121_v11 }
 0x3f5   :  { %v2114_v11 = vsub.f32 %v7565_v22, %v2094_v24  ;;  %v2126_v40 = vsub.f32 %v7608_v58, %v2094_v24 }
 0x3f6   :  { %v7594_v36 = vpop.xlane.xlu2 %2036  ;;  %4646 = vpow2.f32 %v2145_v48 }
 0x3f7   :  { %10467 = vst [vmem:[#allocation29_spill] sm:$0xff] %v7594_v36  ;;  %v2097_v0 = vmax.f32 %v2096_v63, %v7594_v36  ;;  %4648 = vpow2.f32 %v2153_v8  ;;  %v2169_v63 = vmul.f32 1.442695, %v2125_v5  ;;  %v2147_v5 = vmul.f32 1.442695, %v2114_v11 }
 0x3f9   :  { %v2115_v57 = vsub.f32 %v7571_v45, %v2097_v0  ;;  %v2119_v39 = vsub.f32 %v7573_v50, %v2097_v0  ;;  %v2123_v19 = vsub.f32 %v7582_v14, %v2097_v0  ;;  %v2127_v1 = vsub.f32 %v7594_v36, %v2097_v0  ;;  %v7630_v14 = vpop.xlane.xlu0 %2042 }
 0x3fa   :  { %v2118_v0 = vsub.f32 %v7567_v37, %v2094_v24  ;;  %10469 = vst [vmem:[#allocation42_spill] sm:$0xff] %v7630_v14 }
 0x3fb   :  { %v2149_v10 = vmul.f32 1.442695, %v2115_v57  ;;  %v2157_v6 = vmul.f32 1.442695, %v2119_v39  ;;  %v2165_v61 = vmul.f32 1.442695, %v2123_v19  ;;  %v2122_v57 = vsub.f32 %v7577_v60, %v2094_v24 }
 0x3fc   :  { %v7606_v55 = vpop.eup %4646  ;;  %v2173_v8 = vmul.f32 1.442695, %v2127_v1 }
 0x3fd   :  { %4650 = vpow2.f32 %v2149_v10  ;;  %v7610_v48 = vpop.eup %4648  ;;  %v2155_v10 = vmul.f32 1.442695, %v2118_v0  ;;  %v2163_v26 = vmul.f32 1.442695, %v2122_v57 }
 0x3fe   :  { %4652 = vpow2.f32 %v2157_v6  ;;  %v2209_v39 = vadd.f32 %v7610_v48, %v7606_v55  ;;  %v7632_v24 = vpop.xlane.xlu2 %2054 }
 0x3ff   :  { %4654 = vpow2.f32 %v2161_v42  ;;  %10470 = vst [vmem:[#allocation33_spill] sm:$0xff] %v7632_v24 }
 0x400   :  { %4656 = vpow2.f32 %v2165_v61 }
 0x401   :  { %4658 = vpow2.f32 %v2169_v63  ;;  %v2171_v63 = vmul.f32 1.442695, %v2126_v40 }
 0x402   :  { %4660 = vpow2.f32 %v2173_v8 }
 0x403   :  { %v7618_v19 = vpop.eup %4650  ;;  %4662 = vpow2.f32 %v2147_v5 }
 0x404   :  { %v7621_v42 = vpop.eup %4652  ;;  %4664 = vpow2.f32 %v2155_v10  ;;  %v7647_v10 = vpop.xlane.xlu1 %2027 }
 0x405   :  { %v7623_v6 = vpop.eup %4654  ;;  %v2215_v1 = vadd.f32 %v7621_v42, %v7618_v19  ;;  %4666 = vpow2.f32 %v2163_v26  ;;  %10471 = vst [vmem:[#allocation46_spill] sm:$0xff] %v7647_v10  ;;  %v7651_v26 = vpop.xlane.xlu0 %2057 }
 0x406   :  { %v2210_v61 = vadd.f32 %v7623_v6, %v2209_v39  ;;  %v7628_v36 = vpop.eup %4656  ;;  %4668 = vpow2.f32 %v2171_v63  ;;  %10472 = vst [vmem:[#allocation47_spill] sm:$0xff] %v7651_v26  ;;  %v7656_v50 = vpop.xlane.xlu2 %2048 }
 0x407   :  { %v2216_v11 = vadd.f32 %v7628_v36, %v2215_v1  ;;  %v7635_v0 = vpop.eup %4658  ;;  %10473 = vst [vmem:[#allocation48_spill] sm:$0xff] %v7656_v50 }
 0x408   :  { %v2211_v8 = vadd.f32 %v7635_v0, %v2210_v61  ;;  %v7638_v45 = vpop.eup %4660 }
 0x409   :  { %v7640_v57 = vpop.eup %4662  ;;  %v2217_v39 = vadd.f32 %v7638_v45, %v2216_v11 }
 0x40a   :  { %v7643_v5 = vpop.eup %4664  ;;  %4670 = vrcp.f32 %v2211_v8  ;;  %v2242_v53 = vand.u32 2147483647, %v2211_v8  ;;  %v2244_v62 = vand.u32 2147483648, %v2211_v8  ;;  %vm2238_vm13 = vweird.f32 %v2211_v8 }
 0x40b   :  { %v2212_v40 = vadd.f32 %v7643_v5, %v7640_v57  ;;  %v7649_v1 = vpop.eup %4666  ;;  %4672 = vrcp.f32 %v2217_v39  ;;  %v2274_v12 = vand.u32 2147483648, %v2217_v39  ;;  %vm2268_vm1 = vweird.f32 %v2217_v39 }
 0x40c   :  { %v7654_v63 = vpop.eup %4668  ;;  %v7661_v44 = vpop.xlane.xlu1 %2045  ;;  %vm2243_vm3 = vcmp.eq.f32.partialorder %v2242_v53, 8.507059e+37 }
 0x40d   :  { %v2213_v61 = vadd.f32 %v7649_v1, %v2212_v40  ;;  %v7659_v37 = vpop.xlane.xlu0 %2060  ;;  %10475 = vst [vmem:[#allocation9_spill] sm:$0xff] %v7661_v44  ;;  %v2104_v32 = vmax.f32 %v7661_v44, %v7651_v26  ;;  %v2275_v25 = vor.u32 1.1754944e-38, %v2274_v12  ;;  %v2101_v12 = vmax.f32 %v7630_v14, %v7632_v24 }
 0x40e   :  { %10474 = vst [vmem:[#allocation49_spill] sm:$0xff] %v7659_v37  ;;  %v7663_v9 = vpop.xlane.xlu2 %2069 }
 0x40f   :  { %v2214_v11 = vadd.f32 %v7654_v63, %v2213_v61  ;;  %10476 = vst [vmem:[#allocation57_spill] sm:$0xff] %v7663_v9 }
 0x410   :  { %v4671_v58 = vpop.eup %4670 }
 0x411   :  { %4674 = vrcp.f32 %v2214_v11  ;;  %v4673_v60 = vpop.eup %4672  ;;  %v2234_v49 = vmul.f32 %v4671_v58, %v2211_v8  ;;  %vm2239_vm12 = vweird.f32 %v4671_v58  ;;  %v2245_v8 = vor.u32 1.1754944e-38, %v2244_v62 }
 0x412   :  { %v2264_v22 = vmul.f32 %v4673_v60, %v2217_v39  ;;  %vm2269_vm14 = vweird.f32 %v4673_v60  ;;  %vm7673_vm15 = vmor %vm2238_vm13, %vm2239_vm12  ;;  %v2259_v54 = vand.u32 2147483648, %v2214_v11  ;;  %vm2253_vm5 = vweird.f32 %v2214_v11 }
 0x413   :  { %v2235_v56 = vsub.f32 1.0, %v2234_v49  ;;  %vm7682_vm4 = vmor %vm2268_vm1, %vm2269_vm14 }
 0x414   :  { %v2265_v40 = vsub.f32 1.0, %v2264_v22  ;;  %v7667_v7 = vpop.xlane.xlu1 %2066 }
 0x415   :  { %v2236_v27 = vmul.f32 %v4671_v58, %v2235_v56  ;;  %v7665_v31 = vpop.xlane.xlu0 %2063  ;;  %10478 = vst [vmem:[#allocation59_spill] sm:$0xff] %v7667_v7  ;;  %v2272_v56 = vand.u32 2147483647, %v2217_v39 }
 0x416   :  { %10477 = vst [vmem:[#allocation58_spill] sm:$0xff] %v7665_v31  ;;  %v2266_v61 = vmul.f32 %v4673_v60, %v2265_v40  ;;  %v7671_v22 = vpop.xlane.xlu2 %2051 }
 0x417   :  { %v4675_v21 = vpop.eup %4674  ;;  %v2237_v38 = vadd.f32 %v4671_v58, %v2236_v27  ;;  %10479 = vst [vmem:[#allocation23_spill] sm:$0xff] %v7671_v22  ;;  %v2105_v27 = vmax.f32 %v2104_v32, %v7663_v9  ;;  %vm2273_vm7 = vcmp.eq.f32.partialorder %v2272_v56, 8.507059e+37  ;;  %v2098_v56 = vmax.f32 %v7575_v15, %v7591_v35 }
 0x418   :  { %v2249_v28 = vmul.f32 %v4675_v21, %v2214_v11  ;;  %v2267_v49 = vadd.f32 %v4673_v60, %v2266_v61  ;;  %vm2254_vm2 = vweird.f32 %v4675_v21 }
 0x419   :  { %vm7689_vm6 = vmor %vm2253_vm5, %vm2254_vm2 }
 0x41a   :  { %v2250_v2 = vsub.f32 1.0, %v2249_v28  ;;  %v2271_v32 = vsel %vm7682_vm4, %v4673_v60, %v2267_v49  ;;  %v2260_v49 = vor.u32 1.1754944e-38, %v2259_v54 }
 0x41c   :  { %v2251_v51 = vmul.f32 %v4675_v21, %v2250_v2  ;;  %v2241_v2 = vsel %vm7673_vm15, %v4671_v58, %v2237_v38  ;;  %v2257_v38 = vand.u32 2147483647, %v2214_v11  ;;  %v7701_v11 = vsel %vm2273_vm7, %v2275_v25, %v2271_v32 }
 0x41d   :  { %v7680_v43 = vpop.xlane.xlu0 %2081  ;;  %v2246_v58 = vsel %vm2243_vm3, %v2245_v8, %v2241_v2  ;;  %v7716_v32 = vmax.f32 %v2098_v56, %v7647_v10 }
 0x41e   :  { %v2252_v40 = vadd.f32 %v4675_v21, %v2251_v51  ;;  %10482 = vst [vmem:[#allocation61_spill] sm:$0xff] %v7680_v43  ;;  %v2106_v52 = vmax.f32 %v2105_v27, %v7680_v43  ;;  %v7703_v27 = vpop.xlane.xlu1 %2072  ;;  %v2301_v61 = vmul.f32 %v7635_v0, %v2246_v58  ;;  %vm2258_vm8 = vcmp.eq.f32.partialorder %v2257_v38, 8.507059e+37  ;;  %v7713_v25 = vpop.xlane.xlu2 %2078 }
 0x41f   :  { %10487 = vst [vmem:[#allocation60_spill] sm:$0xff] %v7703_v27  ;;  %v2293_v38 = vmul.f32 %v7610_v48, %v2246_v58  ;;  %v2247_v51 = vmul.f32 %v7606_v55, %v2246_v58 }
 0x420   :  { %v2130_v62 = vsub.f32 %v7661_v44, %v2106_v52  ;;  %v2134_v53 = vsub.f32 %v7651_v26, %v2106_v52  ;;  %v2138_v39 = vsub.f32 %v7663_v9, %v2106_v52  ;;  %v2256_v28 = vsel %vm7689_vm6, %v4675_v21, %v2252_v40  ;;  %10488 = vst [vmem:[#allocation51_spill] sm:$0xff] %v7713_v25 }
 0x421   :  { %v2142_v60 = vsub.f32 %v7680_v43, %v2106_v52  ;;  %v7708_v21 = vsel %vm2258_vm8, %v2260_v49, %v2256_v28  ;;  %v2102_v40 = vmax.f32 %v2101_v12, %v7667_v7  ;;  %v2303_v52 = vmul.f32 %v7638_v45, %v7701_v11 }
 0x422   :  { %v2179_v2 = vmul.f32 1.442695, %v2130_v62  ;;  %v2187_v8 = vmul.f32 1.442695, %v2134_v53  ;;  %v2195_v9 = vmul.f32 1.442695, %v2138_v39  ;;  %v2389_v62 = vmul.f32 %v2301_v61, %v10430_v20 }
 0x423   :  { %v2203_v54 = vmul.f32 1.442695, %v2142_v60  ;;  %v2103_v0 = vmax.f32 %v2102_v40, %v7713_v25  ;;  %v2302_v53 = vmul.f32 %v7654_v63, %v7708_v21  ;;  %v2107_v45 = vmax.f32 %v7656_v50, %v7659_v37 }
 0x424   :  { %4676 = vpow2.f32 %v2179_v2  ;;  %v2297_v60 = vmul.f32 %v7623_v6, %v2246_v58  ;;  %v7731_v48 = vmul.f32 %v2303_v52, %v6952_v30  ;;  %v2294_v63 = vmul.f32 %v7643_v5, %v7708_v21 }
 0x425   :  { %4678 = vpow2.f32 %v2187_v8  ;;  %v2129_v39 = vsub.f32 %v7630_v14, %v2103_v0  ;;  %v2133_v28 = vsub.f32 %v7632_v24, %v2103_v0  ;;  %v2137_v12 = vsub.f32 %v7667_v7, %v2103_v0 }
 0x426   :  { %4680 = vpow2.f32 %v2195_v9  ;;  %v2141_v55 = vsub.f32 %v7713_v25, %v2103_v0  ;;  %v2381_v8 = vmul.f32 %v2293_v38, %v10416_v33  ;;  %v2377_v61 = vmul.f32 %v2247_v51, %v10421_v59  ;;  %v7752_v0 = vpop.xlane.xlu0 %2075 }
 0x427   :  { %4682 = vpow2.f32 %v2203_v54  ;;  %v2177_v9 = vmul.f32 1.442695, %v2129_v39  ;;  %v2185_v2 = vmul.f32 1.442695, %v2133_v28  ;;  %v7743_v6 = vmul.f32 %v2302_v53, %v10435_v34  ;;  %v7750_v54 = vpop.xlane.xlu1 %2084  ;;  %10490 = vst [vmem:[#allocation17_spill] sm:$0xff] %v7752_v0 }
 0x428   :  { %v2110_v58 = vmax.f32 %v7671_v22, %v7665_v31  ;;  %v2108_v40 = vmax.f32 %v2107_v45, %v7703_v27  ;;  %v2193_v52 = vmul.f32 1.442695, %v2137_v12  ;;  %10489 = vst [vmem:[#allocation30_spill] sm:$0xff] %v7750_v54  ;;  %v2382_v38 = vmul.f32 %v2294_v63, %v10422_v41 }
 0x429   :  { %4684 = vpow2.f32 %v2177_v9  ;;  %v2385_v51 = vmul.f32 %v2297_v60, %v10425_v4  ;;  %v2201_v39 = vmul.f32 1.442695, %v2141_v55  ;;  %v2262_v45 = vmul.f32 %v7640_v57, %v7708_v21 }
 0x42a   :  { %v7736_v49 = vpop.eup %4676  ;;  %4686 = vpow2.f32 %v2185_v2  ;;  %v2109_v28 = vmax.f32 %v2108_v40, %v7750_v54  ;;  %v2295_v9 = vmul.f32 %v7621_v42, %v7701_v11  ;;  %v2422_v25 = vsel %vm61_vm0, %v2381_v8, 0.0 }
 0x42b   :  { %v7740_v56 = vpop.eup %4678  ;;  %v2409_v63 = vsel %vm61_vm0, %v2377_v61, 0.0  ;;  %4688 = vpow2.f32 %v2193_v52  ;;  %v2423_v42 = vsel %vm61_vm0, %v2382_v38, 0.0  ;;  %v2277_v8 = vmul.f32 %v7618_v19, %v7701_v11 }
 0x42c   :  { %v2224_v5 = vadd.f32 %v7740_v56, %v7736_v49  ;;  %v7756_v53 = vpop.eup %4680  ;;  %v2131_v60 = vsub.f32 %v7656_v50, %v2109_v28  ;;  %v2135_v55 = vsub.f32 %v7659_v37, %v2109_v28  ;;  %v2139_v2 = vsub.f32 %v7703_v27, %v2109_v28 }
 0x42d   :  { %v7766_v7 = vpop.eup %4682  ;;  %v2143_v40 = vsub.f32 %v7750_v54, %v2109_v28  ;;  %4690 = vpow2.f32 %v2201_v39  ;;  %v2378_v52 = vmul.f32 %v2262_v45, %v10420_v46  ;;  %v7784_v14 = vsel %vm61_vm0, %v2385_v51, 0.0 }
 0x42e   :  { %v2225_v12 = vadd.f32 %v7756_v53, %v2224_v5  ;;  %v2181_v61 = vmul.f32 1.442695, %v2131_v60  ;;  %v2189_v5 = vmul.f32 1.442695, %v2135_v55  ;;  %v2197_v27 = vmul.f32 1.442695, %v2139_v2  ;;  %v7796_v55 = vpop.xlane.xlu2 %2039  ;;  %v7798_v51 = vpop.xlane.xlu0 %2087 }
 0x42f   :  { %v7779_v43 = vpop.eup %4684  ;;  %v2424_v38 = vadd.f32 %v2423_v42, %v2422_v25  ;;  %v2298_v19 = vmul.f32 %v7649_v1, %v7708_v21  ;;  %v7791_v39 = vsel %vm61_vm0, %v2389_v62, 0.0  ;;  %v2205_v60 = vmul.f32 1.442695, %v2143_v40  ;;  %10491 = vst [vmem:[#allocation31_spill] sm:$0xff] %v7796_v55 }
 0x430   :  { %v7772_v57 = vadd.f32 %v7766_v7, %v2225_v12  ;;  %v2383_v12 = vmul.f32 %v2295_v9, %v6946_v47  ;;  %v7786_v28 = vpop.eup %4686  ;;  %v2111_v9 = vmax.f32 %v2110_v58, %v7752_v0  ;;  %10492 = vst [vmem:[#allocation52_spill] sm:$0xff] %v7798_v51  ;;  %v2100_v25 = vmax.f32 %v7716_v32, %v7796_v55 }
 0x431   :  { %v2221_v45 = vadd.f32 %v7786_v28, %v7779_v43  ;;  %v7800_v2 = vpop.eup %4688  ;;  %v2379_v1 = vmul.f32 %v2277_v8, %v6943_v29  ;;  %v2410_v21 = vsel %vm61_vm0, %v2378_v52, 0.0  ;;  %v2299_v62 = vmul.f32 %v7628_v36, %v7701_v11 }
 0x432   :  { %4692 = vrcp.f32 %v7772_v57  ;;  %v7810_v58 = vmax.f32 %v2111_v9, %v7798_v51  ;;  %v2425_v42 = vsel %vm61_vm0, %v2383_v12, 0.0  ;;  %v2120_v32 = vsub.f32 %v7591_v35, %v2100_v25  ;;  %v10501_v35 = vld [vmem:[#allocation34_spill] sm:$0xff] }
 0x433   :  { %4694 = vpow2.f32 %v2181_v61  ;;  %v2222_v40 = vadd.f32 %v7800_v2, %v2221_v45  ;;  %v7813_v61 = vpop.eup %4690  ;;  %v2124_v8 = vsub.f32 %v7647_v10, %v2100_v25  ;;  %v7818_v52 = vadd.f32 %v2425_v42, %v2424_v38 }
 0x434   :  { %4696 = vpow2.f32 %v2189_v5  ;;  %v2116_v5 = vsub.f32 %v7575_v15, %v2100_v25  ;;  %v2128_v11 = vsub.f32 %v7796_v55, %v2100_v25  ;;  %vm2325_vm9 = vweird.f32 %v7772_v57 }
 0x435   :  { %4698 = vpow2.f32 %v2197_v27  ;;  %v7821_v36 = vadd.f32 %v7813_v61, %v2222_v40  ;;  %v2411_v27 = vadd.f32 %v2410_v21, %v2409_v63  ;;  %v2159_v50 = vmul.f32 1.442695, %v2120_v32 }
 0x436   :  { %4700 = vpow2.f32 %v2205_v60  ;;  %v2151_v9 = vmul.f32 1.442695, %v2116_v5  ;;  %v2329_v38 = vand.u32 2147483647, %v7772_v57  ;;  %v2132_v60 = vsub.f32 %v7671_v22, %v7810_v58 }
 0x437   :  { %4702 = vrcp.f32 %v7821_v36  ;;  %v2136_v63 = vsub.f32 %v7665_v31, %v7810_v58  ;;  %v2167_v40 = vmul.f32 1.442695, %v2124_v8  ;;  %v2331_v5 = vand.u32 2147483648, %v7772_v57 }
 0x438   :  { %v4693_v54 = vpop.eup %4692  ;;  %4704 = vpow2.f32 %v2151_v9  ;;  %v2175_v32 = vmul.f32 1.442695, %v2128_v11  ;;  %v2412_v55 = vsel %vm61_vm0, %v2379_v1, 0.0  ;;  %v2144_v8 = vsub.f32 %v7798_v51, %v7810_v58 }
 0x439   :  { %v7824_v45 = vpop.eup %4694  ;;  %v2321_v12 = vmul.f32 %v4693_v54, %v7772_v57  ;;  %4706 = vpow2.f32 %v2159_v50  ;;  %vm2326_vm10 = vweird.f32 %v4693_v54  ;;  %v2183_v9 = vmul.f32 1.442695, %v2132_v60 }
 0x43a   :  { %v7828_v37 = vpop.eup %4696  ;;  %4708 = vpow2.f32 %v2167_v40  ;;  %v2386_v10 = vmul.f32 %v2298_v19, %v10426_v17  ;;  %v2191_v1 = vmul.f32 1.442695, %v2136_v63  ;;  %vm2327_vm11 = vmor %vm2325_vm9, %vm2326_vm10  ;;  %vm2330_vm12 = vcmp.eq.f32.partialorder %v2329_v38, 8.507059e+37 }
 0x43b   :  { %v2322_v25 = vsub.f32 1.0, %v2321_v12  ;;  %v2227_v21 = vadd.f32 %v7828_v37, %v7824_v45  ;;  %v7838_v42 = vpop.eup %4698  ;;  %v2140_v12 = vsub.f32 %v7752_v0, %v7810_v58  ;;  %4710 = vpow2.f32 %v2175_v32 }
 0x43c   :  { %v7845_v31 = vpop.eup %4700  ;;  %v2314_v40 = vand.u32 2147483647, %v7821_v36  ;;  %4712 = vpow2.f32 %v2183_v9  ;;  %v2316_v63 = vand.u32 2147483648, %v7821_v36  ;;  %v2387_v57 = vmul.f32 %v2299_v62, %v6949_v23 }
 0x43d   :  { %v2323_v24 = vmul.f32 %v4693_v54, %v2322_v25  ;;  %v2228_v22 = vadd.f32 %v7838_v42, %v2227_v21  ;;  %v4703_v25 = vpop.eup %4702  ;;  %v2332_v21 = vor.u32 1.1754944e-38, %v2331_v5  ;;  %v2436_v38 = vsel %vm61_vm0, %v2386_v10, 0.0 }
 0x43e   :  { %v7856_v0 = vpop.eup %4704  ;;  %v2306_v19 = vmul.f32 %v4703_v25, %v7821_v36  ;;  %vm2310_vm13 = vweird.f32 %v7821_v36  ;;  %vm2311_vm14 = vweird.f32 %v4703_v25  ;;  %vm7870_vm15 = vcmp.eq.f32.partialorder %v2314_v40, 8.507059e+37 }
 0x43f   :  { %v2324_v50 = vadd.f32 %v4693_v54, %v2323_v24  ;;  %v7851_v11 = vadd.f32 %v7845_v31, %v2228_v22  ;;  %v2199_v24 = vmul.f32 1.442695, %v2140_v12  ;;  %v7860_v22 = vpop.eup %4706  ;;  %v2438_v40 = vsel %vm61_vm0, %v2387_v57, 0.0  ;;  %vm2312_vm1 = vmor %vm2310_vm13, %vm2311_vm14 }
 0x440   :  { %v2307_v5 = vsub.f32 1.0, %v2306_v19  ;;  %v2218_v32 = vadd.f32 %v7860_v22, %v7856_v0  ;;  %v7867_v9 = vpop.eup %4708  ;;  %v2437_v19 = vadd.f32 %v2436_v38, %v7784_v14  ;;  %v2449_v51 = vsel %vm61_vm0, %v7743_v6, 0.0 }
 0x441   :  { %v2328_v58 = vsel %vm2327_vm11, %v4693_v54, %v2324_v50  ;;  %4714 = vrcp.f32 %v7851_v11  ;;  %v2207_v54 = vmul.f32 1.442695, %v2144_v8  ;;  %v7874_v50 = vadd.f32 %v2412_v55, %v2411_v27  ;;  %v7876_v62 = vpop.eup %4710 }
 0x442   :  { %v2333_v60 = vsel %vm2330_vm12, %v2332_v21, %v2328_v58  ;;  %4716 = vpow2.f32 %v2191_v1  ;;  %v2308_v21 = vmul.f32 %v4703_v25, %v2307_v5  ;;  %v2219_v58 = vadd.f32 %v7867_v9, %v2218_v32  ;;  %v7880_v8 = vpop.eup %4712 }
 0x443   :  { %v2374_v10 = vmul.f32 %v7766_v7, %v2333_v60  ;;  %4718 = vpow2.f32 %v2199_v24  ;;  %v2317_v1 = vor.u32 1.1754944e-38, %v2316_v63  ;;  %v2451_v7 = vsel %vm61_vm0, %v7731_v48, 0.0 }
 0x444   :  { %v2309_v27 = vadd.f32 %v4703_v25, %v2308_v21  ;;  %v7887_v15 = vadd.f32 %v7876_v62, %v2219_v58  ;;  %4720 = vpow2.f32 %v2207_v54  ;;  %vm2340_vm2 = vweird.f32 %v7851_v11 }
 0x445   :  { %v2344_v24 = vand.u32 2147483647, %v7851_v11  ;;  %v2346_v6 = vand.u32 2147483648, %v7851_v11  ;;  %v2406_v57 = vmul.f32 %v2374_v10, %v10449_v13  ;;  %v2450_v48 = vadd.f32 %v2449_v51, %v7791_v39 }
 0x446   :  { %v2313_v38 = vsel %vm2312_vm1, %v4703_v25, %v2309_v27  ;;  %4722 = vrcp.f32 %v7887_v15  ;;  %v2289_v58 = vand.u32 2147483648, %v7887_v15  ;;  %v2334_v25 = vmul.f32 %v7736_v49, %v2333_v60 }
 0x447   :  { %v4715_v55 = vpop.eup %4714  ;;  %v2318_v36 = vsel %vm7870_vm15, %v2317_v1, %v2313_v38  ;;  %v2366_v10 = vmul.f32 %v7740_v56, %v2333_v60  ;;  %v2287_v39 = vand.u32 2147483647, %v7887_v15  ;;  %v2370_v12 = vmul.f32 %v7756_v53, %v2333_v60 }
 0x448   :  { %v2336_v14 = vmul.f32 %v4715_v55, %v7851_v11  ;;  %v7898_v63 = vpop.eup %4716  ;;  %vm2341_vm3 = vweird.f32 %v4715_v55  ;;  %v2373_v21 = vmul.f32 %v7813_v61, %v2318_v36  ;;  %vm7918_vm4 = vcmp.eq.f32.partialorder %v2344_v24, 8.507059e+37 }
 0x449   :  { %v2230_v32 = vadd.f32 %v7898_v63, %v7880_v8  ;;  %v7907_v54 = vpop.eup %4718  ;;  %v2347_v61 = vor.u32 1.1754944e-38, %v2346_v6  ;;  %v2394_v38 = vmul.f32 %v2334_v25, %v10441_v3  ;;  %v2398_v49 = vmul.f32 %v2366_v10, %v10440_v16  ;;  %vm2342_vm5 = vmor %vm2340_vm2, %vm2341_vm3 }
 0x44a   :  { %v2337_v5 = vsub.f32 1.0, %v2336_v14  ;;  %v7916_v1 = vpop.eup %4720  ;;  %v7932_v60 = vmul.f32 %v2373_v21, %v10451_v18  ;;  %vm2283_vm6 = vweird.f32 %v7887_v15  ;;  %v2290_v24 = vor.u32 1.1754944e-38, %v2289_v58 }
 0x44b   :  { %v2231_v51 = vadd.f32 %v7907_v54, %v2230_v32  ;;  %v7929_v32 = vadd.f32 %v2451_v7, %v2450_v48  ;;  %v7939_v6 = vsel %vm61_vm0, %v2406_v57, 0.0  ;;  %vm7942_vm7 = vcmp.eq.f32.partialorder %v2287_v39, 8.507059e+37  ;;  %v10499_v7 = vld [vmem:[#allocation21_spill] sm:$0xff] }
 0x44c   :  { %v2338_v27 = vmul.f32 %v4715_v55, %v2337_v5  ;;  %v7927_v5 = vadd.f32 %v2438_v40, %v2437_v19  ;;  %v4723_v53 = vpop.eup %4722  ;;  %v2402_v48 = vmul.f32 %v2370_v12, %v10499_v7  ;;  %v2462_v58 = vsel %vm61_vm0, %v2394_v38, 0.0  ;;  %v10509_v40 = vld [vmem:[#allocation39_spill] sm:$0xff] }
 0x44d   :  { %v7925_v56 = vadd.f32 %v7916_v1, %v2231_v51  ;;  %v2279_v19 = vmul.f32 %v4723_v53, %v7887_v15  ;;  %v2475_v57 = vsel %vm61_vm0, %v2398_v49, 0.0  ;;  %v2319_v10 = vmul.f32 %v7779_v43, %v2318_v36  ;;  %v10503_v43 = vld [vmem:[#allocation35_spill] sm:$0xff] }
 0x44e   :  { %v2339_v26 = vadd.f32 %v4715_v55, %v2338_v27  ;;  %vm2284_vm8 = vweird.f32 %v4723_v53  ;;  %v2365_v51 = vmul.f32 %v7786_v28, %v2318_v36  ;;  %v10504_v28 = vld [vmem:[#allocation37_spill] sm:$0xff] }
 0x44f   :  { %4724 = vrcp.f32 %v7925_v56  ;;  %v2361_v21 = vand.u32 2147483648, %v7925_v56  ;;  %v2359_v39 = vand.u32 2147483647, %v7925_v56  ;;  %vm2355_vm9 = vweird.f32 %v7925_v56  ;;  %vm2285_vm10 = vmor %vm2283_vm6, %vm2284_vm8 }
 0x450   :  { %v2343_v25 = vsel %vm2342_vm5, %v4715_v55, %v2339_v26  ;;  %v2280_v55 = vsub.f32 1.0, %v2279_v19 }
 0x451   :  { %v2348_v11 = vsel %vm7918_vm4, %v2347_v61, %v2343_v25  ;;  %v2362_v61 = vor.u32 1.1754944e-38, %v2361_v21  ;;  %v10500_v25 = vld [vmem:[#allocation54_spill] sm:$0xff]  ;;  %vm7973_vm11 = vcmp.eq.f32.partialorder %v2359_v39, 8.507059e+37  ;;  %v10508_v39 = vld [vmem:[#allocation36_spill] sm:$0xff] }
 0x452   :  { %v2375_v26 = vmul.f32 %v7845_v31, %v2348_v11  ;;  %v2349_v27 = vmul.f32 %v7824_v45, %v2348_v11  ;;  %v2367_v12 = vmul.f32 %v7828_v37, %v2348_v11  ;;  %v2281_v14 = vmul.f32 %v4723_v53, %v2280_v55  ;;  %v10502_v31 = vld [vmem:[#allocation55_spill] sm:$0xff] }
 0x453   :  { %v2393_v38 = vmul.f32 %v2319_v10, %v10500_v25  ;;  %v2397_v19 = vmul.f32 %v2365_v51, %v10502_v31  ;;  %v2369_v45 = vmul.f32 %v7800_v2, %v2318_v36  ;;  %v2371_v18 = vmul.f32 %v7838_v42, %v2348_v11  ;;  %v10507_v51 = vld [vmem:[#allocation56_spill] sm:$0xff] }
 0x454   :  { %v2395_v49 = vmul.f32 %v2349_v27, %v10501_v35  ;;  %v2399_v44 = vmul.f32 %v2367_v12, %v10503_v43  ;;  %v2407_v7 = vmul.f32 %v2375_v26, %v10504_v28  ;;  %v2282_v37 = vadd.f32 %v4723_v53, %v2281_v14 }
 0x455   :  { %v4725_v13 = vpop.eup %4724  ;;  %v2461_v21 = vsel %vm61_vm0, %v2393_v38, 0.0  ;;  %v2474_v42 = vsel %vm61_vm0, %v2397_v19, 0.0  ;;  %v2488_v36 = vsel %vm61_vm0, %v2402_v48, 0.0  ;;  %v2401_v12 = vmul.f32 %v2369_v45, %v10507_v51 }
 0x456   :  { %v2464_v55 = vsel %vm61_vm0, %v2395_v49, 0.0  ;;  %v2351_v10 = vmul.f32 %v4725_v13, %v7925_v56  ;;  %v2463_v2 = vadd.f32 %v2462_v58, %v2461_v21  ;;  %v2286_v11 = vsel %vm2285_vm10, %v4723_v53, %v2282_v37  ;;  %v10510_v21 = vld [vmem:[#allocation38_spill] sm:$0xff] }
 0x457   :  { %vm2356_vm12 = vweird.f32 %v4725_v13  ;;  %v2476_v26 = vadd.f32 %v2475_v57, %v2474_v42  ;;  %v2291_v15 = vsel %vm7942_vm7, %v2290_v24, %v2286_v11  ;;  %v2477_v38 = vsel %vm61_vm0, %v2399_v44, 0.0  ;;  %v10511_v44 = vld [vmem:[#allocation40_spill] sm:$0xff] }
 0x458   :  { %v2352_v14 = vsub.f32 1.0, %v2351_v10  ;;  %v2403_v49 = vmul.f32 %v2371_v18, %v10508_v39  ;;  %v2304_v28 = vmul.f32 %v7876_v62, %v2291_v15  ;;  %v2296_v58 = vmul.f32 %v7860_v22, %v2291_v15  ;;  %v10512_v22 = vld [vmem:[#allocation5_spill] sm:$0xff]  ;;  %vm2357_vm13 = vmor %vm2355_vm9, %vm2356_vm12 }
 0x459   :  { %v2292_v19 = vmul.f32 %v7856_v0, %v2291_v15  ;;  %v2300_v53 = vmul.f32 %v7867_v9, %v2291_v15  ;;  %v2465_v57 = vadd.f32 %v2464_v55, %v2463_v2  ;;  %v2478_v37 = vadd.f32 %v2477_v38, %v2476_v26 }
 0x45a   :  { %v2353_v48 = vmul.f32 %v4725_v13, %v2352_v14  ;;  %v2487_v45 = vsel %vm61_vm0, %v2401_v12, 0.0  ;;  %v2384_v24 = vmul.f32 %v2296_v58, %v10509_v40  ;;  %v2490_v62 = vsel %vm61_vm0, %v2403_v49, 0.0 }
 0x45b   :  { %v2380_v10 = vmul.f32 %v2292_v19, %v10510_v21  ;;  %v2388_v42 = vmul.f32 %v2300_v53, %v10511_v44  ;;  %v2489_v18 = vadd.f32 %v2488_v36, %v2487_v45  ;;  %v2500_v0 = vsel %vm61_vm0, %v7932_v60, 0.0 }
 0x45c   :  { %v2354_v11 = vadd.f32 %v4725_v13, %v2353_v48  ;;  %v2392_v9 = vmul.f32 %v2304_v28, %v10512_v22  ;;  %v2427_v55 = vsel %vm61_vm0, %v2384_v24, 0.0  ;;  %v2503_v36 = vsel %vm61_vm0, %v2407_v7, 0.0  ;;  %v10514_v24 = vld [vmem:[#allocation15_spill] sm:$0xff] }
 0x45d   :  { %v2414_v2 = vsel %vm61_vm0, %v2380_v10, 0.0  ;;  %v2440_v26 = vsel %vm61_vm0, %v2388_v42, 0.0  ;;  %v2428_v15 = vadd.f32 %v2427_v55, %v7818_v52  ;;  %v2491_v56 = vadd.f32 %v2490_v62, %v2489_v18  ;;  %v10515_v42 = vld [vmem:[#allocation24_spill] sm:$0xff] }
 0x45e   :  { %v2358_v12 = vsel %vm2357_vm13, %v4725_v13, %v2354_v11  ;;  %v2415_v14 = vadd.f32 %v2414_v2, %v7874_v50  ;;  %v2441_v60 = vadd.f32 %v2440_v26, %v7927_v5  ;;  %v2502_v38 = vadd.f32 %v7939_v6, %v2500_v0 }
 0x45f   :  { %v2363_v28 = vsel %vm7973_vm11, %v2362_v61, %v2358_v12  ;;  %v2453_v49 = vsel %vm61_vm0, %v2392_v9, 0.0  ;;  %v2429_v19 = vrot.slane %v2428_v15, 4  ;;  %v10513_v61 = vld [vmem:[#allocation8_spill] sm:$0xff] }
 0x460   :  { %v2376_v58 = vmul.f32 %v7916_v1, %v2363_v28  ;;  %v2416_v53 = vrot.slane %v2415_v14, 4  ;;  %v2364_v13 = vmul.f32 %v7880_v8, %v2363_v28  ;;  %v2442_v7 = vrot.slane %v2441_v60, 4  ;;  %v10516_v1 = vld [vmem:[#allocation14_spill] sm:$0xff] }
 0x461   :  { %v2368_v52 = vmul.f32 %v7898_v63, %v2363_v28  ;;  %v2372_v50 = vmul.f32 %v7907_v54, %v2363_v28  ;;  %v2504_v5 = vadd.f32 %v2503_v36, %v2502_v38  ;;  %v2430_v48 = vadd.f32 %v2429_v19, %v2428_v15 }
 0x462   :  { %v2417_v27 = vadd.f32 %v2416_v53, %v2415_v14  ;;  %v2396_v45 = vmul.f32 %v2364_v13, %v10513_v61  ;;  %v2408_v6 = vmul.f32 %v2376_v58, %v10514_v24  ;;  %v2443_v10 = vadd.f32 %v2442_v7, %v2441_v60 }
 0x463   :  { %v2400_v18 = vmul.f32 %v2368_v52, %v10515_v42  ;;  %v2404_v11 = vmul.f32 %v2372_v50, %v10516_v1  ;;  %v2454_v62 = vadd.f32 %v2453_v49, %v7929_v32  ;;  %v2431_v8 = vrot.slane %v2430_v48, 2 }
 0x464   :  { %v2418_v0 = vrot.slane %v2417_v27, 2  ;;  %v2466_v63 = vsel %vm61_vm0, %v2396_v45, 0.0  ;;  %v2505_v54 = vsel %vm61_vm0, %v2408_v6, 0.0  ;;  %v2444_v55 = vrot.slane %v2443_v10, 2 }
 0x465   :  { %v2467_v9 = vadd.f32 %v2466_v63, %v2465_v57  ;;  %v2479_v2 = vsel %vm61_vm0, %v2400_v18, 0.0  ;;  %v2492_v26 = vsel %vm61_vm0, %v2404_v11, 0.0  ;;  %v2432_v36 = vadd.f32 %v2431_v8, %v2430_v48 }
 0x466   :  { %v2419_v12 = vadd.f32 %v2418_v0, %v2417_v27  ;;  %v2480_v15 = vadd.f32 %v2479_v2, %v2478_v37  ;;  %v2493_v14 = vadd.f32 %v2492_v26, %v2491_v56  ;;  %v2445_v28 = vadd.f32 %v2444_v55, %v2443_v10 }
 0x467   :  { %v2468_v60 = vrot.slane %v2467_v9, 4  ;;  %v2506_v38 = vadd.f32 %v2505_v54, %v2504_v5  ;;  %v2455_v32 = vrot.slane %v2454_v62, 4  ;;  %v2433_v49 = vrot.slane %v2432_v36, 1 }
 0x468   :  { %v2420_v58 = vrot.slane %v2419_v12, 1  ;;  %v2481_v19 = vrot.slane %v2480_v15, 4  ;;  %v2494_v53 = vrot.slane %v2493_v14, 4  ;;  %v2446_v7 = vrot.slane %v2445_v28, 1 }
 0x469   :  { %v2469_v13 = vadd.f32 %v2468_v60, %v2467_v9  ;;  %v2507_v57 = vrot.slane %v2506_v38, 4  ;;  %v2456_v52 = vadd.f32 %v2455_v32, %v2454_v62  ;;  %v8023_v50 = vadd.f32 %v2433_v49, %v2432_v36 }
 0x46a   :  { %v8025_v45 = vadd.f32 %v2420_v58, %v2419_v12  ;;  %v2482_v48 = vadd.f32 %v2481_v19, %v2480_v15  ;;  %v2495_v27 = vadd.f32 %v2494_v53, %v2493_v14  ;;  %v8031_v0 = vadd.f32 %v2446_v7, %v2445_v28 }
 0x46b   :  { %v2470_v37 = vrot.slane %v2469_v13, 2  ;;  %v2508_v56 = vadd.f32 %v2507_v57, %v2506_v38  ;;  %v2457_v6 = vrot.slane %v2456_v52, 2  ;;  %v2514_v5 = vmul.f32 %v8023_v50, %v8023_v50 }
 0x46c   :  { %v2513_v10 = vmul.f32 %v8025_v45, %v8025_v45  ;;  %v2483_v18 = vrot.slane %v2482_v48, 2  ;;  %v2496_v11 = vrot.slane %v2495_v27, 2  ;;  %v2515_v60 = vmul.f32 %v8031_v0, %v8031_v0 }
 0x46d   :  { %v2471_v8 = vadd.f32 %v2470_v37, %v2469_v13  ;;  %v2509_v62 = vrot.slane %v2508_v56, 2  ;;  %v2458_v63 = vadd.f32 %v2457_v6, %v2456_v52  ;;  %v2524_v54 = vsel %vm61_vm0, %v2514_v5, 0.0 }
 0x46e   :  { %v2521_v9 = vsel %vm61_vm0, %v2513_v10, 0.0  ;;  %v2484_v55 = vadd.f32 %v2483_v18, %v2482_v48  ;;  %v2497_v2 = vadd.f32 %v2496_v11, %v2495_v27  ;;  %2525 = vadd.xlane.f32.xlu2 %v2524_v54  ;;  %v2527_v13 = vsel %vm61_vm0, %v2515_v60, 0.0 }
 0x46f   :  { %2522 = vadd.xlane.f32.xlu1 %v2521_v9  ;;  %v2472_v26 = vrot.slane %v2471_v8, 1  ;;  %v2510_v36 = vadd.f32 %v2509_v62, %v2508_v56  ;;  %v2459_v32 = vrot.slane %v2458_v63, 1 }
 0x470   :  { %v2485_v12 = vrot.slane %v2484_v55, 1  ;;  %v2498_v14 = vrot.slane %v2497_v2, 1 }
 0x471   :  { %v8035_v15 = vadd.f32 %v2472_v26, %v2471_v8  ;;  %v2511_v38 = vrot.slane %v2510_v36, 1  ;;  %v8052_v52 = vadd.f32 %v2459_v32, %v2458_v63 }
 0x472   :  { %v8039_v28 = vadd.f32 %v2485_v12, %v2484_v55  ;;  %v8046_v53 = vadd.f32 %v2498_v14, %v2497_v2 }
 0x473   :  { %10517 = vst [vmem:[#allocation32_spill] sm:$0xff] %v8035_v15  ;;  %v2517_v49 = vmul.f32 %v8035_v15, %v8035_v15  ;;  %v8050_v57 = vadd.f32 %v2511_v38, %v2510_v36  ;;  %v2516_v37 = vmul.f32 %v8052_v52, %v8052_v52 }
 0x474   :  { %10518 = vst [vmem:[#allocation53_spill] sm:$0xff] %v8039_v28  ;;  %v2518_v58 = vmul.f32 %v8039_v28, %v8039_v28  ;;  %v2519_v48 = vmul.f32 %v8046_v53, %v8046_v53 }
 0x475   :  { %v2533_v19 = vsel %vm61_vm0, %v2517_v49, 0.0  ;;  %10519 = vst [vmem:[#allocation50_spill] sm:$0xff] %v8046_v53  ;;  %v2520_v27 = vmul.f32 %v8050_v57, %v8050_v57  ;;  %v2530_v5 = vsel %vm61_vm0, %v2516_v37, 0.0 }
 0x476   :  { %2534 = vadd.xlane.f32.xlu0 %v2533_v19  ;;  %v2536_v7 = vsel %vm61_vm0, %v2518_v58, 0.0  ;;  %10520 = vst [vmem:[#allocation16_spill] sm:$0xff] %v8050_v57  ;;  %2528 = vadd.xlane.f32.xlu2 %v2527_v13  ;;  %v2539_v56 = vsel %vm61_vm0, %v2519_v48, 0.0 }
 0x477   :  { %2537 = vadd.xlane.f32.xlu1 %v2536_v7  ;;  %v2542_v6 = vsel %vm61_vm0, %v2520_v27, 0.0 }
 0x47e   :  { %2540 = vadd.xlane.f32.xlu0 %v2539_v56  ;;  %2543 = vadd.xlane.f32.xlu2 %v2542_v6 }
 0x47f   :  { %2531 = vadd.xlane.f32.xlu1 %v2530_v5 }
 0x4e1   :  { %v8063_v10 = vpop.xlane.xlu2 %2525 }
 0x4e2   :  { %v8065_v18 = vpop.xlane.xlu1 %2522  ;;  %4726 = vrsqrt.f32 %v8063_v10  ;;  %v8070_v11 = vadd.f32 1.0, %v8063_v10  ;;  %vm2700_vm14 = vcmp.eq.f32.partialorder %v8063_v10, inf  ;;  %vm2702_vm15 = vcmp.eq.f32.partialorder %v8063_v10, 0.0 }
 0x4e3   :  { %4728 = vrsqrt.f32 %v8065_v18  ;;  %v8088_v32 = vadd.f32 1.0, %v8065_v18  ;;  %v2703_v56 = vand.u32 2147483648, %v8063_v10  ;;  %vm2688_vm1 = vcmp.eq.f32.partialorder %v8065_v18, inf }
 0x4e4   :  { %4730 = vrcp.f32 %v8070_v11  ;;  %vm2573_vm2 = vweird.f32 %v8070_v11  ;;  %vm2690_vm3 = vcmp.eq.f32.partialorder %v8065_v18, 0.0 }
 0x4e5   :  { %vm2558_vm10 = vweird.f32 %v8088_v32 }
 0x4e8   :  { %v4727_v8 = vpop.eup %4726 }
 0x4e9   :  { %v8073_v62 = vpop.xlane.xlu0 %2534  ;;  %v4729_v63 = vpop.eup %4728  ;;  %v2694_v54 = vmul.f32 %v4727_v8, %v8063_v10 }
 0x4ea   :  { %4732 = vrsqrt.f32 %v8073_v62  ;;  %v8077_v9 = vpop.xlane.xlu2 %2528  ;;  %v2682_v55 = vmul.f32 %v4729_v63, %v8065_v18  ;;  %v8080_v2 = vpop.xlane.xlu1 %2537  ;;  %vm2736_vm9 = vcmp.eq.f32.partialorder %v8073_v62, inf  ;;  %vm2738_vm12 = vcmp.eq.f32.partialorder %v8073_v62, 0.0 }
 0x4eb   :  { %v2695_v26 = vmul.f32 %v4727_v8, %v2694_v54  ;;  %4734 = vrsqrt.f32 %v8077_v9  ;;  %v8083_v14 = vpop.eup %4730  ;;  %v8121_v22 = vadd.f32 1.0, %v8077_v9  ;;  %vm2712_vm6 = vcmp.eq.f32.partialorder %v8077_v9, inf }
 0x4ec   :  { %v2683_v36 = vmul.f32 %v4729_v63, %v2682_v55  ;;  %4736 = vrsqrt.f32 %v8080_v2  ;;  %v2569_v48 = vmul.f32 %v8083_v14, %v8070_v11  ;;  %vm2574_vm5 = vweird.f32 %v8083_v14 }
 0x4ed   :  { %v2696_v12 = vmul.f32 0.5, %v2695_v26  ;;  %4738 = vrcp.f32 %v8088_v32  ;;  %v2579_v26 = vand.u32 2147483648, %v8070_v11  ;;  %vm8188_vm8 = vmor %vm2573_vm2, %vm2574_vm5  ;;  %vm2714_vm11 = vcmp.eq.f32.partialorder %v8077_v9, 0.0 }
 0x4ee   :  { %v2684_v49 = vmul.f32 0.5, %v2683_v36  ;;  %v2564_v36 = vand.u32 2147483648, %v8088_v32 }
 0x4ef   :  { %v2697_v38 = vsub.f32 1.5, %v2696_v12 }
 0x4f0   :  { %v8085_v60 = vpop.eup %4732  ;;  %v2685_v6 = vsub.f32 1.5, %v2684_v49  ;;  %v8117_v49 = vadd.f32 1.0, %v8073_v62  ;;  %v8133_v42 = vor.u32 1.1754944e-38, %v2564_v36 }
 0x4f1   :  { %v2730_v58 = vmul.f32 %v8085_v60, %v8073_v62  ;;  %v2698_v19 = vmul.f32 %v4727_v8, %v2697_v38  ;;  %v8096_v7 = vpop.xlane.xlu0 %2540  ;;  %v4735_v27 = vpop.eup %4734 }
 0x4f2   :  { %v8093_v13 = vpop.xlane.xlu2 %2543  ;;  %v2706_v8 = vmul.f32 %v4735_v27, %v8077_v9  ;;  %v8107_v54 = vpop.xlane.xlu1 %2531  ;;  %v2686_v38 = vmul.f32 %v4729_v63, %v2685_v6 }
 0x4f3   :  { %v2699_v37 = vmul.f32 %v2698_v19, %v8063_v10  ;;  %v2731_v5 = vmul.f32 %v8085_v60, %v2730_v58  ;;  %4740 = vrsqrt.f32 %v8093_v13  ;;  %v8113_v12 = vpop.eup %4736  ;;  %v2570_v19 = vsub.f32 1.0, %v2569_v48 }
 0x4f4   :  { %4742 = vrsqrt.f32 %v8096_v7  ;;  %v2707_v58 = vmul.f32 %v4735_v27, %v2706_v8  ;;  %v8128_v57 = vpop.eup %4738  ;;  %v2742_v48 = vmul.f32 %v8113_v12, %v8080_v2  ;;  %v2580_v8 = vor.u32 1.1754944e-38, %v2579_v26 }
 0x4f5   :  { %v2701_v55 = vsel %vm2700_vm14, %v8063_v10, %v2699_v37  ;;  %4744 = vrsqrt.f32 %v8107_v54  ;;  %v2577_v37 = vand.u32 2147483647, %v8070_v11  ;;  %v2732_v1 = vmul.f32 0.5, %v2731_v5 }
 0x4f6   :  { %v2704_v24 = vsel %vm2702_vm15, %v2703_v56, %v2701_v55  ;;  %v2708_v61 = vmul.f32 0.5, %v2707_v58  ;;  %4746 = vrcp.f32 %v8117_v49  ;;  %v2571_v6 = vmul.f32 %v8083_v14, %v2570_v19 }
 0x4f7   :  { %4748 = vrcp.f32 %v8121_v22  ;;  %v8146_v26 = vadd.f32 1.0, %v8080_v2  ;;  %vm8148_vm4 = vcmp.eq.f32.partialorder %v2577_v37, 8.507059e+37  ;;  %v8152_v58 = vadd.f32 1e-08, %v2704_v24 }
 0x4f8   :  { %v2709_v56 = vsub.f32 1.5, %v2708_v61  ;;  %v2687_v63 = vmul.f32 %v2686_v38, %v8065_v18  ;;  %v2733_v61 = vsub.f32 1.5, %v2732_v1  ;;  %v2554_v19 = vmul.f32 %v8128_v57, %v8088_v32 }
 0x4f9   :  { %v8135_v51 = vpop.eup %4740  ;;  %v2743_v55 = vmul.f32 %v8113_v12, %v2742_v48  ;;  %v2572_v43 = vadd.f32 %v8083_v14, %v2571_v6  ;;  %4750 = vrcp.f32 %v8152_v58  ;;  %v8165_v1 = vadd.f32 1.0, %v8096_v7 }
 0x4fa   :  { %v8141_v5 = vpop.eup %4742  ;;  %v2766_v37 = vmul.f32 %v8135_v51, %v8093_v13  ;;  %v2710_v24 = vmul.f32 %v4735_v27, %v2709_v56  ;;  %4752 = vrcp.f32 %v8146_v26  ;;  %v8173_v53 = vadd.f32 1.0, %v8093_v13 }
 0x4fb   :  { %v4745_v39 = vpop.eup %4744  ;;  %v2754_v38 = vmul.f32 %v8141_v5, %v8096_v7  ;;  %vm2559_vm7 = vweird.f32 %v8128_v57  ;;  %v2689_v27 = vsel %vm2688_vm1, %v8065_v18, %v2687_v63  ;;  %v8182_v56 = vadd.f32 1.0, %v8107_v54 }
 0x4fc   :  { %v2718_v35 = vmul.f32 %v4745_v39, %v8107_v54  ;;  %10523 = vst [vmem:[#allocation62_spill] sm:$0xff] %v8173_v53  ;;  %v8176_v6 = vpop.eup %4746  ;;  %v2555_v16 = vsub.f32 1.0, %v2554_v19  ;;  %v2734_v28 = vmul.f32 %v8085_v60, %v2733_v61  ;;  %v2744_v63 = vmul.f32 0.5, %v2743_v55 }
 0x4fd   :  { %v8192_v31 = vpop.eup %4748  ;;  %v2767_v44 = vmul.f32 %v8135_v51, %v2766_v37  ;;  %v2711_v11 = vmul.f32 %v2710_v24, %v8077_v9  ;;  %4754 = vrcp.f32 %v8165_v1  ;;  %v2755_v19 = vmul.f32 %v8141_v5, %v2754_v38 }
 0x4fe   :  { %v2719_v3 = vmul.f32 %v4745_v39, %v2718_v35  ;;  %v2576_v35 = vsel %vm8188_vm8, %v8083_v14, %v2572_v43  ;;  %v10526_v55 = vand.u32 2147483648, %v8065_v18  ;;  %4756 = vrcp.f32 %v8173_v53 }
 0x4ff   :  { %v4751_v61 = vpop.eup %4750  ;;  %v2581_v24 = vsel %vm8148_vm4, %v2580_v8, %v2576_v35  ;;  %v2735_v30 = vmul.f32 %v2734_v28, %v8073_v62  ;;  %4758 = vrcp.f32 %v8182_v56  ;;  %v2756_v36 = vmul.f32 0.5, %v2755_v19  ;;  %vm8256_vm4 = vmor %vm2558_vm10, %vm2559_vm7 }
 0x500   :  { %v2720_v60 = vmul.f32 0.5, %v2719_v3  ;;  %v2692_v37 = vsel %vm2690_vm3, %v10526_v55, %v2689_v27  ;;  %v2801_v25 = vmul.f32 %v4751_v61, %v8152_v58  ;;  %v2556_v3 = vmul.f32 %v8128_v57, %v2555_v16  ;;  %v8216_v38 = vpop.eup %4752 }
 0x501   :  { %v2745_v27 = vsub.f32 1.5, %v2744_v63  ;;  %v2768_v55 = vmul.f32 0.5, %v2767_v44  ;;  %vm2724_vm13 = vcmp.eq.f32.partialorder %v8107_v54, inf  ;;  %v10527_v16 = vand.u32 2147483647, %v8088_v32 }
 0x502   :  { %v2721_v14 = vsub.f32 1.5, %v2720_v60  ;;  %v2713_v60 = vsel %vm2712_vm6, %v8077_v9, %v2711_v11  ;;  %v2802_v8 = vsub.f32 1.0, %v2801_v25  ;;  %v8231_v28 = vadd.f32 1e-08, %v2692_v37 }
 0x503   :  { %vm8227_vm14 = vcmp.eq.f32.partialorder %v10527_v16, 8.507059e+37  ;;  %v2582_v44 = vmul.f32 %v2581_v24, %v8063_v10  ;;  %v2811_v48 = vand.u32 2147483648, %v8152_v58  ;;  %v2584_v11 = vmul.f32 %v8192_v31, %v8121_v22  ;;  %v8237_v19 = vpop.eup %4754 }
 0x504   :  { %v2722_v63 = vmul.f32 %v4745_v39, %v2721_v14  ;;  %vm2748_vm15 = vcmp.eq.f32.partialorder %v8080_v2, inf  ;;  %v2803_v25 = vmul.f32 %v4751_v61, %v2802_v8  ;;  %vm2806_vm1 = vweird.f32 %v4751_v61  ;;  %v8242_v37 = vpop.eup %4756 }
 0x505   :  { %v2809_v16 = vand.u32 2147483647, %v8152_v58  ;;  %v2557_v43 = vadd.f32 %v8128_v57, %v2556_v3  ;;  %10530 = vst [vmem:[#allocation63_spill] sm:$0xff] %v8242_v37  ;;  %v2746_v39 = vmul.f32 %v8113_v12, %v2745_v27  ;;  %v2769_v10 = vsub.f32 1.5, %v2768_v55  ;;  %v8260_v3 = vpop.eup %4758 }
 0x506   :  { %v2727_v14 = vand.u32 2147483648, %v8107_v54  ;;  %4760 = vrcp.f32 %v8231_v28  ;;  %v2737_v24 = vsel %vm2736_vm9, %v8073_v62, %v2735_v30  ;;  %v2757_v53 = vsub.f32 1.5, %v2756_v36 }
 0x507   :  { %vm2726_vm2 = vcmp.eq.f32.partialorder %v8107_v54, 0.0  ;;  %v2804_v8 = vadd.f32 %v4751_v61, %v2803_v25  ;;  %vm2805_vm3 = vweird.f32 %v8152_v58  ;;  %v10533_v27 = vand.u32 2147483648, %v8077_v9 }
 0x508   :  { %v2723_v55 = vmul.f32 %v2722_v63, %v8107_v54  ;;  %vm2807_vm5 = vmor %vm2805_vm3, %vm2806_vm1  ;;  %v2812_v58 = vor.u32 1.1754944e-38, %v2811_v48  ;;  %v2585_v36 = vsub.f32 1.0, %v2584_v11  ;;  %vm2750_vm6 = vcmp.eq.f32.partialorder %v8080_v2, 0.0 }
 0x509   :  { %v2716_v30 = vsel %vm2714_vm11, %v10533_v27, %v2713_v60  ;;  %vm2772_vm7 = vcmp.eq.f32.partialorder %v8093_v13, inf  ;;  %v2674_v32 = vmul.f32 %v2582_v44, %v8023_v50  ;;  %v2808_v25 = vsel %vm2807_vm5, %v4751_v61, %v2804_v8 }
 0x50a   :  { %vm2810_vm8 = vcmp.eq.f32.partialorder %v2809_v16, 8.507059e+37  ;;  %v2561_v37 = vsel %vm8256_vm4, %v8128_v57, %v2557_v43  ;;  %v2747_v60 = vmul.f32 %v2746_v39, %v8080_v2  ;;  %v2770_v63 = vmul.f32 %v8135_v51, %v2769_v10 }
 0x50b   :  { %v2813_v27 = vsel %vm2810_vm8, %v2812_v58, %v2808_v25  ;;  %v2586_v48 = vmul.f32 %v8192_v31, %v2585_v36  ;;  %v10534_v11 = vand.u32 2147483648, %v8073_v62  ;;  %v2758_v50 = vmul.f32 %v8141_v5, %v2757_v53 }
 0x50c   :  { %v8284_v61 = vmul.f32 %v2813_v27, %v2674_v32  ;;  %v8286_v44 = vadd.f32 1e-08, %v2716_v30  ;;  %v4761_v57 = vpop.eup %4760  ;;  %v2725_v51 = vsel %vm2724_vm13, %v8107_v54, %v2723_v55  ;;  %v2566_v43 = vsel %vm8227_vm14, %v8133_v42, %v2561_v37 }
 0x50d   :  { %v8281_v15 = vsel %vm2738_vm12, %v10534_v11, %v2737_v24  ;;  %vm2589_vm9 = vweird.f32 %v8192_v31  ;;  %v2599_v16 = vmul.f32 %v8260_v3, %v8182_v56  ;;  %v2786_v5 = vmul.f32 %v4761_v57, %v8231_v28 }
 0x50e   :  { %v2909_v53 = vmul.f32 %v8284_v61, %v10416_v33  ;;  %v2587_v39 = vadd.f32 %v8192_v31, %v2586_v48  ;;  %4762 = vrcp.f32 %v8286_v44  ;;  %v2749_v10 = vsel %vm2748_vm15, %v8080_v2, %v2747_v60 }
 0x50f   :  { %v2771_v42 = vmul.f32 %v2770_v63, %v8093_v13  ;;  %vm2588_vm10 = vweird.f32 %v8121_v22  ;;  %v2594_v35 = vand.u32 2147483648, %v8121_v22  ;;  %v2567_v24 = vmul.f32 %v2566_v43, %v8065_v18 }
 0x510   :  { %v2949_v37 = vsel %vm61_vm0, %v2909_v53, 0.0  ;;  %v2787_v8 = vsub.f32 1.0, %v2786_v5  ;;  %v2592_v12 = vand.u32 2147483647, %v8121_v22  ;;  %v8312_v30 = vmul.f32 %v2758_v50, %v8096_v7  ;;  %vm8320_vm11 = vmor %vm2588_vm10, %vm2589_vm9 }
 0x511   :  { %v2728_v55 = vsel %vm2726_vm2, %v2727_v14, %v2725_v51  ;;  %2950 = vadd.xlane.f32.xlu2 %v2949_v37  ;;  %v2794_v58 = vand.u32 2147483647, %v8231_v28  ;;  %v2796_v36 = vand.u32 2147483648, %v8231_v28  ;;  %vm2791_vm12 = vweird.f32 %v4761_v57 }
 0x512   :  { %v2788_v18 = vmul.f32 %v4761_v57, %v2787_v8  ;;  %v2591_v22 = vsel %vm8320_vm11, %v8192_v31, %v2587_v39  ;;  %v2600_v25 = vsub.f32 1.0, %v2599_v16  ;;  %v10537_v14 = vand.u32 2147483648, %v8080_v2 }
 0x513   :  { %v2773_v63 = vsel %vm2772_vm7, %v8093_v13, %v2771_v42  ;;  %vm2790_vm13 = vweird.f32 %v8231_v28  ;;  %v2595_v27 = vor.u32 1.1754944e-38, %v2594_v35  ;;  %v2673_v11 = vmul.f32 %v2567_v24, %v8025_v45 }
 0x514   :  { %v8331_v60 = vsel %vm2750_vm6, %v10537_v14, %v2749_v10  ;;  %v4763_v48 = vpop.eup %4762  ;;  %v2789_v50 = vadd.f32 %v4761_v57, %v2788_v18  ;;  %vm2593_vm14 = vcmp.eq.f32.partialorder %v2592_v12, 8.507059e+37  ;;  %v8338_v31 = vadd.f32 1e-08, %v2728_v55  ;;  %vm2792_vm2 = vmor %vm2790_vm13, %vm2791_vm12 }
 0x515   :  { %vm2760_vm15 = vcmp.eq.f32.partialorder %v8096_v7, inf  ;;  %vm2774_vm1 = vcmp.eq.f32.partialorder %v8093_v13, 0.0  ;;  %v2797_v51 = vor.u32 1.1754944e-38, %v2796_v36  ;;  %v2596_v43 = vsel %vm2593_vm14, %v2595_v27, %v2591_v22 }
 0x516   :  { %v2816_v16 = vmul.f32 %v4763_v48, %v8286_v44  ;;  %v2601_v53 = vmul.f32 %v8260_v3, %v2600_v25  ;;  %v2793_v28 = vsel %vm2792_vm2, %v4761_v57, %v2789_v50  ;;  %vm2795_vm3 = vcmp.eq.f32.partialorder %v2794_v58, 8.507059e+37 }
 0x517   :  { %vm2603_vm4 = vweird.f32 %v8182_v56  ;;  %4764 = vrcp.f32 %v8338_v31  ;;  %v2798_v45 = vsel %vm2795_vm3, %v2797_v51, %v2793_v28  ;;  %v2824_v39 = vand.u32 2147483647, %v8286_v44 }
 0x518   :  { %v2817_v5 = vsub.f32 1.0, %v2816_v16  ;;  %v2826_v10 = vand.u32 2147483648, %v8286_v44  ;;  %v8348_v42 = vmul.f32 %v2798_v45, %v2673_v11  ;;  %v2597_v35 = vmul.f32 %v2596_v43, %v8077_v9 }
 0x519   :  { %vm2604_vm5 = vweird.f32 %v8260_v3  ;;  %v2614_v57 = vmul.f32 %v8176_v6, %v8117_v49  ;;  %vm2820_vm6 = vweird.f32 %v8286_v44  ;;  %vm2821_vm7 = vweird.f32 %v4763_v48 }
 0x51a   :  { %v2818_v37 = vmul.f32 %v4763_v48, %v2817_v5  ;;  %v2602_v24 = vadd.f32 %v8260_v3, %v2601_v53  ;;  %v2906_v8 = vmul.f32 %v8348_v42, %v10420_v46  ;;  %v2905_v12 = vmul.f32 %v8348_v42, %v10421_v59  ;;  %vm8369_vm9 = vmor %vm2603_vm4, %vm2604_vm5 }
 0x51b   :  { %v2907_v9 = vmul.f32 %v8348_v42, %v6943_v29  ;;  %v2609_v55 = vand.u32 2147483648, %v8182_v56  ;;  %vm8363_vm8 = vcmp.eq.f32.partialorder %v2824_v39, 8.507059e+37  ;;  %v2827_v32 = vor.u32 1.1754944e-38, %v2826_v10  ;;  %vm2822_vm10 = vmor %vm2820_vm6, %vm2821_vm7 }
 0x51c   :  { %v2819_v58 = vadd.f32 %v4763_v48, %v2818_v37  ;;  %v2607_v22 = vand.u32 2147483647, %v8182_v56  ;;  %v2940_v14 = vsel %vm61_vm0, %v2906_v8, 0.0  ;;  %v2937_v27 = vsel %vm61_vm0, %v2905_v12, 0.0 }
 0x51d   :  { %v4765_v25 = vpop.eup %4764  ;;  %v2675_v11 = vmul.f32 %v2597_v35, %v8031_v0  ;;  %v2615_v50 = vsub.f32 1.0, %v2614_v57  ;;  %2941 = vadd.xlane.f32.xlu1 %v2940_v14  ;;  %2938 = vadd.xlane.f32.xlu0 %v2937_v27  ;;  %v2943_v51 = vsel %vm61_vm0, %v2907_v9, 0.0  ;;  %v2606_v56 = vsel %vm8369_vm9, %v8260_v3, %v2602_v24 }
 0x51e   :  { %v2823_v43 = vsel %vm2822_vm10, %v4763_v48, %v2819_v58  ;;  %v2831_v16 = vmul.f32 %v4765_v25, %v8338_v31  ;;  %v2761_v0 = vsel %vm2760_vm15, %v8096_v7, %v8312_v30  ;;  %vm2762_vm11 = vcmp.eq.f32.partialorder %v8096_v7, 0.0  ;;  %2944 = vadd.xlane.f32.xlu2 %v2943_v51 }
 0x51f   :  { %v10542_v44 = vand.u32 2147483648, %v8093_v13  ;;  %v2828_v48 = vsel %vm8363_vm8, %v2827_v32, %v2823_v43  ;;  %v2610_v28 = vor.u32 1.1754944e-38, %v2609_v55  ;;  %vm2608_vm12 = vcmp.eq.f32.partialorder %v2607_v22, 8.507059e+37 }
 0x520   :  { %v8396_v3 = vmul.f32 %v2828_v48, %v2675_v11  ;;  %v2832_v45 = vsub.f32 1.0, %v2831_v16  ;;  %v8399_v5 = vadd.f32 1e-08, %v8281_v15  ;;  %v2910_v30 = vmul.f32 %v8284_v61, %v10422_v41 }
 0x521   :  { %v2776_v53 = vsel %vm2774_vm1, %v10542_v44, %v2773_v63  ;;  %v2611_v39 = vsel %vm2608_vm12, %v2610_v28, %v2606_v56  ;;  %vm2836_vm13 = vweird.f32 %v4765_v25  ;;  %v2616_v10 = vmul.f32 %v8176_v6, %v2615_v50 }
 0x522   :  { %v2913_v63 = vmul.f32 %v8396_v3, %v10425_v4  ;;  %v2914_v35 = vmul.f32 %v8396_v3, %v10426_v17  ;;  %v2833_v57 = vmul.f32 %v4765_v25, %v2832_v45  ;;  %v2629_v37 = vmul.f32 %v8216_v38, %v8146_v26 }
 0x523   :  { %v8410_v24 = vadd.f32 1e-08, %v2776_v53  ;;  %v2911_v15 = vmul.f32 %v8284_v61, %v6946_v47  ;;  %v2841_v8 = vand.u32 2147483648, %v8338_v31  ;;  %4766 = vrcp.f32 %v8399_v5 }
 0x524   :  { %v2961_v12 = vsel %vm61_vm0, %v2913_v63, 0.0  ;;  %v2834_v9 = vadd.f32 %v4765_v25, %v2833_v57  ;;  %vm2835_vm14 = vweird.f32 %v8338_v31  ;;  %v2839_v55 = vand.u32 2147483647, %v8338_v31 }
 0x525   :  { %v2952_v58 = vsel %vm61_vm0, %v2910_v30, 0.0  ;;  %v2612_v36 = vmul.f32 %v2611_v39, %v8107_v54  ;;  %vm8422_vm15 = vmor %vm2835_vm14, %vm2836_vm13  ;;  %v2617_v18 = vadd.f32 %v8176_v6, %v2616_v10  ;;  %vm2619_vm1 = vweird.f32 %v8176_v6  ;;  %2962 = vadd.xlane.f32.xlu1 %v2961_v12 }
 0x526   :  { %2953 = vadd.xlane.f32.xlu0 %v2952_v58  ;;  %v2964_v22 = vsel %vm61_vm0, %v2914_v35, 0.0  ;;  %v2838_v31 = vsel %vm8422_vm15, %v4765_v25, %v2834_v9  ;;  %v2624_v14 = vand.u32 2147483648, %v8117_v49  ;;  %v2630_v27 = vsub.f32 1.0, %v2629_v37 }
 0x527   :  { %2965 = vadd.xlane.f32.xlu2 %v2964_v22  ;;  %v2912_v54 = vmul.f32 %v8284_v61, %v10509_v40  ;;  %v2842_v11 = vor.u32 1.1754944e-38, %v2841_v8  ;;  %vm2618_vm2 = vweird.f32 %v8117_v49  ;;  %v2622_v50 = vand.u32 2147483647, %v8117_v49 }
 0x528   :  { %v10545_v51 = vand.u32 2147483648, %v8096_v7  ;;  %4768 = vrcp.f32 %v8410_v24  ;;  %v2908_v25 = vmul.f32 %v8348_v42, %v10510_v21  ;;  %vm2840_vm3 = vcmp.eq.f32.partialorder %v2839_v55, 8.507059e+37  ;;  %vm8445_vm4 = vmor %vm2618_vm2, %vm2619_vm1 }
 0x529   :  { %v4767_v56 = vpop.eup %4766  ;;  %v2843_v16 = vsel %vm2840_vm3, %v2842_v11, %v2838_v31  ;;  %v2621_v49 = vsel %vm8445_vm4, %v8176_v6, %v2617_v18  ;;  %v8454_v44 = vadd.f32 1e-08, %v8331_v60  ;;  %v2676_v42 = vmul.f32 %v2612_v36, %v8052_v52  ;;  %v10550_v11 = vld [vmem:[#allocation32_spill] sm:$0xff] }
 0x52a   :  { %v2764_v43 = vsel %vm2762_vm11, %v10545_v51, %v2761_v0  ;;  %v2631_v0 = vmul.f32 %v8216_v38, %v2630_v27  ;;  %v2625_v53 = vor.u32 1.1754944e-38, %v2624_v14  ;;  %v2846_v48 = vmul.f32 %v4767_v56, %v8399_v5 }
 0x52b   :  { %v2644_v28 = vmul.f32 %v8237_v19, %v8165_v1  ;;  %v2955_v45 = vsel %vm61_vm0, %v2911_v15, 0.0  ;;  %v2958_v30 = vsel %vm61_vm0, %v2912_v54, 0.0  ;;  %vm2623_vm5 = vcmp.eq.f32.partialorder %v2622_v50, 8.507059e+37 }
 0x52c   :  { %4770 = vrcp.f32 %v8454_v44  ;;  %v2946_v6 = vsel %vm61_vm0, %v2908_v25, 0.0  ;;  %v8464_v39 = vmul.f32 %v2843_v16, %v2676_v42  ;;  %v2626_v60 = vsel %vm2623_vm5, %v2625_v53, %v2621_v49 }
 0x52d   :  { %v2847_v10 = vsub.f32 1.0, %v2846_v48  ;;  %v2854_v52 = vand.u32 2147483647, %v8399_v5  ;;  %v2856_v63 = vand.u32 2147483648, %v8399_v5  ;;  %v2632_v35 = vadd.f32 %v8216_v38, %v2631_v0  ;;  %2947 = vadd.xlane.f32.xlu1 %v2946_v6 }
 0x52e   :  { %vm2634_vm6 = vweird.f32 %v8216_v38  ;;  %v8470_v57 = vpop.eup %4768  ;;  %2956 = vadd.xlane.f32.xlu0 %v2955_v45  ;;  %vm2851_vm7 = vweird.f32 %v4767_v56  ;;  %v2639_v15 = vand.u32 2147483648, %v8146_v26  ;;  %v2645_v8 = vsub.f32 1.0, %v2644_v28  ;;  %v10551_v45 = vld [vmem:[#allocation7_spill] sm:$0xff] }
 0x52f   :  { %v2848_v37 = vmul.f32 %v4767_v56, %v2847_v10  ;;  %2959 = vadd.xlane.f32.xlu2 %v2958_v30  ;;  %v2915_v12 = vmul.f32 %v8396_v3, %v6949_v23  ;;  %v2627_v9 = vmul.f32 %v2626_v60, %v8073_v62  ;;  %vm2633_vm8 = vweird.f32 %v8146_v26 }
 0x530   :  { %v2637_v55 = vand.u32 2147483647, %v8146_v26  ;;  %v2917_v58 = vmul.f32 %v8464_v39, %v10430_v20  ;;  %vm2850_vm9 = vweird.f32 %v8399_v5  ;;  %vm8483_vm10 = vmor %vm2633_vm8, %vm2634_vm6  ;;  %v8487_v18 = vadd.f32 1e-08, %v2764_v43 }
 0x531   :  { %v2849_v36 = vadd.f32 %v4767_v56, %v2848_v37  ;;  %v2918_v62 = vmul.f32 %v8464_v39, %v10435_v34  ;;  %vm2852_vm11 = vmor %vm2850_vm9, %vm2851_vm7  ;;  %vm2855_vm12 = vcmp.eq.f32.partialorder %v2854_v52, 8.507059e+37  ;;  %v2857_v26 = vor.u32 1.1754944e-38, %v2856_v63  ;;  %v10554_v63 = vld [vmem:[#allocation54_spill] sm:$0xff] }
 0x532   :  { %v4771_v22 = vpop.eup %4770  ;;  %v2636_v5 = vsel %vm8483_vm10, %v8216_v38, %v2632_v35  ;;  %v2640_v14 = vor.u32 1.1754944e-38, %v2639_v15  ;;  %v2646_v54 = vmul.f32 %v8237_v19, %v2645_v8  ;;  %v2677_v50 = vmul.f32 %v2627_v9, %v10550_v11  ;;  %v10555_v35 = vld [vmem:[#allocation40_spill] sm:$0xff]  ;;  %v10556_v8 = vld [vmem:[#allocation62_spill] sm:$0xff] }
 0x533   :  { %v2853_v31 = vsel %vm2852_vm11, %v4767_v56, %v2849_v36  ;;  %v2861_v27 = vmul.f32 %v4771_v22, %v8454_v44  ;;  %vm2638_vm13 = vcmp.eq.f32.partialorder %v2637_v55, 8.507059e+37  ;;  %4772 = vrcp.f32 %v8487_v18 }
 0x534   :  { %v2858_v51 = vsel %vm2855_vm12, %v2857_v26, %v2853_v31  ;;  %v2973_v43 = vsel %vm61_vm0, %v2917_v58, 0.0  ;;  %v2967_v25 = vsel %vm61_vm0, %v2915_v12, 0.0  ;;  %v2641_v61 = vsel %vm2638_vm13, %v2640_v14, %v2636_v5  ;;  %v10557_v12 = vld [vmem:[#allocation63_spill] sm:$0xff]  ;;  %v10558_v58 = vld [vmem:[#allocation53_spill] sm:$0xff] }
 0x535   :  { %v2862_v16 = vsub.f32 1.0, %v2861_v27  ;;  %v2976_v38 = vsel %vm61_vm0, %v2918_v62, 0.0  ;;  %v8502_v56 = vmul.f32 %v2858_v51, %v2677_v50  ;;  %v2871_v49 = vand.u32 2147483648, %v8454_v44  ;;  %2974 = vadd.xlane.f32.xlu1 %v2973_v43  ;;  %v10559_v43 = vld [vmem:[#allocation55_spill] sm:$0xff] }
 0x536   :  { %vm2649_vm14 = vweird.f32 %v8237_v19  ;;  %2968 = vadd.xlane.f32.xlu0 %v2967_v25  ;;  %vm2866_vm15 = vweird.f32 %v4771_v22  ;;  %v2869_v42 = vand.u32 2147483647, %v8454_v44  ;;  %v2647_v53 = vadd.f32 %v8237_v19, %v2646_v54 }
 0x537   :  { %v2863_v0 = vmul.f32 %v4771_v22, %v2862_v16  ;;  %2977 = vadd.xlane.f32.xlu2 %v2976_v38  ;;  %v2642_v48 = vmul.f32 %v2641_v61, %v8080_v2  ;;  %vm2648_vm1 = vweird.f32 %v8165_v1  ;;  %v2654_v28 = vand.u32 2147483648, %v8165_v1  ;;  %v10560_v61 = vld [vmem:[#allocation20_spill] sm:$0xff] }
 0x538   :  { %v2919_v30 = vmul.f32 %v8464_v39, %v10551_v45  ;;  %vm2865_vm2 = vweird.f32 %v8454_v44  ;;  %vm8514_vm3 = vmor %vm2648_vm1, %vm2649_vm14  ;;  %v2652_v10 = vand.u32 2147483647, %v8165_v1  ;;  %v2921_v2 = vmul.f32 %v8502_v56, %v10554_v63 }
 0x539   :  { %v2864_v6 = vadd.f32 %v4771_v22, %v2863_v0  ;;  %v4773_v52 = vpop.eup %4772  ;;  %v2916_v37 = vmul.f32 %v8396_v3, %v10555_v35  ;;  %vm2867_vm4 = vmor %vm2865_vm2, %vm2866_vm15  ;;  %v2872_v15 = vor.u32 1.1754944e-38, %v2871_v49  ;;  %v2659_v9 = vmul.f32 %v10557_v12, %v10556_v8  ;;  %v10561_v0 = vld [vmem:[#allocation19_spill] sm:$0xff] }
 0x53a   :  { %vm2870_vm5 = vcmp.eq.f32.partialorder %v2869_v42, 8.507059e+37  ;;  %v2651_v55 = vsel %vm8514_vm3, %v8237_v19, %v2647_v53  ;;  %v2876_v1 = vmul.f32 %v4773_v52, %v8487_v18  ;;  %v2678_v36 = vmul.f32 %v2642_v48, %v10558_v58 }
 0x53b   :  { %v2868_v44 = vsel %vm2867_vm4, %v4771_v22, %v2864_v6  ;;  %v2655_v62 = vor.u32 1.1754944e-38, %v2654_v28  ;;  %v2979_v3 = vsel %vm61_vm0, %v2919_v30, 0.0  ;;  %vm2653_vm6 = vcmp.eq.f32.partialorder %v2652_v10, 8.507059e+37  ;;  %v10562_v30 = vld [vmem:[#allocation50_spill] sm:$0xff] }
 0x53c   :  { %v2873_v32 = vsel %vm2870_vm5, %v2872_v15, %v2868_v44  ;;  %v2877_v26 = vsub.f32 1.0, %v2876_v1  ;;  %v2985_v5 = vsel %vm61_vm0, %v2921_v2, 0.0  ;;  %v2660_v22 = vsub.f32 1.0, %v2659_v9  ;;  %v10563_v44 = vld [vmem:[#allocation34_spill] sm:$0xff]  ;;  %v10564_v1 = vld [vmem:[#allocation35_spill] sm:$0xff] }
 0x53d   :  { %v2874_v31 = vmul.f32 %v2873_v32, %v2678_v36  ;;  %v2656_v14 = vsel %vm2653_vm6, %v2655_v62, %v2651_v55  ;;  %2986 = vadd.xlane.f32.xlu1 %v2985_v5  ;;  %v2970_v27 = vsel %vm61_vm0, %v2916_v37, 0.0  ;;  %v2886_v19 = vand.u32 2147483648, %v8487_v18  ;;  %v10565_v32 = vld [vmem:[#allocation56_spill] sm:$0xff] }
 0x53e   :  { %2980 = vadd.xlane.f32.xlu0 %v2979_v3  ;;  %v2878_v54 = vmul.f32 %v4773_v52, %v2877_v26  ;;  %vm2881_vm7 = vweird.f32 %v4773_v52  ;;  %v2884_v11 = vand.u32 2147483647, %v8487_v18  ;;  %v2891_v50 = vmul.f32 %v8470_v57, %v8410_v24 }
 0x53f   :  { %2971 = vadd.xlane.f32.xlu2 %v2970_v27  ;;  %v2657_v51 = vmul.f32 %v2656_v14, %v8096_v7  ;;  %vm2880_vm8 = vweird.f32 %v8487_v18  ;;  %v2925_v25 = vmul.f32 %v2874_v31, %v10559_v43  ;;  %v2926_v16 = vmul.f32 %v2874_v31, %v10560_v61 }
 0x540   :  { %v2879_v38 = vadd.f32 %v4773_v52, %v2878_v54  ;;  %v2661_v49 = vmul.f32 %v10557_v12, %v2660_v22  ;;  %v2922_v42 = vmul.f32 %v8502_v56, %v10561_v0  ;;  %vm2882_vm9 = vmor %vm2880_vm8, %vm2881_vm7  ;;  %v2887_v53 = vor.u32 1.1754944e-38, %v2886_v19 }
 0x541   :  { %vm2885_vm10 = vcmp.eq.f32.partialorder %v2884_v11, 8.507059e+37  ;;  %v2892_v28 = vsub.f32 1.0, %v2891_v50  ;;  %v2679_v6 = vmul.f32 %v2657_v51, %v10562_v30  ;;  %v2997_v18 = vsel %vm61_vm0, %v2925_v25, 0.0  ;;  %v10566_v50 = vld [vmem:[#allocation24_spill] sm:$0xff]  ;;  %v10567_v25 = vld [vmem:[#allocation21_spill] sm:$0xff] }
 0x542   :  { %v2883_v48 = vsel %vm2882_vm9, %v4773_v52, %v2879_v38  ;;  %v3000_v60 = vsel %vm61_vm0, %v2926_v16, 0.0  ;;  %v2662_v10 = vadd.f32 %v10557_v12, %v2661_v49  ;;  %vm2664_vm11 = vweird.f32 %v10557_v12  ;;  %v10568_v49 = vld [vmem:[#allocation36_spill] sm:$0xff] }
 0x543   :  { %v2888_v7 = vsel %vm2885_vm10, %v2887_v53, %v2883_v48  ;;  %v2988_v2 = vsel %vm61_vm0, %v2922_v42, 0.0  ;;  %v2669_v52 = vand.u32 2147483648, %v10556_v8  ;;  %vm2663_vm12 = vweird.f32 %v10556_v8 }
 0x544   :  { %v2889_v37 = vmul.f32 %v2888_v7, %v2679_v6  ;;  %v2667_v15 = vand.u32 2147483647, %v10556_v8  ;;  %v2893_v9 = vmul.f32 %v8470_v57, %v2892_v28  ;;  %vm2665_vm13 = vmor %vm2663_vm12, %vm2664_vm11  ;;  %v2923_v55 = vmul.f32 %v8502_v56, %v10563_v44  ;;  %v10571_v6 = vld [vmem:[#allocation8_spill] sm:$0xff] }
 0x545   :  { %3001 = vadd.xlane.f32.xlu1 %v3000_v60  ;;  %v2927_v58 = vmul.f32 %v2874_v31, %v10564_v1  ;;  %v2666_v36 = vsel %vm2665_vm13, %v10557_v12, %v2662_v10  ;;  %v2670_v3 = vor.u32 1.1754944e-38, %v2669_v52  ;;  %vm2896_vm15 = vweird.f32 %v8470_v57 }
 0x546   :  { %2998 = vadd.xlane.f32.xlu0 %v2997_v18  ;;  %v2929_v62 = vmul.f32 %v2889_v37, %v10565_v32  ;;  %vm2668_vm14 = vcmp.eq.f32.partialorder %v2667_v15, 8.507059e+37  ;;  %v2894_v26 = vadd.f32 %v8470_v57, %v2893_v9  ;;  %v2901_v8 = vand.u32 2147483648, %v8410_v24  ;;  %v10572_v18 = vld [vmem:[#allocation37_spill] sm:$0xff]  ;;  %v10573_v15 = vld [vmem:[#allocation14_spill] sm:$0xff] }
 0x547   :  { %2989 = vadd.xlane.f32.xlu2 %v2988_v2  ;;  %v2671_v5 = vsel %vm2668_vm14, %v2670_v3, %v2666_v36  ;;  %v2991_v14 = vsel %vm61_vm0, %v2923_v55, 0.0  ;;  %v3003_v22 = vsel %vm61_vm0, %v2927_v58, 0.0  ;;  %vm2895_vm1 = vweird.f32 %v8410_v24  ;;  %v10574_v55 = vld [vmem:[#allocation18_spill] sm:$0xff] }
 0x548   :  { %v2899_v27 = vand.u32 2147483647, %v8410_v24  ;;  %v3009_v12 = vsel %vm61_vm0, %v2929_v62, 0.0  ;;  %vm2897_vm2 = vmor %vm2895_vm1, %vm2896_vm15  ;;  %v2672_v19 = vmul.f32 %v2671_v5, %v8093_v13  ;;  %v2902_v11 = vor.u32 1.1754944e-38, %v2901_v8  ;;  %v10569_v24 = vld [vmem:[#allocation16_spill] sm:$0xff] }
 0x549   :  { %v2898_v54 = vsel %vm2897_vm2, %v8470_v57, %v2894_v26  ;;  %v2928_v51 = vmul.f32 %v2874_v31, %v10566_v50  ;;  %v2930_v16 = vmul.f32 %v2889_v37, %v10567_v25  ;;  %v2931_v42 = vmul.f32 %v2889_v37, %v10568_v49  ;;  %v10570_v57 = vld [vmem:[#allocation22_spill] sm:$0xff]  ;;  %v10576_v26 = vld [vmem:[#allocation5_spill] sm:$0xff] }
 0x54a   :  { %vm2900_vm3 = vcmp.eq.f32.partialorder %v2899_v27, 8.507059e+37  ;;  %v2680_v53 = vmul.f32 %v2672_v19, %v10569_v24  ;;  %v2924_v7 = vmul.f32 %v8502_v56, %v10571_v6  ;;  %v2932_v9 = vmul.f32 %v2889_v37, %v10573_v15  ;;  %v10575_v56 = vld [vmem:[#allocation15_spill] sm:$0xff]  ;;  %v10579_v24 = vld [vmem:[#allocation13_spill] sm:$0xff]  ;;  %v10593_v15 = vld [vmem:[#allocation44_spill] sm:$0xff] }
 0x54b   :  { %v2903_v38 = vsel %vm2900_vm3, %v2902_v11, %v2898_v54  ;;  %v3006_v48 = vsel %vm61_vm0, %v2928_v51, 0.0  ;;  %v3012_v28 = vsel %vm61_vm0, %v2930_v16, 0.0  ;;  %v3015_v13 = vsel %vm61_vm0, %v2931_v42, 0.0  ;;  %v10578_v54 = vld [vmem:[#allocation12_spill] sm:$0xff] }
 0x54c   :  { %v2904_v30 = vmul.f32 %v2903_v38, %v2680_v53  ;;  %v2994_v2 = vsel %vm61_vm0, %v2924_v7, 0.0  ;;  %v3018_v36 = vsel %vm61_vm0, %v2932_v9, 0.0  ;;  %v2920_v5 = vmul.f32 %v8464_v39, %v10576_v26  ;;  %v10580_v39 = vld [vmem:[#allocation26_spill] sm:$0xff] }
 0x54d   :  { %3004 = vadd.xlane.f32.xlu1 %v3003_v22  ;;  %v10577_v22 = vld [vmem:[#allocation6_spill] sm:$0xff] }
 0x54e   :  { %2992 = vadd.xlane.f32.xlu0 %v2991_v14  ;;  %v2934_v31 = vmul.f32 %v2904_v30, %v10570_v57  ;;  %v2935_v60 = vmul.f32 %v2904_v30, %v10572_v18  ;;  %v2933_v58 = vmul.f32 %v2904_v30, %v10574_v55  ;;  %v2936_v3 = vmul.f32 %v2904_v30, %v10575_v56 }
 0x54f   :  { %3010 = vadd.xlane.f32.xlu2 %v3009_v12  ;;  %v2982_v14 = vsel %vm61_vm0, %v2920_v5, 0.0 }
 0x550   :  { %v3024_v10 = vsel %vm61_vm0, %v2934_v31, 0.0  ;;  %v3027_v52 = vsel %vm61_vm0, %v2935_v60, 0.0  ;;  %v3021_v62 = vsel %vm61_vm0, %v2933_v58, 0.0  ;;  %v3030_v8 = vsel %vm61_vm0, %v2936_v3, 0.0 }
 0x555   :  { %3007 = vadd.xlane.f32.xlu1 %v3006_v48 }
 0x556   :  { %3013 = vadd.xlane.f32.xlu0 %v3012_v28  ;;  %v10581_v28 = vld [vmem:[#allocation25_spill] sm:$0xff] }
 0x557   :  { %3016 = vadd.xlane.f32.xlu2 %v3015_v13 }
 0x55d   :  { %3025 = vadd.xlane.f32.xlu1 %v3024_v10 }
 0x55e   :  { %2995 = vadd.xlane.f32.xlu0 %v2994_v2  ;;  %v10582_v2 = vld [vmem:[#allocation27_spill] sm:$0xff] }
 0x55f   :  { %3028 = vadd.xlane.f32.xlu2 %v3027_v52 }
 0x565   :  { %3019 = vadd.xlane.f32.xlu1 %v3018_v36 }
 0x566   :  { %3022 = vadd.xlane.f32.xlu0 %v3021_v62 }
 0x56d   :  { %3031 = vadd.xlane.f32.xlu1 %v3030_v8 }
 0x56e   :  { %2983 = vadd.xlane.f32.xlu0 %v2982_v14 }
 0x584   :  { %v2951_v37 = vpop.xlane.xlu2 %2950 }
 0x585   :  { %v3037_v27 = vadd.f32 %v2951_v37, %v10577_v22 }
 0x590   :  { %v2942_v12 = vpop.xlane.xlu1 %2941  ;;  %v2939_v19 = vpop.xlane.xlu0 %2938 }
 0x591   :  { %v3033_v11 = vadd.f32 %v2939_v19, %v10578_v54  ;;  %v2945_v16 = vpop.xlane.xlu2 %2944  ;;  %v3034_v53 = vadd.f32 %v2942_v12, %v10579_v24  ;;  %v10583_v12 = vld [vmem:[#allocation45_spill] sm:$0xff] }
 0x593   :  { %v3065_v51 = vmax.f32 %v3033_v11, %v3037_v27 }
 0x598   :  { %v2963_v38 = vpop.xlane.xlu1 %2962 }
 0x599   :  { %v2954_v42 = vpop.xlane.xlu0 %2953  ;;  %v3041_v48 = vadd.f32 %v2963_v38, %v10580_v39 }
 0x59a   :  { %v3038_v30 = vadd.f32 %v2954_v42, %v10581_v28  ;;  %v2966_v7 = vpop.xlane.xlu2 %2965  ;;  %v10584_v42 = vld [vmem:[#allocation10_spill] sm:$0xff] }
 0x59b   :  { %v3066_v13 = vmax.f32 %v3065_v51, %v3041_v48  ;;  %v3042_v19 = vadd.f32 %v2966_v7, %v10583_v12 }
 0x59c   :  { %v3068_v31 = vmax.f32 %v3034_v53, %v3038_v30 }
 0x59e   :  { %v3069_v38 = vmax.f32 %v3068_v31, %v3042_v19 }
 0x5a0   :  { %v8598_v60 = vpop.xlane.xlu1 %2947 }
 0x5a1   :  { %v2957_v36 = vpop.xlane.xlu0 %2956  ;;  %v8674_v6 = vadd.f32 %v8598_v60, %v10593_v15 }
 0x5a2   :  { %v8601_v9 = vpop.xlane.xlu2 %2959 }
 0x5a8   :  { %v2975_v10 = vpop.xlane.xlu1 %2974 }
 0x5a9   :  { %v3045_v52 = vadd.f32 %v2975_v10, %v10582_v2 }
 0x5aa   :  { %v2978_v51 = vpop.xlane.xlu2 %2977 }
 0x5ab   :  { %v3067_v58 = vmax.f32 %v3066_v13, %v3045_v52  ;;  %v3046_v24 = vadd.f32 %v2978_v51, %v10584_v42  ;;  %v10588_v42 = vld [vmem:[#allocation29_spill] sm:$0xff] }
 0x5ad   :  { %v3089_v62 = vsub.f32 %v3033_v11, %v3067_v58  ;;  %v3093_v3 = vsub.f32 %v3037_v27, %v3067_v58  ;;  %v3097_v5 = vsub.f32 %v3041_v48, %v3067_v58  ;;  %v3101_v8 = vsub.f32 %v3045_v52, %v3067_v58  ;;  %v2969_v11 = vpop.xlane.xlu0 %2968 }
 0x5ae   :  { %v3070_v27 = vmax.f32 %v3069_v38, %v3046_v24 }
 0x5af   :  { %v3121_v14 = vmul.f32 1.442695, %v3089_v62  ;;  %v3129_v37 = vmul.f32 1.442695, %v3093_v3  ;;  %v3137_v22 = vmul.f32 1.442695, %v3097_v5 }
 0x5b0   :  { %v3145_v54 = vmul.f32 1.442695, %v3101_v8  ;;  %v3090_v13 = vsub.f32 %v3034_v53, %v3070_v27  ;;  %v3094_v7 = vsub.f32 %v3038_v30, %v3070_v27  ;;  %v3098_v10 = vsub.f32 %v3042_v19, %v3070_v27  ;;  %v10585_v5 = vld [vmem:[#allocation43_spill] sm:$0xff] }
 0x5b1   :  { %4774 = vpow2.f32 %v3121_v14  ;;  %v3102_v52 = vsub.f32 %v3046_v24, %v3070_v27  ;;  %v3039_v8 = vadd.f32 %v2957_v36, %v10585_v5 }
 0x5b2   :  { %4776 = vpow2.f32 %v3129_v37  ;;  %v3123_v58 = vmul.f32 1.442695, %v3090_v13  ;;  %v3131_v62 = vmul.f32 1.442695, %v3094_v7  ;;  %v3139_v14 = vmul.f32 1.442695, %v3098_v10 }
 0x5b3   :  { %4778 = vpow2.f32 %v3137_v22  ;;  %v10586_v22 = vld [vmem:[#allocation41_spill] sm:$0xff]  ;;  %v3147_v53 = vmul.f32 1.442695, %v3102_v52 }
 0x5b4   :  { %4780 = vpow2.f32 %v3145_v54  ;;  %v3035_v12 = vadd.f32 %v2945_v16, %v10586_v22  ;;  %v10587_v54 = vld [vmem:[#allocation11_spill] sm:$0xff] }
 0x5b5   :  { %4782 = vpow2.f32 %v3123_v58  ;;  %v3043_v51 = vadd.f32 %v2969_v11, %v10587_v54  ;;  %v2981_v19 = vpop.xlane.xlu0 %2980 }
 0x5b6   :  { %4784 = vpow2.f32 %v3131_v62  ;;  %v3071_v30 = vmax.f32 %v3035_v12, %v3039_v8  ;;  %v3047_v24 = vadd.f32 %v2981_v19, %v10588_v42 }
 0x5b7   :  { %v8605_v39 = vpop.eup %4774 }
 0x5b8   :  { %v8607_v48 = vpop.eup %4776  ;;  %v3072_v38 = vmax.f32 %v3071_v30, %v3043_v51 }
 0x5b9   :  { %v3185_v28 = vadd.f32 %v8607_v48, %v8605_v39  ;;  %v8611_v2 = vpop.eup %4778 }
 0x5ba   :  { %v4781_v3 = vpop.eup %4780  ;;  %v3073_v13 = vmax.f32 %v3072_v38, %v3047_v24 }
 0x5bb   :  { %v3186_v31 = vadd.f32 %v8611_v2, %v3185_v28  ;;  %v8618_v27 = vpop.eup %4782  ;;  %v8622_v28 = vpop.xlane.xlu1 %2986 }
 0x5bc   :  { %v8620_v36 = vpop.eup %4784  ;;  %v3091_v52 = vsub.f32 %v3035_v12, %v3073_v13  ;;  %v3099_v62 = vsub.f32 %v3043_v51, %v3073_v13  ;;  %v3103_v5 = vsub.f32 %v3047_v24, %v3073_v13  ;;  %v2972_v51 = vpop.xlane.xlu2 %2971 }
 0x5bd   :  { %v3187_v37 = vadd.f32 %v4781_v3, %v3186_v31  ;;  %v3188_v11 = vadd.f32 %v8620_v36, %v8618_v27  ;;  %v3095_v31 = vsub.f32 %v3039_v8, %v3073_v13 }
 0x5be   :  { %v3125_v54 = vmul.f32 1.442695, %v3091_v52  ;;  %v3141_v35 = vmul.f32 1.442695, %v3099_v62  ;;  %v3149_v21 = vmul.f32 1.442695, %v3103_v5 }
 0x5bf   :  { %4786 = vrcp.f32 %v3187_v37  ;;  %v3218_v30 = vand.u32 2147483647, %v3187_v37  ;;  %v3220_v19 = vand.u32 2147483648, %v3187_v37  ;;  %vm3214_vm5 = vweird.f32 %v3187_v37 }
 0x5c0   :  { %4788 = vpow2.f32 %v3139_v14 }
 0x5c1   :  { %4790 = vpow2.f32 %v3147_v53  ;;  %v3133_v53 = vmul.f32 1.442695, %v3095_v31  ;;  %v3221_v8 = vor.u32 1.1754944e-38, %v3220_v19  ;;  %vm3219_vm7 = vcmp.eq.f32.partialorder %v3218_v30, 8.507059e+37 }
 0x5c2   :  { %4792 = vpow2.f32 %v3125_v54 }
 0x5c3   :  { %v3002_v24 = vpop.xlane.xlu1 %3001 }
 0x5c5   :  { %v4787_v16 = vpop.eup %4786 }
 0x5c6   :  { %v8626_v7 = vpop.eup %4788  ;;  %v3210_v10 = vmul.f32 %v4787_v16, %v3187_v37  ;;  %vm3215_vm4 = vweird.f32 %v4787_v16 }
 0x5c7   :  { %v3189_v58 = vadd.f32 %v8626_v7, %v3188_v11  ;;  %v4791_v14 = vpop.eup %4790  ;;  %vm3216_vm6 = vmor %vm3214_vm5, %vm3215_vm4  ;;  %v2999_v11 = vpop.xlane.xlu0 %2998 }
 0x5c8   :  { %v3211_v22 = vsub.f32 1.0, %v3210_v10  ;;  %v8629_v10 = vpop.eup %4792 }
 0x5c9   :  { %v3190_v38 = vadd.f32 %v4791_v14, %v3189_v58 }
 0x5ca   :  { %v3212_v42 = vmul.f32 %v4787_v16, %v3211_v22 }
 0x5cb   :  { %4794 = vrcp.f32 %v3190_v38  ;;  %vm3229_vm9 = vweird.f32 %v3190_v38 }
 0x5cc   :  { %v3213_v40 = vadd.f32 %v4787_v16, %v3212_v42  ;;  %4796 = vpow2.f32 %v3133_v53  ;;  %v2990_v53 = vpop.xlane.xlu2 %2989 }
 0x5cd   :  { %4798 = vpow2.f32 %v3141_v35 }
 0x5ce   :  { %v3217_v12 = vsel %vm3216_vm6, %v4787_v16, %v3213_v40  ;;  %4800 = vpow2.f32 %v3149_v21 }
 0x5cf   :  { %v3222_v13 = vsel %vm3219_vm7, %v3221_v8, %v3217_v12  ;;  %v2993_v19 = vpop.xlane.xlu0 %2992 }
 0x5d0   :  { %v8632_v52 = vmul.f32 %v8605_v39, %v3222_v13  ;;  %v8635_v31 = vmul.f32 %v8607_v48, %v3222_v13  ;;  %v8638_v37 = vmul.f32 %v8611_v2, %v3222_v13  ;;  %v3277_v58 = vmul.f32 %v4781_v3, %v3222_v13  ;;  %v3005_v3 = vpop.xlane.xlu1 %3004 }
 0x5d1   :  { %v4795_v40 = vpop.eup %4794  ;;  %v3235_v39 = vand.u32 2147483648, %v3190_v38  ;;  %v3233_v2 = vand.u32 2147483647, %v3190_v38 }
 0x5d2   :  { %v8640_v16 = vpop.eup %4796  ;;  %v3225_v35 = vmul.f32 %v4795_v40, %v3190_v38  ;;  %vm3230_vm8 = vweird.f32 %v4795_v40  ;;  %v3365_v13 = vmul.f32 %v3277_v58, %v10430_v20 }
 0x5d3   :  { %v3191_v21 = vadd.f32 %v8640_v16, %v8629_v10  ;;  %v8644_v62 = vpop.eup %4798  ;;  %vm3231_vm10 = vmor %vm3229_vm9, %vm3230_vm8  ;;  %v3236_v8 = vor.u32 1.1754944e-38, %v3235_v39  ;;  %vm3234_vm11 = vcmp.eq.f32.partialorder %v3233_v2, 8.507059e+37 }
 0x5d4   :  { %v3226_v5 = vsub.f32 1.0, %v3225_v35  ;;  %v8646_v22 = vpop.eup %4800  ;;  %v3011_v39 = vpop.xlane.xlu2 %3010  ;;  %v3424_v2 = vsel %vm61_vm0, %v3365_v13, 0.0 }
 0x5d5   :  { %v3192_v48 = vadd.f32 %v8644_v62, %v3191_v21 }
 0x5d6   :  { %v3227_v54 = vmul.f32 %v4795_v40, %v3226_v5 }
 0x5d7   :  { %v3193_v30 = vadd.f32 %v8646_v22, %v3192_v48 }
 0x5d8   :  { %v3228_v42 = vadd.f32 %v4795_v40, %v3227_v54  ;;  %v3008_v54 = vpop.xlane.xlu1 %3007 }
 0x5d9   :  { %4802 = vrcp.f32 %v3193_v30  ;;  %vm3244_vm13 = vweird.f32 %v3193_v30 }
 0x5da   :  { %v3232_v12 = vsel %vm3231_vm10, %v4795_v40, %v3228_v42  ;;  %v3014_v40 = vpop.xlane.xlu0 %3013  ;;  %v10589_v42 = vld [vmem:[#allocation9_spill] sm:$0xff] }
 0x5db   :  { %v3237_v35 = vsel %vm3234_vm11, %v3236_v8, %v3232_v12  ;;  %v10590_v12 = vld [vmem:[#allocation28_spill] sm:$0xff] }
 0x5dc   :  { %v8652_v21 = vmul.f32 %v8618_v27, %v3237_v35  ;;  %v8655_v5 = vmul.f32 %v8620_v36, %v3237_v35  ;;  %v8658_v26 = vmul.f32 %v8626_v7, %v3237_v35  ;;  %v3278_v48 = vmul.f32 %v4791_v14, %v3237_v35  ;;  %v10591_v14 = vld [vmem:[#allocation47_spill] sm:$0xff]  ;;  %v10592_v35 = vld [vmem:[#allocation57_spill] sm:$0xff]  ;;  %v3017_v60 = vpop.xlane.xlu2 %3016 }
 0x5dd   :  { %v3050_v36 = vadd.f32 %v2990_v53, %v10589_v42  ;;  %v8668_v7 = vadd.f32 %v8601_v9, %v10590_v12  ;;  %v10595_v53 = vld [vmem:[#allocation33_spill] sm:$0xff] }
 0x5de   :  { %v3366_v38 = vmul.f32 %v3278_v48, %v10435_v34  ;;  %v3054_v34 = vadd.f32 %v3002_v24, %v10591_v14  ;;  %v3058_v48 = vadd.f32 %v3014_v40, %v10592_v35  ;;  %v10596_v24 = vld [vmem:[#allocation49_spill] sm:$0xff]  ;;  %v10597_v40 = vld [vmem:[#allocation48_spill] sm:$0xff]  ;;  %v10598_v35 = vld [vmem:[#allocation42_spill] sm:$0xff] }
 0x5df   :  { %v4803_v50 = vpop.eup %4802  ;;  %v8683_v12 = vadd.f32 %v3005_v3, %v10596_v24  ;;  %v8686_v14 = vadd.f32 %v2993_v19, %v10597_v40  ;;  %v10600_v24 = vld [vmem:[#allocation59_spill] sm:$0xff]  ;;  %v10601_v19 = vld [vmem:[#allocation60_spill] sm:$0xff] }
 0x5e0   :  { %v3425_v20 = vsel %vm61_vm0, %v3366_v38, 0.0  ;;  %v3240_v58 = vmul.f32 %v4803_v50, %v3193_v30  ;;  %vm3245_vm12 = vweird.f32 %v4803_v50  ;;  %v3250_v38 = vand.u32 2147483648, %v3193_v30  ;;  %v3026_v15 = vpop.xlane.xlu1 %3025 }
 0x5e1   :  { %v8663_v27 = vadd.f32 %v3425_v20, %v3424_v2  ;;  %v3248_v2 = vand.u32 2147483647, %v3193_v30  ;;  %v10594_v20 = vld [vmem:[#allocation46_spill] sm:$0xff]  ;;  %v3080_v9 = vmax.f32 %v3050_v36, %v3054_v34  ;;  %vm3246_vm14 = vmor %vm3244_vm13, %vm3245_vm12  ;;  %v8696_v43 = vadd.f32 %v3011_v39, %v10600_v24 }
 0x5e2   :  { %v3241_v8 = vsub.f32 1.0, %v3240_v58  ;;  %v8677_v56 = vadd.f32 %v2972_v51, %v10594_v20  ;;  %v8680_v58 = vadd.f32 %v2999_v11, %v10595_v53  ;;  %v8692_v51 = vadd.f32 %v8622_v28, %v10598_v35  ;;  %v10599_v20 = vld [vmem:[#allocation61_spill] sm:$0xff]  ;;  %v2996_v30 = vpop.xlane.xlu0 %2995 }
 0x5e3   :  { %v3081_v11 = vmax.f32 %v3080_v9, %v3058_v48  ;;  %v3251_v3 = vor.u32 1.1754944e-38, %v3250_v38  ;;  %v3059_v40 = vadd.f32 %v3017_v60, %v10601_v19  ;;  %vm3249_vm15 = vcmp.eq.f32.partialorder %v3248_v2, 8.507059e+37 }
 0x5e4   :  { %v3242_v13 = vmul.f32 %v4803_v50, %v3241_v8  ;;  %v3074_v8 = vmax.f32 %v8674_v6, %v8668_v7  ;;  %v3077_v28 = vmax.f32 %v8692_v51, %v8680_v58  ;;  %v3083_v9 = vmax.f32 %v8686_v14, %v8683_v12 }
 0x5e5   :  { %v3357_v39 = vmul.f32 %v8635_v31, %v10416_v33 }
 0x5e6   :  { %v3243_v42 = vadd.f32 %v4803_v50, %v3242_v13  ;;  %v3062_v13 = vadd.f32 %v3026_v15, %v10599_v20  ;;  %v8700_v32 = vmax.f32 %v3074_v8, %v8677_v56  ;;  %v10603_v8 = vld [vmem:[#allocation58_spill] sm:$0xff] }
 0x5e7   :  { %v8714_v20 = vadd.f32 %v3008_v54, %v10603_v8 }
 0x5e8   :  { %v3247_v53 = vsel %vm3246_vm14, %v4803_v50, %v3243_v42  ;;  %v3082_v35 = vmax.f32 %v3081_v11, %v3062_v13  ;;  %v10602_v50 = vld [vmem:[#allocation23_spill] sm:$0xff]  ;;  %v3078_v11 = vmax.f32 %v3077_v28, %v8696_v43 }
 0x5e9   :  { %v8704_v63 = vsel %vm3249_vm15, %v3251_v3, %v3247_v53  ;;  %v8709_v38 = vadd.f32 %v2996_v30, %v10602_v50  ;;  %v3084_v53 = vmax.f32 %v3083_v9, %v3059_v40  ;;  %v3353_v3 = vmul.f32 %v8632_v52, %v10421_v59  ;;  %v10604_v52 = vld [vmem:[#allocation30_spill] sm:$0xff] }
 0x5ea   :  { %v3106_v42 = vsub.f32 %v3050_v36, %v3082_v35  ;;  %v3110_v2 = vsub.f32 %v3054_v34, %v3082_v35  ;;  %v3114_v15 = vsub.f32 %v3058_v48, %v3082_v35  ;;  %v3118_v60 = vsub.f32 %v3062_v13, %v3082_v35  ;;  %v3020_v36 = vpop.xlane.xlu1 %3019  ;;  %v3029_v34 = vpop.xlane.xlu2 %3028 }
 0x5eb   :  { %v3271_v50 = vmul.f32 %v8640_v16, %v8704_v63  ;;  %v3253_v33 = vmul.f32 %v8629_v10, %v8704_v63  ;;  %v8725_v31 = vmul.f32 %v8646_v22, %v8704_v63  ;;  %v3398_v48 = vsel %vm61_vm0, %v3357_v39, 0.0  ;;  %v3023_v28 = vpop.xlane.xlu0 %3022  ;;  %v10605_v10 = vld [vmem:[#allocation51_spill] sm:$0xff] }
 0x5ec   :  { %v3155_v24 = vmul.f32 1.442695, %v3106_v42  ;;  %v3163_v19 = vmul.f32 1.442695, %v3110_v2  ;;  %v3171_v30 = vmul.f32 1.442695, %v3114_v15  ;;  %v3086_v59 = vmax.f32 %v8709_v38, %v8714_v20 }
 0x5ed   :  { %v3179_v54 = vmul.f32 1.442695, %v3118_v60  ;;  %v3063_v13 = vadd.f32 %v3029_v34, %v10604_v52  ;;  %v3358_v16 = vmul.f32 %v8655_v5, %v10422_v41  ;;  %v3061_v35 = vadd.f32 %v3023_v28, %v10605_v10  ;;  %v10606_v42 = vld [vmem:[#allocation17_spill] sm:$0xff]  ;;  %v10607_v10 = vld [vmem:[#allocation52_spill] sm:$0xff] }
 0x5ee   :  { %4804 = vpow2.f32 %v3155_v24  ;;  %v3359_v22 = vmul.f32 %v3271_v50, %v6946_v47  ;;  %v3385_v9 = vsel %vm61_vm0, %v3353_v3, 0.0  ;;  %v8737_v39 = vadd.f32 %v3020_v36, %v10606_v42 }
 0x5ef   :  { %4806 = vpow2.f32 %v3163_v19  ;;  %v3085_v2 = vmax.f32 %v3084_v53, %v3063_v13  ;;  %v3399_v15 = vsel %vm61_vm0, %v3358_v16, 0.0  ;;  %v3079_v60 = vmax.f32 %v3078_v11, %v3061_v35 }
 0x5f0   :  { %4808 = vpow2.f32 %v3171_v30  ;;  %v3400_v8 = vadd.f32 %v3399_v15, %v3398_v48  ;;  %v3354_v41 = vmul.f32 %v8652_v21, %v10420_v46  ;;  %v3401_v50 = vsel %vm61_vm0, %v3359_v22, 0.0 }
 0x5f1   :  { %4810 = vpow2.f32 %v3179_v54  ;;  %v3107_v5 = vsub.f32 %v8686_v14, %v3085_v2  ;;  %v3111_v24 = vsub.f32 %v8683_v12, %v3085_v2  ;;  %v3115_v47 = vsub.f32 %v3059_v40, %v3085_v2 }
 0x5f2   :  { %v3119_v19 = vsub.f32 %v3063_v13, %v3085_v2  ;;  %v3105_v3 = vsub.f32 %v8692_v51, %v3079_v60  ;;  %v3109_v30 = vsub.f32 %v8680_v58, %v3079_v60  ;;  %v3113_v53 = vsub.f32 %v8696_v43, %v3079_v60  ;;  %v3032_v51 = vpop.xlane.xlu1 %3031 }
 0x5f3   :  { %v3157_v11 = vmul.f32 1.442695, %v3107_v5  ;;  %v3165_v36 = vmul.f32 1.442695, %v3111_v24  ;;  %v3173_v34 = vmul.f32 1.442695, %v3115_v47  ;;  %v8750_v46 = vadd.f32 %v3401_v50, %v3400_v8  ;;  %v2984_v28 = vpop.xlane.xlu0 %2983 }
 0x5f4   :  { %v8748_v54 = vpop.eup %4804  ;;  %v3087_v12 = vmax.f32 %v3086_v59, %v8737_v39  ;;  %v3181_v14 = vmul.f32 1.442695, %v3119_v19  ;;  %v3117_v40 = vsub.f32 %v3061_v35, %v3079_v60  ;;  %v3355_v58 = vmul.f32 %v3253_v33, %v6943_v29  ;;  %v10608_v59 = vld [vmem:[#allocation31_spill] sm:$0xff] }
 0x5f5   :  { %v8752_v21 = vpop.eup %4806  ;;  %4812 = vpow2.f32 %v3157_v11  ;;  %v3153_v52 = vmul.f32 1.442695, %v3105_v3  ;;  %v3161_v13 = vmul.f32 1.442695, %v3109_v30  ;;  %v3064_v22 = vadd.f32 %v3032_v51, %v10607_v10 }
 0x5f6   :  { %v8756_v48 = vpop.eup %4808  ;;  %v3200_v43 = vadd.f32 %v8752_v21, %v8748_v54  ;;  %4814 = vpow2.f32 %v3165_v36  ;;  %v8764_v42 = vadd.f32 %v2984_v28, %v10608_v59  ;;  %v3386_v35 = vsel %vm61_vm0, %v3354_v41, 0.0 }
 0x5f7   :  { %v8760_v16 = vpop.eup %4810  ;;  %4816 = vpow2.f32 %v3173_v34  ;;  %v3169_v33 = vmul.f32 1.442695, %v3113_v53  ;;  %v3387_v2 = vadd.f32 %v3386_v35, %v3385_v9  ;;  %v3177_v15 = vmul.f32 1.442695, %v3117_v40 }
 0x5f8   :  { %v3201_v29 = vadd.f32 %v8756_v48, %v3200_v43  ;;  %4818 = vpow2.f32 %v3181_v14  ;;  %v3088_v60 = vmax.f32 %v3087_v12, %v3064_v22  ;;  %v3388_v8 = vsel %vm61_vm0, %v3355_v58, 0.0 }
 0x5f9   :  { %4820 = vpow2.f32 %v3153_v52  ;;  %v3076_v24 = vmax.f32 %v8700_v32, %v8764_v42  ;;  %v8774_v47 = vadd.f32 %v3388_v8, %v3387_v2  ;;  %v3361_v30 = vmul.f32 %v8638_v37, %v10425_v4 }
 0x5fa   :  { %v8770_v5 = vadd.f32 %v8760_v16, %v3201_v29  ;;  %4822 = vpow2.f32 %v3161_v13  ;;  %v3108_v41 = vsub.f32 %v8709_v38, %v3088_v60  ;;  %v3112_v19 = vsub.f32 %v8714_v20, %v3088_v60 }
 0x5fb   :  { %v3116_v9 = vsub.f32 %v8737_v39, %v3088_v60  ;;  %v8779_v3 = vpop.eup %4812  ;;  %v3120_v32 = vsub.f32 %v3064_v22, %v3088_v60  ;;  %v3367_v38 = vmul.f32 %v8725_v31, %v10551_v45  ;;  %v3362_v39 = vmul.f32 %v8658_v26, %v10426_v17 }
 0x5fc   :  { %4824 = vrcp.f32 %v8770_v5  ;;  %v8784_v53 = vpop.eup %4814  ;;  %v3159_v50 = vmul.f32 1.442695, %v3108_v41  ;;  %v3167_v11 = vmul.f32 1.442695, %v3112_v19  ;;  %v3092_v12 = vsub.f32 %v8674_v6, %v3076_v24 }
 0x5fd   :  { %4826 = vpow2.f32 %v3169_v33  ;;  %v8786_v36 = vpop.eup %4816  ;;  %v3203_v20 = vadd.f32 %v8784_v53, %v8779_v3  ;;  %v3175_v4 = vmul.f32 1.442695, %v3116_v9  ;;  %v3183_v37 = vmul.f32 1.442695, %v3120_v32 }
 0x5fe   :  { %4828 = vpow2.f32 %v3177_v15  ;;  %v8794_v34 = vpop.eup %4818  ;;  %v3096_v45 = vsub.f32 %v8668_v7, %v3076_v24  ;;  %v3100_v31 = vsub.f32 %v8677_v56, %v3076_v24  ;;  %v3104_v17 = vsub.f32 %v8764_v42, %v3076_v24 }
 0x5ff   :  { %4830 = vpow2.f32 %v3159_v50  ;;  %v8797_v14 = vpop.eup %4820  ;;  %v3204_v40 = vadd.f32 %v8786_v36, %v3203_v20  ;;  %v3127_v26 = vmul.f32 1.442695, %v3092_v12  ;;  %v3275_v58 = vmul.f32 %v8644_v62, %v8704_v63 }
 0x600   :  { %4832 = vpow2.f32 %v3167_v11  ;;  %v8802_v51 = vpop.eup %4822  ;;  %v3135_v7 = vmul.f32 1.442695, %v3096_v45  ;;  %v3412_v28 = vsel %vm61_vm0, %v3362_v39, 0.0  ;;  %v3307_v63 = vand.u32 2147483648, %v8770_v5 }
 0x601   :  { %4834 = vpow2.f32 %v3175_v4  ;;  %v8808_v6 = vadd.f32 %v8794_v34, %v3204_v40  ;;  %v3197_v52 = vadd.f32 %v8802_v51, %v8797_v14  ;;  %v3143_v62 = vmul.f32 1.442695, %v3100_v31 }
 0x602   :  { %v4825_v43 = vpop.eup %4824  ;;  %4836 = vpow2.f32 %v3183_v37  ;;  %v3411_v22 = vsel %vm61_vm0, %v3361_v30, 0.0  ;;  %v3363_v29 = vmul.f32 %v3275_v58, %v6949_v23  ;;  %v3427_v2 = vsel %vm61_vm0, %v3367_v38, 0.0 }
 0x603   :  { %v8812_v13 = vpop.eup %4826  ;;  %v3297_v56 = vmul.f32 %v4825_v43, %v8770_v5  ;;  %4838 = vpow2.f32 %v3127_v26  ;;  %v3305_v15 = vand.u32 2147483647, %v8770_v5  ;;  %v3151_v60 = vmul.f32 1.442695, %v3104_v17 }
 0x604   :  { %v8816_v10 = vpop.eup %4828  ;;  %4840 = vrcp.f32 %v8808_v6  ;;  %v3198_v35 = vadd.f32 %v8812_v13, %v3197_v52  ;;  %v3413_v8 = vadd.f32 %v3412_v28, %v3411_v22  ;;  %vm3302_vm1 = vweird.f32 %v4825_v43 }
 0x605   :  { %v8821_v59 = vpop.eup %4830  ;;  %v3298_v42 = vsub.f32 1.0, %v3297_v56  ;;  %4842 = vpow2.f32 %v3135_v7  ;;  %vm3301_vm2 = vweird.f32 %v8770_v5  ;;  %v3308_v23 = vor.u32 1.1754944e-38, %v3307_v63 }
 0x606   :  { %v8825_v33 = vpop.eup %4832  ;;  %v8832_v19 = vadd.f32 %v8816_v10, %v3198_v35  ;;  %4844 = vpow2.f32 %v3143_v62  ;;  %v8840_v32 = vadd.f32 %v3427_v2, %v8663_v27  ;;  %v3320_v38 = vand.u32 2147483647, %v8808_v6  ;;  %vm3303_vm3 = vmor %vm3301_vm2, %vm3302_vm1 }
 0x607   :  { %v8829_v24 = vpop.eup %4834  ;;  %v3299_v41 = vmul.f32 %v4825_v43, %v3298_v42  ;;  %v3206_v9 = vadd.f32 %v8825_v33, %v8821_v59  ;;  %v3414_v20 = vsel %vm61_vm0, %v3363_v29, 0.0  ;;  %v3322_v4 = vand.u32 2147483648, %v8808_v6 }
 0x608   :  { %v8836_v30 = vpop.eup %4836  ;;  %4846 = vrcp.f32 %v8832_v19  ;;  %v8849_v37 = vadd.f32 %v3414_v20, %v3413_v8  ;;  %vm3306_vm4 = vcmp.eq.f32.partialorder %v3305_v15, 8.507059e+37  ;;  %vm3316_vm5 = vweird.f32 %v8808_v6 }
 0x609   :  { %v8842_v50 = vpop.eup %4838  ;;  %v3300_v11 = vadd.f32 %v4825_v43, %v3299_v41  ;;  %v3207_v5 = vadd.f32 %v8829_v24, %v3206_v9  ;;  %4848 = vpow2.f32 %v3151_v60  ;;  %vm8861_vm6 = vcmp.eq.f32.partialorder %v3320_v38, 8.507059e+37 }
 0x60a   :  { %v4841_v39 = vpop.eup %4840  ;;  %v3292_v52 = vand.u32 2147483648, %v8832_v19  ;;  %v3323_v63 = vor.u32 1.1754944e-38, %v3322_v4  ;;  %vm3286_vm8 = vweird.f32 %v8832_v19 }
 0x60b   :  { %v8851_v27 = vpop.eup %4842  ;;  %v3304_v12 = vsel %vm3303_vm3, %v4825_v43, %v3300_v11  ;;  %v3312_v40 = vmul.f32 %v4841_v39, %v8808_v6  ;;  %v8856_v31 = vadd.f32 %v8836_v30, %v3207_v5  ;;  %v3290_v43 = vand.u32 2147483647, %v8832_v19 }
 0x60c   :  { %v3309_v45 = vsel %vm3306_vm4, %v3308_v23, %v3304_v12  ;;  %v3194_v17 = vadd.f32 %v8851_v27, %v8842_v50  ;;  %v8867_v7 = vpop.eup %4844  ;;  %vm3317_vm7 = vweird.f32 %v4841_v39 }
 0x60d   :  { %v3350_v26 = vmul.f32 %v8760_v16, %v3309_v45  ;;  %v3310_v56 = vmul.f32 %v8748_v54, %v3309_v45  ;;  %v3313_v28 = vsub.f32 1.0, %v3312_v40  ;;  %4850 = vrcp.f32 %v8856_v31  ;;  %vm3318_vm10 = vmor %vm3316_vm5, %vm3317_vm7 }
 0x60e   :  { %v4847_v62 = vpop.eup %4846  ;;  %v3346_v22 = vmul.f32 %v8756_v48, %v3309_v45  ;;  %v3195_v42 = vadd.f32 %v8867_v7, %v3194_v17  ;;  %v3342_v29 = vmul.f32 %v8752_v21, %v3309_v45  ;;  %v3337_v54 = vand.u32 2147483648, %v8856_v31 }
 0x60f   :  { %v3382_v16 = vmul.f32 %v3350_v26, %v10570_v57  ;;  %v8874_v35 = vpop.eup %4848  ;;  %v3314_v2 = vmul.f32 %v4841_v39, %v3313_v28  ;;  %v3282_v15 = vmul.f32 %v4847_v62, %v8832_v19  ;;  %vm8880_vm9 = vcmp.eq.f32.partialorder %v3290_v43, 8.507059e+37 }
 0x610   :  { %v3293_v48 = vor.u32 1.1754944e-38, %v3292_v52  ;;  %v8885_v57 = vadd.f32 %v8874_v35, %v3195_v42  ;;  %v3335_v9 = vand.u32 2147483647, %v8856_v31  ;;  %v3370_v21 = vmul.f32 %v3310_v56, %v10561_v0 }
 0x611   :  { %v3315_v8 = vadd.f32 %v4841_v39, %v3314_v2  ;;  %v3283_v41 = vsub.f32 1.0, %v3282_v15  ;;  %v8890_v23 = vsel %vm61_vm0, %v3382_v16, 0.0  ;;  %vm3287_vm11 = vweird.f32 %v4847_v62 }
 0x612   :  { %4852 = vrcp.f32 %v8885_v57  ;;  %v3378_v11 = vmul.f32 %v3346_v22, %v10567_v25  ;;  %vm3331_vm12 = vweird.f32 %v8856_v31  ;;  %v3338_v5 = vor.u32 1.1754944e-38, %v3337_v54  ;;  %vm3288_vm14 = vmor %vm3286_vm8, %vm3287_vm11 }
 0x613   :  { %v4851_v38 = vpop.eup %4850  ;;  %v3319_v20 = vsel %vm3318_vm10, %v4841_v39, %v3315_v8  ;;  %v3284_v4 = vmul.f32 %v4847_v62, %v3283_v41  ;;  %v3374_v0 = vmul.f32 %v3342_v29, %v10560_v61  ;;  %v3263_v6 = vand.u32 2147483647, %v8885_v57  ;;  %v10618_v41 = vld [vmem:[#allocation56_spill] sm:$0xff] }
 0x614   :  { %v3324_v12 = vsel %vm8861_vm6, %v3323_v63, %v3319_v20  ;;  %v3327_v40 = vmul.f32 %v4851_v38, %v8856_v31  ;;  %v3265_v45 = vand.u32 2147483648, %v8885_v57  ;;  %vm8908_vm13 = vcmp.eq.f32.partialorder %v3335_v9, 8.507059e+37  ;;  %v10619_v9 = vld [vmem:[#allocation55_spill] sm:$0xff] }
 0x615   :  { %v3325_v17 = vmul.f32 %v8779_v3, %v3324_v12  ;;  %v3343_v25 = vmul.f32 %v8784_v53, %v3324_v12  ;;  %v3347_v39 = vmul.f32 %v8786_v36, %v3324_v12  ;;  %v3351_v26 = vmul.f32 %v8794_v34, %v3324_v12 }
 0x616   :  { %v3285_v61 = vadd.f32 %v4847_v62, %v3284_v4  ;;  %v3328_v58 = vsub.f32 1.0, %v3327_v40  ;;  %v3438_v52 = vsel %vm61_vm0, %v3370_v21, 0.0  ;;  %v3464_v56 = vsel %vm61_vm0, %v3378_v11, 0.0 }
 0x617   :  { %vm3332_vm15 = vweird.f32 %v4851_v38  ;;  %vm3259_vm1 = vweird.f32 %v8885_v57  ;;  %v3371_v3 = vmul.f32 %v3325_v17, %v10563_v44  ;;  %v3379_v53 = vmul.f32 %v3347_v39, %v10568_v49  ;;  %v10620_v39 = vld [vmem:[#allocation15_spill] sm:$0xff] }
 0x618   :  { %v3451_v36 = vsel %vm61_vm0, %v3374_v0, 0.0  ;;  %v4853_v34 = vpop.eup %4852  ;;  %v3383_v28 = vmul.f32 %v3351_v26, %v10572_v18  ;;  %v3289_v63 = vsel %vm3288_vm14, %v4847_v62, %v3285_v61  ;;  %v3329_v22 = vmul.f32 %v4851_v38, %v3328_v58  ;;  %vm3333_vm4 = vmor %vm3331_vm12, %vm3332_vm15  ;;  %v10621_v61 = vld [vmem:[#allocation8_spill] sm:$0xff] }
 0x619   :  { %v3266_v16 = vor.u32 1.1754944e-38, %v3265_v45  ;;  %v3294_v42 = vsel %vm8880_vm9, %v3293_v48, %v3289_v63  ;;  %v3255_v19 = vmul.f32 %v4853_v34, %v8885_v57  ;;  %vm3260_vm2 = vweird.f32 %v4853_v34 }
 0x61a   :  { %vm8925_vm3 = vcmp.eq.f32.partialorder %v3263_v6, 8.507059e+37  ;;  %v3375_v44 = vmul.f32 %v3343_v25, %v10564_v1  ;;  %v3295_v49 = vmul.f32 %v8797_v14, %v3294_v42  ;;  %v3341_v2 = vmul.f32 %v8802_v51, %v3294_v42  ;;  %v10617_v1 = vld [vmem:[#allocation54_spill] sm:$0xff]  ;;  %vm3261_vm5 = vmor %vm3259_vm1, %vm3260_vm2 }
 0x61b   :  { %v3345_v18 = vmul.f32 %v8812_v13, %v3294_v42  ;;  %v3349_v62 = vmul.f32 %v8816_v10, %v3294_v42  ;;  %v3330_v15 = vadd.f32 %v4851_v38, %v3329_v22  ;;  %v3256_v54 = vsub.f32 1.0, %v3255_v19 }
 0x61c   :  { %v3440_v60 = vsel %vm61_vm0, %v3371_v3, 0.0  ;;  %v3466_v48 = vsel %vm61_vm0, %v3379_v53, 0.0  ;;  %v3369_v14 = vmul.f32 %v3295_v49, %v10617_v1  ;;  %v3373_v13 = vmul.f32 %v3341_v2, %v10619_v9  ;;  %v10623_v53 = vld [vmem:[#allocation24_spill] sm:$0xff]  ;;  %v10626_v2 = vld [vmem:[#allocation38_spill] sm:$0xff] }
 0x61d   :  { %v3381_v8 = vmul.f32 %v3349_v62, %v10574_v55  ;;  %v3377_v51 = vmul.f32 %v3345_v18, %v10618_v41  ;;  %v3334_v21 = vsel %vm3333_vm4, %v4851_v38, %v3330_v15  ;;  %v3257_v10 = vmul.f32 %v4853_v34, %v3256_v54  ;;  %v10627_v15 = vld [vmem:[#allocation40_spill] sm:$0xff] }
 0x61e   :  { %v3453_v11 = vsel %vm61_vm0, %v3375_v44, 0.0  ;;  %v3479_v20 = vsel %vm61_vm0, %v3383_v28, 0.0  ;;  %v3339_v55 = vsel %vm8908_vm13, %v3338_v5, %v3334_v21  ;;  %v3437_v31 = vsel %vm61_vm0, %v3369_v14, 0.0  ;;  %v10625_v44 = vld [vmem:[#allocation39_spill] sm:$0xff] }
 0x61f   :  { %v3476_v4 = vsel %vm61_vm0, %v3381_v8, 0.0  ;;  %v3463_v0 = vsel %vm61_vm0, %v3377_v51, 0.0  ;;  %v3352_v12 = vmul.f32 %v8836_v30, %v3339_v55  ;;  %v3258_v40 = vadd.f32 %v4853_v34, %v3257_v10 }
 0x620   :  { %v3340_v6 = vmul.f32 %v8821_v59, %v3339_v55  ;;  %v3439_v38 = vadd.f32 %v3438_v52, %v3437_v31  ;;  %v3348_v45 = vmul.f32 %v8829_v24, %v3339_v55  ;;  %v3465_v17 = vadd.f32 %v3464_v56, %v3463_v0  ;;  %v10622_v52 = vld [vmem:[#allocation14_spill] sm:$0xff] }
 0x621   :  { %v3344_v25 = vmul.f32 %v8825_v33, %v3339_v55  ;;  %v3450_v5 = vsel %vm61_vm0, %v3373_v13, 0.0  ;;  %v3384_v26 = vmul.f32 %v3352_v12, %v10620_v39  ;;  %v3262_v43 = vsel %vm3261_vm5, %v4853_v34, %v3258_v40 }
 0x622   :  { %v3372_v30 = vmul.f32 %v3340_v6, %v10621_v61  ;;  %v3441_v58 = vadd.f32 %v3440_v60, %v3439_v38  ;;  %v3267_v59 = vsel %vm8925_vm3, %v3266_v16, %v3262_v43  ;;  %v3380_v3 = vmul.f32 %v3348_v45, %v10622_v52  ;;  %v10624_v16 = vld [vmem:[#allocation5_spill] sm:$0xff] }
 0x623   :  { %v3467_v57 = vadd.f32 %v3466_v48, %v3465_v17  ;;  %v3376_v28 = vmul.f32 %v3344_v25, %v10623_v53  ;;  %v3280_v24 = vmul.f32 %v8874_v35, %v3267_v59  ;;  %v3272_v56 = vmul.f32 %v8851_v27, %v3267_v59 }
 0x624   :  { %v3442_v33 = vsel %vm61_vm0, %v3372_v30, 0.0  ;;  %v3268_v63 = vmul.f32 %v8842_v50, %v3267_v59  ;;  %v3468_v22 = vsel %vm61_vm0, %v3380_v3, 0.0  ;;  %v3276_v42 = vmul.f32 %v8867_v7, %v3267_v59 }
 0x625   :  { %v3443_v34 = vadd.f32 %v3442_v33, %v3441_v58  ;;  %v3452_v19 = vadd.f32 %v3451_v36, %v3450_v5  ;;  %v3368_v29 = vmul.f32 %v3280_v24, %v10624_v16  ;;  %v3360_v49 = vmul.f32 %v3272_v56, %v10625_v44 }
 0x626   :  { %v3356_v18 = vmul.f32 %v3268_v63, %v10626_v2  ;;  %v3469_v62 = vadd.f32 %v3468_v22, %v3467_v57  ;;  %v3364_v54 = vmul.f32 %v3276_v42, %v10627_v15  ;;  %v3455_v27 = vsel %vm61_vm0, %v3376_v28, 0.0 }
 0x627   :  { %v3444_v35 = vrot.slane %v3443_v34, 4  ;;  %v3454_v60 = vadd.f32 %v3453_v11, %v3452_v19  ;;  %v3403_v50 = vsel %vm61_vm0, %v3360_v49, 0.0  ;;  %v3478_v7 = vadd.f32 %v8890_v23, %v3476_v4 }
 0x628   :  { %v3390_v48 = vsel %vm61_vm0, %v3356_v18, 0.0  ;;  %v3470_v8 = vrot.slane %v3469_v62, 4  ;;  %v3404_v1 = vadd.f32 %v3403_v50, %v8750_v46  ;;  %v3416_v41 = vsel %vm61_vm0, %v3364_v54, 0.0 }
 0x629   :  { %v3445_v36 = vadd.f32 %v3444_v35, %v3443_v34  ;;  %v3391_v14 = vadd.f32 %v3390_v48, %v8774_v47  ;;  %v3417_v9 = vadd.f32 %v3416_v41, %v8849_v37  ;;  %v3456_v13 = vadd.f32 %v3455_v27, %v3454_v60 }
 0x62a   :  { %v3471_v51 = vadd.f32 %v3470_v8, %v3469_v62  ;;  %v3480_v21 = vadd.f32 %v3479_v20, %v3478_v7  ;;  %v3405_v11 = vrot.slane %v3404_v1, 4  ;;  %v3481_v31 = vsel %vm61_vm0, %v3384_v26, 0.0 }
 0x62b   :  { %v3446_v10 = vrot.slane %v3445_v36, 2  ;;  %v3392_v55 = vrot.slane %v3391_v14, 4  ;;  %v3418_v12 = vrot.slane %v3417_v9, 4  ;;  %v3457_v23 = vrot.slane %v3456_v13, 4 }
 0x62c   :  { %v3472_v0 = vrot.slane %v3471_v51, 2  ;;  %v3482_v4 = vadd.f32 %v3481_v31, %v3480_v21  ;;  %v3406_v46 = vadd.f32 %v3405_v11, %v3404_v1  ;;  %v3429_v47 = vsel %vm61_vm0, %v3368_v29, 0.0 }
 0x62d   :  { %v3447_v40 = vadd.f32 %v3446_v10, %v3445_v36  ;;  %v3393_v6 = vadd.f32 %v3392_v55, %v3391_v14  ;;  %v3419_v45 = vadd.f32 %v3418_v12, %v3417_v9  ;;  %v3458_v17 = vadd.f32 %v3457_v23, %v3456_v13 }
 0x62e   :  { %v3473_v38 = vadd.f32 %v3472_v0, %v3471_v51  ;;  %v3483_v37 = vrot.slane %v3482_v4, 4  ;;  %v3407_v20 = vrot.slane %v3406_v46, 2  ;;  %v3430_v39 = vadd.f32 %v3429_v47, %v8840_v32 }
 0x62f   :  { %v3448_v25 = vrot.slane %v3447_v40, 1  ;;  %v3394_v5 = vrot.slane %v3393_v6, 2  ;;  %v3420_v26 = vrot.slane %v3419_v45, 2  ;;  %v3459_v61 = vrot.slane %v3458_v17, 2 }
 0x630   :  { %v3474_v43 = vrot.slane %v3473_v38, 1  ;;  %v3484_v30 = vadd.f32 %v3483_v37, %v3482_v4  ;;  %v3408_v59 = vadd.f32 %v3407_v20, %v3406_v46  ;;  %v3431_v3 = vrot.slane %v3430_v39, 4 }
 0x631   :  { %v8985_v58 = vadd.f32 %v3448_v25, %v3447_v40  ;;  %v3395_v52 = vadd.f32 %v3394_v5, %v3393_v6  ;;  %v3421_v57 = vadd.f32 %v3420_v26, %v3419_v45  ;;  %v3460_v53 = vadd.f32 %v3459_v61, %v3458_v17 }
 0x632   :  { %v3409_v24 = vrot.slane %v3408_v59, 1  ;;  %v3432_v56 = vadd.f32 %v3431_v3, %v3430_v39  ;;  %v8989_v63 = vadd.f32 %v3474_v43, %v3473_v38  ;;  %v3485_v22 = vrot.slane %v3484_v30, 2 }
 0x633   :  { %v3493_v28 = vmul.f32 %v8985_v58, %v8985_v58  ;;  %v3396_v33 = vrot.slane %v3395_v52, 1  ;;  %v3422_v32 = vrot.slane %v3421_v57, 1  ;;  %v3461_v34 = vrot.slane %v3460_v53, 1 }
 0x634   :  { %v8992_v19 = vadd.f32 %v3409_v24, %v3408_v59  ;;  %v3433_v29 = vrot.slane %v3432_v56, 2  ;;  %v3495_v2 = vmul.f32 %v8989_v63, %v8989_v63  ;;  %v3486_v62 = vadd.f32 %v3485_v22, %v3484_v30 }
 0x635   :  { %v3509_v42 = vsel %vm61_vm0, %v3493_v28, 0.0  ;;  %v8994_v16 = vadd.f32 %v3396_v33, %v3395_v52  ;;  %v9002_v18 = vadd.f32 %v3422_v32, %v3421_v57  ;;  %v9006_v54 = vadd.f32 %v3461_v34, %v3460_v53 }
 0x636   :  { %3510 = vadd.xlane.f32.xlu1 %v3509_v42  ;;  %v3490_v44 = vmul.f32 %v8992_v19, %v8992_v19  ;;  %v3434_v60 = vadd.f32 %v3433_v29, %v3432_v56  ;;  %v3515_v27 = vsel %vm61_vm0, %v3495_v2, 0.0  ;;  %v3487_v8 = vrot.slane %v3486_v62, 1 }
 0x637   :  { %v3489_v49 = vmul.f32 %v8994_v16, %v8994_v16  ;;  %v3491_v50 = vmul.f32 %v9002_v18, %v9002_v18  ;;  %v3494_v48 = vmul.f32 %v9006_v54, %v9006_v54 }
 0x638   :  { %v3500_v35 = vsel %vm61_vm0, %v3490_v44, 0.0  ;;  %v3435_v7 = vrot.slane %v3434_v60, 1  ;;  %v9015_v14 = vadd.f32 %v3487_v8, %v3486_v62 }
 0x639   :  { %v3497_v15 = vsel %vm61_vm0, %v3489_v49, 0.0  ;;  %3501 = vadd.xlane.f32.xlu0 %v3500_v35  ;;  %v3503_v36 = vsel %vm61_vm0, %v3491_v50, 0.0  ;;  %v3512_v1 = vsel %vm61_vm0, %v3494_v48, 0.0 }
 0x63a   :  { %3498 = vadd.xlane.f32.xlu2 %v3497_v15  ;;  %v9017_v41 = vadd.f32 %v3435_v7, %v3434_v60  ;;  %v3496_v51 = vmul.f32 %v9015_v14, %v9015_v14 }
 0x63c   :  { %v3492_v9 = vmul.f32 %v9017_v41, %v9017_v41  ;;  %v3518_v13 = vsel %vm61_vm0, %v3496_v51, 0.0 }
 0x63e   :  { %3516 = vadd.xlane.f32.xlu1 %v3515_v27  ;;  %v3506_v21 = vsel %vm61_vm0, %v3492_v9, 0.0 }
 0x641   :  { %3504 = vadd.xlane.f32.xlu0 %v3503_v36 }
 0x642   :  { %3513 = vadd.xlane.f32.xlu2 %v3512_v1 }
 0x649   :  { %3519 = vadd.xlane.f32.xlu0 %v3518_v13 }
 0x64a   :  { %3507 = vadd.xlane.f32.xlu2 %v3506_v21 }
 0x6a9   :  { %v9025_v10 = vpop.xlane.xlu1 %3510 }
 0x6aa   :  { %4854 = vrsqrt.f32 %v9025_v10  ;;  %v9036_v12 = vadd.f32 1.0, %v9025_v10  ;;  %vm3712_vm6 = vcmp.eq.f32.partialorder %v9025_v10, inf  ;;  %v3715_v53 = vand.u32 2147483648, %v9025_v10 }
 0x6ab   :  { %vm3714_vm7 = vcmp.eq.f32.partialorder %v9025_v10, 0.0 }
 0x6ac   :  { %v9028_v11 = vpop.xlane.xlu0 %3501  ;;  %v3598_v27 = vand.u32 2147483647, %v9036_v12  ;;  %v3600_v48 = vand.u32 2147483648, %v9036_v12  ;;  %vm3594_vm11 = vweird.f32 %v9036_v12 }
 0x6ad   :  { %4856 = vrsqrt.f32 %v9028_v11  ;;  %v9031_v55 = vpop.xlane.xlu2 %3498  ;;  %v9039_v46 = vadd.f32 1.0, %v9028_v11  ;;  %vm3676_vm8 = vcmp.eq.f32.partialorder %v9028_v11, inf  ;;  %v3679_v7 = vand.u32 2147483648, %v9028_v11 }
 0x6ae   :  { %4858 = vrsqrt.f32 %v9031_v55  ;;  %v9043_v47 = vadd.f32 1.0, %v9031_v55  ;;  %vm3678_vm10 = vcmp.eq.f32.partialorder %v9028_v11, 0.0  ;;  %vm9101_vm12 = vcmp.eq.f32.partialorder %v3598_v27, 8.507059e+37 }
 0x6af   :  { %4860 = vrcp.f32 %v9036_v12  ;;  %vm3549_vm13 = vweird.f32 %v9039_v46  ;;  %vm3664_vm5 = vcmp.eq.f32.partialorder %v9031_v55, inf }
 0x6b0   :  { %v4855_v31 = vpop.eup %4854  ;;  %4862 = vrcp.f32 %v9039_v46  ;;  %vm3534_vm3 = vweird.f32 %v9043_v47 }
 0x6b1   :  { %v3706_v0 = vmul.f32 %v4855_v31, %v9025_v10  ;;  %v9047_v25 = vpop.xlane.xlu1 %3516  ;;  %4864 = vrcp.f32 %v9043_v47 }
 0x6b2   :  { %4866 = vrsqrt.f32 %v9047_v25  ;;  %v9059_v59 = vadd.f32 1.0, %v9047_v25 }
 0x6b3   :  { %v3707_v23 = vmul.f32 %v4855_v31, %v3706_v0  ;;  %v4857_v4 = vpop.eup %4856 }
 0x6b4   :  { %v3670_v6 = vmul.f32 %v4857_v4, %v9028_v11  ;;  %v4859_v45 = vpop.eup %4858  ;;  %4868 = vrcp.f32 %v9059_v59  ;;  %v9081_v15 = vpop.xlane.xlu0 %3504  ;;  %v3628_v27 = vand.u32 2147483647, %v9059_v59 }
 0x6b5   :  { %v3708_v40 = vmul.f32 0.5, %v3707_v23  ;;  %v3658_v5 = vmul.f32 %v4859_v45, %v9031_v55  ;;  %v9053_v43 = vpop.eup %4860  ;;  %v3601_v23 = vor.u32 1.1754944e-38, %v3600_v48 }
 0x6b6   :  { %v3671_v17 = vmul.f32 %v4857_v4, %v3670_v6  ;;  %v9055_v61 = vpop.eup %4862  ;;  %v3590_v3 = vmul.f32 %v9053_v43, %v9036_v12  ;;  %vm3595_vm9 = vweird.f32 %v9053_v43 }
 0x6b7   :  { %v3709_v38 = vsub.f32 1.5, %v3708_v40  ;;  %v3659_v30 = vmul.f32 %v4859_v45, %v3658_v5  ;;  %v9061_v52 = vpop.eup %4864  ;;  %v3545_v24 = vmul.f32 %v9055_v61, %v9039_v46  ;;  %vm3550_vm14 = vweird.f32 %v9055_v61  ;;  %vm9108_vm15 = vmor %vm3594_vm11, %vm3595_vm9 }
 0x6b8   :  { %v3672_v20 = vmul.f32 0.5, %v3671_v17  ;;  %v9067_v28 = vpop.eup %4866  ;;  %v3530_v32 = vmul.f32 %v9061_v52, %v9043_v47  ;;  %v3591_v22 = vsub.f32 1.0, %v3590_v3  ;;  %vm3535_vm1 = vweird.f32 %v9061_v52  ;;  %vm9124_vm2 = vmor %vm3549_vm13, %vm3550_vm14 }
 0x6b9   :  { %v3710_v37 = vmul.f32 %v4855_v31, %v3709_v38  ;;  %v3660_v34 = vmul.f32 0.5, %v3659_v30  ;;  %v3730_v42 = vmul.f32 %v9067_v28, %v9047_v25  ;;  %v3546_v49 = vsub.f32 1.0, %v3545_v24  ;;  %vm9131_vm4 = vmor %vm3534_vm3, %vm3535_vm1 }
 0x6ba   :  { %v3673_v26 = vsub.f32 1.5, %v3672_v20  ;;  %v3531_v2 = vsub.f32 1.0, %v3530_v32  ;;  %v3592_v35 = vmul.f32 %v9053_v43, %v3591_v22  ;;  %v9083_v60 = vpop.eup %4868  ;;  %v3538_v30 = vand.u32 2147483647, %v9043_v47 }
 0x6bb   :  { %v3711_v39 = vmul.f32 %v3710_v37, %v9025_v10  ;;  %v3661_v62 = vsub.f32 1.5, %v3660_v34  ;;  %v3731_v50 = vmul.f32 %v9067_v28, %v3730_v42  ;;  %v3547_v36 = vmul.f32 %v9055_v61, %v3546_v49 }
 0x6bc   :  { %v3674_v33 = vmul.f32 %v4857_v4, %v3673_v26  ;;  %v3532_v1 = vmul.f32 %v9061_v52, %v3531_v2  ;;  %v3593_v9 = vadd.f32 %v9053_v43, %v3592_v35  ;;  %v3620_v13 = vmul.f32 %v9083_v60, %v9059_v59 }
 0x6bd   :  { %v3713_v57 = vsel %vm3712_vm6, %v9025_v10, %v3711_v39  ;;  %v3662_v51 = vmul.f32 %v4859_v45, %v3661_v62  ;;  %v3732_v0 = vmul.f32 0.5, %v3731_v50  ;;  %v3555_v4 = vand.u32 2147483648, %v9039_v46  ;;  %v9160_v50 = vpop.xlane.xlu2 %3513 }
 0x6be   :  { %v3716_v56 = vsel %vm3714_vm7, %v3715_v53, %v3713_v57  ;;  %v3675_v44 = vmul.f32 %v3674_v33, %v9028_v11  ;;  %v3548_v6 = vadd.f32 %v9055_v61, %v3547_v36  ;;  %v3533_v12 = vadd.f32 %v9061_v52, %v3532_v1 }
 0x6bf   :  { %v9077_v29 = vadd.f32 1e-08, %v3716_v56  ;;  %v3663_v38 = vmul.f32 %v3662_v51, %v9031_v55  ;;  %v3597_v17 = vsel %vm9108_vm15, %v9053_v43, %v3593_v9  ;;  %v3553_v37 = vand.u32 2147483647, %v9039_v46 }
 0x6c0   :  { %v3677_v8 = vsel %vm3676_vm8, %v9028_v11, %v3675_v44  ;;  %v3621_v5 = vsub.f32 1.0, %v3620_v13  ;;  %v3540_v3 = vand.u32 2147483648, %v9043_v47  ;;  %v3733_v57 = vsub.f32 1.5, %v3732_v0 }
 0x6c1   :  { %4870 = vrcp.f32 %v9077_v29  ;;  %v3680_v31 = vsel %vm3678_vm10, %v3679_v7, %v3677_v8  ;;  %v3556_v53 = vor.u32 1.1754944e-38, %v3555_v4  ;;  %v3667_v46 = vand.u32 2147483648, %v9031_v55  ;;  %v9185_v4 = vpop.xlane.xlu0 %3519 }
 0x6c2   :  { %4872 = vrsqrt.f32 %v9081_v15  ;;  %v9122_v20 = vadd.f32 1e-08, %v3680_v31  ;;  %v3602_v33 = vsel %vm9101_vm12, %v3601_v23, %v3597_v17  ;;  %v3552_v56 = vsel %vm9124_vm2, %v9055_v61, %v3548_v6 }
 0x6c3   :  { %v3537_v47 = vsel %vm9131_vm4, %v9061_v52, %v3533_v12  ;;  %v3665_v32 = vsel %vm3664_vm5, %v9031_v55, %v3663_v38  ;;  %v3622_v22 = vmul.f32 %v9083_v60, %v3621_v5  ;;  %v3541_v44 = vor.u32 1.1754944e-38, %v3540_v3 }
 0x6c4   :  { %4874 = vrcp.f32 %v9122_v20  ;;  %vm3666_vm6 = vcmp.eq.f32.partialorder %v9031_v55, 0.0  ;;  %v3734_v49 = vmul.f32 %v9067_v28, %v3733_v57  ;;  %v9154_v61 = vadd.f32 1.0, %v9081_v15 }
 0x6c5   :  { %vm3554_vm7 = vcmp.eq.f32.partialorder %v3553_v37, 8.507059e+37  ;;  %vm3539_vm8 = vcmp.eq.f32.partialorder %v3538_v30, 8.507059e+37  ;;  %v3668_v52 = vsel %vm3666_vm6, %v3667_v46, %v3665_v32  ;;  %vm3736_vm9 = vcmp.eq.f32.partialorder %v9047_v25, inf }
 0x6c6   :  { %v3603_v2 = vmul.f32 %v3602_v33, %v9025_v10  ;;  %v3557_v62 = vsel %vm3554_vm7, %v3556_v53, %v3552_v56  ;;  %v3542_v35 = vsel %vm3539_vm8, %v3541_v44, %v3537_v47  ;;  %vm3738_vm10 = vcmp.eq.f32.partialorder %v9047_v25, 0.0 }
 0x6c7   :  { %v9116_v45 = vpop.eup %4870  ;;  %v3623_v28 = vadd.f32 %v9083_v60, %v3622_v22  ;;  %vm3625_vm11 = vweird.f32 %v9083_v60  ;;  %v9164_v7 = vadd.f32 1e-08, %v3668_v52  ;;  %v3735_v36 = vmul.f32 %v3734_v49, %v9047_v25 }
 0x6c8   :  { %v4873_v39 = vpop.eup %4872  ;;  %v3822_v34 = vmul.f32 %v9116_v45, %v9077_v29  ;;  %v3739_v10 = vand.u32 2147483648, %v9047_v25  ;;  %4876 = vrcp.f32 %v9154_v61  ;;  %vm3624_vm12 = vweird.f32 %v9059_v59 }
 0x6c9   :  { %v3682_v24 = vmul.f32 %v4873_v39, %v9081_v15  ;;  %v3630_v51 = vand.u32 2147483648, %v9059_v59  ;;  %4878 = vrsqrt.f32 %v9160_v50  ;;  %v3832_v13 = vand.u32 2147483648, %v9077_v29  ;;  %vm9177_vm13 = vmor %vm3624_vm12, %vm3625_vm11 }
 0x6ca   :  { %v3823_v48 = vsub.f32 1.0, %v3822_v34  ;;  %v9169_v1 = vpop.eup %4874  ;;  %v3558_v21 = vmul.f32 %v3557_v62, %v9028_v11  ;;  %v3543_v31 = vmul.f32 %v3542_v35, %v9031_v55  ;;  %vm9181_vm14 = vcmp.eq.f32.partialorder %v3628_v27, 8.507059e+37 }
 0x6cb   :  { %v3683_v42 = vmul.f32 %v4873_v39, %v3682_v24  ;;  %v9188_v59 = vmul.f32 %v3603_v2, %v8985_v58  ;;  %v3830_v6 = vand.u32 2147483647, %v9077_v29  ;;  %v3627_v11 = vsel %vm9177_vm13, %v9083_v60, %v3623_v28 }
 0x6cc   :  { %v3824_v40 = vmul.f32 %v9116_v45, %v3823_v48  ;;  %v3777_v55 = vmul.f32 %v9169_v1, %v9122_v20  ;;  %4880 = vrcp.f32 %v9164_v7  ;;  %v3737_v12 = vsel %vm3736_vm9, %v9047_v25, %v3735_v36 }
 0x6cd   :  { %v3684_v8 = vmul.f32 0.5, %v3683_v42  ;;  %v9202_v58 = vadd.f32 1.0, %v9160_v50  ;;  %v3787_v38 = vand.u32 2147483648, %v9122_v20  ;;  %v3631_v17 = vor.u32 1.1754944e-38, %v3630_v51  ;;  %v9264_v51 = vpop.xlane.xlu2 %3507 }
 0x6ce   :  { %4882 = vrsqrt.f32 %v9185_v4  ;;  %v9206_v5 = vpop.eup %4876  ;;  %vm3826_vm15 = vweird.f32 %v9077_v29  ;;  %v3833_v60 = vor.u32 1.1754944e-38, %v3832_v13  ;;  %v9210_v26 = vmul.f32 %v3558_v21, %v8992_v19 }
 0x6cf   :  { %v3685_v9 = vsub.f32 1.5, %v3684_v8  ;;  %v9213_v30 = vmul.f32 %v3543_v31, %v8994_v16  ;;  %v4879_v3 = vpop.eup %4878  ;;  %vm3827_vm1 = vweird.f32 %v9116_v45  ;;  %v3772_v57 = vand.u32 2147483648, %v9164_v7 }
 0x6d0   :  { %v3740_v53 = vsel %vm3738_vm10, %v3739_v10, %v3737_v12  ;;  %v3825_v43 = vadd.f32 %v9116_v45, %v3824_v40  ;;  %vm9222_vm2 = vcmp.eq.f32.partialorder %v3830_v6, 8.507059e+37  ;;  %v3778_v19 = vsub.f32 1.0, %v3777_v55  ;;  %vm9245_vm4 = vmor %vm3826_vm15, %vm3827_vm1 }
 0x6d1   :  { %v3686_v37 = vmul.f32 %v4873_v39, %v3685_v9  ;;  %v3632_v39 = vsel %vm9181_vm14, %v3631_v17, %v3627_v11  ;;  %4884 = vrcp.f32 %v9202_v58  ;;  %v3718_v16 = vmul.f32 %v4879_v3, %v9160_v50 }
 0x6d2   :  { %v3785_v24 = vand.u32 2147483647, %v9122_v20  ;;  %v9229_v33 = vor.u32 1.1754944e-38, %v3787_v38  ;;  %v3560_v56 = vmul.f32 %v9206_v5, %v9154_v61  ;;  %v9234_v32 = vpop.eup %4880  ;;  %vm3781_vm3 = vweird.f32 %v9122_v20 }
 0x6d3   :  { %v3687_v47 = vmul.f32 %v3686_v37, %v9081_v15  ;;  %v9237_v34 = vadd.f32 1e-08, %v3740_v53  ;;  %v3568_v22 = vand.u32 2147483647, %v9154_v61  ;;  %v3570_v42 = vand.u32 2147483648, %v9154_v61 }
 0x6d4   :  { %v3719_v44 = vmul.f32 %v4879_v3, %v3718_v16  ;;  %v4883_v49 = vpop.eup %4882  ;;  %vm3782_vm5 = vweird.f32 %v9169_v1  ;;  %v3770_v2 = vand.u32 2147483647, %v9164_v7  ;;  %v9251_v62 = vor.u32 1.1754944e-38, %v3772_v57 }
 0x6d5   :  { %v3633_v35 = vmul.f32 %v3632_v39, %v9047_v25  ;;  %v3829_v27 = vsel %vm9245_vm4, %v9116_v45, %v3825_v43  ;;  %v3779_v48 = vmul.f32 %v9169_v1, %v3778_v19  ;;  %vm3688_vm6 = vcmp.eq.f32.partialorder %v9081_v15, inf  ;;  %vm9299_vm10 = vmor %vm3781_vm3, %vm3782_vm5 }
 0x6d6   :  { %v3720_v29 = vmul.f32 0.5, %v3719_v44  ;;  %v3561_v28 = vsub.f32 1.0, %v3560_v56  ;;  %v3689_v8 = vsel %vm3688_vm6, %v9081_v15, %v3687_v47  ;;  %v9261_v36 = vadd.f32 1.0, %v9185_v4 }
 0x6d7   :  { %v3742_v10 = vmul.f32 %v4883_v49, %v9185_v4  ;;  %v9266_v25 = vpop.eup %4884  ;;  %vm9268_vm7 = vcmp.eq.f32.partialorder %v3785_v24, 8.507059e+37  ;;  %v3762_v45 = vmul.f32 %v9234_v32, %v9164_v7  ;;  %4886 = vrcp.f32 %v9237_v34 }
 0x6d8   :  { %v3691_v13 = vand.u32 2147483648, %v9081_v15  ;;  %v3721_v21 = vsub.f32 1.5, %v3720_v29  ;;  %v9277_v31 = vmul.f32 %v3633_v35, %v8989_v63  ;;  %v9279_v0 = vor.u32 1.1754944e-38, %v3570_v42 }
 0x6d9   :  { %vm3690_vm8 = vcmp.eq.f32.partialorder %v9081_v15, 0.0  ;;  %v3743_v23 = vmul.f32 %v4883_v49, %v3742_v10  ;;  %v3780_v40 = vadd.f32 %v9169_v1, %v3779_v48  ;;  %vm3564_vm9 = vweird.f32 %v9154_v61 }
 0x6da   :  { %v3692_v6 = vsel %vm3690_vm8, %v3691_v13, %v3689_v8  ;;  %v3722_v11 = vmul.f32 %v4879_v3, %v3721_v21  ;;  %4888 = vrsqrt.f32 %v9264_v51  ;;  %v3834_v55 = vsel %vm9222_vm2, %v3833_v60, %v3829_v27 }
 0x6db   :  { %v3605_v63 = vmul.f32 %v9266_v25, %v9202_v58  ;;  %4890 = vrcp.f32 %v9261_v36  ;;  %v3744_v12 = vmul.f32 0.5, %v3743_v23  ;;  %v3763_v38 = vsub.f32 1.0, %v3762_v45 }
 0x6dc   :  { %v3562_v17 = vmul.f32 %v9206_v5, %v3561_v28  ;;  %v3723_v37 = vmul.f32 %v3722_v11, %v9160_v50  ;;  %v9293_v57 = vadd.f32 1.0, %v9264_v51  ;;  %v9303_v3 = vadd.f32 1e-08, %v3692_v6  ;;  %v3914_v6 = vld [vmem:[%s10064_s5 + $0x48] sm:$0xff] }
 0x6dd   :  { %vm3724_vm11 = vcmp.eq.f32.partialorder %v9160_v50, inf  ;;  %v3727_v39 = vand.u32 2147483648, %v9160_v50  ;;  %v3745_v53 = vsub.f32 1.5, %v3744_v12  ;;  %v9307_v43 = vpop.eup %4886  ;;  %v3784_v46 = vsel %vm9299_vm10, %v9169_v1, %v3780_v40  ;;  %3962 = vmatpush.msra.mxu2 %v3914_v6  ;;  %v3922_v12 = vld [vmem:[%s10064_s5 + $0x88] sm:$0xff] }
 0x6de   :  { %vm3766_vm12 = vweird.f32 %v9164_v7  ;;  %vm3565_vm13 = vweird.f32 %v9206_v5  ;;  %vm9314_vm14 = vcmp.eq.f32.partialorder %v3568_v22, 8.507059e+37  ;;  %v3725_v19 = vsel %vm3724_vm11, %v9160_v50, %v3723_v37  ;;  %4122 = vmatpush.msrb.mxu1 %v3922_v12 }
 0x6df   :  { %vm3726_vm15 = vcmp.eq.f32.partialorder %v9160_v50, 0.0  ;;  %vm3767_vm1 = vweird.f32 %v9234_v32  ;;  %v3606_v16 = vsub.f32 1.0, %v3605_v63  ;;  %v3746_v56 = vmul.f32 %v4883_v49, %v3745_v53  ;;  %vm9351_vm4 = vmor %vm3564_vm9, %vm3565_vm13  ;;  %v3913_v53 = vld [vmem:[%s10064_s5 + $0x40] sm:$0xff] }
 0x6e0   :  { %v3728_v24 = vsel %vm3726_vm15, %v3727_v39, %v3725_v19  ;;  %v9321_v47 = vpop.eup %4888  ;;  %v3764_v1 = vmul.f32 %v9234_v32, %v3763_v38  ;;  %v3563_v42 = vadd.f32 %v9206_v5, %v3562_v17  ;;  %4892 = vrcp.f32 %v9293_v57  ;;  %v3905_v38 = vld [vmem:[%s10064_s5] sm:$0xff]  ;;  %4123 = vmatpush.msrb.mxu1 %v3913_v53 }
 0x6e1   :  { %v9325_v44 = vadd.f32 1e-08, %v3728_v24  ;;  %v9328_v22 = vpop.eup %4890  ;;  %v3789_v52 = vsel %vm9268_vm7, %v9229_v33, %v3784_v46  ;;  %v3852_v35 = vmul.f32 %v9307_v43, %v9237_v34  ;;  %4894 = vrcp.f32 %v9303_v3  ;;  %vm9399_vm7 = vmor %vm3766_vm12, %vm3767_vm1  ;;  %3963 = vmatpush.msra.mxu2 %v3905_v38 }
 0x6e2   :  { %v3747_v49 = vmul.f32 %v3746_v56, %v9185_v4  ;;  %vm9337_vm2 = vcmp.eq.f32.partialorder %v3770_v2, 8.507059e+37  ;;  %vm3748_vm3 = vcmp.eq.f32.partialorder %v9185_v4, inf  ;;  %v3751_v48 = vand.u32 2147483648, %v9185_v4 }
 0x6e3   :  { %4896 = vrcp.f32 %v9325_v44  ;;  %v3694_v33 = vmul.f32 %v9321_v47, %v9264_v51  ;;  %v3860_v29 = vand.u32 2147483647, %v9237_v34  ;;  %v3607_v28 = vmul.f32 %v9266_v25, %v3606_v16 }
 0x6e4   :  { %v3749_v8 = vsel %vm3748_vm3, %v9185_v4, %v3747_v49  ;;  %vm3750_vm5 = vcmp.eq.f32.partialorder %v9185_v4, 0.0  ;;  %v3765_v10 = vadd.f32 %v9234_v32, %v3764_v1  ;;  %v3567_v9 = vsel %vm9351_vm4, %v9206_v5, %v3563_v42  ;;  %v3915_v5 = vld [vmem:[%s10064_s5 + $0x50] sm:$0xff] }
 0x6e5   :  { %v3635_v45 = vmul.f32 %v9328_v22, %v9261_v36  ;;  %v3752_v61 = vsel %vm3750_vm5, %v3751_v48, %v3749_v8  ;;  %v9365_v13 = vmul.f32 %v3834_v55, %v9188_v59  ;;  %v3853_v21 = vsub.f32 1.0, %v3852_v35  ;;  %3982 = vmatpush.msra.mxu3 %v3915_v5 }
 0x6e6   :  { %v3862_v23 = vand.u32 2147483648, %v9237_v34  ;;  %v9368_v40 = vadd.f32 1e-08, %v3752_v61  ;;  %v9376_v11 = vpop.eup %4892  ;;  %v9379_v63 = vmul.f32 %v3789_v52, %v9210_v26  ;;  %vm3609_vm6 = vweird.f32 %v9202_v58  ;;  %v3906_v26 = vld [vmem:[%s10064_s5 + $0x8] sm:$0xff] }
 0x6e7   :  { %v3613_v59 = vand.u32 2147483647, %v9202_v58  ;;  %v3695_v55 = vmul.f32 %v9321_v47, %v3694_v33  ;;  %v9393_v17 = vpop.eup %4894  ;;  %v3572_v60 = vsel %vm9314_vm14, %v9279_v0, %v3567_v9  ;;  %v3608_v39 = vadd.f32 %v9266_v25, %v3607_v28  ;;  %3983 = vmatpush.msra.mxu3 %v3906_v26  ;;  %v3907_v33 = vld [vmem:[%s10064_s5 + $0x10] sm:$0xff] }
 0x6e8   :  { %vm3610_vm8 = vweird.f32 %v9266_v25  ;;  %4898 = vrcp.f32 %v9368_v40  ;;  %v3769_v46 = vsel %vm9399_vm7, %v9234_v32, %v3765_v10  ;;  %v3615_v20 = vand.u32 2147483648, %v9202_v58  ;;  %v3916_v32 = vld [vmem:[%s10064_s5 + $0x58] sm:$0xff] }
 0x6e9   :  { %v9412_v7 = vpop.eup %4896  ;;  %v3636_v0 = vsub.f32 1.0, %v3635_v45  ;;  %v3696_v19 = vmul.f32 0.5, %v3695_v55  ;;  %v3854_v16 = vmul.f32 %v9307_v43, %v3853_v21  ;;  %v9419_v24 = vor.u32 1.1754944e-38, %v3862_v23  ;;  %vm9437_vm9 = vmor %vm3609_vm6, %vm3610_vm8  ;;  %4002 = vmatpush.msrb.mxu2 %v3916_v32  ;;  %v3908_v10 = vld [vmem:[%s10064_s5 + $0x18] sm:$0xff] }
 0x6ea   :  { %v3837_v56 = vmul.f32 %v9412_v7, %v9325_v44  ;;  %v3575_v1 = vmul.f32 %v9376_v11, %v9293_v57  ;;  %v9429_v42 = vmul.f32 %v3572_v60, %v9081_v15  ;;  %v3792_v52 = vmul.f32 %v9393_v17, %v9303_v3  ;;  %v3917_v15 = vld [vmem:[%s10064_s5 + $0x60] sm:$0xff] }
 0x6eb   :  { %v3643_v49 = vand.u32 2147483647, %v9261_v36  ;;  %v3697_v48 = vsub.f32 1.5, %v3696_v19  ;;  %v9451_v58 = vsel %vm9337_vm2, %v9251_v62, %v3769_v46  ;;  %v3612_v2 = vsel %vm9437_vm9, %v9266_v25, %v3608_v39  ;;  %4022 = vmatpush.msrb.mxu3 %v3917_v15  ;;  %4003 = vmatpush.msrb.mxu2 %v3907_v33 }
 0x6ec   :  { %vm9456_vm10 = vcmp.eq.f32.partialorder %v3613_v59, 8.507059e+37  ;;  %v3838_v8 = vsub.f32 1.0, %v3837_v56  ;;  %vm3857_vm11 = vweird.f32 %v9307_v43  ;;  %v3616_v9 = vor.u32 1.1754944e-38, %v3615_v20 }
 0x6ed   :  { %v3637_v62 = vmul.f32 %v9328_v22, %v3636_v0  ;;  %v3698_v27 = vmul.f32 %v9321_v47, %v3697_v48  ;;  %v9469_v25 = vadd.f32 %v9307_v43, %v3854_v16  ;;  %vm3639_vm12 = vweird.f32 %v9261_v36  ;;  %4023 = vmatpush.msrb.mxu3 %v3908_v10  ;;  %v4180_v48 = vld [vmem:[%s10066_s7 + $0x160] sm:$0xff] }
 0x6ee   :  { %v9466_v45 = vpop.eup %4898  ;;  %v3645_v61 = vand.u32 2147483648, %v9261_v36  ;;  %v3576_v21 = vsub.f32 1.0, %v3575_v1  ;;  %vm3856_vm13 = vweird.f32 %v9237_v34  ;;  %v3793_v23 = vsub.f32 1.0, %v3792_v52 }
 0x6ef   :  { %v3617_v6 = vsel %vm9456_vm10, %v3616_v9, %v3612_v2  ;;  %vm9476_vm14 = vcmp.eq.f32.partialorder %v3643_v49, 8.507059e+37  ;;  %v3867_v5 = vmul.f32 %v9466_v45, %v9368_v40  ;;  %v3699_v59 = vmul.f32 %v3698_v27, %v9264_v51 }
 0x6f0   :  { %v3839_v55 = vmul.f32 %v9412_v7, %v3838_v8  ;;  %vm3640_vm15 = vweird.f32 %v9328_v22  ;;  %vm3700_vm1 = vcmp.eq.f32.partialorder %v9264_v51, inf  ;;  %v3703_v12 = vand.u32 2147483648, %v9264_v51 }
 0x6f1   :  { %v3638_v38 = vadd.f32 %v9328_v22, %v3637_v62  ;;  %v3868_v26 = vsub.f32 1.0, %v3867_v5  ;;  %v3701_v37 = vsel %vm3700_vm1, %v9264_v51, %v3699_v59  ;;  %vm3702_vm2 = vcmp.eq.f32.partialorder %v9264_v51, 0.0  ;;  %vm9510_vm6 = vmor %vm3639_vm12, %vm3640_vm15  ;;  %v4176_v62 = vld [vmem:[%s10066_s7 + $0x140] sm:$0xff] }
 0x6f2   :  { %vm3796_vm3 = vweird.f32 %v9303_v3  ;;  %v3800_v60 = vand.u32 2147483647, %v9303_v3  ;;  %v3577_v39 = vmul.f32 %v9376_v11, %v3576_v21  ;;  %v3704_v53 = vsel %vm3702_vm2, %v3703_v12, %v3701_v37  ;;  %vm9537_vm15 = vmor %vm3856_vm13, %vm3857_vm11  ;;  %v4166_v21 = vld [vmem:[%s10066_s7 + $0xf0] sm:$0xff] }
 0x6f3   :  { %v3794_v46 = vmul.f32 %v9393_v17, %v3793_v23  ;;  %v3802_v20 = vand.u32 2147483648, %v9303_v3  ;;  %v3646_v0 = vor.u32 1.1754944e-38, %v3645_v61  ;;  %v9495_v19 = vadd.f32 1e-08, %v3704_v53 }
 0x6f4   :  { %vm9499_vm4 = vcmp.eq.f32.partialorder %v3860_v29, 8.507059e+37  ;;  %v3618_v56 = vmul.f32 %v3617_v6, %v9160_v50  ;;  %v3840_v1 = vadd.f32 %v9412_v7, %v3839_v55  ;;  %vm3842_vm5 = vweird.f32 %v9412_v7 }
 0x6f5   :  { %v3869_v52 = vmul.f32 %v9466_v45, %v3868_v26  ;;  %v3847_v29 = vand.u32 2147483648, %v9325_v44  ;;  %v3642_v50 = vsel %vm9510_vm6, %v9328_v22, %v3638_v38  ;;  %vm3579_vm7 = vweird.f32 %v9293_v57 }
 0x6f6   :  { %4900 = vrcp.f32 %v9495_v19  ;;  %vm3841_vm8 = vweird.f32 %v9325_v44  ;;  %v3845_v36 = vand.u32 2147483647, %v9325_v44  ;;  %v3578_v35 = vadd.f32 %v9376_v11, %v3577_v39  ;;  %v4195_v44 = vld [vmem:[%s10066_s7 + $0x1d8] sm:$0xff] }
 0x6f7   :  { %vm3580_vm9 = vweird.f32 %v9376_v11  ;;  %v3795_v49 = vadd.f32 %v9393_v17, %v3794_v46  ;;  %vm3797_vm10 = vweird.f32 %v9393_v17  ;;  %vm9527_vm12 = vmor %vm3841_vm8, %vm3842_vm5  ;;  %v3583_v22 = vand.u32 2147483647, %v9293_v57 }
 0x6f8   :  { %v3585_v15 = vand.u32 2147483648, %v9293_v57  ;;  %v3844_v33 = vsel %vm9527_vm12, %v9412_v7, %v3840_v1  ;;  %v3647_v2 = vsel %vm9476_vm14, %v3646_v0, %v3642_v50  ;;  %v3870_v28 = vadd.f32 %v9466_v45, %v3869_v52  ;;  %vm9557_vm11 = vmor %vm3579_vm7, %vm3580_vm9  ;;  %v4198_v1 = vld [vmem:[%s10066_s7 + $0x1f0] sm:$0xff]  ;;  %v3918_v52 = vld [vmem:[%s10064_s5 + $0x68] sm:$0xff] }
 0x6f9   :  { %vm3872_vm1 = vweird.f32 %v9466_v45  ;;  %v3859_v34 = vsel %vm9537_vm15, %v9307_v43, %v9469_v25  ;;  %v3803_v8 = vor.u32 1.1754944e-38, %v3802_v20  ;;  %v3848_v10 = vor.u32 1.1754944e-38, %v3847_v29  ;;  %vm9563_vm13 = vmor %vm3796_vm3, %vm3797_vm10  ;;  %v3919_v29 = vld [vmem:[%s10064_s5 + $0x70] sm:$0xff]  ;;  %v4181_v50 = vld [vmem:[%s10066_s7 + $0x168] sm:$0xff] }
 0x6fa   :  { %v3877_v9 = vand.u32 2147483648, %v9368_v40  ;;  %vm3846_vm14 = vcmp.eq.f32.partialorder %v3845_v36, 8.507059e+37  ;;  %vm3871_vm2 = vweird.f32 %v9368_v40  ;;  %v3875_v43 = vand.u32 2147483647, %v9368_v40  ;;  %v3909_v36 = vld [vmem:[%s10064_s5 + $0x20] sm:$0xff]  ;;  %v4193_v7 = vld [vmem:[%s10066_s7 + $0x1c8] sm:$0xff] }
 0x6fb   :  { %v3582_v27 = vsel %vm9557_vm11, %v9376_v11, %v3578_v35  ;;  %v3799_v25 = vsel %vm9563_vm13, %v9393_v17, %v3795_v49  ;;  %v3849_v61 = vsel %vm3846_vm14, %v3848_v10, %v3844_v33  ;;  %v3648_v3 = vmul.f32 %v3647_v2, %v9185_v4  ;;  %vm9578_vm3 = vmor %vm3871_vm2, %vm3872_vm1  ;;  %v4197_v35 = vld [vmem:[%s10066_s7 + $0x1e8] sm:$0xff]  ;;  %v3920_v33 = vld [vmem:[%s10064_s5 + $0x78] sm:$0xff] }
 0x6fc   :  { %v4901_v57 = vpop.eup %4900  ;;  %v3586_v23 = vor.u32 1.1754944e-38, %v3585_v15  ;;  %v3654_v40 = vmul.f32 %v3618_v56, %v9006_v54  ;;  %v3874_v11 = vsel %vm9578_vm3, %v9466_v45, %v3870_v28  ;;  %vm3584_vm5 = vcmp.eq.f32.partialorder %v3583_v22, 8.507059e+37  ;;  %v3910_v49 = vld [vmem:[%s10064_s5 + $0x28] sm:$0xff]  ;;  %v4196_v22 = vld [vmem:[%s10066_s7 + $0x1e0] sm:$0xff]  ;;  %v4179_v15 = vld [vmem:[%s10066_s7 + $0x158] sm:$0xff] }
 0x6fd   :  { %v3807_v6 = vmul.f32 %v4901_v57, %v9495_v19  ;;  %v3864_v4 = vsel %vm9499_vm4, %v9419_v24, %v3859_v34  ;;  %vm3801_vm6 = vcmp.eq.f32.partialorder %v3800_v60, 8.507059e+37  ;;  %v3878_v17 = vor.u32 1.1754944e-38, %v3877_v9  ;;  %v3921_v2 = vld [vmem:[%s10064_s5 + $0x80] sm:$0xff]  ;;  %v4178_v28 = vld [vmem:[%s10066_s7 + $0x150] sm:$0xff]  ;;  %v3912_v10 = vld [vmem:[%s10064_s5 + $0x38] sm:$0xff] }
 0x6fe   :  { %v3587_v47 = vsel %vm3584_vm5, %v3586_v23, %v3582_v27  ;;  %v3804_v5 = vsel %vm3801_vm6, %v3803_v8, %v3799_v25  ;;  %v3850_v59 = vmul.f32 %v3849_v61, %v3654_v40  ;;  %vm3876_vm7 = vcmp.eq.f32.partialorder %v3875_v43, 8.507059e+37  ;;  %v4194_v34 = vld [vmem:[%s10066_s7 + $0x1d0] sm:$0xff]  ;;  %v4177_v9 = vld [vmem:[%s10066_s7 + $0x148] sm:$0xff]  ;;  %v4192_v43 = vld [vmem:[%s10066_s7 + $0x1c0] sm:$0xff] }
 0x6ff   :  { %v3808_v55 = vsub.f32 1.0, %v3807_v6  ;;  %v3656_v54 = vmul.f32 %v3648_v3, %v9015_v14  ;;  %v3879_v12 = vsel %vm3876_vm7, %v3878_v17, %v3874_v11  ;;  %v3817_v38 = vand.u32 2147483648, %v9495_v19  ;;  %v3911_v8 = vld [vmem:[%s10064_s5 + $0x30] sm:$0xff]  ;;  %v4151_v27 = vld [vmem:[%s10066_s7 + $0x78] sm:$0xff]  ;;  %v4149_v11 = vld [vmem:[%s10066_s7 + $0x68] sm:$0xff] }
 0x700   :  { %vm3896_vm8 = vcmask 1045509   ;;  %v3588_v45 = vmul.f32 %v3587_v47, %v9264_v51  ;;  %vm3812_vm9 = vweird.f32 %v4901_v57  ;;  %v3815_v37 = vand.u32 2147483647, %v9495_v19  ;;  %v4175_v25 = vld [vmem:[%s10066_s7 + $0x138] sm:$0xff]  ;;  %v4150_v3 = vld [vmem:[%s10066_s7 + $0x70] sm:$0xff]  ;;  %v4165_v6 = vld [vmem:[%s10066_s7 + $0xe8] sm:$0xff] }
 0x701   :  { %v3809_v26 = vmul.f32 %v4901_v57, %v3808_v55  ;;  %v3775_v24 = vmul.f32 %v9451_v58, %v9213_v30  ;;  %v3865_v60 = vmul.f32 %v3864_v4, %v9277_v31  ;;  %v3651_v39 = vmul.f32 %v9429_v42, %v9002_v18  ;;  %v4183_v42 = vld [vmem:[%s10066_s7 + $0x178] sm:$0xff]  ;;  %v4174_v23 = vld [vmem:[%s10066_s7 + $0x130] sm:$0xff]  ;;  %v4173_v4 = vld [vmem:[%s10066_s7 + $0x128] sm:$0xff] }
 0x702   :  { %vm3898_vm4 = vcmask 1046534   ;;  %v3880_v14 = vmul.f32 %v3879_v12, %v3656_v54  ;;  %vm3811_vm10 = vweird.f32 %v9495_v19  ;;  %v3897_v46 = vsel %vm3896_vm8, %v3850_v59, %v9365_v13  ;;  %v4199_v13 = vld [vmem:[%s10066_s7 + $0x1f8] sm:$0xff]  ;;  %4308 = vmatpush.msrb.mxu0 %v4183_v42  ;;  %v4190_v40 = vld [vmem:[%s10066_s7 + $0x1b0] sm:$0xff]  ;;  %v4189_v17 = vld [vmem:[%s10066_s7 + $0x1a8] sm:$0xff] }
 0x703   :  { %v3810_v53 = vadd.f32 %v4901_v57, %v3809_v26  ;;  %v3805_v51 = vmul.f32 %v3804_v5, %v3651_v39  ;;  %vm3813_vm12 = vmor %vm3811_vm10, %vm3812_vm9  ;;  %v3818_v20 = vor.u32 1.1754944e-38, %v3817_v38  ;;  %vm3885_vm15 = vcmask 1041409   ;;  %4328 = vmatpush.msra.mxu1 %v4199_v13  ;;  %v4191_v61 = vld [vmem:[%s10066_s7 + $0x1b8] sm:$0xff]  ;;  %v4148_v47 = vld [vmem:[%s10066_s7 + $0x60] sm:$0xff] }
 0x704   :  { %vm3900_vm1 = vcmask 1047559   ;;  %v3652_v0 = vmul.f32 %v3588_v45, %v9017_v41  ;;  %vm3816_vm11 = vcmp.eq.f32.partialorder %v3815_v37, 8.507059e+37  ;;  %vm3887_vm13 = vcmask 1042434   ;;  %v4182_v41 = vld [vmem:[%s10066_s7 + $0x170] sm:$0xff]  ;;  %v4164_v5 = vld [vmem:[%s10066_s7 + $0xe0] sm:$0xff]  ;;  %v4147_v59 = vld [vmem:[%s10066_s7 + $0x58] sm:$0xff] }
 0x705   :  { %v3814_v30 = vsel %vm3813_vm12, %v4901_v57, %v3810_v53  ;;  %vm3889_vm14 = vcmask 1043459   ;;  %v3899_v18 = vsel %vm3898_vm4, %v3865_v60, %v3897_v46  ;;  %v3886_v19 = vsel %vm3885_vm15, %v9379_v63, %v3775_v24  ;;  %4309 = vmatpush.msrb.mxu0 %v4182_v41  ;;  %4329 = vmatpush.msra.mxu1 %v4198_v1  ;;  %v4167_v57 = vld [vmem:[%s10066_s7 + $0xf8] sm:$0xff]  ;;  %v4172_v54 = vld [vmem:[%s10066_s7 + $0x120] sm:$0xff]  ;;  %v4146_v38 = vld [vmem:[%s10066_s7 + $0x50] sm:$0xff] }
 0x706   :  { %v3819_v31 = vsel %vm3816_vm11, %v3818_v20, %v3814_v30  ;;  %v3901_v16 = vsel %vm3900_vm1, %v3880_v14, %v3899_v18  ;;  %vm3903_vm2 = vcmask 1043456   ;;  %v3888_v56 = vsel %vm3887_vm13, %v3805_v51, %v3886_v19  ;;  %v4163_v55 = vld [vmem:[%s10066_s7 + $0xd8] sm:$0xff]  ;;  %v4188_v12 = vld [vmem:[%s10066_s7 + $0x1a0] sm:$0xff]  ;;  %v4162_v45 = vld [vmem:[%s10066_s7 + $0xd0] sm:$0xff] }
 0x707   :  { %v3820_v58 = vmul.f32 %v3819_v31, %v3652_v0  ;;  %4310 = vmatpush.msrb.mxu0 %v4181_v50  ;;  %4330 = vmatpush.msra.mxu1 %v4197_v35  ;;  %v4171_v26 = vld [vmem:[%s10066_s7 + $0x118] sm:$0xff]  ;;  %v4145_v24 = vld [vmem:[%s10066_s7 + $0x48] sm:$0xff]  ;;  %v4170_v39 = vld [vmem:[%s10066_s7 + $0x110] sm:$0xff] }
 0x708   :  { %v4187_v37 = vld [vmem:[%s10066_s7 + $0x198] sm:$0xff]  ;;  %v4161_v60 = vld [vmem:[%s10066_s7 + $0xc8] sm:$0xff]  ;;  %v4186_v14 = vld [vmem:[%s10066_s7 + $0x190] sm:$0xff] }
 0x709   :  { %v3890_v32 = vsel %vm3889_vm14, %v3820_v58, %v3888_v56  ;;  %4311 = vmatpush.msrb.mxu0 %v4180_v48  ;;  %4331 = vmatpush.msra.mxu1 %v4196_v22  ;;  %v4144_v53 = vld [vmem:[%s10066_s7 + $0x40] sm:$0xff]  ;;  %v4143_v51 = vld [vmem:[%s10066_s7 + $0x38] sm:$0xff]  ;;  %v4142_v0 = vld [vmem:[%s10066_s7 + $0x30] sm:$0xff] }
 0x70a   :  { %v9619_v63 = vsel %vm3903_vm2, %v3890_v32, %v3901_v16  ;;  %v4160_v46 = vld [vmem:[%s10066_s7 + $0xc0] sm:$0xff]  ;;  %v4159_v20 = vld [vmem:[%s10066_s7 + $0xb8] sm:$0xff]  ;;  %v4158_v30 = vld [vmem:[%s10066_s7 + $0xb0] sm:$0xff] }
 0x70b   :  { %4465 = vmatmul.msk.f32.vlgmr.msra.gmra.mxu2 %vm61_vm0, %v9619_v63  ;;  %4466 = vmatmul.msk.f32.vlgmr.msra.gmra.mxu3 %vm61_vm0, %v9619_v63  ;;  %v4141_v31 = vld [vmem:[%s10066_s7 + $0x28] sm:$0xff]  ;;  %v4140_v42 = vld [vmem:[%s10066_s7 + $0x20] sm:$0xff]  ;;  %v4139_v58 = vld [vmem:[%s10066_s7 + $0x18] sm:$0xff] }
 0x70c   :  { %4473 = vmatmul.msk.f32.vlgmr.msrb.gmra.mxu1 %vm61_vm0, %v9619_v63  ;;  %4042 = vmatpush.msra.mxu2 %v3918_v52  ;;  %v4157_v18 = vld [vmem:[%s10066_s7 + $0xa8] sm:$0xff]  ;;  %v4156_v13 = vld [vmem:[%s10066_s7 + $0xa0] sm:$0xff]  ;;  %v4155_v19 = vld [vmem:[%s10066_s7 + $0x98] sm:$0xff] }
 0x70d   :  { %4062 = vmatpush.msra.mxu3 %v3919_v29  ;;  %4312 = vmatpush.msrb.mxu0 %v4179_v15  ;;  %v4138_v16 = vld [vmem:[%s10066_s7 + $0x10] sm:$0xff]  ;;  %v4137_v56 = vld [vmem:[%s10066_s7 + $0x8] sm:$0xff]  ;;  %v4136_v32 = vld [vmem:[%s10066_s7] sm:$0xff] }
 0x70e   :  { %4043 = vmatpush.msra.mxu2 %v3909_v36  ;;  %4332 = vmatpush.msra.mxu1 %v4195_v44  ;;  %v4154_v41 = vld [vmem:[%s10066_s7 + $0x90] sm:$0xff]  ;;  %v4153_v1 = vld [vmem:[%s10066_s7 + $0x88] sm:$0xff]  ;;  %v4152_v52 = vld [vmem:[%s10066_s7 + $0x80] sm:$0xff] }
 0x70f   :  { %4063 = vmatpush.msra.mxu3 %v3910_v49  ;;  %4313 = vmatpush.msrb.mxu0 %v4178_v28  ;;  %v4231_v29 = vld [vmem:[%s10066_s7 + $0x2f8] sm:$0xff]  ;;  %v4214_v50 = vld [vmem:[%s10066_s7 + $0x270] sm:$0xff]  ;;  %v4213_v35 = vld [vmem:[%s10066_s7 + $0x268] sm:$0xff] }
 0x710   :  { %4333 = vmatpush.msra.mxu1 %v4194_v34  ;;  %v4230_v36 = vld [vmem:[%s10066_s7 + $0x2f0] sm:$0xff]  ;;  %v4229_v49 = vld [vmem:[%s10066_s7 + $0x2e8] sm:$0xff]  ;;  %v4212_v15 = vld [vmem:[%s10066_s7 + $0x260] sm:$0xff] }
 0x711   :  { %4314 = vmatpush.msrb.mxu0 %v4177_v9  ;;  %v4169_v48 = vld [vmem:[%s10066_s7 + $0x108] sm:$0xff]  ;;  %v4228_v44 = vld [vmem:[%s10066_s7 + $0x2e0] sm:$0xff]  ;;  %v4211_v28 = vld [vmem:[%s10066_s7 + $0x258] sm:$0xff] }
 0x712   :  { %4334 = vmatpush.msra.mxu1 %v4193_v7  ;;  %v4185_v22 = vld [vmem:[%s10066_s7 + $0x188] sm:$0xff]  ;;  %v4227_v34 = vld [vmem:[%s10066_s7 + $0x2d8] sm:$0xff]  ;;  %v4210_v9 = vld [vmem:[%s10066_s7 + $0x250] sm:$0xff] }
 0x713   :  { %4467 = vmatmul.msk.f32.vlgmr.msrb.gmra.mxu2 %vm61_vm0, %v9619_v63  ;;  %4468 = vmatmul.msk.f32.vlgmr.msrb.gmra.mxu3 %vm61_vm0, %v9619_v63  ;;  %v4226_v7 = vld [vmem:[%s10066_s7 + $0x2d0] sm:$0xff] }
 0x714   :  { %4082 = vmatpush.msrb.mxu2 %v3920_v33  ;;  %4102 = vmatpush.msrb.mxu3 %v3921_v2  ;;  %v4168_v33 = vld [vmem:[%s10066_s7 + $0x100] sm:$0xff] }
 0x715   :  { %4315 = vmatpush.msrb.mxu0 %v4176_v62  ;;  %4335 = vmatpush.msra.mxu1 %v4192_v43  ;;  %v4184_v2 = vld [vmem:[%s10066_s7 + $0x180] sm:$0xff]  ;;  %v4246_v62 = vld [vmem:[%s10066_s7 + $0x370] sm:$0xff] }
 0x716   :  { %4083 = vmatpush.msrb.mxu2 %v3911_v8  ;;  %4103 = vmatpush.msrb.mxu3 %v3912_v10  ;;  %v4247_v8 = vld [vmem:[%s10066_s7 + $0x378] sm:$0xff]  ;;  %v4262_v43 = vld [vmem:[%s10066_s7 + $0x3f0] sm:$0xff] }
 0x717   :  { %4316 = vmatpush.msrb.mxu0 %v4175_v25  ;;  %4336 = vmatpush.msra.mxu1 %v4191_v61  ;;  %v4263_v10 = vld [vmem:[%s10066_s7 + $0x3f8] sm:$0xff]  ;;  %v4245_v25 = vld [vmem:[%s10066_s7 + $0x368] sm:$0xff] }
 0x718   :  { %v4261_v61 = vld [vmem:[%s10066_s7 + $0x3e8] sm:$0xff] }
 0x719   :  { %4317 = vmatpush.msrb.mxu0 %v4174_v23  ;;  %4337 = vmatpush.msra.mxu1 %v4190_v40  ;;  %v4244_v23 = vld [vmem:[%s10066_s7 + $0x360] sm:$0xff] }
 0x71a   :  { %v4260_v40 = vld [vmem:[%s10066_s7 + $0x3e0] sm:$0xff] }
 0x71b   :  { %4469 = vmatmul.msk.f32.vlgmr.msra.gmra.mxu2 %vm61_vm0, %v9619_v63  ;;  %4470 = vmatmul.msk.f32.vlgmr.msra.gmra.mxu3 %vm61_vm0, %v9619_v63 }
 0x71c   :  { %4268 = vmatpush.msra.mxu2 %v4151_v27  ;;  %4288 = vmatpush.msra.mxu3 %v4167_v57  ;;  %v4209_v27 = vld [vmem:[%s10066_s7 + $0x248] sm:$0xff] }
 0x71d   :  { %4318 = vmatpush.msrb.mxu0 %v4173_v4  ;;  %4338 = vmatpush.msra.mxu1 %v4189_v17  ;;  %v4225_v57 = vld [vmem:[%s10066_s7 + $0x2c8] sm:$0xff]  ;;  %v4243_v4 = vld [vmem:[%s10066_s7 + $0x358] sm:$0xff] }
 0x71e   :  { %4269 = vmatpush.msra.mxu2 %v4150_v3  ;;  %4289 = vmatpush.msra.mxu3 %v4166_v21  ;;  %v4208_v3 = vld [vmem:[%s10066_s7 + $0x240] sm:$0xff]  ;;  %v4259_v17 = vld [vmem:[%s10066_s7 + $0x3d8] sm:$0xff] }
 0x71f   :  { %4319 = vmatpush.msrb.mxu0 %v4172_v54  ;;  %4339 = vmatpush.msra.mxu1 %v4188_v12  ;;  %v4224_v21 = vld [vmem:[%s10066_s7 + $0x2c0] sm:$0xff]  ;;  %v4205_v54 = vld [vmem:[%s10066_s7 + $0x228] sm:$0xff] }
 0x720   :  { %4270 = vmatpush.msra.mxu2 %v4149_v11  ;;  %4290 = vmatpush.msra.mxu3 %v4165_v6  ;;  %v4207_v11 = vld [vmem:[%s10066_s7 + $0x238] sm:$0xff]  ;;  %v4221_v12 = vld [vmem:[%s10066_s7 + $0x2a8] sm:$0xff] }
 0x721   :  { %4320 = vmatpush.msrb.mxu0 %v4171_v26  ;;  %4340 = vmatpush.msra.mxu1 %v4187_v37  ;;  %v4223_v6 = vld [vmem:[%s10066_s7 + $0x2b8] sm:$0xff]  ;;  %v4204_v26 = vld [vmem:[%s10066_s7 + $0x220] sm:$0xff] }
 0x722   :  { %4271 = vmatpush.msra.mxu2 %v4148_v47  ;;  %4291 = vmatpush.msra.mxu3 %v4164_v5  ;;  %v4206_v47 = vld [vmem:[%s10066_s7 + $0x230] sm:$0xff]  ;;  %v4220_v37 = vld [vmem:[%s10066_s7 + $0x2a0] sm:$0xff] }
 0x723   :  { %4471 = vmatmul.msk.f32.vlgmr.msrb.gmra.mxu2 %vm61_vm0, %v9619_v63  ;;  %4472 = vmatmul.msk.f32.vlgmr.msrb.gmra.mxu3 %vm61_vm0, %v9619_v63  ;;  %v4215_v63 = vld [vmem:[%s10066_s7 + $0x278] sm:$0xff]  ;;  %v4222_v5 = vld [vmem:[%s10066_s7 + $0x2b0] sm:$0xff]  ;;  %vm4428_vm0 = vcmask 261120  }
 0x724   :  { %4272 = vmatpush.msra.mxu2 %v4147_v59  ;;  %4292 = vmatpush.msra.mxu3 %v4163_v55  ;;  %v4242_v59 = vld [vmem:[%s10066_s7 + $0x350] sm:$0xff] }
 0x725   :  { %4321 = vmatpush.msrb.mxu0 %v4170_v39  ;;  %4341 = vmatpush.msra.mxu1 %v4186_v14  ;;  %v4258_v55 = vld [vmem:[%s10066_s7 + $0x3d0] sm:$0xff]  ;;  %v4203_v39 = vld [vmem:[%s10066_s7 + $0x218] sm:$0xff] }
 0x726   :  { %4273 = vmatpush.msra.mxu2 %v4146_v38  ;;  %4293 = vmatpush.msra.mxu3 %v4162_v45  ;;  %v4241_v38 = vld [vmem:[%s10066_s7 + $0x348] sm:$0xff]  ;;  %v4219_v14 = vld [vmem:[%s10066_s7 + $0x298] sm:$0xff] }
 0x727   :  { %4322 = vmatpush.msrb.mxu0 %v4169_v48  ;;  %4342 = vmatpush.msra.mxu1 %v4185_v22  ;;  %v4257_v45 = vld [vmem:[%s10066_s7 + $0x3c8] sm:$0xff] }
 0x728   :  { %4274 = vmatpush.msra.mxu2 %v4145_v24  ;;  %4294 = vmatpush.msra.mxu3 %v4161_v60  ;;  %v4240_v24 = vld [vmem:[%s10066_s7 + $0x340] sm:$0xff] }
 0x729   :  { %4323 = vmatpush.msrb.mxu0 %v4168_v33  ;;  %4343 = vmatpush.msra.mxu1 %v4184_v2  ;;  %v4256_v60 = vld [vmem:[%s10066_s7 + $0x3c0] sm:$0xff] }
 0x72a   :  { %4275 = vmatpush.msra.mxu2 %v4144_v53  ;;  %4295 = vmatpush.msra.mxu3 %v4160_v46  ;;  %v4239_v53 = vld [vmem:[%s10066_s7 + $0x338] sm:$0xff] }
 0x72b   :  { %4388 = vmatpush.msra.mxu0 %v4247_v8  ;;  %4408 = vmatpush.msrb.mxu1 %v4263_v10  ;;  %v4255_v46 = vld [vmem:[%s10066_s7 + $0x3b8] sm:$0xff] }
 0x72c   :  { %4276 = vmatpush.msra.mxu2 %v4143_v51  ;;  %4296 = vmatpush.msra.mxu3 %v4159_v20  ;;  %v4202_v51 = vld [vmem:[%s10066_s7 + $0x210] sm:$0xff] }
 0x72d   :  { %4389 = vmatpush.msra.mxu0 %v4246_v62  ;;  %4409 = vmatpush.msrb.mxu1 %v4262_v43  ;;  %v4218_v20 = vld [vmem:[%s10066_s7 + $0x290] sm:$0xff] }
 0x72e   :  { %4277 = vmatpush.msra.mxu2 %v4142_v0  ;;  %4297 = vmatpush.msra.mxu3 %v4158_v30  ;;  %v4238_v0 = vld [vmem:[%s10066_s7 + $0x330] sm:$0xff] }
 0x72f   :  { %4390 = vmatpush.msra.mxu0 %v4245_v25  ;;  %4410 = vmatpush.msrb.mxu1 %v4261_v61  ;;  %v4254_v30 = vld [vmem:[%s10066_s7 + $0x3b0] sm:$0xff] }
 0x730   :  { %4278 = vmatpush.msra.mxu2 %v4141_v31  ;;  %4298 = vmatpush.msra.mxu3 %v4157_v18  ;;  %v4201_v31 = vld [vmem:[%s10066_s7 + $0x208] sm:$0xff] }
 0x731   :  { %4391 = vmatpush.msra.mxu0 %v4244_v23  ;;  %4411 = vmatpush.msrb.mxu1 %v4260_v40  ;;  %v4217_v18 = vld [vmem:[%s10066_s7 + $0x288] sm:$0xff] }
 0x732   :  { %4279 = vmatpush.msra.mxu2 %v4140_v42  ;;  %4299 = vmatpush.msra.mxu3 %v4156_v13  ;;  %v4237_v42 = vld [vmem:[%s10066_s7 + $0x328] sm:$0xff] }
 0x733   :  { %4392 = vmatpush.msra.mxu0 %v4243_v4  ;;  %4412 = vmatpush.msrb.mxu1 %v4259_v17  ;;  %v4253_v13 = vld [vmem:[%s10066_s7 + $0x3a8] sm:$0xff] }
 0x734   :  { %4280 = vmatpush.msra.mxu2 %v4139_v58  ;;  %4300 = vmatpush.msra.mxu3 %v4155_v19  ;;  %v4200_v58 = vld [vmem:[%s10066_s7 + $0x200] sm:$0xff] }
 0x735   :  { %4393 = vmatpush.msra.mxu0 %v4242_v59  ;;  %4413 = vmatpush.msrb.mxu1 %v4258_v55  ;;  %v4216_v19 = vld [vmem:[%s10066_s7 + $0x280] sm:$0xff] }
 0x736   :  { %4281 = vmatpush.msra.mxu2 %v4138_v16  ;;  %4301 = vmatpush.msra.mxu3 %v4154_v41  ;;  %v4236_v16 = vld [vmem:[%s10066_s7 + $0x320] sm:$0xff] }
 0x737   :  { %4394 = vmatpush.msra.mxu0 %v4241_v38  ;;  %4414 = vmatpush.msrb.mxu1 %v4257_v45  ;;  %v4252_v41 = vld [vmem:[%s10066_s7 + $0x3a0] sm:$0xff] }
 0x738   :  { %4282 = vmatpush.msra.mxu2 %v4137_v56  ;;  %4302 = vmatpush.msra.mxu3 %v4153_v1  ;;  %v4548_v56 = vld [vmem:[%s10065_s6 + $0x8] ss:$0 sm:$0xff]  ;;  %v4235_v1 = vld [vmem:[%s10066_s7 + $0x318] sm:$0xff] }
 0x739   :  { %4395 = vmatpush.msra.mxu0 %v4240_v24  ;;  %4415 = vmatpush.msrb.mxu1 %v4256_v60 }
 0x73a   :  { %4283 = vmatpush.msra.mxu2 %v4136_v32  ;;  %4303 = vmatpush.msra.mxu3 %v4152_v52  ;;  %v4251_v32 = vld [vmem:[%s10066_s7 + $0x398] sm:$0xff]  ;;  %v10020_v52 = vld [vmem:[%s10065_s6] sm:$0xff] }
 0x73b   :  { %4396 = vmatpush.msra.mxu0 %v4239_v53  ;;  %4416 = vmatpush.msrb.mxu1 %v4255_v46  ;;  %v3927_v48 = vperm.slane %v10020_v52, 0  ;;  %v3928_v22 = vperm.slane %v10020_v52, 1  ;;  %v3929_v43 = vperm.slane %v10020_v52, 2  ;;  %v3932_v4 = vperm.slane %v10020_v52, 5 }
 0x73c   :  { %4348 = vmatpush.msrb.mxu2 %v4215_v63  ;;  %4368 = vmatpush.msrb.mxu3 %v4231_v29  ;;  %v4234_v63 = vld [vmem:[%s10066_s7 + $0x310] sm:$0xff] }
 0x73d   :  { %4397 = vmatpush.msra.mxu0 %v4238_v0  ;;  %4417 = vmatpush.msrb.mxu1 %v4254_v30  ;;  %v4250_v29 = vld [vmem:[%s10066_s7 + $0x390] sm:$0xff]  ;;  %v4549_v0 = vld [vmem:[%s10067_s8] ss:$0 sm:$0xff] }
 0x73e   :  { %4349 = vmatpush.msrb.mxu2 %v4214_v50  ;;  %4369 = vmatpush.msrb.mxu3 %v4230_v36  ;;  %v4233_v36 = vld [vmem:[%s10066_s7 + $0x308] sm:$0xff] }
 0x73f   :  { %4398 = vmatpush.msra.mxu0 %v4237_v42  ;;  %4418 = vmatpush.msrb.mxu1 %v4253_v13 }
 0x740   :  { %4350 = vmatpush.msrb.mxu2 %v4213_v35  ;;  %4370 = vmatpush.msrb.mxu3 %v4229_v49  ;;  %v4249_v35 = vld [vmem:[%s10066_s7 + $0x388] sm:$0xff] }
 0x741   :  { %4399 = vmatpush.msra.mxu0 %v4236_v16  ;;  %4419 = vmatpush.msrb.mxu1 %v4252_v41 }
 0x742   :  { %4351 = vmatpush.msrb.mxu2 %v4212_v15  ;;  %4371 = vmatpush.msrb.mxu3 %v4228_v44  ;;  %v4232_v15 = vld [vmem:[%s10066_s7 + $0x300] sm:$0xff] }
 0x743   :  { %4400 = vmatpush.msra.mxu0 %v4235_v1  ;;  %4420 = vmatpush.msrb.mxu1 %v4251_v32  ;;  %v4248_v44 = vld [vmem:[%s10066_s7 + $0x380] sm:$0xff] }
 0x744   :  { %4352 = vmatpush.msrb.mxu2 %v4211_v28  ;;  %4372 = vmatpush.msrb.mxu3 %v4227_v34 }
 0x745   :  { %4401 = vmatpush.msra.mxu0 %v4234_v63  ;;  %4421 = vmatpush.msrb.mxu1 %v4250_v29 }
 0x746   :  { %4353 = vmatpush.msrb.mxu2 %v4210_v9  ;;  %4373 = vmatpush.msrb.mxu3 %v4226_v7 }
 0x747   :  { %4402 = vmatpush.msra.mxu0 %v4233_v36  ;;  %4422 = vmatpush.msrb.mxu1 %v4249_v35 }
 0x748   :  { %4354 = vmatpush.msrb.mxu2 %v4209_v27  ;;  %4374 = vmatpush.msrb.mxu3 %v4225_v57  ;;  %v3930_v27 = vperm.slane %v10020_v52, 3 }
 0x749   :  { %4403 = vmatpush.msra.mxu0 %v4232_v15  ;;  %4423 = vmatpush.msrb.mxu1 %v4248_v44 }
 0x74a   :  { %4355 = vmatpush.msrb.mxu2 %v4208_v3  ;;  %4375 = vmatpush.msrb.mxu3 %v4224_v21 }
 0x74c   :  { %4356 = vmatpush.msrb.mxu2 %v4207_v11  ;;  %4376 = vmatpush.msrb.mxu3 %v4223_v6  ;;  %v3931_v6 = vperm.slane %v10020_v52, 4 }
 0x74e   :  { %4357 = vmatpush.msrb.mxu2 %v4206_v47  ;;  %4377 = vmatpush.msrb.mxu3 %v4222_v5 }
 0x750   :  { %4358 = vmatpush.msrb.mxu2 %v4205_v54  ;;  %4378 = vmatpush.msrb.mxu3 %v4221_v12 }
 0x752   :  { %4359 = vmatpush.msrb.mxu2 %v4204_v26  ;;  %4379 = vmatpush.msrb.mxu3 %v4220_v37  ;;  %v3933_v26 = vperm.slane %v10020_v52, 6  ;;  %v3934_v37 = vperm.slane %v10020_v52, 7 }
 0x754   :  { %4360 = vmatpush.msrb.mxu2 %v4203_v39  ;;  %4380 = vmatpush.msrb.mxu3 %v4219_v14 }
 0x756   :  { %4361 = vmatpush.msrb.mxu2 %v4202_v51  ;;  %4381 = vmatpush.msrb.mxu3 %v4218_v20 }
 0x758   :  { %4362 = vmatpush.msrb.mxu2 %v4201_v31  ;;  %4382 = vmatpush.msrb.mxu3 %v4217_v18 }
 0x75a   :  { %4363 = vmatpush.msrb.mxu2 %v4200_v58  ;;  %4383 = vmatpush.msrb.mxu3 %v4216_v19 }
 0x789   :  { %v4125_v50 = vpop.f32.mrf.mxu1 }
 0x78a   :  { %v4126_v49 = vadd.f32 %v4548_v56, %v4125_v50 }
 0x78c   :  { %v4431_v33 = vand.u32 2147483647, %v4126_v49  ;;  %v4430_v38 = vmax.f32 %v4126_v49, 0.0 }
 0x78e   :  { %v4432_v2 = vsub.f32 0.0, %v4431_v33  ;;  %v3965_v28 = vpop.f32.mrf.mxu2  ;;  %v3985_v34 = vpop.f32.mrf.mxu3 }
 0x78f   :  { %v3966_v8 = vadd.f32 %v3965_v28, %v3927_v48  ;;  %v3986_v10 = vadd.f32 %v3985_v34, %v3928_v22 }
 0x790   :  { %v4433_v9 = vmul.f32 1.442695, %v4432_v2 }
 0x791   :  { %v4128_v7 = vmax.f32 %v3966_v8, 0.0  ;;  %v4129_v62 = vmax.f32 %v3986_v10, 0.0 }
 0x792   :  { %4902 = vpow2.f32 %v4433_v9 }
 0x793   :  { %4284 = vmatmul.f32.vlgmr.msra.gmra.mxu2 %v4128_v7  ;;  %4304 = vmatmul.f32.vlgmr.msra.gmra.mxu3 %v4129_v62 }
 0x796   :  { %v4005_v57 = vpop.f32.mrf.mxu2  ;;  %v4025_v25 = vpop.f32.mrf.mxu3 }
 0x797   :  { %v4006_v61 = vadd.f32 %v4005_v57, %v3929_v43  ;;  %v4026_v3 = vadd.f32 %v4025_v25, %v3930_v27 }
 0x798   :  { %v4903_v21 = vpop.eup %4902 }
 0x799   :  { %v4435_v23 = vadd.f32 1.0, %v4903_v21  ;;  %v4130_v40 = vmax.f32 %v4006_v61, 0.0  ;;  %v4131_v11 = vmax.f32 %v4026_v3, 0.0 }
 0x79b   :  { %4904 = vlog2.f32 %v4435_v23  ;;  %4324 = vmatmul.f32.vlgmr.msrb.gmra.mxu0 %v4130_v40  ;;  %4344 = vmatmul.f32.vlgmr.msra.gmra.mxu1 %v4131_v11 }
 0x79e   :  { %v4045_v17 = vpop.f32.mrf.mxu2  ;;  %v4065_v47 = vpop.f32.mrf.mxu3 }
 0x79f   :  { %v4046_v5 = vadd.f32 %v4045_v17, %v3931_v6  ;;  %v4066_v59 = vadd.f32 %v4065_v47, %v3932_v4 }
 0x7a1   :  { %v4905_v55 = vpop.eup %4904  ;;  %v4132_v54 = vmax.f32 %v4046_v5, 0.0  ;;  %v4133_v12 = vmax.f32 %v4066_v59, 0.0 }
 0x7a2   :  { %v4437_v45 = vmul.f32 0.6931472, %v4905_v55 }
 0x7a3   :  { %4364 = vmatmul.f32.vlgmr.msrb.gmra.mxu2 %v4132_v54  ;;  %4384 = vmatmul.f32.vlgmr.msrb.gmra.mxu3 %v4133_v12 }
 0x7a4   :  { %v4438_v24 = vadd.f32 %v4437_v45, %v4430_v38 }
 0x7a6   :  { %v4439_v60 = vadd.f32 1e-08, %v4438_v24  ;;  %v4085_v39 = vpop.f32.mrf.mxu2  ;;  %v4105_v14 = vpop.f32.mrf.mxu3 }
 0x7a7   :  { %v4086_v53 = vadd.f32 %v4085_v39, %v3933_v26  ;;  %v4106_v46 = vadd.f32 %v4105_v14, %v3934_v37 }
 0x7a8   :  { %4440 = vst.msk [vmem:[#allocation2] sm:$0xff] %vm4428_vm0, %v4439_v60 }
 0x7a9   :  { %v4134_v51 = vmax.f32 %v4086_v53, 0.0  ;;  %v4135_v20 = vmax.f32 %v4106_v46, 0.0  ;;  %4453 = dma.vmem_to_hbm [thread:$0]  %s4449_s11, 128, %s4451_s29, [#allocation3]  }
 0x7ab   :  { %4404 = vmatmul.f32.vlgmr.msra.gmra.mxu0 %v4134_v51  ;;  %4424 = vmatmul.f32.vlgmr.msrb.gmra.mxu1 %v4135_v20 }
 0x816   :  { %v4285_v30 = vpop.f32.mrf.mxu2  ;;  %v4305_v18 = vpop.f32.mrf.mxu3 }
 0x817   :  { %v4286_v31 = vadd.f32 %v4549_v0, %v4285_v30 }
 0x818   :  { %v4325_v13 = vpop.f32.mrf.mxu0  ;;  %v4345_v19 = vpop.f32.mrf.mxu1 }
 0x819   :  { %v4306_v42 = vadd.f32 %v4305_v18, %v4286_v31 }
 0x81b   :  { %v4326_v58 = vadd.f32 %v4325_v13, %v4306_v42 }
 0x81d   :  { %v4346_v16 = vadd.f32 %v4345_v19, %v4326_v58 }
 0x826   :  { %v4365_v41 = vpop.f32.mrf.mxu2  ;;  %v4385_v1 = vpop.f32.mrf.mxu3 }
 0x827   :  { %v4366_v56 = vadd.f32 %v4365_v41, %v4346_v16 }
 0x828   :  { %v4405_v52 = vpop.f32.mrf.mxu0  ;;  %v4425_v29 = vpop.f32.mrf.mxu1 }
 0x829   :  { %v4386_v32 = vadd.f32 %v4385_v1, %v4366_v56 }
 0x82b   :  { %v4406_v63 = vadd.f32 %v4405_v52, %v4386_v32 }
 0x82d   :  { %v4426_v50 = vadd.f32 %v4425_v29, %v4406_v63 }
 0x82f   :  { %4429 = vst.msk [vmem:[%s10068_s9] sm:$0xff] %vm4428_vm0, %v4426_v50 }
 0x830   :  { %4930 = dma.done.wait [#allocation3], 128  }
 0x831   :  { %4931 = vsyncadd [#allocation3], 4294967168 }
 0x832   :  { %4460 = vsyncpa [#allocation3], 1 }

</bundles_post_ra>
